<compile_context>
chip_gen: v7x
topology: tpu7x:2x2x1
jax: 0.10.0
libtpu: 0.0.40
codegen_flags: <defaults>
</compile_context>

<pallas_src>
import jax
import jax.numpy as jnp
from jax import lax
from jax.experimental import pallas as pl
from jax.experimental.pallas import tpu as pltpu

IMG_H = 16
IMG_W = 16
PATCHES = IMG_H * IMG_W   # 256 spatial positions per image
SEQ_LEN = 8               # tokens emitted by the gumbel RNN
VOCAB = 10                # proj_size=10
VOCAB_PAD = 128           # lane-padded vocab
HIDDEN = 256              # rnn hidden_size
RNN_IN = 512              # rnn input_size / img_proj out
CNN_FEAT = 2048           # BaseNet output dim
EMBED = 1024              # CLIP RN50 embed dim
CONV_C = 64               # per-stem conv channels (2 stems -> 128 lanes)
K = 3                     # conv kernel size
KCOL_PAD = 32             # padded im2col contraction dim (3*3*3 = 27 -> 32)


# ----------------------------------------------------------------------------
# the single fused kernel (one grid step == one batch tile)
# ----------------------------------------------------------------------------
def mirror_kernel(patches_ref, g_ref,
                  stem_w_ref, stem_bias_ref,
                  fc_w_ref, fc_b_ref,
                  proj_w_ref, proj_b_ref,
                  wih_ref, whhproj_ref, bh_ref, bproj_ref,
                  emb_ref, posmean_ref, txt_w_ref, txt_b_ref,
                  cimg_w_ref, cimg_b_ref,
                  txt_out_ref, img_out_ref):
    f32 = jnp.float32
    bf16 = jnp.bfloat16
    n = g_ref.shape[1]                       # batch-tile size (static)

    # ---- both 3x3 conv stems (BaseNet lanes 0..63, CLIP lanes 64..127) as ONE
    # matmul.  CLIP preprocess normalization ("normalize then zero-pad") is
    # folded into stem_w / stem_bias host-side, so the input is raw patches.
    y = jnp.dot(patches_ref[...].astype(bf16), stem_w_ref[...],
                preferred_element_type=f32)                     # (n*256, 128)
    y = y.reshape(n, PATCHES, 2 * CONV_C) + stem_bias_ref[...]  # norm + conv bias
    y = jnp.maximum(y, 0.0)
    gap = jnp.mean(y, axis=1)                                   # (n, 128) GAP
    gap_b = gap.astype(bf16)

    # ---- CLIP image encoder head (rows [:64] of cimg_w are zero) ----
    img_out_ref[...] = (
        jnp.dot(gap_b, cimg_w_ref[...], preferred_element_type=f32)
        + cimg_b_ref[...])

    # ---- BaseNet fc (ReLU) -> img_proj, all intermediates stay in vregs/VMEM --
    x2 = jnp.maximum(
        jnp.dot(gap_b, fc_w_ref[...], preferred_element_type=f32) + fc_b_ref[...],
        0.0)                                                    # (n, 2048)
    x3 = (jnp.dot(x2.astype(bf16), proj_w_ref[...], preferred_element_type=f32)
          + proj_b_ref[...])                                    # (n, 512)

    # ---- gumbel RNN, fully unrolled (T=8 static), vectorized over the batch --
    lane = lax.broadcasted_iota(jnp.int32, (n, VOCAB_PAD), 1).astype(f32)
    g = g_ref[...]                                              # (T, n, 128) noise
    # time-invariant input term with the hidden bias folded in
    xwb = (jnp.dot(x3.astype(bf16), wih_ref[...], preferred_element_type=f32)
           + bh_ref[...])
    recur = jnp.zeros((n, HIDDEN), f32)       # h_0 @ Whh == 0  (dot skipped)
    oh_sum = jnp.zeros((n, VOCAB_PAD), f32)   # sum of per-step one-hots
    for t in range(SEQ_LEN):
        # NOTE: h is cast to bf16 for the MXU; if token flips vs an f32
        # reference appear, keep this dot in f32.
        h = jnp.tanh(xwb + recur)
        # fused [Whh | Wproj]: one MXU push per serial step (384 = 3 lane vregs)
        hm = jnp.dot(h.astype(bf16), whhproj_ref[...], preferred_element_type=f32)
        recur = hm[:, :HIDDEN]
        # vocab mask baked into bproj (-1e30 on padded lanes); g padded lanes = 0
        pert = hm[:, HIDDEN:] + bproj_ref[...] + g[t]
        # hard gumbel-softmax forward value: strict single-hot first-argmax
        # (off the recurrence critical path -> overlaps with the next step)
        m = jnp.max(pert, axis=-1, keepdims=True)
        cand = jnp.where(pert >= m, lane, float(VOCAB_PAD))
        first = jnp.min(cand, axis=-1, keepdims=True)
        oh_sum = oh_sum + (lane == first).astype(f32)

    # ---- CLIP text encoder stand-in: embed + pos -> mean pool -> proj ----
    # mean_t(onehot_t @ emb + pos_t) == (sum_t onehot_t) @ emb / T + mean_t(pos)
    pooled = (jnp.dot(oh_sum.astype(bf16), emb_ref[...], preferred_element_type=f32)
              * (1.0 / SEQ_LEN) + posmean_ref[...])             # (n, 512)
    txt_out_ref[...] = (
        jnp.dot(pooled.astype(bf16), txt_w_ref[...], preferred_element_type=f32)
        + txt_b_ref[...])


# ----------------------------------------------------------------------------
# JAX-side glue
# ----------------------------------------------------------------------------
def im2col_batched(x_nchw, k=K, pad=1):
    # x: (N, C, H, W) -> patches (N*H*W, C*k*k -> KCOL_PAD), zero-padded conv.
    # TODO(synk): patch extraction (pad/stack/transpose) has no clean Pallas
    # gather equivalent at this layout; it stays as one tiny XLA fusion.
    N, C, H, W = x_nchw.shape
    xp = jnp.pad(x_nchw, ((0, 0), (0, 0), (pad, pad), (pad, pad)))
    cols = []
    for di in range(k):
        for dj in range(k):
            cols.append(xp[:, :, di:di + H, dj:dj + W])
    p = jnp.stack(cols, axis=0)                       # (k*k, N, C, H, W)
    p = p.transpose(1, 3, 4, 2, 0).reshape(N * H * W, C * k * k)
    return jnp.pad(p, ((0, 0), (0, KCOL_PAD - C * k * k)))


_WEIGHT_NAMES = ("stem_w", "stem_bias", "fc_w", "fc_b", "proj_w", "proj_b",
                 "wih", "whh_wproj", "bh", "bproj", "emb", "pos_mean",
                 "txt_w", "txt_b", "cimg_w", "cimg_b")


def _pinned(shape):
    # full-array block, same block every grid step -> DMA'd once, stays resident
    zeros = (0,) * len(shape)
    return pl.BlockSpec(shape, lambda i, _z=zeros: _z)


def mirror_pallas(fp, patches, gumbel, n, tile_n):
    assert n % tile_n == 0
    weights = [fp[k] for k in _WEIGHT_NAMES]

    in_specs = [
        pl.BlockSpec((tile_n * PATCHES, KCOL_PAD), lambda i: (i, 0)),
        pl.BlockSpec((SEQ_LEN, tile_n, VOCAB_PAD), lambda i: (0, i, 0)),
    ] + [_pinned(w.shape) for w in weights]

    out_specs = (pl.BlockSpec((tile_n, EMBED), lambda i: (i, 0)),
                 pl.BlockSpec((tile_n, EMBED), lambda i: (i, 0)))

    return pl.pallas_call(
        mirror_kernel,
        grid=(n // tile_n,),
        out_shape=(jax.ShapeDtypeStruct((n, EMBED), jnp.float32),
                   jax.ShapeDtypeStruct((n, EMBED), jnp.float32)),
        in_specs=in_specs,
        out_specs=out_specs,
        compiler_params=pltpu.CompilerParams(
            # batch-tile axis is embarrassingly parallel -> megacore on v7x
            dimension_semantics=("parallel",),
            # ~4.5 MiB weights + small tiles; above v5e's 16 MiB default, well
            # under v7x's 64 MiB physical.  Re-size tile_n per generation if
            # batch tiles grow (≈64 imgs on v7x, 128-256 on v5e/v6e).
            vmem_limit_bytes=32 * 1024 * 1024),
    )(patches, gumbel, *weights)


def mirror_forward(fp, x, gumbel_key, *, tile_n):
    n = x.shape[0]
    # per-call, per-image gumbel sampling (matches F.gumbel_softmax semantics)
    g = jax.random.gumbel(gumbel_key, (SEQ_LEN, n, VOCAB)).astype(jnp.float32)
    g = jnp.pad(g, ((0, 0), (0, 0), (0, VOCAB_PAD - VOCAB)))
    # TODO(synk): torchvision resize/center-crop of clip.preprocess is omitted;
    # the per-channel normalization is folded into stem_w/stem_bias host-side.
    patches = im2col_batched(x)                     # raw-image patches
    return mirror_pallas(fp, patches, g, n, tile_n)


# ----------------------------------------------------------------------------
# deterministic parameters (stand-ins for the frozen torch modules)
# ----------------------------------------------------------------------------
def init_params(key):
    ks = jax.random.split(key, 16)
    n = lambda k, shape, scale=0.02: (scale * jax.random.normal(k, shape)).astype(jnp.float32)

    wproj = n(ks[8], (HIDDEN, VOCAB_PAD))
    wproj = jnp.where(jnp.arange(VOCAB_PAD)[None, :] < VOCAB, wproj, 0.0)

    emb = n(ks[10], (VOCAB_PAD, RNN_IN))
    emb = jnp.where(jnp.arange(VOCAB_PAD)[:, None] < VOCAB, emb, 0.0)

    return {
        "clip_mean": jnp.array([0.48145466, 0.4578275, 0.40821073], jnp.float32),
        "clip_std": jnp.array([0.26862954, 0.26130258, 0.27577711], jnp.float32),
        # BaseNet (frozen ResNet50 stand-in): conv+relu+GAP -> fc 2048
        "cnn_conv_w": n(ks[0], (KCOL_PAD, CONV_C)),
        "cnn_conv_b": n(ks[1], (1, CONV_C)),
        "cnn_fc_w": n(ks[2], (CONV_C, CNN_FEAT)),
        "cnn_fc_b": n(ks[3], (1, CNN_FEAT)),
        # img_proj: Linear(2048, 512)
        "proj_w": n(ks[4], (CNN_FEAT, RNN_IN)),
        "proj_b": n(ks[5], (1, RNN_IN)),
        # RNN_gumbel(input=512, hidden=256, proj=10)
        "rnn_wih": n(ks[6], (RNN_IN, HIDDEN)),
        "rnn_whh": n(ks[7], (HIDDEN, HIDDEN)),
        "rnn_bh": jnp.zeros((1, HIDDEN), jnp.float32),
        "rnn_wproj": wproj,
        "rnn_bproj": jnp.zeros((1, VOCAB_PAD), jnp.float32),
        # CLIP text encoder stand-in
        "txt_emb": emb,
        "txt_pos": n(ks[11], (SEQ_LEN, RNN_IN)),
        "txt_w": n(ks[12], (RNN_IN, EMBED)),
        "txt_b": jnp.zeros((1, EMBED), jnp.float32),
        # CLIP image encoder stand-in (frozen)
        "clipimg_conv_w": n(ks[13], (KCOL_PAD, CONV_C)),
        "clipimg_conv_b": jnp.zeros((1, CONV_C), jnp.float32),
        "clipimg_w": n(ks[14], (CONV_C, EMBED)),
        "clipimg_b": jnp.zeros((1, EMBED), jnp.float32),
    }


def prepare_fused_params(p):
    """Fold / concat / pad / bf16-cast the frozen weights for the fused kernel."""
    bf = lambda w: w.astype(jnp.bfloat16)

    # --- fold CLIP normalization into the stem (exact for frozen weights) ---
    # column order of im2col is channel-major: col = c*9 + kk
    mean, invstd = p["clip_mean"], 1.0 / p["clip_std"]
    col_ch = jnp.clip(jnp.arange(KCOL_PAD) // (K * K), 0, 2)
    valid = (jnp.arange(KCOL_PAD) < 3 * K * K).astype(jnp.float32)
    col_scale = valid * invstd[col_ch]                       # (32,)
    col_shift = valid * (-mean[col_ch] * invstd[col_ch])     # (32,)

    # both 3x3 stems consume identical patches -> one (32, 128) weight
    stem_w = jnp.concatenate([p["cnn_conv_w"], p["clipimg_conv_w"]], axis=1)
    stem_b = jnp.concatenate([p["cnn_conv_b"], p["clipimg_conv_b"]], axis=1)
    stem_w_scaled = stem_w * col_scale[:, None]
    # position-dependent correction: only non-zero-padded patch entries carry
    # the -mean/std offset ("normalize then zero-pad" of the reference conv)
    pmask = im2col_batched(jnp.ones((1, 3, IMG_H, IMG_W), jnp.float32))  # (256,32)
    stem_bias = (pmask * col_shift[None, :]) @ stem_w + stem_b           # (256,128)

    # heads consuming the split GAP are zero-row-padded to a 128-deep
    # contraction so the kernel never slices the 128-lane GAP vector.
    fc_w = jnp.zeros((2 * CONV_C, CNN_FEAT), jnp.float32).at[:CONV_C].set(p["cnn_fc_w"])
    cimg_w = jnp.zeros((2 * CONV_C, EMBED), jnp.float32).at[CONV_C:].set(p["clipimg_w"])

    # vocab mask baked into bproj; fused [Whh | Wproj] weight
    bproj = jnp.where(jnp.arange(VOCAB_PAD)[None, :] < VOCAB, p["rnn_bproj"], -1e30)
    whh_wproj = jnp.concatenate([p["rnn_whh"], p["rnn_wproj"]], axis=1)   # (256,384)

    return {
        "stem_w": bf(stem_w_scaled), "stem_bias": stem_bias,
        "fc_w": bf(fc_w), "fc_b": p["cnn_fc_b"],
        "proj_w": bf(p["proj_w"]), "proj_b": p["proj_b"],
        "wih": bf(p["rnn_wih"]), "whh_wproj": bf(whh_wproj),
        "bh": p["rnn_bh"], "bproj": bproj,
        "emb": bf(p["txt_emb"]),
        "pos_mean": jnp.mean(p["txt_pos"], axis=0, keepdims=True),
        "txt_w": bf(p["txt_w"]), "txt_b": p["txt_b"],
        "cimg_w": bf(cimg_w), "cimg_b": p["clipimg_b"],
    }


if __name__ == "__main__":
    root = jax.random.PRNGKey(0)
    k_x, k_p, k_g = jax.random.split(root, 3)

    N = 16        # small batch for the smoke test (use 64-256 in production)
    TILE_N = 8    # batch tile per grid step
    x = jax.random.uniform(k_x, (N, 3, IMG_H, IMG_W), jnp.float32)  # NCHW in [0,1]
    fused_params = prepare_fused_params(init_params(k_p))

    fwd = jax.jit(mirror_forward, static_argnames=("tile_n",))
    txt_, img_ = fwd(fused_params, x, k_g, tile_n=TILE_N)
    jax.block_until_ready((txt_, img_))

    assert txt_.shape == (N, EMBED) and img_.shape == (N, EMBED)
    assert jnp.all(jnp.isfinite(txt_)) and jnp.all(jnp.isfinite(img_))
    print("KERNEL_OK")
</pallas_src>

<mosaic_0001>
module attributes {stable_mosaic.version = 11 : i64} {
  func.func @mirror_kernel(%arg0: i32, %arg1: memref<2048x32xf32, #tpu.memory_space<vmem>>, %arg2: memref<8x8x128xf32, #tpu.memory_space<vmem>>, %arg3: memref<32x128xbf16, #tpu.memory_space<vmem>>, %arg4: memref<256x128xf32, #tpu.memory_space<vmem>>, %arg5: memref<128x2048xbf16, #tpu.memory_space<vmem>>, %arg6: memref<1x2048xf32, #tpu.memory_space<vmem>>, %arg7: memref<2048x512xbf16, #tpu.memory_space<vmem>>, %arg8: memref<1x512xf32, #tpu.memory_space<vmem>>, %arg9: memref<512x256xbf16, #tpu.memory_space<vmem>>, %arg10: memref<256x384xbf16, #tpu.memory_space<vmem>>, %arg11: memref<1x256xf32, #tpu.memory_space<vmem>>, %arg12: memref<1x128xf32, #tpu.memory_space<vmem>>, %arg13: memref<128x512xbf16, #tpu.memory_space<vmem>>, %arg14: memref<1x512xf32, #tpu.memory_space<vmem>>, %arg15: memref<512x1024xbf16, #tpu.memory_space<vmem>>, %arg16: memref<1x1024xf32, #tpu.memory_space<vmem>>, %arg17: memref<128x1024xbf16, #tpu.memory_space<vmem>>, %arg18: memref<1x1024xf32, #tpu.memory_space<vmem>>, %arg19: memref<8x1024xf32, #tpu.memory_space<vmem>>, %arg20: memref<8x1024xf32, #tpu.memory_space<vmem>>) attributes {dimension_semantics = [#tpu.dimension_semantics<parallel>], iteration_bounds = array<i64: 2>, scalar_prefetch = 0 : i64, scratch_operands = 0 : i64, tpu.core_type = #tpu.core_type<tc>, window_params = [{transform_indices = @transform_0, window_bounds = array<i64: 2048, 32>}, {transform_indices = @transform_1, window_bounds = array<i64: 8, 8, 128>}, {pipeline_mode = #tpu.pipeline_mode<synchronous>, transform_indices = @transform_2, window_bounds = array<i64: 32, 128>}, {pipeline_mode = #tpu.pipeline_mode<synchronous>, transform_indices = @transform_3, window_bounds = array<i64: 256, 128>}, {pipeline_mode = #tpu.pipeline_mode<synchronous>, transform_indices = @transform_4, window_bounds = array<i64: 128, 2048>}, {pipeline_mode = #tpu.pipeline_mode<synchronous>, transform_indices = @transform_5, window_bounds = array<i64: 1, 2048>}, {pipeline_mode = #tpu.pipeline_mode<synchronous>, transform_indices = @transform_6, window_bounds = array<i64: 2048, 512>}, {pipeline_mode = #tpu.pipeline_mode<synchronous>, transform_indices = @transform_7, window_bounds = array<i64: 1, 512>}, {pipeline_mode = #tpu.pipeline_mode<synchronous>, transform_indices = @transform_8, window_bounds = array<i64: 512, 256>}, {pipeline_mode = #tpu.pipeline_mode<synchronous>, transform_indices = @transform_9, window_bounds = array<i64: 256, 384>}, {pipeline_mode = #tpu.pipeline_mode<synchronous>, transform_indices = @transform_10, window_bounds = array<i64: 1, 256>}, {pipeline_mode = #tpu.pipeline_mode<synchronous>, transform_indices = @transform_11, window_bounds = array<i64: 1, 128>}, {pipeline_mode = #tpu.pipeline_mode<synchronous>, transform_indices = @transform_12, window_bounds = array<i64: 128, 512>}, {pipeline_mode = #tpu.pipeline_mode<synchronous>, transform_indices = @transform_13, window_bounds = array<i64: 1, 512>}, {pipeline_mode = #tpu.pipeline_mode<synchronous>, transform_indices = @transform_14, window_bounds = array<i64: 512, 1024>}, {pipeline_mode = #tpu.pipeline_mode<synchronous>, transform_indices = @transform_15, window_bounds = array<i64: 1, 1024>}, {pipeline_mode = #tpu.pipeline_mode<synchronous>, transform_indices = @transform_16, window_bounds = array<i64: 128, 1024>}, {pipeline_mode = #tpu.pipeline_mode<synchronous>, transform_indices = @transform_17, window_bounds = array<i64: 1, 1024>}, {transform_indices = @transform_18, window_bounds = array<i64: 8, 1024>}, {transform_indices = @transform_19, window_bounds = array<i64: 8, 1024>}]} {
    %c0 = arith.constant 0 : index
    %c0_0 = arith.constant 0 : index
    %0 = vector.load %arg1[%c0, %c0_0] : memref<2048x32xf32, #tpu.memory_space<vmem>>, vector<2048x32xf32>
    %1 = arith.truncf %0 : vector<2048x32xf32> to vector<2048x32xbf16>
    %c0_1 = arith.constant 0 : index
    %c0_2 = arith.constant 0 : index
    %2 = vector.load %arg3[%c0_1, %c0_2] : memref<32x128xbf16, #tpu.memory_space<vmem>>, vector<32x128xbf16>
    %cst = arith.constant dense<0.000000e+00> : vector<2048x128xf32>
    %3 = tpu.matmul %1, %2, %cst {dimension_numbers = #tpu.dot_dimension_numbers<[1], [0], [0], [1], [0, 0, 1, 1], [], []>} : vector<2048x32xbf16>, vector<32x128xbf16>, vector<2048x128xf32> -> vector<2048x128xf32>
    %4 = vector.shape_cast %3 : vector<2048x128xf32> to vector<8x256x128xf32>
    %c0_3 = arith.constant 0 : index
    %c0_4 = arith.constant 0 : index
    %5 = vector.load %arg4[%c0_3, %c0_4] : memref<256x128xf32, #tpu.memory_space<vmem>>, vector<256x128xf32>
    %6 = vector.shape_cast %5 : vector<256x128xf32> to vector<1x256x128xf32>
    %7 = vector.broadcast %6 : vector<1x256x128xf32> to vector<8x256x128xf32>
    %8 = arith.addf %4, %7 : vector<8x256x128xf32>
    %cst_5 = arith.constant 0.000000e+00 : f32
    %9 = vector.broadcast %cst_5 : f32 to vector<8x256x128xf32>
    %10 = arith.maximumf %8, %9 : vector<8x256x128xf32>
    %cst_6 = arith.constant dense<0.000000e+00> : vector<8x128xf32>
    %11 = vector.multi_reduction <add>, %10, %cst_6 [1] : vector<8x256x128xf32> to vector<8x128xf32>
    %cst_7 = arith.constant 2.560000e+02 : f32
    %12 = vector.broadcast %cst_7 : f32 to vector<8x128xf32>
    %13 = arith.divf %11, %12 : vector<8x128xf32>
    %14 = arith.truncf %13 : vector<8x128xf32> to vector<8x128xbf16>
    %c0_8 = arith.constant 0 : index
    %c0_9 = arith.constant 0 : index
    %15 = vector.load %arg17[%c0_8, %c0_9] : memref<128x1024xbf16, #tpu.memory_space<vmem>>, vector<128x1024xbf16>
    %cst_10 = arith.constant dense<0.000000e+00> : vector<8x1024xf32>
    %16 = tpu.matmul %14, %15, %cst_10 {dimension_numbers = #tpu.dot_dimension_numbers<[1], [0], [0], [1], [0, 0, 1, 1], [], []>} : vector<8x128xbf16>, vector<128x1024xbf16>, vector<8x1024xf32> -> vector<8x1024xf32>
    %c0_11 = arith.constant 0 : index
    %c0_12 = arith.constant 0 : index
    %17 = vector.load %arg18[%c0_11, %c0_12] : memref<1x1024xf32, #tpu.memory_space<vmem>>, vector<1x1024xf32>
    %18 = vector.broadcast %17 : vector<1x1024xf32> to vector<8x1024xf32>
    %19 = arith.addf %16, %18 : vector<8x1024xf32>
    %c0_13 = arith.constant 0 : index
    %c0_14 = arith.constant 0 : index
    %20 = vector.load %arg20[%c0_13, %c0_14] : memref<8x1024xf32, #tpu.memory_space<vmem>>, vector<8x1024xf32>
    tpu.vector_store %arg20[%c0_13, %c0_14], %19 {strides = array<i32>} : memref<8x1024xf32, #tpu.memory_space<vmem>>, vector<8x1024xf32>,
    %c0_15 = arith.constant 0 : index
    %c0_16 = arith.constant 0 : index
    %21 = vector.load %arg5[%c0_15, %c0_16] : memref<128x2048xbf16, #tpu.memory_space<vmem>>, vector<128x2048xbf16>
    %cst_17 = arith.constant dense<0.000000e+00> : vector<8x2048xf32>
    %22 = tpu.matmul %14, %21, %cst_17 {dimension_numbers = #tpu.dot_dimension_numbers<[1], [0], [0], [1], [0, 0, 1, 1], [], []>} : vector<8x128xbf16>, vector<128x2048xbf16>, vector<8x2048xf32> -> vector<8x2048xf32>
    %c0_18 = arith.constant 0 : index
    %c0_19 = arith.constant 0 : index
    %23 = vector.load %arg6[%c0_18, %c0_19] : memref<1x2048xf32, #tpu.memory_space<vmem>>, vector<1x2048xf32>
    %24 = vector.broadcast %23 : vector<1x2048xf32> to vector<8x2048xf32>
    %25 = arith.addf %22, %24 : vector<8x2048xf32>
    %cst_20 = arith.constant 0.000000e+00 : f32
    %26 = vector.broadcast %cst_20 : f32 to vector<8x2048xf32>
    %27 = arith.maximumf %25, %26 : vector<8x2048xf32>
    %28 = arith.truncf %27 : vector<8x2048xf32> to vector<8x2048xbf16>
    %c0_21 = arith.constant 0 : index
    %c0_22 = arith.constant 0 : index
    %29 = vector.load %arg7[%c0_21, %c0_22] : memref<2048x512xbf16, #tpu.memory_space<vmem>>, vector<2048x512xbf16>
    %cst_23 = arith.constant dense<0.000000e+00> : vector<8x512xf32>
    %30 = tpu.matmul %28, %29, %cst_23 {dimension_numbers = #tpu.dot_dimension_numbers<[1], [0], [0], [1], [0, 0, 1, 1], [], []>} : vector<8x2048xbf16>, vector<2048x512xbf16>, vector<8x512xf32> -> vector<8x512xf32>
    %c0_24 = arith.constant 0 : index
    %c0_25 = arith.constant 0 : index
    %31 = vector.load %arg8[%c0_24, %c0_25] : memref<1x512xf32, #tpu.memory_space<vmem>>, vector<1x512xf32>
    %32 = vector.broadcast %31 : vector<1x512xf32> to vector<8x512xf32>
    %33 = arith.addf %30, %32 : vector<8x512xf32>
    %34 = tpu.iota {dimensions = array<i32: 1>} : vector<8x128xi32>
    %35 = arith.sitofp %34 : vector<8x128xi32> to vector<8x128xf32>
    %c0_26 = arith.constant 0 : index
    %c0_27 = arith.constant 0 : index
    %c0_28 = arith.constant 0 : index
    %36 = vector.load %arg2[%c0_26, %c0_27, %c0_28] : memref<8x8x128xf32, #tpu.memory_space<vmem>>, vector<8x8x128xf32>
    %37 = arith.truncf %33 : vector<8x512xf32> to vector<8x512xbf16>
    %c0_29 = arith.constant 0 : index
    %c0_30 = arith.constant 0 : index
    %38 = vector.load %arg9[%c0_29, %c0_30] : memref<512x256xbf16, #tpu.memory_space<vmem>>, vector<512x256xbf16>
    %cst_31 = arith.constant dense<0.000000e+00> : vector<8x256xf32>
    %39 = tpu.matmul %37, %38, %cst_31 {dimension_numbers = #tpu.dot_dimension_numbers<[1], [0], [0], [1], [0, 0, 1, 1], [], []>} : vector<8x512xbf16>, vector<512x256xbf16>, vector<8x256xf32> -> vector<8x256xf32>
    %c0_32 = arith.constant 0 : index
    %c0_33 = arith.constant 0 : index
    %40 = vector.load %arg11[%c0_32, %c0_33] : memref<1x256xf32, #tpu.memory_space<vmem>>, vector<1x256xf32>
    %41 = vector.broadcast %40 : vector<1x256xf32> to vector<8x256xf32>
    %42 = arith.addf %39, %41 : vector<8x256xf32>
    %cst_34 = arith.constant 0.000000e+00 : f32
    %43 = vector.broadcast %cst_34 : f32 to vector<8x256xf32>
    %cst_35 = arith.constant 0.000000e+00 : f32
    %44 = vector.broadcast %cst_35 : f32 to vector<8x128xf32>
    %45 = arith.addf %42, %43 : vector<8x256xf32>
    %46 = math.tanh %45 : vector<8x256xf32>
    %47 = arith.truncf %46 : vector<8x256xf32> to vector<8x256xbf16>
    %c0_36 = arith.constant 0 : index
    %c0_37 = arith.constant 0 : index
    %48 = vector.load %arg10[%c0_36, %c0_37] : memref<256x384xbf16, #tpu.memory_space<vmem>>, vector<256x384xbf16>
    %cst_38 = arith.constant dense<0.000000e+00> : vector<8x384xf32>
    %49 = tpu.matmul %47, %48, %cst_38 {dimension_numbers = #tpu.dot_dimension_numbers<[1], [0], [0], [1], [0, 0, 1, 1], [], []>} : vector<8x256xbf16>, vector<256x384xbf16>, vector<8x384xf32> -> vector<8x384xf32>
    %50 = vector.extract_strided_slice %49 {offsets = [0, 0], sizes = [8, 256], strides = [1, 1]} : vector<8x384xf32> to vector<8x256xf32>
    %51 = vector.extract_strided_slice %49 {offsets = [0, 256], sizes = [8, 128], strides = [1, 1]} : vector<8x384xf32> to vector<8x128xf32>
    %c0_39 = arith.constant 0 : index
    %c0_40 = arith.constant 0 : index
    %52 = vector.load %arg12[%c0_39, %c0_40] : memref<1x128xf32, #tpu.memory_space<vmem>>, vector<1x128xf32>
    %53 = vector.broadcast %52 : vector<1x128xf32> to vector<8x128xf32>
    %54 = arith.addf %51, %53 : vector<8x128xf32>
    %55 = vector.extract_strided_slice %36 {offsets = [0, 0, 0], sizes = [1, 8, 128], strides = [1, 1, 1]} : vector<8x8x128xf32> to vector<1x8x128xf32>
    %56 = vector.shape_cast %55 : vector<1x8x128xf32> to vector<8x128xf32>
    %57 = arith.addf %54, %56 : vector<8x128xf32>
    %cst_41 = arith.constant dense<0xFF800000> : vector<8xf32>
    %58 = vector.multi_reduction <maximumf>, %57, %cst_41 [1] : vector<8x128xf32> to vector<8xf32>
    %59 = vector.shape_cast %58 : vector<8xf32> to vector<8x1xf32>
    %60 = vector.broadcast %59 : vector<8x1xf32> to vector<8x128xf32>
    %61 = arith.cmpf oge, %57, %60 : vector<8x128xf32>
    %cst_42 = arith.constant 1.280000e+02 : f32
    %62 = vector.broadcast %cst_42 : f32 to vector<8x128xf32>
    %63 = arith.select %61, %35, %62 : vector<8x128xi1>, vector<8x128xf32>
    %cst_43 = arith.constant dense<0x7F800000> : vector<8xf32>
    %64 = vector.multi_reduction <minimumf>, %63, %cst_43 [1] : vector<8x128xf32> to vector<8xf32>
    %65 = vector.shape_cast %64 : vector<8xf32> to vector<8x1xf32>
    %66 = vector.broadcast %65 : vector<8x1xf32> to vector<8x128xf32>
    %67 = arith.cmpf oeq, %35, %66 : vector<8x128xf32>
    %68 = arith.extui %67 : vector<8x128xi1> to vector<8x128xi32>
    %69 = arith.sitofp %68 : vector<8x128xi32> to vector<8x128xf32>
    %70 = arith.addf %44, %69 : vector<8x128xf32>
    %71 = arith.addf %42, %50 : vector<8x256xf32>
    %72 = math.tanh %71 : vector<8x256xf32>
    %73 = arith.truncf %72 : vector<8x256xf32> to vector<8x256xbf16>
    %c0_44 = arith.constant 0 : index
    %c0_45 = arith.constant 0 : index
    %74 = vector.load %arg10[%c0_44, %c0_45] : memref<256x384xbf16, #tpu.memory_space<vmem>>, vector<256x384xbf16>
    %cst_46 = arith.constant dense<0.000000e+00> : vector<8x384xf32>
    %75 = tpu.matmul %73, %74, %cst_46 {dimension_numbers = #tpu.dot_dimension_numbers<[1], [0], [0], [1], [0, 0, 1, 1], [], []>} : vector<8x256xbf16>, vector<256x384xbf16>, vector<8x384xf32> -> vector<8x384xf32>
    %76 = vector.extract_strided_slice %75 {offsets = [0, 0], sizes = [8, 256], strides = [1, 1]} : vector<8x384xf32> to vector<8x256xf32>
    %77 = vector.extract_strided_slice %75 {offsets = [0, 256], sizes = [8, 128], strides = [1, 1]} : vector<8x384xf32> to vector<8x128xf32>
    %c0_47 = arith.constant 0 : index
    %c0_48 = arith.constant 0 : index
    %78 = vector.load %arg12[%c0_47, %c0_48] : memref<1x128xf32, #tpu.memory_space<vmem>>, vector<1x128xf32>
    %79 = vector.broadcast %78 : vector<1x128xf32> to vector<8x128xf32>
    %80 = arith.addf %77, %79 : vector<8x128xf32>
    %81 = vector.extract_strided_slice %36 {offsets = [1, 0, 0], sizes = [1, 8, 128], strides = [1, 1, 1]} : vector<8x8x128xf32> to vector<1x8x128xf32>
    %82 = vector.shape_cast %81 : vector<1x8x128xf32> to vector<8x128xf32>
    %83 = arith.addf %80, %82 : vector<8x128xf32>
    %cst_49 = arith.constant dense<0xFF800000> : vector<8xf32>
    %84 = vector.multi_reduction <maximumf>, %83, %cst_49 [1] : vector<8x128xf32> to vector<8xf32>
    %85 = vector.shape_cast %84 : vector<8xf32> to vector<8x1xf32>
    %86 = vector.broadcast %85 : vector<8x1xf32> to vector<8x128xf32>
    %87 = arith.cmpf oge, %83, %86 : vector<8x128xf32>
    %cst_50 = arith.constant 1.280000e+02 : f32
    %88 = vector.broadcast %cst_50 : f32 to vector<8x128xf32>
    %89 = arith.select %87, %35, %88 : vector<8x128xi1>, vector<8x128xf32>
    %cst_51 = arith.constant dense<0x7F800000> : vector<8xf32>
    %90 = vector.multi_reduction <minimumf>, %89, %cst_51 [1] : vector<8x128xf32> to vector<8xf32>
    %91 = vector.shape_cast %90 : vector<8xf32> to vector<8x1xf32>
    %92 = vector.broadcast %91 : vector<8x1xf32> to vector<8x128xf32>
    %93 = arith.cmpf oeq, %35, %92 : vector<8x128xf32>
    %94 = arith.extui %93 : vector<8x128xi1> to vector<8x128xi32>
    %95 = arith.sitofp %94 : vector<8x128xi32> to vector<8x128xf32>
    %96 = arith.addf %70, %95 : vector<8x128xf32>
    %97 = arith.addf %42, %76 : vector<8x256xf32>
    %98 = math.tanh %97 : vector<8x256xf32>
    %99 = arith.truncf %98 : vector<8x256xf32> to vector<8x256xbf16>
    %c0_52 = arith.constant 0 : index
    %c0_53 = arith.constant 0 : index
    %100 = vector.load %arg10[%c0_52, %c0_53] : memref<256x384xbf16, #tpu.memory_space<vmem>>, vector<256x384xbf16>
    %cst_54 = arith.constant dense<0.000000e+00> : vector<8x384xf32>
    %101 = tpu.matmul %99, %100, %cst_54 {dimension_numbers = #tpu.dot_dimension_numbers<[1], [0], [0], [1], [0, 0, 1, 1], [], []>} : vector<8x256xbf16>, vector<256x384xbf16>, vector<8x384xf32> -> vector<8x384xf32>
    %102 = vector.extract_strided_slice %101 {offsets = [0, 0], sizes = [8, 256], strides = [1, 1]} : vector<8x384xf32> to vector<8x256xf32>
    %103 = vector.extract_strided_slice %101 {offsets = [0, 256], sizes = [8, 128], strides = [1, 1]} : vector<8x384xf32> to vector<8x128xf32>
    %c0_55 = arith.constant 0 : index
    %c0_56 = arith.constant 0 : index
    %104 = vector.load %arg12[%c0_55, %c0_56] : memref<1x128xf32, #tpu.memory_space<vmem>>, vector<1x128xf32>
    %105 = vector.broadcast %104 : vector<1x128xf32> to vector<8x128xf32>
    %106 = arith.addf %103, %105 : vector<8x128xf32>
    %107 = vector.extract_strided_slice %36 {offsets = [2, 0, 0], sizes = [1, 8, 128], strides = [1, 1, 1]} : vector<8x8x128xf32> to vector<1x8x128xf32>
    %108 = vector.shape_cast %107 : vector<1x8x128xf32> to vector<8x128xf32>
    %109 = arith.addf %106, %108 : vector<8x128xf32>
    %cst_57 = arith.constant dense<0xFF800000> : vector<8xf32>
    %110 = vector.multi_reduction <maximumf>, %109, %cst_57 [1] : vector<8x128xf32> to vector<8xf32>
    %111 = vector.shape_cast %110 : vector<8xf32> to vector<8x1xf32>
    %112 = vector.broadcast %111 : vector<8x1xf32> to vector<8x128xf32>
    %113 = arith.cmpf oge, %109, %112 : vector<8x128xf32>
    %cst_58 = arith.constant 1.280000e+02 : f32
    %114 = vector.broadcast %cst_58 : f32 to vector<8x128xf32>
    %115 = arith.select %113, %35, %114 : vector<8x128xi1>, vector<8x128xf32>
    %cst_59 = arith.constant dense<0x7F800000> : vector<8xf32>
    %116 = vector.multi_reduction <minimumf>, %115, %cst_59 [1] : vector<8x128xf32> to vector<8xf32>
    %117 = vector.shape_cast %116 : vector<8xf32> to vector<8x1xf32>
    %118 = vector.broadcast %117 : vector<8x1xf32> to vector<8x128xf32>
    %119 = arith.cmpf oeq, %35, %118 : vector<8x128xf32>
    %120 = arith.extui %119 : vector<8x128xi1> to vector<8x128xi32>
    %121 = arith.sitofp %120 : vector<8x128xi32> to vector<8x128xf32>
    %122 = arith.addf %96, %121 : vector<8x128xf32>
    %123 = arith.addf %42, %102 : vector<8x256xf32>
    %124 = math.tanh %123 : vector<8x256xf32>
    %125 = arith.truncf %124 : vector<8x256xf32> to vector<8x256xbf16>
    %c0_60 = arith.constant 0 : index
    %c0_61 = arith.constant 0 : index
    %126 = vector.load %arg10[%c0_60, %c0_61] : memref<256x384xbf16, #tpu.memory_space<vmem>>, vector<256x384xbf16>
    %cst_62 = arith.constant dense<0.000000e+00> : vector<8x384xf32>
    %127 = tpu.matmul %125, %126, %cst_62 {dimension_numbers = #tpu.dot_dimension_numbers<[1], [0], [0], [1], [0, 0, 1, 1], [], []>} : vector<8x256xbf16>, vector<256x384xbf16>, vector<8x384xf32> -> vector<8x384xf32>
    %128 = vector.extract_strided_slice %127 {offsets = [0, 0], sizes = [8, 256], strides = [1, 1]} : vector<8x384xf32> to vector<8x256xf32>
    %129 = vector.extract_strided_slice %127 {offsets = [0, 256], sizes = [8, 128], strides = [1, 1]} : vector<8x384xf32> to vector<8x128xf32>
    %c0_63 = arith.constant 0 : index
    %c0_64 = arith.constant 0 : index
    %130 = vector.load %arg12[%c0_63, %c0_64] : memref<1x128xf32, #tpu.memory_space<vmem>>, vector<1x128xf32>
    %131 = vector.broadcast %130 : vector<1x128xf32> to vector<8x128xf32>
    %132 = arith.addf %129, %131 : vector<8x128xf32>
    %133 = vector.extract_strided_slice %36 {offsets = [3, 0, 0], sizes = [1, 8, 128], strides = [1, 1, 1]} : vector<8x8x128xf32> to vector<1x8x128xf32>
    %134 = vector.shape_cast %133 : vector<1x8x128xf32> to vector<8x128xf32>
    %135 = arith.addf %132, %134 : vector<8x128xf32>
    %cst_65 = arith.constant dense<0xFF800000> : vector<8xf32>
    %136 = vector.multi_reduction <maximumf>, %135, %cst_65 [1] : vector<8x128xf32> to vector<8xf32>
    %137 = vector.shape_cast %136 : vector<8xf32> to vector<8x1xf32>
    %138 = vector.broadcast %137 : vector<8x1xf32> to vector<8x128xf32>
    %139 = arith.cmpf oge, %135, %138 : vector<8x128xf32>
    %cst_66 = arith.constant 1.280000e+02 : f32
    %140 = vector.broadcast %cst_66 : f32 to vector<8x128xf32>
    %141 = arith.select %139, %35, %140 : vector<8x128xi1>, vector<8x128xf32>
    %cst_67 = arith.constant dense<0x7F800000> : vector<8xf32>
    %142 = vector.multi_reduction <minimumf>, %141, %cst_67 [1] : vector<8x128xf32> to vector<8xf32>
    %143 = vector.shape_cast %142 : vector<8xf32> to vector<8x1xf32>
    %144 = vector.broadcast %143 : vector<8x1xf32> to vector<8x128xf32>
    %145 = arith.cmpf oeq, %35, %144 : vector<8x128xf32>
    %146 = arith.extui %145 : vector<8x128xi1> to vector<8x128xi32>
    %147 = arith.sitofp %146 : vector<8x128xi32> to vector<8x128xf32>
    %148 = arith.addf %122, %147 : vector<8x128xf32>
    %149 = arith.addf %42, %128 : vector<8x256xf32>
    %150 = math.tanh %149 : vector<8x256xf32>
    %151 = arith.truncf %150 : vector<8x256xf32> to vector<8x256xbf16>
    %c0_68 = arith.constant 0 : index
    %c0_69 = arith.constant 0 : index
    %152 = vector.load %arg10[%c0_68, %c0_69] : memref<256x384xbf16, #tpu.memory_space<vmem>>, vector<256x384xbf16>
    %cst_70 = arith.constant dense<0.000000e+00> : vector<8x384xf32>
    %153 = tpu.matmul %151, %152, %cst_70 {dimension_numbers = #tpu.dot_dimension_numbers<[1], [0], [0], [1], [0, 0, 1, 1], [], []>} : vector<8x256xbf16>, vector<256x384xbf16>, vector<8x384xf32> -> vector<8x384xf32>
    %154 = vector.extract_strided_slice %153 {offsets = [0, 0], sizes = [8, 256], strides = [1, 1]} : vector<8x384xf32> to vector<8x256xf32>
    %155 = vector.extract_strided_slice %153 {offsets = [0, 256], sizes = [8, 128], strides = [1, 1]} : vector<8x384xf32> to vector<8x128xf32>
    %c0_71 = arith.constant 0 : index
    %c0_72 = arith.constant 0 : index
    %156 = vector.load %arg12[%c0_71, %c0_72] : memref<1x128xf32, #tpu.memory_space<vmem>>, vector<1x128xf32>
    %157 = vector.broadcast %156 : vector<1x128xf32> to vector<8x128xf32>
    %158 = arith.addf %155, %157 : vector<8x128xf32>
    %159 = vector.extract_strided_slice %36 {offsets = [4, 0, 0], sizes = [1, 8, 128], strides = [1, 1, 1]} : vector<8x8x128xf32> to vector<1x8x128xf32>
    %160 = vector.shape_cast %159 : vector<1x8x128xf32> to vector<8x128xf32>
    %161 = arith.addf %158, %160 : vector<8x128xf32>
    %cst_73 = arith.constant dense<0xFF800000> : vector<8xf32>
    %162 = vector.multi_reduction <maximumf>, %161, %cst_73 [1] : vector<8x128xf32> to vector<8xf32>
    %163 = vector.shape_cast %162 : vector<8xf32> to vector<8x1xf32>
    %164 = vector.broadcast %163 : vector<8x1xf32> to vector<8x128xf32>
    %165 = arith.cmpf oge, %161, %164 : vector<8x128xf32>
    %cst_74 = arith.constant 1.280000e+02 : f32
    %166 = vector.broadcast %cst_74 : f32 to vector<8x128xf32>
    %167 = arith.select %165, %35, %166 : vector<8x128xi1>, vector<8x128xf32>
    %cst_75 = arith.constant dense<0x7F800000> : vector<8xf32>
    %168 = vector.multi_reduction <minimumf>, %167, %cst_75 [1] : vector<8x128xf32> to vector<8xf32>
    %169 = vector.shape_cast %168 : vector<8xf32> to vector<8x1xf32>
    %170 = vector.broadcast %169 : vector<8x1xf32> to vector<8x128xf32>
    %171 = arith.cmpf oeq, %35, %170 : vector<8x128xf32>
    %172 = arith.extui %171 : vector<8x128xi1> to vector<8x128xi32>
    %173 = arith.sitofp %172 : vector<8x128xi32> to vector<8x128xf32>
    %174 = arith.addf %148, %173 : vector<8x128xf32>
    %175 = arith.addf %42, %154 : vector<8x256xf32>
    %176 = math.tanh %175 : vector<8x256xf32>
    %177 = arith.truncf %176 : vector<8x256xf32> to vector<8x256xbf16>
    %c0_76 = arith.constant 0 : index
    %c0_77 = arith.constant 0 : index
    %178 = vector.load %arg10[%c0_76, %c0_77] : memref<256x384xbf16, #tpu.memory_space<vmem>>, vector<256x384xbf16>
    %cst_78 = arith.constant dense<0.000000e+00> : vector<8x384xf32>
    %179 = tpu.matmul %177, %178, %cst_78 {dimension_numbers = #tpu.dot_dimension_numbers<[1], [0], [0], [1], [0, 0, 1, 1], [], []>} : vector<8x256xbf16>, vector<256x384xbf16>, vector<8x384xf32> -> vector<8x384xf32>
    %180 = vector.extract_strided_slice %179 {offsets = [0, 0], sizes = [8, 256], strides = [1, 1]} : vector<8x384xf32> to vector<8x256xf32>
    %181 = vector.extract_strided_slice %179 {offsets = [0, 256], sizes = [8, 128], strides = [1, 1]} : vector<8x384xf32> to vector<8x128xf32>
    %c0_79 = arith.constant 0 : index
    %c0_80 = arith.constant 0 : index
    %182 = vector.load %arg12[%c0_79, %c0_80] : memref<1x128xf32, #tpu.memory_space<vmem>>, vector<1x128xf32>
    %183 = vector.broadcast %182 : vector<1x128xf32> to vector<8x128xf32>
    %184 = arith.addf %181, %183 : vector<8x128xf32>
    %185 = vector.extract_strided_slice %36 {offsets = [5, 0, 0], sizes = [1, 8, 128], strides = [1, 1, 1]} : vector<8x8x128xf32> to vector<1x8x128xf32>
    %186 = vector.shape_cast %185 : vector<1x8x128xf32> to vector<8x128xf32>
    %187 = arith.addf %184, %186 : vector<8x128xf32>
    %cst_81 = arith.constant dense<0xFF800000> : vector<8xf32>
    %188 = vector.multi_reduction <maximumf>, %187, %cst_81 [1] : vector<8x128xf32> to vector<8xf32>
    %189 = vector.shape_cast %188 : vector<8xf32> to vector<8x1xf32>
    %190 = vector.broadcast %189 : vector<8x1xf32> to vector<8x128xf32>
    %191 = arith.cmpf oge, %187, %190 : vector<8x128xf32>
    %cst_82 = arith.constant 1.280000e+02 : f32
    %192 = vector.broadcast %cst_82 : f32 to vector<8x128xf32>
    %193 = arith.select %191, %35, %192 : vector<8x128xi1>, vector<8x128xf32>
    %cst_83 = arith.constant dense<0x7F800000> : vector<8xf32>
    %194 = vector.multi_reduction <minimumf>, %193, %cst_83 [1] : vector<8x128xf32> to vector<8xf32>
    %195 = vector.shape_cast %194 : vector<8xf32> to vector<8x1xf32>
    %196 = vector.broadcast %195 : vector<8x1xf32> to vector<8x128xf32>
    %197 = arith.cmpf oeq, %35, %196 : vector<8x128xf32>
    %198 = arith.extui %197 : vector<8x128xi1> to vector<8x128xi32>
    %199 = arith.sitofp %198 : vector<8x128xi32> to vector<8x128xf32>
    %200 = arith.addf %174, %199 : vector<8x128xf32>
    %201 = arith.addf %42, %180 : vector<8x256xf32>
    %202 = math.tanh %201 : vector<8x256xf32>
    %203 = arith.truncf %202 : vector<8x256xf32> to vector<8x256xbf16>
    %c0_84 = arith.constant 0 : index
    %c0_85 = arith.constant 0 : index
    %204 = vector.load %arg10[%c0_84, %c0_85] : memref<256x384xbf16, #tpu.memory_space<vmem>>, vector<256x384xbf16>
    %cst_86 = arith.constant dense<0.000000e+00> : vector<8x384xf32>
    %205 = tpu.matmul %203, %204, %cst_86 {dimension_numbers = #tpu.dot_dimension_numbers<[1], [0], [0], [1], [0, 0, 1, 1], [], []>} : vector<8x256xbf16>, vector<256x384xbf16>, vector<8x384xf32> -> vector<8x384xf32>
    %206 = vector.extract_strided_slice %205 {offsets = [0, 0], sizes = [8, 256], strides = [1, 1]} : vector<8x384xf32> to vector<8x256xf32>
    %207 = vector.extract_strided_slice %205 {offsets = [0, 256], sizes = [8, 128], strides = [1, 1]} : vector<8x384xf32> to vector<8x128xf32>
    %c0_87 = arith.constant 0 : index
    %c0_88 = arith.constant 0 : index
    %208 = vector.load %arg12[%c0_87, %c0_88] : memref<1x128xf32, #tpu.memory_space<vmem>>, vector<1x128xf32>
    %209 = vector.broadcast %208 : vector<1x128xf32> to vector<8x128xf32>
    %210 = arith.addf %207, %209 : vector<8x128xf32>
    %211 = vector.extract_strided_slice %36 {offsets = [6, 0, 0], sizes = [1, 8, 128], strides = [1, 1, 1]} : vector<8x8x128xf32> to vector<1x8x128xf32>
    %212 = vector.shape_cast %211 : vector<1x8x128xf32> to vector<8x128xf32>
    %213 = arith.addf %210, %212 : vector<8x128xf32>
    %cst_89 = arith.constant dense<0xFF800000> : vector<8xf32>
    %214 = vector.multi_reduction <maximumf>, %213, %cst_89 [1] : vector<8x128xf32> to vector<8xf32>
    %215 = vector.shape_cast %214 : vector<8xf32> to vector<8x1xf32>
    %216 = vector.broadcast %215 : vector<8x1xf32> to vector<8x128xf32>
    %217 = arith.cmpf oge, %213, %216 : vector<8x128xf32>
    %cst_90 = arith.constant 1.280000e+02 : f32
    %218 = vector.broadcast %cst_90 : f32 to vector<8x128xf32>
    %219 = arith.select %217, %35, %218 : vector<8x128xi1>, vector<8x128xf32>
    %cst_91 = arith.constant dense<0x7F800000> : vector<8xf32>
    %220 = vector.multi_reduction <minimumf>, %219, %cst_91 [1] : vector<8x128xf32> to vector<8xf32>
    %221 = vector.shape_cast %220 : vector<8xf32> to vector<8x1xf32>
    %222 = vector.broadcast %221 : vector<8x1xf32> to vector<8x128xf32>
    %223 = arith.cmpf oeq, %35, %222 : vector<8x128xf32>
    %224 = arith.extui %223 : vector<8x128xi1> to vector<8x128xi32>
    %225 = arith.sitofp %224 : vector<8x128xi32> to vector<8x128xf32>
    %226 = arith.addf %200, %225 : vector<8x128xf32>
    %227 = arith.addf %42, %206 : vector<8x256xf32>
    %228 = math.tanh %227 : vector<8x256xf32>
    %229 = arith.truncf %228 : vector<8x256xf32> to vector<8x256xbf16>
    %c0_92 = arith.constant 0 : index
    %c0_93 = arith.constant 0 : index
    %230 = vector.load %arg10[%c0_92, %c0_93] : memref<256x384xbf16, #tpu.memory_space<vmem>>, vector<256x384xbf16>
    %cst_94 = arith.constant dense<0.000000e+00> : vector<8x384xf32>
    %231 = tpu.matmul %229, %230, %cst_94 {dimension_numbers = #tpu.dot_dimension_numbers<[1], [0], [0], [1], [0, 0, 1, 1], [], []>} : vector<8x256xbf16>, vector<256x384xbf16>, vector<8x384xf32> -> vector<8x384xf32>
    %232 = vector.extract_strided_slice %231 {offsets = [0, 256], sizes = [8, 128], strides = [1, 1]} : vector<8x384xf32> to vector<8x128xf32>
    %c0_95 = arith.constant 0 : index
    %c0_96 = arith.constant 0 : index
    %233 = vector.load %arg12[%c0_95, %c0_96] : memref<1x128xf32, #tpu.memory_space<vmem>>, vector<1x128xf32>
    %234 = vector.broadcast %233 : vector<1x128xf32> to vector<8x128xf32>
    %235 = arith.addf %232, %234 : vector<8x128xf32>
    %236 = vector.extract_strided_slice %36 {offsets = [7, 0, 0], sizes = [1, 8, 128], strides = [1, 1, 1]} : vector<8x8x128xf32> to vector<1x8x128xf32>
    %237 = vector.shape_cast %236 : vector<1x8x128xf32> to vector<8x128xf32>
    %238 = arith.addf %235, %237 : vector<8x128xf32>
    %cst_97 = arith.constant dense<0xFF800000> : vector<8xf32>
    %239 = vector.multi_reduction <maximumf>, %238, %cst_97 [1] : vector<8x128xf32> to vector<8xf32>
    %240 = vector.shape_cast %239 : vector<8xf32> to vector<8x1xf32>
    %241 = vector.broadcast %240 : vector<8x1xf32> to vector<8x128xf32>
    %242 = arith.cmpf oge, %238, %241 : vector<8x128xf32>
    %cst_98 = arith.constant 1.280000e+02 : f32
    %243 = vector.broadcast %cst_98 : f32 to vector<8x128xf32>
    %244 = arith.select %242, %35, %243 : vector<8x128xi1>, vector<8x128xf32>
    %cst_99 = arith.constant dense<0x7F800000> : vector<8xf32>
    %245 = vector.multi_reduction <minimumf>, %244, %cst_99 [1] : vector<8x128xf32> to vector<8xf32>
    %246 = vector.shape_cast %245 : vector<8xf32> to vector<8x1xf32>
    %247 = vector.broadcast %246 : vector<8x1xf32> to vector<8x128xf32>
    %248 = arith.cmpf oeq, %35, %247 : vector<8x128xf32>
    %249 = arith.extui %248 : vector<8x128xi1> to vector<8x128xi32>
    %250 = arith.sitofp %249 : vector<8x128xi32> to vector<8x128xf32>
    %251 = arith.addf %226, %250 : vector<8x128xf32>
    %252 = arith.truncf %251 : vector<8x128xf32> to vector<8x128xbf16>
    %c0_100 = arith.constant 0 : index
    %c0_101 = arith.constant 0 : index
    %253 = vector.load %arg13[%c0_100, %c0_101] : memref<128x512xbf16, #tpu.memory_space<vmem>>, vector<128x512xbf16>
    %cst_102 = arith.constant dense<0.000000e+00> : vector<8x512xf32>
    %254 = tpu.matmul %252, %253, %cst_102 {dimension_numbers = #tpu.dot_dimension_numbers<[1], [0], [0], [1], [0, 0, 1, 1], [], []>} : vector<8x128xbf16>, vector<128x512xbf16>, vector<8x512xf32> -> vector<8x512xf32>
    %cst_103 = arith.constant 1.250000e-01 : f32
    %255 = vector.broadcast %cst_103 : f32 to vector<8x512xf32>
    %256 = arith.mulf %254, %255 : vector<8x512xf32>
    %c0_104 = arith.constant 0 : index
    %c0_105 = arith.constant 0 : index
    %257 = vector.load %arg14[%c0_104, %c0_105] : memref<1x512xf32, #tpu.memory_space<vmem>>, vector<1x512xf32>
    %258 = vector.broadcast %257 : vector<1x512xf32> to vector<8x512xf32>
    %259 = arith.addf %256, %258 : vector<8x512xf32>
    %260 = arith.truncf %259 : vector<8x512xf32> to vector<8x512xbf16>
    %c0_106 = arith.constant 0 : index
    %c0_107 = arith.constant 0 : index
    %261 = vector.load %arg15[%c0_106, %c0_107] : memref<512x1024xbf16, #tpu.memory_space<vmem>>, vector<512x1024xbf16>
    %cst_108 = arith.constant dense<0.000000e+00> : vector<8x1024xf32>
    %262 = tpu.matmul %260, %261, %cst_108 {dimension_numbers = #tpu.dot_dimension_numbers<[1], [0], [0], [1], [0, 0, 1, 1], [], []>} : vector<8x512xbf16>, vector<512x1024xbf16>, vector<8x1024xf32> -> vector<8x1024xf32>
    %c0_109 = arith.constant 0 : index
    %c0_110 = arith.constant 0 : index
    %263 = vector.load %arg16[%c0_109, %c0_110] : memref<1x1024xf32, #tpu.memory_space<vmem>>, vector<1x1024xf32>
    %264 = vector.broadcast %263 : vector<1x1024xf32> to vector<8x1024xf32>
    %265 = arith.addf %262, %264 : vector<8x1024xf32>
    %c0_111 = arith.constant 0 : index
    %c0_112 = arith.constant 0 : index
    %266 = vector.load %arg19[%c0_111, %c0_112] : memref<8x1024xf32, #tpu.memory_space<vmem>>, vector<8x1024xf32>
    tpu.vector_store %arg19[%c0_111, %c0_112], %265 {strides = array<i32>} : memref<8x1024xf32, #tpu.memory_space<vmem>>, vector<8x1024xf32>,
    return
  }
  func.func @transform_0(%arg0: i32) -> (i32, i32) {
    %c0_i32 = arith.constant 0 : i32
    %c0_i32_0 = arith.constant 0 : i32
    return %arg0, %c0_i32 : i32, i32
  }
  func.func @transform_1(%arg0: i32) -> (i32, i32, i32) {
    %c0_i32 = arith.constant 0 : i32
    %c0_i32_0 = arith.constant 0 : i32
    %c0_i32_1 = arith.constant 0 : i32
    return %c0_i32, %arg0, %c0_i32_0 : i32, i32, i32
  }
  func.func @transform_2(%arg0: i32) -> (i32, i32) {
    %c0_i32 = arith.constant 0 : i32
    %c0_i32_0 = arith.constant 0 : i32
    %c0_i32_1 = arith.constant 0 : i32
    return %c0_i32, %c0_i32_0 : i32, i32
  }
  func.func @transform_3(%arg0: i32) -> (i32, i32) {
    %c0_i32 = arith.constant 0 : i32
    %c0_i32_0 = arith.constant 0 : i32
    %c0_i32_1 = arith.constant 0 : i32
    return %c0_i32, %c0_i32_0 : i32, i32
  }
  func.func @transform_4(%arg0: i32) -> (i32, i32) {
    %c0_i32 = arith.constant 0 : i32
    %c0_i32_0 = arith.constant 0 : i32
    %c0_i32_1 = arith.constant 0 : i32
    return %c0_i32, %c0_i32_0 : i32, i32
  }
  func.func @transform_5(%arg0: i32) -> (i32, i32) {
    %c0_i32 = arith.constant 0 : i32
    %c0_i32_0 = arith.constant 0 : i32
    %c0_i32_1 = arith.constant 0 : i32
    return %c0_i32, %c0_i32_0 : i32, i32
  }
  func.func @transform_6(%arg0: i32) -> (i32, i32) {
    %c0_i32 = arith.constant 0 : i32
    %c0_i32_0 = arith.constant 0 : i32
    %c0_i32_1 = arith.constant 0 : i32
    return %c0_i32, %c0_i32_0 : i32, i32
  }
  func.func @transform_7(%arg0: i32) -> (i32, i32) {
    %c0_i32 = arith.constant 0 : i32
    %c0_i32_0 = arith.constant 0 : i32
    %c0_i32_1 = arith.constant 0 : i32
    return %c0_i32, %c0_i32_0 : i32, i32
  }
  func.func @transform_8(%arg0: i32) -> (i32, i32) {
    %c0_i32 = arith.constant 0 : i32
    %c0_i32_0 = arith.constant 0 : i32
    %c0_i32_1 = arith.constant 0 : i32
    return %c0_i32, %c0_i32_0 : i32, i32
  }
  func.func @transform_9(%arg0: i32) -> (i32, i32) {
    %c0_i32 = arith.constant 0 : i32
    %c0_i32_0 = arith.constant 0 : i32
    %c0_i32_1 = arith.constant 0 : i32
    return %c0_i32, %c0_i32_0 : i32, i32
  }
  func.func @transform_10(%arg0: i32) -> (i32, i32) {
    %c0_i32 = arith.constant 0 : i32
    %c0_i32_0 = arith.constant 0 : i32
    %c0_i32_1 = arith.constant 0 : i32
    return %c0_i32, %c0_i32_0 : i32, i32
  }
  func.func @transform_11(%arg0: i32) -> (i32, i32) {
    %c0_i32 = arith.constant 0 : i32
    %c0_i32_0 = arith.constant 0 : i32
    %c0_i32_1 = arith.constant 0 : i32
    return %c0_i32, %c0_i32_0 : i32, i32
  }
  func.func @transform_12(%arg0: i32) -> (i32, i32) {
    %c0_i32 = arith.constant 0 : i32
    %c0_i32_0 = arith.constant 0 : i32
    %c0_i32_1 = arith.constant 0 : i32
    return %c0_i32, %c0_i32_0 : i32, i32
  }
  func.func @transform_13(%arg0: i32) -> (i32, i32) {
    %c0_i32 = arith.constant 0 : i32
    %c0_i32_0 = arith.constant 0 : i32
    %c0_i32_1 = arith.constant 0 : i32
    return %c0_i32, %c0_i32_0 : i32, i32
  }
  func.func @transform_14(%arg0: i32) -> (i32, i32) {
    %c0_i32 = arith.constant 0 : i32
    %c0_i32_0 = arith.constant 0 : i32
    %c0_i32_1 = arith.constant 0 : i32
    return %c0_i32, %c0_i32_0 : i32, i32
  }
  func.func @transform_15(%arg0: i32) -> (i32, i32) {
    %c0_i32 = arith.constant 0 : i32
    %c0_i32_0 = arith.constant 0 : i32
    %c0_i32_1 = arith.constant 0 : i32
    return %c0_i32, %c0_i32_0 : i32, i32
  }
  func.func @transform_16(%arg0: i32) -> (i32, i32) {
    %c0_i32 = arith.constant 0 : i32
    %c0_i32_0 = arith.constant 0 : i32
    %c0_i32_1 = arith.constant 0 : i32
    return %c0_i32, %c0_i32_0 : i32, i32
  }
  func.func @transform_17(%arg0: i32) -> (i32, i32) {
    %c0_i32 = arith.constant 0 : i32
    %c0_i32_0 = arith.constant 0 : i32
    %c0_i32_1 = arith.constant 0 : i32
    return %c0_i32, %c0_i32_0 : i32, i32
  }
  func.func @transform_18(%arg0: i32) -> (i32, i32) {
    %c0_i32 = arith.constant 0 : i32
    %c0_i32_0 = arith.constant 0 : i32
    return %arg0, %c0_i32 : i32, i32
  }
  func.func @transform_19(%arg0: i32) -> (i32, i32) {
    %c0_i32 = arith.constant 0 : i32
    %c0_i32_0 = arith.constant 0 : i32
    return %arg0, %c0_i32 : i32, i32
  }
}

</mosaic_0001>

<bundles_post_ra>
// kernel: mirror_forward.1
= control target key start
LH: loop header
LB: loop body
LE: loop exit
PB: predicated region body
PF: predicated region fallthrough
CT: control target
= control target key end

     0   :  { %s21709_s0 = inlined_call_operand.vmem [shape: f32[4096,32], index: 0, kind: input, shape index: {}]   ;;  %s21710_s1 = inlined_call_operand.vmem [shape: f32[8,16,128], index: 1, kind: input, shape index: {}]   ;;  %s21711_s2 = inlined_call_operand.vmem [shape: bf16[32,128], index: 2, kind: input, shape index: {}]   ;;  %s21712_s3 = inlined_call_operand.vmem [shape: f32[256,128], index: 3, kind: input, shape index: {}]   ;;  %s21713_s4 = inlined_call_operand.vmem [shape: bf16[128,2048], index: 4, kind: input, shape index: {}]   ;;  %s21714_s5 = inlined_call_operand.vmem [shape: f32[1,2048], index: 5, kind: input, shape index: {}]   ;;  %s21715_s6 = inlined_call_operand.vmem [shape: bf16[2048,512], index: 6, kind: input, shape index: {}]   ;;  %s21716_s7 = inlined_call_operand.vmem [shape: f32[1,512], index: 7, kind: input, shape index: {}]   ;;  %s21717_s8 = inlined_call_operand.vmem [shape: bf16[512,256], index: 8, kind: input, shape index: {}]   ;;  %s21718_s9 = inlined_call_operand.vmem [shape: bf16[256,384], index: 9, kind: input, shape index: {}]   ;;  %s21719_s10 = inlined_call_operand.vmem [shape: f32[1,256], index: 10, kind: input, shape index: {}]   ;;  %s21720_s11 = inlined_call_operand.vmem [shape: f32[1,128], index: 11, kind: input, shape index: {}]   ;;  %s21721_s12 = inlined_call_operand.vmem [shape: bf16[128,512], index: 12, kind: input, shape index: {}]   ;;  %s21722_s13 = inlined_call_operand.vmem [shape: f32[1,512], index: 13, kind: input, shape index: {}]   ;;  %s21723_s14 = inlined_call_operand.vmem [shape: bf16[512,1024], index: 14, kind: input, shape index: {}]   ;;  %s21724_s15 = inlined_call_operand.vmem [shape: f32[1,1024], index: 15, kind: input, shape index: {}]   ;;  %s21725_s16 = inlined_call_operand.vmem [shape: bf16[128,1024], index: 16, kind: input, shape index: {}]   ;;  %s21726_s17 = inlined_call_operand.vmem [shape: f32[1,1024], index: 17, kind: input, shape index: {}]   ;;  %s21727_s18 = inlined_call_operand.hbm [shape: f32[16,1024], index: 18, kind: output, shape index: {0}]   ;;  %s21728_s19 = inlined_call_operand.hbm [shape: f32[16,1024], index: 19, kind: output, shape index: {1}]  }
   0x1   :  { %21763 = sst [smem:[#allocation29_spill]] %s21709_s0 }
   0x2   :  { %21764 = sst [smem:[#allocation30_spill]] %s21710_s1 }
   0x3   :  { %21765 = sst [smem:[#allocation31_spill]] %s21711_s2 }
   0x4   :  { %21766 = sst [smem:[#allocation32_spill]] %s21712_s3 }
   0x5   :  { %21767 = sst [smem:[#allocation33_spill]] %s21713_s4 }
   0x6   :  { %21768 = sst [smem:[#allocation34_spill]] %s21714_s5 }
   0x7   :  { %21769 = sst [smem:[#allocation35_spill]] %s21725_s16 }
   0x8   :  { %21770 = sst [smem:[#allocation36_spill]] %s21726_s17 }
   0x9   :  { %25 = vsyncpa [#allocation4], 0 }
   0xa   :  { %27 = vsyncpa [#allocation4 + $0x1], 0 }
   0xb   :  { %28 = vsyncpa [#allocation6], 0 }
   0xc   :  { %30 = vsyncpa [#allocation6 + $0x1], 0  ;;  %s16190_s0 = smov 0   ;;  %s16192_s30 = smov 0  }
   0xd   :  { %s16194_s20 = smov 0   ;;  %s16196_s21 = smov 0  }
   0xe LB: > { %21771 = sst [smem:[#allocation9_spill]] %s16080_s20  ;;  %s16211_s1 = sadd.s32 4294967295, %s16084_s21   ;;  %s16084_s21 = sphi %s16196_s21, %s21829_s21   ;;  %s16080_s20 = sphi %s16194_s20, %s21831_s20   ;;  %s16076_s30 = sphi %s16192_s30, %s21833_s30   ;;  %s16072_s0 = sphi %s16190_s0, %s21832_s0  }
   0xf   : > { %21772 = sst [smem:[#allocation10_spill]] %s16084_s21  ;;  %s12925_s22 = sadd.s32 4294967294, %s16084_s21  }
  0x10   : > { %s16215_s2 = sadd.s32 1, %s16084_s21   ;;  %s69_s23 = sadd.s32 1, %s16080_s20 }
  0x11   : > { %21773 = sst [smem:[#allocation11_spill]] %s16215_s2  ;;  %s66_s24 = ssub.s32 %s16084_s21, %s16215_s2 }
  0x12   : > { %p76_p0 = scmp.ne.s32.totalorder %s16080_s20, %s16076_s30  ;;  %p67_p1 = scmp.eq.s32.totalorder %s66_s24, 0 }
  0x13   : > { %p77_p2 = scmp.eq.s32.totalorder %s16084_s21, 0  ;;  %p442_p3 = scmp.eq.s32.totalorder %s16211_s1, 1 }
  0x14   : > { %p447_p4 = scmp.ne.s32.totalorder %s16076_s30, %s16072_s0  ;;  %p448_p7 = scmp.eq.s32.totalorder %s12925_s22, 1 }
  0x15   : > { %s16227_s25 = scalar_select %p67_p1, %s16080_s20, %s69_s23  }
  0x16   : > { %p78_p5 = por %p77_p2, %p76_p0  ;;  %p16229_p6 = por %p442_p3, %p76_p0 }
  0x17   : > { %21774 = sst [smem:[#allocation12_spill]] %s16227_s25  ;;  %p16233_p8 = por %p448_p7, %p447_p4 }
  0x18   : > { %p12927_p9 = scmp.ge.s32.totalorder %s16084_s21, 2 }
  0x19   : > { %s21776_s26 = scalar_select %p16233_p8, 1, 0 }
  0x1a   : > { %538 = sbr.rel (%p12927_p9) target bundleno = 47 (0x2f), region = 80 }
  0x1b   : > { %21777 = sst [smem:[#allocation13_spill]] %s21776_s26 }
  0x21   : > { %550 = sbr.rel (!%p78_p5) target bundleno = 47 (0x2f), region = 88  ;;  %s552_s27 = sand.u32 (%p78_p5), 1, %s16080_s20  }
  0x22   : > { %s12929_s28 = sshll.u32 (%p78_p5), %s16084_s21, 3  ;;  %s12928_s29 = sshll.u32 (%p78_p5), %s552_s27, 6 }
  0x23   : > { %s21778_s25 = sld [smem:[#allocation30_spill]] (%p78_p5)  ;;  %s554_s22 = scalar_lea.vmem (%p78_p5), [#allocation2], %s12928_s29 }
  0x29   : > { %s556_s2 = scalar_lea.vmem %s21778_s25, %s12929_s28 }
  0x2a   : > { %v598_v0 = vld [vmem:[%s556_s2] sm:$0xff]  ;;  %v600_v1 = vld [vmem:[%s556_s2 + $0x10] sm:$0xff] }
  0x2b   : > { %v602_v2 = vld [vmem:[%s556_s2 + $0x20] sm:$0xff]  ;;  %599 = vst [vmem:[%s554_s22] sm:$0xff] %v598_v0  ;;  %601 = vst [vmem:[%s554_s22 + $0x8] sm:$0xff] %v600_v1  ;;  %v604_v3 = vld [vmem:[%s556_s2 + $0x30] sm:$0xff] }
  0x2c   : > { %603 = vst [vmem:[%s554_s22 + $0x10] sm:$0xff] %v602_v2  ;;  %v606_v4 = vld [vmem:[%s556_s2 + $0x40] sm:$0xff]  ;;  %v608_v5 = vld [vmem:[%s556_s2 + $0x50] sm:$0xff]  ;;  %605 = vst [vmem:[%s554_s22 + $0x18] sm:$0xff] %v604_v3 }
  0x2d   : > { %607 = vst [vmem:[%s554_s22 + $0x20] sm:$0xff] %v606_v4  ;;  %609 = vst [vmem:[%s554_s22 + $0x28] sm:$0xff] %v608_v5  ;;  %v610_v6 = vld [vmem:[%s556_s2 + $0x60] sm:$0xff]  ;;  %v612_v7 = vld [vmem:[%s556_s2 + $0x70] sm:$0xff] }
  0x2e   : > { %611 = vst [vmem:[%s554_s22 + $0x30] sm:$0xff] %v610_v6  ;;  %613 = vst [vmem:[%s554_s22 + $0x38] sm:$0xff] %v612_v7 }
  0x2f PF: > { %p12930_p10 = scmp.ge.s32.totalorder %s16084_s21, 1  ;;  %p618_p11 = scmp.lt.s32.totalorder %s16084_s21, 3 }
  0x31   : > { %p619_p12 = pnand %p12930_p10, %p618_p11 }
  0x33   : > { %622 = sbr.rel (%p619_p12) target bundleno = 4955 (0x135b), region = 126 }
  0x3a   : > { %s21779_s28 = sld [smem:[#allocation31_spill]]  ;;  %s12934_s29 = sshll.u32 %s16211_s1, 8  ;;  %vm1097_vm0 = vcmask 261120   ;;  %vm3518_vm1 = vcmask 1041409   ;;  %vm3520_vm2 = vcmask 1042434   ;;  %vm3522_vm3 = vcmask 1043459  }
  0x3b   : > { %p691_p13 = scmp.lt.s32.totalorder %s12934_s29, 511  ;;  %s21780_s21 = sld [smem:[#allocation29_spill]]  ;;  %vm3524_vm4 = vcmask 1044484   ;;  %vm3526_vm5 = vcmask 1045509   ;;  %vm3528_vm6 = vcmask 1046534   ;;  %vm3530_vm7 = vcmask 1047559  }
  0x3c   : > { %s21781_s25 = sld [smem:[#allocation32_spill]]  ;;  %s21782_s16 = sld [smem:[#allocation35_spill]] }
  0x3d   : > { %s21835_s29 = smov (!%p691_p13, %s12934_s29), 511  ;;  %s21783_s4 = sld [smem:[#allocation33_spill]] }
  0x3e   : > { %s12935_s2 = sshll.u32 %s21835_s29, 3  ;;  %s17883_s20 = sand.u32 1, %s16076_s30  }
  0x3f   : > { %s21785_s17 = sld [smem:[#allocation36_spill]]  ;;  %s17909_s27 = sshll.u32 %s17883_s20, 6 }
  0x40   : > { %v14891_v8 = vld [vmem:[%s21779_s28] sm:$0xff]   ;;  %v14892_v9 = vld [vmem:[%s21779_s28 + $0x8] sm:$0xff]   ;;  %s17931_s24 = scalar_lea.vmem [#allocation5], %s17909_s27  ;;  %s21793_s5 = sld [smem:[#allocation34_spill]] }
  0x41   : > { %14495 = vmatprep.subr.bf16.mxu0 %v14891_v8  ;;  %s16257_s26 = scalar_lea.vmem %s21780_s21, %s12935_s2  ;;  %s21614_s23 = scalar_lea.vmem [#allocation3], %s17909_s27 }
  0x42   : > { %14496 = vmatpush3.bf16.msra.mxu0 %v14891_v8  ;;  %v697_v10 = vld [vmem:[%s16257_s26] sm:$0xff]  ;;  %v698_v11 = vld [vmem:[%s16257_s26 + $0x8] sm:$0xff]  ;;  %v699_v12 = vld [vmem:[%s16257_s26 + $0x10] sm:$0xff]  ;;  %s14187_s2 = sshll.u32 %s16211_s1, 10 }
  0x43   : > { %14497 = vmatprep.subr.bf16.mxu0 %v14892_v9  ;;  %v953_v13 = vpack.c.bf16 %v698_v11, %v697_v10  ;;  %v700_v14 = vld [vmem:[%s16257_s26 + $0x18] sm:$0xff]  ;;  %v701_v15 = vld [vmem:[%s16257_s26 + $0x20] sm:$0xff]  ;;  %v702_v16 = vld [vmem:[%s16257_s26 + $0x28] sm:$0xff] }
  0x44   : > { %v954_v17 = vpack.c.bf16 %v700_v14, %v699_v12  ;;  %v955_v18 = vpack.c.bf16 %v702_v16, %v701_v15  ;;  %v703_v19 = vld [vmem:[%s16257_s26 + $0x30] sm:$0xff]  ;;  %v704_v20 = vld [vmem:[%s16257_s26 + $0x38] sm:$0xff]  ;;  %v705_v21 = vld [vmem:[%s16257_s26 + $0x40] sm:$0xff] }
  0x45   : > { %14499 = vmatprep.mubr.msk.bf16.mxu0 %vm1097_vm0, %v953_v13  ;;  %v706_v22 = vld [vmem:[%s16257_s26 + $0x48] sm:$0xff]  ;;  %v956_v23 = vpack.c.bf16 %v704_v20, %v703_v19  ;;  %v707_v25 = vld [vmem:[%s16257_s26 + $0x50] sm:$0xff]  ;;  %v708_v26 = vld [vmem:[%s16257_s26 + $0x58] sm:$0xff] }
  0x46   : > { %14498 = vmatpush3.bf16.msra.mxu0 %v14892_v9  ;;  %v957_v24 = vpack.c.bf16 %v706_v22, %v705_v21  ;;  %v709_v27 = vld [vmem:[%s16257_s26 + $0x60] sm:$0xff]  ;;  %v710_v28 = vld [vmem:[%s16257_s26 + $0x68] sm:$0xff]  ;;  %v958_v29 = vpack.c.bf16 %v708_v26, %v707_v25  ;;  %v711_v31 = vld [vmem:[%s16257_s26 + $0x70] sm:$0xff] }
  0x47   : > { %v959_v30 = vpack.c.bf16 %v710_v28, %v709_v27  ;;  %v712_v32 = vld [vmem:[%s16257_s26 + $0x78] sm:$0xff]  ;;  %v713_v33 = vld [vmem:[%s16257_s26 + $0x80] sm:$0xff]  ;;  %v714_v34 = vld [vmem:[%s16257_s26 + $0x88] sm:$0xff] }
  0x48   : > { %v960_v35 = vpack.c.bf16 %v712_v32, %v711_v31  ;;  %v961_v36 = vpack.c.bf16 %v714_v34, %v713_v33  ;;  %v715_v37 = vld [vmem:[%s16257_s26 + $0x90] sm:$0xff]  ;;  %v716_v38 = vld [vmem:[%s16257_s26 + $0x98] sm:$0xff]  ;;  %v717_v39 = vld [vmem:[%s16257_s26 + $0xa0] sm:$0xff] }
  0x49   : > { %14500 = vmatmul.mubr.msk.bf16.vlgmr.msra.gmra.mrb[0].mxu0 %vm1097_vm0, %v954_v17  ;;  %v718_v40 = vld [vmem:[%s16257_s26 + $0xa8] sm:$0xff]  ;;  %v962_v41 = vpack.c.bf16 %v716_v38, %v715_v37  ;;  %v719_v43 = vld [vmem:[%s16257_s26 + $0xb0] sm:$0xff]  ;;  %v720_v44 = vld [vmem:[%s16257_s26 + $0xb8] sm:$0xff] }
  0x4a   : > { %14503 = vmatprep.mubr.msk.bf16.mxu0 %vm1097_vm0, %v955_v18  ;;  %v963_v42 = vpack.c.bf16 %v718_v40, %v717_v39  ;;  %v721_v45 = vld [vmem:[%s16257_s26 + $0xc0] sm:$0xff]  ;;  %v722_v46 = vld [vmem:[%s16257_s26 + $0xc8] sm:$0xff]  ;;  %v964_v47 = vpack.c.bf16 %v720_v44, %v719_v43  ;;  %v723_v49 = vld [vmem:[%s16257_s26 + $0xd0] sm:$0xff] }
  0x4b   : > { %v965_v48 = vpack.c.bf16 %v722_v46, %v721_v45  ;;  %v724_v50 = vld [vmem:[%s16257_s26 + $0xd8] sm:$0xff]  ;;  %v725_v51 = vld [vmem:[%s16257_s26 + $0xe0] sm:$0xff]  ;;  %v726_v52 = vld [vmem:[%s16257_s26 + $0xe8] sm:$0xff] }
  0x4c   : > { %v966_v53 = vpack.c.bf16 %v724_v50, %v723_v49  ;;  %v967_v54 = vpack.c.bf16 %v726_v52, %v725_v51  ;;  %v727_v55 = vld [vmem:[%s16257_s26 + $0xf0] sm:$0xff]  ;;  %v728_v56 = vld [vmem:[%s16257_s26 + $0xf8] sm:$0xff]  ;;  %v729_v57 = vld [vmem:[%s16257_s26 + $0x100] sm:$0xff] }
  0x4d   : > { %v730_v58 = vld [vmem:[%s16257_s26 + $0x108] sm:$0xff]  ;;  %v968_v59 = vpack.c.bf16 %v728_v56, %v727_v55  ;;  %v731_v61 = vld [vmem:[%s16257_s26 + $0x110] sm:$0xff]  ;;  %v732_v62 = vld [vmem:[%s16257_s26 + $0x118] sm:$0xff] }
  0x4e   : > { %v969_v60 = vpack.c.bf16 %v730_v58, %v729_v57  ;;  %v733_v63 = vld [vmem:[%s16257_s26 + $0x120] sm:$0xff]  ;;  %v734_v0 = vld [vmem:[%s16257_s26 + $0x128] sm:$0xff]  ;;  %v970_v1 = vpack.c.bf16 %v732_v62, %v731_v61  ;;  %v735_v3 = vld [vmem:[%s16257_s26 + $0x130] sm:$0xff] }
  0x4f   : > { %v971_v2 = vpack.c.bf16 %v734_v0, %v733_v63  ;;  %v736_v4 = vld [vmem:[%s16257_s26 + $0x138] sm:$0xff]  ;;  %v737_v5 = vld [vmem:[%s16257_s26 + $0x140] sm:$0xff]  ;;  %v738_v6 = vld [vmem:[%s16257_s26 + $0x148] sm:$0xff] }
  0x50   : > { %v972_v7 = vpack.c.bf16 %v736_v4, %v735_v3  ;;  %v973_v8 = vpack.c.bf16 %v738_v6, %v737_v5  ;;  %v739_v9 = vld [vmem:[%s16257_s26 + $0x150] sm:$0xff]  ;;  %v740_v10 = vld [vmem:[%s16257_s26 + $0x158] sm:$0xff]  ;;  %v741_v11 = vld [vmem:[%s16257_s26 + $0x160] sm:$0xff] }
  0x51   : > { %14504 = vmatmul.mubr.msk.bf16.gmra.mrb[4].mxu0 %vm1097_vm0, %v956_v23  ;;  %v742_v12 = vld [vmem:[%s16257_s26 + $0x168] sm:$0xff]  ;;  %v974_v13 = vpack.c.bf16 %v740_v10, %v739_v9  ;;  %v743_v15 = vld [vmem:[%s16257_s26 + $0x170] sm:$0xff]  ;;  %v744_v16 = vld [vmem:[%s16257_s26 + $0x178] sm:$0xff] }
  0x52   : > { %14507 = vmatprep.mubr.msk.bf16.mxu0 %vm1097_vm0, %v957_v24  ;;  %v975_v14 = vpack.c.bf16 %v742_v12, %v741_v11  ;;  %v745_v17 = vld [vmem:[%s16257_s26 + $0x180] sm:$0xff]  ;;  %v746_v18 = vld [vmem:[%s16257_s26 + $0x188] sm:$0xff]  ;;  %v976_v19 = vpack.c.bf16 %v744_v16, %v743_v15  ;;  %v747_v21 = vld [vmem:[%s16257_s26 + $0x190] sm:$0xff] }
  0x53   : > { %v977_v20 = vpack.c.bf16 %v746_v18, %v745_v17  ;;  %v748_v22 = vld [vmem:[%s16257_s26 + $0x198] sm:$0xff]  ;;  %v749_v23 = vld [vmem:[%s16257_s26 + $0x1a0] sm:$0xff]  ;;  %v750_v24 = vld [vmem:[%s16257_s26 + $0x1a8] sm:$0xff] }
  0x54   : > { %v978_v25 = vpack.c.bf16 %v748_v22, %v747_v21  ;;  %v979_v26 = vpack.c.bf16 %v750_v24, %v749_v23  ;;  %v751_v27 = vld [vmem:[%s16257_s26 + $0x1b0] sm:$0xff]  ;;  %v752_v28 = vld [vmem:[%s16257_s26 + $0x1b8] sm:$0xff] }
  0x55   : > { %v980_v31 = vpack.c.bf16 %v752_v28, %v751_v27  ;;  %v755_v33 = vld [vmem:[%s16257_s26 + $0x1d0] sm:$0xff]  ;;  %v756_v34 = vld [vmem:[%s16257_s26 + $0x1d8] sm:$0xff] }
  0x56   : > { %v982_v37 = vpack.c.bf16 %v756_v34, %v755_v33  ;;  %v759_v39 = vld [vmem:[%s16257_s26 + $0x1f0] sm:$0xff]  ;;  %v760_v40 = vld [vmem:[%s16257_s26 + $0x1f8] sm:$0xff] }
  0x57   : > { %v984_v43 = vpack.c.bf16 %v760_v40, %v759_v39  ;;  %v763_v45 = vld [vmem:[%s16257_s26 + $0x210] sm:$0xff]  ;;  %v764_v46 = vld [vmem:[%s16257_s26 + $0x218] sm:$0xff] }
  0x58   : > { %v986_v49 = vpack.c.bf16 %v764_v46, %v763_v45  ;;  %v767_v51 = vld [vmem:[%s16257_s26 + $0x230] sm:$0xff]  ;;  %v768_v52 = vld [vmem:[%s16257_s26 + $0x238] sm:$0xff] }
  0x59   : > { %14508 = vmatmul.mubr.msk.bf16.gmra.mrb[8].mxu0 %vm1097_vm0, %v958_v29  ;;  %v753_v29 = vld [vmem:[%s16257_s26 + $0x1c0] sm:$0xff]  ;;  %v988_v55 = vpack.c.bf16 %v768_v52, %v767_v51  ;;  %v771_v57 = vld [vmem:[%s16257_s26 + $0x250] sm:$0xff]  ;;  %v772_v58 = vld [vmem:[%s16257_s26 + $0x258] sm:$0xff] }
  0x5a   : > { %14511 = vmatprep.mubr.msk.bf16.mxu0 %vm1097_vm0, %v959_v30  ;;  %v754_v30 = vld [vmem:[%s16257_s26 + $0x1c8] sm:$0xff]  ;;  %v990_v61 = vpack.c.bf16 %v772_v58, %v771_v57  ;;  %v775_v63 = vld [vmem:[%s16257_s26 + $0x270] sm:$0xff]  ;;  %v776_v0 = vld [vmem:[%s16257_s26 + $0x278] sm:$0xff] }
  0x5b   : > { %v981_v32 = vpack.c.bf16 %v754_v30, %v753_v29  ;;  %v992_v3 = vpack.c.bf16 %v776_v0, %v775_v63  ;;  %v779_v5 = vld [vmem:[%s16257_s26 + $0x290] sm:$0xff]  ;;  %v780_v6 = vld [vmem:[%s16257_s26 + $0x298] sm:$0xff]  ;;  %v810_v51 = vld [vmem:[%s16257_s26 + $0x388] sm:$0xff] }
  0x5c   : > { %v994_v9 = vpack.c.bf16 %v780_v6, %v779_v5  ;;  %v783_v11 = vld [vmem:[%s16257_s26 + $0x2b0] sm:$0xff]  ;;  %v784_v12 = vld [vmem:[%s16257_s26 + $0x2b8] sm:$0xff] }
  0x5d   : > { %v996_v15 = vpack.c.bf16 %v784_v12, %v783_v11  ;;  %v787_v17 = vld [vmem:[%s16257_s26 + $0x2d0] sm:$0xff]  ;;  %v788_v18 = vld [vmem:[%s16257_s26 + $0x2d8] sm:$0xff] }
  0x5e   : > { %v998_v21 = vpack.c.bf16 %v788_v18, %v787_v17  ;;  %v791_v23 = vld [vmem:[%s16257_s26 + $0x2f0] sm:$0xff]  ;;  %v792_v24 = vld [vmem:[%s16257_s26 + $0x2f8] sm:$0xff] }
  0x5f   : > { %v1000_v27 = vpack.c.bf16 %v792_v24, %v791_v23  ;;  %v795_v29 = vld [vmem:[%s16257_s26 + $0x310] sm:$0xff]  ;;  %v796_v30 = vld [vmem:[%s16257_s26 + $0x318] sm:$0xff] }
  0x60   : > { %v1002_v33 = vpack.c.bf16 %v796_v30, %v795_v29  ;;  %v16446_v58 = vld [vmem:[%s21781_s25 + $0x18] sm:$0xff]  ;;  %v811_v0 = vld [vmem:[%s16257_s26 + $0x390] sm:$0xff]  ;;  %v817_v29 = vld [vmem:[%s16257_s26 + $0x3c0] sm:$0xff] }
  0x61   : > { %14512 = vmatmul.mubr.msk.bf16.gmra.mrb[12].mxu0 %vm1097_vm0, %v960_v35  ;;  %v757_v35 = vld [vmem:[%s16257_s26 + $0x1e0] sm:$0xff]  ;;  %v16466_v11 = vld [vmem:[%s21781_s25 + $0x30] sm:$0xff]  ;;  %v818_v30 = vld [vmem:[%s16257_s26 + $0x3c8] sm:$0xff] }
  0x62   : > { %14515 = vmatprep.mubr.msk.bf16.mxu0 %vm1097_vm0, %v961_v36  ;;  %v758_v36 = vld [vmem:[%s16257_s26 + $0x1e8] sm:$0xff] }
  0x63   : > { %v983_v38 = vpack.c.bf16 %v758_v36, %v757_v35  ;;  %v799_v35 = vld [vmem:[%s16257_s26 + $0x330] sm:$0xff]  ;;  %v800_v36 = vld [vmem:[%s16257_s26 + $0x338] sm:$0xff] }
  0x64   : > { %v1004_v39 = vpack.c.bf16 %v800_v36, %v799_v35 }
  0x69   : > { %14516 = vmatmul.mubr.msk.bf16.gmra.mrb[16].mxu0 %vm1097_vm0, %v962_v41  ;;  %v761_v41 = vld [vmem:[%s16257_s26 + $0x200] sm:$0xff] }
  0x6a   : > { %14519 = vmatprep.mubr.msk.bf16.mxu0 %vm1097_vm0, %v963_v42  ;;  %v762_v42 = vld [vmem:[%s16257_s26 + $0x208] sm:$0xff] }
  0x6b   : > { %v985_v44 = vpack.c.bf16 %v762_v42, %v761_v41  ;;  %v803_v41 = vld [vmem:[%s16257_s26 + $0x350] sm:$0xff]  ;;  %v804_v42 = vld [vmem:[%s16257_s26 + $0x358] sm:$0xff] }
  0x6c   : > { %v1006_v45 = vpack.c.bf16 %v804_v42, %v803_v41 }
  0x71   : > { %14520 = vmatmul.mubr.msk.bf16.gmra.mrb[20].mxu0 %vm1097_vm0, %v964_v47  ;;  %v765_v47 = vld [vmem:[%s16257_s26 + $0x220] sm:$0xff] }
  0x72   : > { %14523 = vmatprep.mubr.msk.bf16.mxu0 %vm1097_vm0, %v965_v48  ;;  %v766_v48 = vld [vmem:[%s16257_s26 + $0x228] sm:$0xff] }
  0x73   : > { %v987_v50 = vpack.c.bf16 %v766_v48, %v765_v47  ;;  %v807_v47 = vld [vmem:[%s16257_s26 + $0x370] sm:$0xff]  ;;  %v808_v48 = vld [vmem:[%s16257_s26 + $0x378] sm:$0xff] }
  0x79   : > { %14524 = vmatmul.mubr.msk.bf16.gmra.mrb[24].mxu0 %vm1097_vm0, %v966_v53  ;;  %v769_v53 = vld [vmem:[%s16257_s26 + $0x240] sm:$0xff] }
  0x7a   : > { %14527 = vmatprep.mubr.msk.bf16.mxu0 %vm1097_vm0, %v967_v54  ;;  %v770_v54 = vld [vmem:[%s16257_s26 + $0x248] sm:$0xff] }
  0x7b   : > { %v989_v56 = vpack.c.bf16 %v770_v54, %v769_v53  ;;  %v1008_v54 = vpack.c.bf16 %v808_v48, %v807_v47 }
  0x81   : > { %14528 = vmatmul.mubr.msk.bf16.gmra.mrb[28].mxu0 %vm1097_vm0, %v968_v59  ;;  %v773_v59 = vld [vmem:[%s16257_s26 + $0x260] sm:$0xff] }
  0x82   : > { %14531 = vmatprep.mubr.msk.bf16.mxu0 %vm1097_vm0, %v969_v60  ;;  %v774_v60 = vld [vmem:[%s16257_s26 + $0x268] sm:$0xff] }
  0x83   : > { %v991_v62 = vpack.c.bf16 %v774_v60, %v773_v59 }
  0x89   : > { %14532 = vmatmul.mubr.msk.bf16.gmra.mrb[32].mxu0 %vm1097_vm0, %v970_v1  ;;  %v777_v1 = vld [vmem:[%s16257_s26 + $0x280] sm:$0xff] }
  0x8a   : > { %14535 = vmatprep.mubr.msk.bf16.mxu0 %vm1097_vm0, %v971_v2  ;;  %v778_v2 = vld [vmem:[%s16257_s26 + $0x288] sm:$0xff] }
  0x8b   : > { %v993_v4 = vpack.c.bf16 %v778_v2, %v777_v1  ;;  %v812_v1 = vld [vmem:[%s16257_s26 + $0x398] sm:$0xff]  ;;  %v16457_v2 = vld [vmem:[%s21781_s25 + $0x20] sm:$0xff] }
  0x91   : > { %14536 = vmatmul.mubr.msk.bf16.gmra.mrb[36].mxu0 %vm1097_vm0, %v972_v7  ;;  %v781_v7 = vld [vmem:[%s16257_s26 + $0x2a0] sm:$0xff] }
  0x92   : > { %14539 = vmatprep.mubr.msk.bf16.mxu0 %vm1097_vm0, %v973_v8  ;;  %v782_v8 = vld [vmem:[%s16257_s26 + $0x2a8] sm:$0xff] }
  0x93   : > { %v995_v10 = vpack.c.bf16 %v782_v8, %v781_v7 }
  0x99   : > { %14540 = vmatmul.mubr.msk.bf16.gmra.mrb[40].mxu0 %vm1097_vm0, %v974_v13  ;;  %v785_v13 = vld [vmem:[%s16257_s26 + $0x2c0] sm:$0xff] }
  0x9a   : > { %14543 = vmatprep.mubr.msk.bf16.mxu0 %vm1097_vm0, %v975_v14  ;;  %v786_v14 = vld [vmem:[%s16257_s26 + $0x2c8] sm:$0xff] }
  0x9b   : > { %v997_v16 = vpack.c.bf16 %v786_v14, %v785_v13  ;;  %v16471_v13 = vld [vmem:[%s21781_s25 + $0x28] sm:$0xff]  ;;  %v1010_v14 = vpack.c.bf16 %v812_v1, %v811_v0 }
  0xa1   : > { %14544 = vmatmul.mubr.msk.bf16.gmra.mrb[44].mxu0 %vm1097_vm0, %v976_v19  ;;  %v789_v19 = vld [vmem:[%s16257_s26 + $0x2e0] sm:$0xff] }
  0xa2   : > { %14547 = vmatprep.mubr.msk.bf16.mxu0 %vm1097_vm0, %v977_v20  ;;  %v790_v20 = vld [vmem:[%s16257_s26 + $0x2e8] sm:$0xff] }
  0xa3   : > { %v999_v22 = vpack.c.bf16 %v790_v20, %v789_v19  ;;  %v16477_v19 = vld [vmem:[%s21781_s25 + $0x38] sm:$0xff] }
  0xa9   : > { %14548 = vmatmul.mubr.msk.bf16.gmra.mrb[48].mxu0 %vm1097_vm0, %v978_v25  ;;  %v793_v25 = vld [vmem:[%s16257_s26 + $0x300] sm:$0xff] }
  0xaa   : > { %14551 = vmatprep.mubr.msk.bf16.mxu0 %vm1097_vm0, %v979_v26  ;;  %v794_v26 = vld [vmem:[%s16257_s26 + $0x308] sm:$0xff] }
  0xab   : > { %v1001_v28 = vpack.c.bf16 %v794_v26, %v793_v25  ;;  %v815_v26 = vld [vmem:[%s16257_s26 + $0x3b0] sm:$0xff] }
  0xb1   : > { %14552 = vmatmul.mubr.msk.bf16.gmra.mrb[52].mxu0 %vm1097_vm0, %v980_v31  ;;  %v797_v31 = vld [vmem:[%s16257_s26 + $0x320] sm:$0xff] }
  0xb2   : > { %14555 = vmatprep.mubr.msk.bf16.mxu0 %vm1097_vm0, %v981_v32  ;;  %v798_v32 = vld [vmem:[%s16257_s26 + $0x328] sm:$0xff] }
  0xb3   : > { %v1003_v34 = vpack.c.bf16 %v798_v32, %v797_v31 }
  0xb9   : > { %14556 = vmatmul.mubr.msk.bf16.gmra.mrb[56].mxu0 %vm1097_vm0, %v982_v37  ;;  %v801_v37 = vld [vmem:[%s16257_s26 + $0x340] sm:$0xff] }
  0xba   : > { %14559 = vmatprep.mubr.msk.bf16.mxu0 %vm1097_vm0, %v983_v38  ;;  %v802_v38 = vld [vmem:[%s16257_s26 + $0x348] sm:$0xff] }
  0xbb   : > { %v1005_v40 = vpack.c.bf16 %v802_v38, %v801_v37  ;;  %v16496_v37 = vld [vmem:[%s21781_s25 + $0x50] sm:$0xff] }
  0xc1   : > { %14560 = vmatmul.mubr.msk.bf16.gmra.mrb[60].mxu0 %vm1097_vm0, %v984_v43  ;;  %v805_v43 = vld [vmem:[%s16257_s26 + $0x360] sm:$0xff] }
  0xc2   : > { %14563 = vmatprep.mubr.msk.bf16.mxu0 %vm1097_vm0, %v985_v44  ;;  %v806_v44 = vld [vmem:[%s16257_s26 + $0x368] sm:$0xff] }
  0xc3   : > { %v1007_v46 = vpack.c.bf16 %v806_v44, %v805_v43 }
  0xc9   : > { %14564 = vmatmul.mubr.msk.bf16.gmra.mrb[64].mxu0 %vm1097_vm0, %v986_v49  ;;  %v16428_v49 = vld [vmem:[%s21781_s25] sm:$0xff] }
  0xca   : > { %14567 = vmatprep.mubr.msk.bf16.mxu0 %vm1097_vm0, %v987_v50  ;;  %v809_v50 = vld [vmem:[%s16257_s26 + $0x380] sm:$0xff] }
  0xcb   : > { %v1009_v60 = vpack.c.bf16 %v810_v51, %v809_v50 }
  0xd1   : > { %14568 = vmatmul.mubr.msk.bf16.gmra.mrb[68].mxu0 %vm1097_vm0, %v988_v55  ;;  %v16436_v55 = vld [vmem:[%s21781_s25 + $0x8] sm:$0xff] }
  0xd2   : > { %14571 = vmatprep.mubr.msk.bf16.mxu0 %vm1097_vm0, %v989_v56  ;;  %v16441_v56 = vld [vmem:[%s21781_s25 + $0x10] sm:$0xff] }
  0xd9   : > { %14572 = vmatmul.mubr.msk.bf16.gmra.mrb[72].mxu0 %vm1097_vm0, %v990_v61 }
  0xda   : > { %14575 = vmatprep.mubr.msk.bf16.mxu0 %vm1097_vm0, %v991_v62 }
  0xe1   : > { %14576 = vmatmul.mubr.msk.bf16.gmra.mrb[76].mxu0 %vm1097_vm0, %v992_v3  ;;  %v813_v3 = vld [vmem:[%s16257_s26 + $0x3a0] sm:$0xff] }
  0xe2   : > { %14579 = vmatprep.mubr.msk.bf16.mxu0 %vm1097_vm0, %v993_v4  ;;  %v814_v4 = vld [vmem:[%s16257_s26 + $0x3a8] sm:$0xff] }
  0xe3   : > { %v1011_v20 = vpack.c.bf16 %v814_v4, %v813_v3  ;;  %v16526_v4 = vld [vmem:[%s21781_s25 + $0x70] sm:$0xff] }
  0xe9   : > { %14580 = vmatmul.mubr.msk.bf16.gmra.mrb[80].mxu0 %vm1097_vm0, %v994_v9 }
  0xea   : > { %14583 = vmatprep.mubr.msk.bf16.mxu0 %vm1097_vm0, %v995_v10 }
  0xf1   : > { %14584 = vmatmul.mubr.msk.bf16.gmra.mrb[84].mxu0 %vm1097_vm0, %v996_v15 }
  0xf2   : > { %14587 = vmatprep.mubr.msk.bf16.mxu0 %vm1097_vm0, %v997_v16 }
  0xf9   : > { %14588 = vmatmul.mubr.msk.bf16.gmra.mrb[88].mxu0 %vm1097_vm0, %v998_v21 }
  0xfa   : > { %14591 = vmatprep.mubr.msk.bf16.mxu0 %vm1097_vm0, %v999_v22 }
 0x101   : > { %14592 = vmatmul.mubr.msk.bf16.gmra.mrb[92].mxu0 %vm1097_vm0, %v1000_v27  ;;  %v816_v27 = vld [vmem:[%s16257_s26 + $0x3b8] sm:$0xff] }
 0x102   : > { %14595 = vmatprep.mubr.msk.bf16.mxu0 %vm1097_vm0, %v1001_v28  ;;  %v16487_v28 = vld [vmem:[%s21781_s25 + $0x40] sm:$0xff] }
 0x109   : > { %14596 = vmatmul.mubr.msk.bf16.gmra.mrb[96].mxu0 %vm1097_vm0, %v1002_v33 }
 0x10a   : > { %14599 = vmatprep.mubr.msk.bf16.mxu0 %vm1097_vm0, %v1003_v34 }
 0x111   : > { %14600 = vmatmul.mubr.msk.bf16.gmra.mrb[100].mxu0 %vm1097_vm0, %v1004_v39  ;;  %v16501_v39 = vld [vmem:[%s21781_s25 + $0x48] sm:$0xff] }
 0x112   : > { %14603 = vmatprep.mubr.msk.bf16.mxu0 %vm1097_vm0, %v1005_v40  ;;  %v1012_v40 = vpack.c.bf16 %v816_v27, %v815_v26  ;;  %v826_v26 = vld [vmem:[%s16257_s26 + $0x408] sm:$0xff] }
 0x119   : > { %14604 = vmatmul.mubr.msk.bf16.gmra.mrb[104].mxu0 %vm1097_vm0, %v1006_v45  ;;  %v16507_v45 = vld [vmem:[%s21781_s25 + $0x58] sm:$0xff] }
 0x11a   : > { %14607 = vmatprep.mubr.msk.bf16.mxu0 %vm1097_vm0, %v1007_v46  ;;  %v1013_v46 = vpack.c.bf16 %v818_v30, %v817_v29 }
 0x11c   : > { %v14501_v52 = vpop.f32.mrb[0].mxu0 }
 0x11d   : > { %v1516_v53 = vpop.f32.mrb[1].mxu0  ;;  %v2573_v63 = vadd.f32 %v14501_v52, %v16441_v56 }
 0x11e   : > { %v14502_v57 = vpop.f32.mrb[2].mxu0  ;;  %v2571_v59 = vadd.f32 %v16428_v49, %v1516_v53  ;;  %v819_v53 = vld [vmem:[%s16257_s26 + $0x3d0] sm:$0xff] }
 0x11f   : > { %v1519_v61 = vpop.f32.mrb[3].mxu0  ;;  %v2574_v5 = vadd.f32 %v14502_v57, %v16446_v58  ;;  %v2829_v9 = vmax.f32 %v2573_v63, 0.0  ;;  %v16517_v57 = vld [vmem:[%s21781_s25 + $0x60] sm:$0xff] }
 0x120   : > { %v2572_v62 = vadd.f32 %v16436_v55, %v1519_v61  ;;  %v2827_v6 = vmax.f32 %v2571_v59, 0.0  ;;  %v821_v59 = vld [vmem:[%s16257_s26 + $0x3e0] sm:$0xff] }
 0x121   : > { %14608 = vmatmul.mubr.msk.bf16.gmra.mrb[108].mxu0 %vm1097_vm0, %v1008_v54  ;;  %v2830_v16 = vmax.f32 %v2574_v5, 0.0  ;;  %v820_v54 = vld [vmem:[%s16257_s26 + $0x3d8] sm:$0xff] }
 0x122   : > { %v2828_v7 = vmax.f32 %v2572_v62, 0.0  ;;  %14611 = vmatprep.mubr.msk.bf16.mxu0 %vm1097_vm0, %v1009_v60  ;;  %v822_v60 = vld [vmem:[%s16257_s26 + $0x3e8] sm:$0xff] }
 0x124   : > { %v14505_v8 = vpop.f32.mrb[4].mxu0  ;;  %v3083_v10 = vadd.f32 %v2828_v7, %v2827_v6  ;;  %v16531_v6 = vld [vmem:[%s21781_s25 + $0x68] sm:$0xff]  ;;  %v1014_v7 = vpack.c.bf16 %v820_v54, %v819_v53  ;;  %v827_v53 = vld [vmem:[%s16257_s26 + $0x410] sm:$0xff]  ;;  %v828_v54 = vld [vmem:[%s16257_s26 + $0x418] sm:$0xff] }
 0x125   : > { %v1532_v12 = vpop.f32.mrb[5].mxu0  ;;  %v2577_v22 = vadd.f32 %v14505_v8, %v16466_v11 }
 0x126   : > { %v2575_v15 = vadd.f32 %v16457_v2, %v1532_v12  ;;  %v3084_v17 = vadd.f32 %v3083_v10, %v2829_v9  ;;  %v14506_v18 = vpop.f32.mrb[6].mxu0 }
 0x127   : > { %v1535_v21 = vpop.f32.mrb[7].mxu0  ;;  %v2578_v32 = vadd.f32 %v14506_v18, %v16477_v19  ;;  %v2833_v34 = vmax.f32 %v2577_v22, 0.0  ;;  %v823_v22 = vld [vmem:[%s16257_s26 + $0x3f0] sm:$0xff] }
 0x128   : > { %v2831_v23 = vmax.f32 %v2575_v15, 0.0  ;;  %v3085_v24 = vadd.f32 %v3084_v17, %v2830_v16  ;;  %v2576_v25 = vadd.f32 %v16471_v13, %v1535_v21  ;;  %v1015_v15 = vpack.c.bf16 %v822_v60, %v821_v59  ;;  %v16577_v59 = vld [vmem:[%s21781_s25 + $0xa0] sm:$0xff] }
 0x129   : > { %14612 = vmatmul.mubr.msk.bf16.gmra.mrb[112].mxu0 %vm1097_vm0, %v1010_v14  ;;  %v2834_v41 = vmax.f32 %v2578_v32, 0.0  ;;  %v16537_v14 = vld [vmem:[%s21781_s25 + $0x78] sm:$0xff]  ;;  %v829_v60 = vld [vmem:[%s16257_s26 + $0x420] sm:$0xff] }
 0x12a   : > { %v3086_v31 = vadd.f32 %v3085_v24, %v2831_v23  ;;  %v2832_v33 = vmax.f32 %v2576_v25, 0.0  ;;  %14615 = vmatprep.mubr.msk.bf16.mxu0 %vm1097_vm0, %v1011_v20  ;;  %v824_v23 = vld [vmem:[%s16257_s26 + $0x3f8] sm:$0xff]  ;;  %v16547_v24 = vld [vmem:[%s21781_s25 + $0x80] sm:$0xff] }
 0x12b   : > { %v825_v25 = vld [vmem:[%s16257_s26 + $0x400] sm:$0xff] }
 0x12c   : > { %v3087_v35 = vadd.f32 %v3086_v31, %v2832_v33  ;;  %v14509_v36 = vpop.f32.mrb[8].mxu0 }
 0x12d   : > { %v1548_v38 = vpop.f32.mrb[9].mxu0  ;;  %v2581_v48 = vadd.f32 %v14509_v36, %v16496_v37  ;;  %v16561_v36 = vld [vmem:[%s21781_s25 + $0x88] sm:$0xff] }
 0x12e   : > { %v3088_v42 = vadd.f32 %v3087_v35, %v2833_v34  ;;  %v2579_v43 = vadd.f32 %v16487_v28, %v1548_v38  ;;  %v14510_v44 = vpop.f32.mrb[10].mxu0  ;;  %v16556_v34 = vld [vmem:[%s21781_s25 + $0x90] sm:$0xff]  ;;  %v1016_v38 = vpack.c.bf16 %v824_v23, %v823_v22 }
 0x12f   : > { %v1551_v47 = vpop.f32.mrb[11].mxu0  ;;  %v2582_v62 = vadd.f32 %v14510_v44, %v16507_v45  ;;  %v2837_v0 = vmax.f32 %v2581_v48, 0.0  ;;  %v16567_v44 = vld [vmem:[%s21781_s25 + $0x98] sm:$0xff] }
 0x130   : > { %v2835_v50 = vmax.f32 %v2579_v43, 0.0  ;;  %v3089_v51 = vadd.f32 %v3088_v42, %v2834_v41  ;;  %v2580_v52 = vadd.f32 %v16501_v39, %v1551_v47 }
 0x131   : > { %14616 = vmatmul.mubr.msk.bf16.gmra.mrb[116].mxu0 %vm1097_vm0, %v1012_v40  ;;  %v2838_v8 = vmax.f32 %v2582_v62, 0.0 }
 0x132   : > { %v3090_v61 = vadd.f32 %v3089_v51, %v2835_v50  ;;  %v2836_v63 = vmax.f32 %v2580_v52, 0.0  ;;  %14619 = vmatprep.mubr.msk.bf16.mxu0 %vm1097_vm0, %v1013_v46  ;;  %v1017_v46 = vpack.c.bf16 %v826_v26, %v825_v25 }
 0x134   : > { %v3091_v1 = vadd.f32 %v3090_v61, %v2836_v63  ;;  %v14513_v3 = vpop.f32.mrb[12].mxu0  ;;  %v830_v61 = vld [vmem:[%s16257_s26 + $0x428] sm:$0xff] }
 0x135   : > { %v1564_v5 = vpop.f32.mrb[13].mxu0  ;;  %v2585_v17 = vadd.f32 %v14513_v3, %v16526_v4 }
 0x136   : > { %v3092_v9 = vadd.f32 %v3091_v1, %v2837_v0  ;;  %v2583_v10 = vadd.f32 %v16517_v57, %v1564_v5  ;;  %v14514_v12 = vpop.f32.mrb[14].mxu0 }
 0x137   : > { %v1567_v16 = vpop.f32.mrb[15].mxu0  ;;  %v2586_v29 = vadd.f32 %v14514_v12, %v16537_v14  ;;  %v2841_v31 = vmax.f32 %v2585_v17, 0.0 }
 0x138   : > { %v2839_v18 = vmax.f32 %v2583_v10, 0.0  ;;  %v3093_v20 = vadd.f32 %v3092_v9, %v2838_v8  ;;  %v2584_v21 = vadd.f32 %v16531_v6, %v1567_v16  ;;  %v16591_v9 = vld [vmem:[%s21781_s25 + $0xa8] sm:$0xff]  ;;  %v1018_v10 = vpack.c.bf16 %v828_v54, %v827_v53  ;;  %v16627_v54 = vld [vmem:[%s21781_s25 + $0xd8] sm:$0xff] }
 0x139   : > { %14620 = vmatmul.mubr.msk.bf16.gmra.mrb[120].mxu0 %vm1097_vm0, %v1014_v7  ;;  %v2842_v40 = vmax.f32 %v2586_v29, 0.0  ;;  %v16586_v7 = vld [vmem:[%s21781_s25 + $0xb0] sm:$0xff]  ;;  %v832_v29 = vld [vmem:[%s16257_s26 + $0x438] sm:$0xff] }
 0x13a   : > { %v3094_v27 = vadd.f32 %v3093_v20, %v2839_v18  ;;  %v2840_v30 = vmax.f32 %v2584_v21, 0.0  ;;  %14623 = vmatprep.mubr.msk.bf16.mxu0 %vm1097_vm0, %v1015_v15  ;;  %v16597_v18 = vld [vmem:[%s21781_s25 + $0xb8] sm:$0xff]  ;;  %v1019_v20 = vpack.c.bf16 %v830_v61, %v829_v60 }
 0x13c   : > { %v3095_v32 = vadd.f32 %v3094_v27, %v2840_v30  ;;  %v14517_v33 = vpop.f32.mrb[16].mxu0  ;;  %v831_v27 = vld [vmem:[%s16257_s26 + $0x430] sm:$0xff]  ;;  %v16607_v30 = vld [vmem:[%s21781_s25 + $0xc0] sm:$0xff] }
 0x13d   : > { %v1580_v35 = vpop.f32.mrb[17].mxu0  ;;  %v2589_v48 = vadd.f32 %v14517_v33, %v16556_v34 }
 0x13e   : > { %v3096_v41 = vadd.f32 %v3095_v32, %v2841_v31  ;;  %v2587_v42 = vadd.f32 %v16547_v24, %v1580_v35  ;;  %v14518_v43 = vpop.f32.mrb[18].mxu0  ;;  %v833_v31 = vld [vmem:[%s16257_s26 + $0x440] sm:$0xff]  ;;  %v834_v32 = vld [vmem:[%s16257_s26 + $0x448] sm:$0xff] }
 0x13f   : > { %v1583_v47 = vpop.f32.mrb[19].mxu0  ;;  %v2590_v63 = vadd.f32 %v14518_v43, %v16567_v44  ;;  %v2845_v1 = vmax.f32 %v2589_v48, 0.0  ;;  %v1020_v48 = vpack.c.bf16 %v832_v29, %v831_v27  ;;  %v1021_v60 = vpack.c.bf16 %v834_v32, %v833_v31 }
 0x140   : > { %v2843_v50 = vmax.f32 %v2587_v42, 0.0  ;;  %v3097_v51 = vadd.f32 %v3096_v41, %v2842_v40  ;;  %v2588_v52 = vadd.f32 %v16561_v36, %v1583_v47  ;;  %v16615_v40 = vld [vmem:[%s21781_s25 + $0xd0] sm:$0xff]  ;;  %v16621_v47 = vld [vmem:[%s21781_s25 + $0xc8] sm:$0xff] }
 0x141   : > { %14624 = vmatmul.mubr.msk.bf16.gmra.mrb[124].mxu0 %vm1097_vm0, %v1016_v38  ;;  %v2846_v12 = vmax.f32 %v2590_v63, 0.0 }
 0x142   : > { %v3098_v62 = vadd.f32 %v3097_v51, %v2843_v50  ;;  %v2844_v0 = vmax.f32 %v2588_v52, 0.0  ;;  %14627 = vmatprep.mubr.msk.bf16.mxu0 %vm1097_vm0, %v1017_v46 }
 0x144   : > { %v3099_v3 = vadd.f32 %v3098_v62, %v2844_v0  ;;  %v14521_v5 = vpop.f32.mrb[20].mxu0 }
 0x145   : > { %v1596_v8 = vpop.f32.mrb[21].mxu0  ;;  %v2593_v22 = vadd.f32 %v14521_v5, %v16586_v7  ;;  %v836_v5 = vld [vmem:[%s16257_s26 + $0x458] sm:$0xff] }
 0x146   : > { %v3100_v15 = vadd.f32 %v3099_v3, %v2845_v1  ;;  %v2591_v16 = vadd.f32 %v16577_v59, %v1596_v8  ;;  %v14522_v17 = vpop.f32.mrb[22].mxu0  ;;  %v835_v3 = vld [vmem:[%s16257_s26 + $0x450] sm:$0xff]  ;;  %v16637_v8 = vld [vmem:[%s21781_s25 + $0xe0] sm:$0xff] }
 0x147   : > { %v1599_v21 = vpop.f32.mrb[23].mxu0  ;;  %v2594_v35 = vadd.f32 %v14522_v17, %v16597_v18  ;;  %v2849_v41 = vmax.f32 %v2593_v22, 0.0  ;;  %v1022_v27 = vpack.c.bf16 %v836_v5, %v835_v3 }
 0x148   : > { %v2847_v23 = vmax.f32 %v2591_v16, 0.0  ;;  %v3101_v25 = vadd.f32 %v3100_v15, %v2846_v12  ;;  %v2592_v26 = vadd.f32 %v16591_v9, %v1599_v21  ;;  %v838_v12 = vld [vmem:[%s16257_s26 + $0x468] sm:$0xff] }
 0x149   : > { %14628 = vmatmul.mubr.msk.bf16.gmra.mrb[128].mxu0 %vm1097_vm0, %v1018_v10  ;;  %v2850_v50 = vmax.f32 %v2594_v35, 0.0  ;;  %v837_v10 = vld [vmem:[%s16257_s26 + $0x460] sm:$0xff] }
 0x14a   : > { %v3102_v33 = vadd.f32 %v3101_v25, %v2847_v23  ;;  %v2848_v38 = vmax.f32 %v2592_v26, 0.0  ;;  %14631 = vmatprep.mubr.msk.bf16.mxu0 %vm1097_vm0, %v1019_v20  ;;  %v16646_v23 = vld [vmem:[%s21781_s25 + $0xf0] sm:$0xff]  ;;  %v16651_v26 = vld [vmem:[%s21781_s25 + $0xe8] sm:$0xff]  ;;  %v1023_v35 = vpack.c.bf16 %v838_v12, %v837_v10 }
 0x14c   : > { %v3103_v42 = vadd.f32 %v3102_v33, %v2848_v38  ;;  %v14525_v43 = vpop.f32.mrb[24].mxu0  ;;  %v16657_v38 = vld [vmem:[%s21781_s25 + $0xf8] sm:$0xff] }
 0x14d   : > { %v1612_v46 = vpop.f32.mrb[25].mxu0  ;;  %v2597_v61 = vadd.f32 %v14525_v43, %v16615_v40 }
 0x14e   : > { %v3104_v51 = vadd.f32 %v3103_v42, %v2849_v41  ;;  %v2595_v52 = vadd.f32 %v16607_v30, %v1612_v46  ;;  %v14526_v53 = vpop.f32.mrb[26].mxu0 }
 0x14f   : > { %v1615_v62 = vpop.f32.mrb[27].mxu0  ;;  %v2598_v16 = vadd.f32 %v14526_v53, %v16627_v54  ;;  %v2853_v20 = vmax.f32 %v2597_v61, 0.0  ;;  %v842_v53 = vld [vmem:[%s16257_s26 + $0x488] sm:$0xff] }
 0x150   : > { %v2851_v63 = vmax.f32 %v2595_v52, 0.0  ;;  %v3105_v0 = vadd.f32 %v3104_v51, %v2850_v50  ;;  %v2596_v1 = vadd.f32 %v16621_v47, %v1615_v62  ;;  %v839_v50 = vld [vmem:[%s16257_s26 + $0x470] sm:$0xff]  ;;  %v840_v51 = vld [vmem:[%s16257_s26 + $0x478] sm:$0xff]  ;;  %v841_v52 = vld [vmem:[%s16257_s26 + $0x480] sm:$0xff] }
 0x151   : > { %14632 = vmatmul.mubr.msk.bf16.gmra.mrb[132].mxu0 %vm1097_vm0, %v1020_v48  ;;  %v2854_v29 = vmax.f32 %v2598_v16, 0.0  ;;  %v1024_v10 = vpack.c.bf16 %v840_v51, %v839_v50 }
 0x152   : > { %v3106_v15 = vadd.f32 %v3105_v0, %v2851_v63  ;;  %v2852_v17 = vmax.f32 %v2596_v1, 0.0  ;;  %14635 = vmatprep.mubr.msk.bf16.mxu0 %vm1097_vm0, %v1021_v60 }
 0x154   : > { %v3107_v21 = vadd.f32 %v3106_v15, %v2852_v17  ;;  %v14529_v22 = vpop.f32.mrb[28].mxu0 }
 0x155   : > { %v1628_v25 = vpop.f32.mrb[29].mxu0  ;;  %v2601_v42 = vadd.f32 %v14529_v22, %v16646_v23 }
 0x156   : > { %v3108_v31 = vadd.f32 %v3107_v21, %v2853_v20  ;;  %v2599_v32 = vadd.f32 %v16637_v8, %v1628_v25  ;;  %v14530_v33 = vpop.f32.mrb[30].mxu0  ;;  %v1025_v20 = vpack.c.bf16 %v842_v53, %v841_v52 }
 0x157   : > { %v1631_v41 = vpop.f32.mrb[31].mxu0  ;;  %v2602_v61 = vadd.f32 %v14530_v33, %v16657_v38  ;;  %v2857_v63 = vmax.f32 %v2601_v42, 0.0 }
 0x158   : > { %v2855_v43 = vmax.f32 %v2599_v32, 0.0  ;;  %v3109_v46 = vadd.f32 %v3108_v31, %v2854_v29  ;;  %v2600_v48 = vadd.f32 %v16651_v26, %v1631_v41  ;;  %v844_v29 = vld [vmem:[%s16257_s26 + $0x498] sm:$0xff]  ;;  %v846_v32 = vld [vmem:[%s16257_s26 + $0x4a8] sm:$0xff] }
 0x159   : > { %14636 = vmatmul.mubr.msk.bf16.gmra.mrb[136].mxu0 %vm1097_vm0, %v1022_v27  ;;  %v2858_v12 = vmax.f32 %v2602_v61, 0.0  ;;  %v843_v27 = vld [vmem:[%s16257_s26 + $0x490] sm:$0xff] }
 0x15a   : > { %v3110_v60 = vadd.f32 %v3109_v46, %v2855_v43  ;;  %v2856_v62 = vmax.f32 %v2600_v48, 0.0  ;;  %14639 = vmatprep.mubr.msk.bf16.mxu0 %vm1097_vm0, %v1023_v35 }
 0x15c   : > { %v3111_v0 = vadd.f32 %v3110_v60, %v2856_v62  ;;  %v14533_v1 = vpop.f32.mrb[32].mxu0 }
 0x15d   : > { %v2605_v3 = vadd.f32 %v14533_v1, %v16441_v56  ;;  %v1644_v5 = vpop.f32.mrb[33].mxu0  ;;  %v845_v56 = vld [vmem:[%s16257_s26 + $0x4a0] sm:$0xff] }
 0x15e   : > { %v3112_v15 = vadd.f32 %v3111_v0, %v2857_v63  ;;  %v2603_v16 = vadd.f32 %v16428_v49, %v1644_v5  ;;  %v14534_v17 = vpop.f32.mrb[34].mxu0  ;;  %v1027_v52 = vpack.c.bf16 %v846_v32, %v845_v56  ;;  %v847_v63 = vld [vmem:[%s16257_s26 + $0x4b0] sm:$0xff]  ;;  %v848_v0 = vld [vmem:[%s16257_s26 + $0x4b8] sm:$0xff]  ;;  %v849_v1 = vld [vmem:[%s16257_s26 + $0x4c0] sm:$0xff] }
 0x15f   : > { %v1647_v21 = vpop.f32.mrb[35].mxu0  ;;  %v2861_v31 = vmax.f32 %v2605_v3, 0.0  ;;  %v2606_v35 = vadd.f32 %v14534_v17, %v16446_v58  ;;  %v850_v3 = vld [vmem:[%s16257_s26 + $0x4c8] sm:$0xff]  ;;  %v1028_v17 = vpack.c.bf16 %v848_v0, %v847_v63 }
 0x160   : > { %v16670_v22 = vadd.f32 %v3112_v15, %v2858_v12  ;;  %v2604_v25 = vadd.f32 %v16436_v55, %v1647_v21  ;;  %v2859_v33 = vmax.f32 %v2603_v16, 0.0  ;;  %v1026_v55 = vpack.c.bf16 %v844_v29, %v843_v27 }
 0x161   : > { %14640 = vmatmul.mubr.msk.bf16.gmra.mrb[140].mxu0 %vm1097_vm0, %v1024_v10  ;;  %v2862_v46 = vmax.f32 %v2606_v35, 0.0  ;;  %v1029_v27 = vpack.c.bf16 %v850_v3, %v849_v1  ;;  %v852_v35 = vld [vmem:[%s16257_s26 + $0x4d8] sm:$0xff] }
 0x162   : > { %v2860_v41 = vmax.f32 %v2604_v25, 0.0  ;;  %14643 = vmatprep.mubr.msk.bf16.mxu0 %vm1097_vm0, %v1025_v20 }
 0x164   : > { %v3120_v49 = vadd.f32 %v2860_v41, %v2859_v33  ;;  %v14537_v42 = vpop.f32.mrb[36].mxu0  ;;  %v851_v33 = vld [vmem:[%s16257_s26 + $0x4d0] sm:$0xff] }
 0x165   : > { %v1660_v43 = vpop.f32.mrb[37].mxu0  ;;  %v2609_v58 = vadd.f32 %v14537_v42, %v16466_v11 }
 0x166   : > { %v3121_v48 = vadd.f32 %v3120_v49, %v2861_v31  ;;  %v2607_v50 = vadd.f32 %v16457_v2, %v1660_v43  ;;  %v14538_v51 = vpop.f32.mrb[38].mxu0  ;;  %v854_v43 = vld [vmem:[%s16257_s26 + $0x4e8] sm:$0xff] }
 0x167   : > { %v1663_v53 = vpop.f32.mrb[39].mxu0  ;;  %v2610_v10 = vadd.f32 %v14538_v51, %v16477_v19  ;;  %v2865_v2 = vmax.f32 %v2609_v58, 0.0 }
 0x168   : > { %v2863_v60 = vmax.f32 %v2607_v50, 0.0  ;;  %v3122_v61 = vadd.f32 %v3121_v48, %v2862_v46  ;;  %v2608_v62 = vadd.f32 %v16471_v13, %v1663_v53 }
 0x169   : > { %14644 = vmatmul.mubr.msk.bf16.gmra.mrb[144].mxu0 %vm1097_vm0, %v1026_v55  ;;  %v2866_v13 = vmax.f32 %v2610_v10, 0.0  ;;  %v857_v10 = vld [vmem:[%s16257_s26 + $0x500] sm:$0xff] }
 0x16a   : > { %v3123_v5 = vadd.f32 %v3122_v61, %v2863_v60  ;;  %v2864_v12 = vmax.f32 %v2608_v62, 0.0  ;;  %14647 = vmatprep.mubr.msk.bf16.mxu0 %vm1097_vm0, %v1027_v52 }
 0x16c   : > { %v3124_v11 = vadd.f32 %v3123_v5, %v2864_v12  ;;  %v14541_v15 = vpop.f32.mrb[40].mxu0  ;;  %v855_v5 = vld [vmem:[%s16257_s26 + $0x4f0] sm:$0xff]  ;;  %v858_v12 = vld [vmem:[%s16257_s26 + $0x508] sm:$0xff] }
 0x16d   : > { %v1676_v16 = vpop.f32.mrb[41].mxu0  ;;  %v2613_v31 = vadd.f32 %v14541_v15, %v16496_v37  ;;  %v1030_v37 = vpack.c.bf16 %v852_v35, %v851_v33  ;;  %v860_v33 = vld [vmem:[%s16257_s26 + $0x518] sm:$0xff]  ;;  %v861_v35 = vld [vmem:[%s16257_s26 + $0x520] sm:$0xff] }
 0x16e   : > { %v3125_v20 = vadd.f32 %v3124_v11, %v2865_v2  ;;  %v2611_v21 = vadd.f32 %v16487_v28, %v1676_v16  ;;  %v14542_v25 = vpop.f32.mrb[42].mxu0  ;;  %v853_v28 = vld [vmem:[%s16257_s26 + $0x4e0] sm:$0xff] }
 0x16f   : > { %v1679_v29 = vpop.f32.mrb[43].mxu0  ;;  %v2614_v49 = vadd.f32 %v14542_v25, %v16507_v45  ;;  %v2869_v55 = vmax.f32 %v2613_v31, 0.0  ;;  %v1031_v45 = vpack.c.bf16 %v854_v43, %v853_v28 }
 0x170   : > { %v3126_v19 = vadd.f32 %v3125_v20, %v2866_v13  ;;  %v2867_v56 = vmax.f32 %v2611_v21, 0.0  ;;  %v2612_v32 = vadd.f32 %v16501_v39, %v1679_v29  ;;  %v1033_v20 = vpack.c.bf16 %v858_v12, %v857_v10 }
 0x171   : > { %14648 = vmatmul.mubr.msk.bf16.gmra.mrb[148].mxu0 %vm1097_vm0, %v1028_v17  ;;  %v2870_v51 = vmax.f32 %v2614_v49, 0.0 }
 0x172   : > { %v3127_v41 = vadd.f32 %v3126_v19, %v2867_v56  ;;  %v2868_v42 = vmax.f32 %v2612_v32, 0.0  ;;  %14651 = vmatprep.mubr.msk.bf16.mxu0 %vm1097_vm0, %v1029_v27 }
 0x174   : > { %v3128_v46 = vadd.f32 %v3127_v41, %v2868_v42  ;;  %v14545_v48 = vpop.f32.mrb[44].mxu0  ;;  %v862_v41 = vld [vmem:[%s16257_s26 + $0x528] sm:$0xff] }
 0x175   : > { %v1692_v50 = vpop.f32.mrb[45].mxu0  ;;  %v2617_v60 = vadd.f32 %v14545_v48, %v16526_v4  ;;  %v1035_v48 = vpack.c.bf16 %v862_v41, %v861_v35 }
 0x176   : > { %v3129_v39 = vadd.f32 %v3128_v46, %v2869_v55  ;;  %v2615_v52 = vadd.f32 %v16517_v57, %v1692_v50  ;;  %v14546_v53 = vpop.f32.mrb[46].mxu0  ;;  %v856_v57 = vld [vmem:[%s16257_s26 + $0x4f8] sm:$0xff] }
 0x177   : > { %v1695_v58 = vpop.f32.mrb[47].mxu0  ;;  %v2618_v1 = vadd.f32 %v14546_v53, %v16537_v14  ;;  %v2873_v2 = vmax.f32 %v2617_v60, 0.0  ;;  %v1032_v16 = vpack.c.bf16 %v856_v57, %v855_v5  ;;  %v863_v60 = vld [vmem:[%s16257_s26 + $0x530] sm:$0xff] }
 0x178   : > { %v2871_v61 = vmax.f32 %v2615_v52, 0.0  ;;  %v3130_v62 = vadd.f32 %v3129_v39, %v2870_v51  ;;  %v2616_v63 = vadd.f32 %v16531_v6, %v1695_v58 }
 0x179   : > { %14652 = vmatmul.mubr.msk.bf16.gmra.mrb[152].mxu0 %vm1097_vm0, %v1030_v37  ;;  %v2874_v17 = vmax.f32 %v2618_v1, 0.0 }
 0x17a   : > { %v3131_v0 = vadd.f32 %v3130_v62, %v2871_v61  ;;  %v2872_v3 = vmax.f32 %v2616_v63, 0.0  ;;  %14655 = vmatprep.mubr.msk.bf16.mxu0 %vm1097_vm0, %v1031_v45  ;;  %v865_v61 = vld [vmem:[%s16257_s26 + $0x540] sm:$0xff]  ;;  %v866_v62 = vld [vmem:[%s16257_s26 + $0x548] sm:$0xff] }
 0x17b   : > { %v1037_v10 = vpack.c.bf16 %v866_v62, %v865_v61 }
 0x17c   : > { %v3132_v11 = vadd.f32 %v3131_v0, %v2872_v3  ;;  %v14549_v15 = vpop.f32.mrb[48].mxu0 }
 0x17d   : > { %v1708_v4 = vpop.f32.mrb[49].mxu0  ;;  %v2621_v25 = vadd.f32 %v14549_v15, %v16556_v34 }
 0x17e   : > { %v2619_v6 = vadd.f32 %v16547_v24, %v1708_v4  ;;  %v3133_v13 = vadd.f32 %v3132_v11, %v2873_v2  ;;  %v14550_v14 = vpop.f32.mrb[50].mxu0  ;;  %v859_v24 = vld [vmem:[%s16257_s26 + $0x510] sm:$0xff] }
 0x17f   : > { %v1711_v21 = vpop.f32.mrb[51].mxu0  ;;  %v2622_v56 = vadd.f32 %v14550_v14, %v16567_v44  ;;  %v2877_v49 = vmax.f32 %v2621_v25, 0.0  ;;  %v1034_v43 = vpack.c.bf16 %v860_v33, %v859_v24  ;;  %v868_v14 = vld [vmem:[%s16257_s26 + $0x558] sm:$0xff] }
 0x180   : > { %v2875_v27 = vmax.f32 %v2619_v6, 0.0  ;;  %v3134_v29 = vadd.f32 %v3133_v13, %v2874_v17  ;;  %v2620_v19 = vadd.f32 %v16561_v36, %v1711_v21  ;;  %v870_v21 = vld [vmem:[%s16257_s26 + $0x568] sm:$0xff] }
 0x181   : > { %14656 = vmatmul.mubr.msk.bf16.gmra.mrb[156].mxu0 %vm1097_vm0, %v1032_v16  ;;  %v2878_v55 = vmax.f32 %v2622_v56, 0.0  ;;  %v3114_v16 = vrot.slane %v16670_v22, 4 }
 0x182   : > { %v3135_v31 = vadd.f32 %v3134_v29, %v2875_v27  ;;  %v2876_v32 = vmax.f32 %v2620_v19, 0.0  ;;  %14659 = vmatprep.mubr.msk.bf16.mxu0 %vm1097_vm0, %v1033_v20  ;;  %v869_v20 = vld [vmem:[%s16257_s26 + $0x560] sm:$0xff] }
 0x183   : > { %v3115_v29 = vadd.f32 %v3114_v16, %v16670_v22  ;;  %v1039_v35 = vpack.c.bf16 %v870_v21, %v869_v20  ;;  %v877_v16 = vld [vmem:[%s16257_s26 + $0x5a0] sm:$0xff] }
 0x184   : > { %v3136_v42 = vadd.f32 %v3135_v31, %v2876_v32  ;;  %v14553_v28 = vpop.f32.mrb[52].mxu0 }
 0x185   : > { %v1724_v34 = vpop.f32.mrb[53].mxu0  ;;  %v2625_v37 = vadd.f32 %v14553_v28, %v16586_v7  ;;  %v3116_v22 = vrot.slane %v3115_v29, 2 }
 0x186   : > { %v3137_v36 = vadd.f32 %v3136_v42, %v2877_v49  ;;  %v2623_v46 = vadd.f32 %v16577_v59, %v1724_v34  ;;  %v14554_v44 = vpop.f32.mrb[54].mxu0  ;;  %v864_v59 = vld [vmem:[%s16257_s26 + $0x538] sm:$0xff] }
 0x187   : > { %v1727_v50 = vpop.f32.mrb[55].mxu0  ;;  %v2626_v45 = vadd.f32 %v14554_v44, %v16597_v18  ;;  %v2881_v63 = vmax.f32 %v2625_v37, 0.0  ;;  %v1036_v3 = vpack.c.bf16 %v864_v59, %v863_v60  ;;  %v872_v44 = vld [vmem:[%s16257_s26 + $0x578] sm:$0xff]  ;;  %v16755_v59 = vld [vmem:[%s21781_s25] sm:$0xff] }
 0x188   : > { %v2879_v51 = vmax.f32 %v2623_v46, 0.0  ;;  %v3138_v39 = vadd.f32 %v3137_v36, %v2878_v55  ;;  %v2624_v52 = vadd.f32 %v16591_v9, %v1727_v50  ;;  %v871_v46 = vld [vmem:[%s16257_s26 + $0x570] sm:$0xff]  ;;  %v874_v50 = vld [vmem:[%s16257_s26 + $0x588] sm:$0xff] }
 0x189   : > { %14660 = vmatmul.mubr.msk.bf16.gmra.mrb[160].mxu0 %vm1097_vm0, %v1034_v43  ;;  %v2882_v5 = vmax.f32 %v2626_v45, 0.0  ;;  %v1040_v45 = vpack.c.bf16 %v872_v44, %v871_v46  ;;  %v16805_v46 = vld [vmem:[%s21781_s25 + $0x38] sm:$0xff] }
 0x18a   : > { %v3139_v53 = vadd.f32 %v3138_v39, %v2879_v51  ;;  %v2880_v58 = vmax.f32 %v2624_v52, 0.0  ;;  %14663 = vmatprep.mubr.msk.bf16.mxu0 %vm1097_vm0, %v1035_v48  ;;  %v873_v48 = vld [vmem:[%s16257_s26 + $0x580] sm:$0xff]  ;;  %v3117_v52 = vadd.f32 %v3116_v22, %v3115_v29 }
 0x18c   : > { %v3140_v0 = vadd.f32 %v3139_v53, %v2880_v58  ;;  %v14557_v1 = vpop.f32.mrb[56].mxu0 }
 0x18d   : > { %v1740_v7 = vpop.f32.mrb[57].mxu0  ;;  %v2629_v2 = vadd.f32 %v14557_v1, %v16615_v40 }
 0x18e   : > { %v3141_v9 = vadd.f32 %v3140_v0, %v2881_v63  ;;  %v2627_v57 = vadd.f32 %v16607_v30, %v1740_v7  ;;  %v14558_v18 = vpop.f32.mrb[58].mxu0  ;;  %v867_v30 = vld [vmem:[%s16257_s26 + $0x550] sm:$0xff]  ;;  %v1041_v63 = vpack.c.bf16 %v874_v50, %v873_v48  ;;  %v880_v50 = vld [vmem:[%s16257_s26 + $0x5b8] sm:$0xff] }
 0x18f   : > { %v1743_v12 = vpop.f32.mrb[59].mxu0  ;;  %v2630_v6 = vadd.f32 %v14558_v18, %v16627_v54  ;;  %v2885_v25 = vmax.f32 %v2629_v2, 0.0  ;;  %v1038_v31 = vpack.c.bf16 %v868_v14, %v867_v30  ;;  %v16761_v7 = vld [vmem:[%s21781_s25 + $0x10] sm:$0xff]  ;;  %v16775_v2 = vld [vmem:[%s21781_s25 + $0x18] sm:$0xff] }
 0x190   : > { %v2883_v11 = vmax.f32 %v2627_v57, 0.0  ;;  %v3142_v15 = vadd.f32 %v3141_v9, %v2882_v5  ;;  %v2628_v4 = vadd.f32 %v16621_v47, %v1743_v12  ;;  %v16767_v5 = vld [vmem:[%s21781_s25 + $0x8] sm:$0xff]  ;;  %v3118_v57 = vrot.slane %v3117_v52, 1  ;;  %v875_v18 = vld [vmem:[%s16257_s26 + $0x590] sm:$0xff] }
 0x191   : > { %14664 = vmatmul.mubr.msk.bf16.gmra.mrb[164].mxu0 %vm1097_vm0, %v1036_v3  ;;  %v2886_v56 = vmax.f32 %v2630_v6, 0.0 }
 0x192   : > { %v3143_v17 = vadd.f32 %v3142_v15, %v2883_v11  ;;  %v2884_v13 = vmax.f32 %v2628_v4, 0.0  ;;  %14667 = vmatprep.mubr.msk.bf16.mxu0 %vm1097_vm0, %v1037_v10  ;;  %v876_v4 = vld [vmem:[%s16257_s26 + $0x598] sm:$0xff]  ;;  %v3119_v20 = vadd.f32 %v3118_v57, %v3117_v52 }
 0x194   : > { %v3144_v40 = vadd.f32 %v3143_v17, %v2884_v13  ;;  %v14561_v27 = vpop.f32.mrb[60].mxu0  ;;  %v878_v17 = vld [vmem:[%s16257_s26 + $0x5a8] sm:$0xff]  ;;  %v3380_v22 = vmul.f32 0.00390625, %v3119_v20 }
 0x195   : > { %v1756_v19 = vpop.f32.mrb[61].mxu0  ;;  %v2633_v49 = vadd.f32 %v14561_v27, %v16646_v23 }
 0x196   : > { %v3145_v32 = vadd.f32 %v3144_v40, %v2885_v25  ;;  %v2631_v24 = vadd.f32 %v16637_v8, %v1756_v19  ;;  %v14562_v33 = vpop.f32.mrb[62].mxu0  ;;  %v1042_v25 = vpack.c.bf16 %v876_v4, %v875_v18  ;;  %v1043_v40 = vpack.c.bf16 %v878_v17, %v877_v16  ;;  %v16821_v18 = vld [vmem:[%s21781_s25 + $0x50] sm:$0xff]  ;;  %v16827_v16 = vld [vmem:[%s21781_s25 + $0x48] sm:$0xff] }
 0x197   : > { %v1759_v41 = vpop.f32.mrb[63].mxu0  ;;  %v2634_v55 = vadd.f32 %v14562_v33, %v16657_v38  ;;  %v2889_v37 = vmax.f32 %v2633_v49, 0.0 }
 0x198   : > { %v2887_v42 = vmax.f32 %v2631_v24, 0.0  ;;  %v3146_v28 = vadd.f32 %v3145_v32, %v2886_v56  ;;  %v2632_v34 = vadd.f32 %v16651_v26, %v1759_v41  ;;  %v16791_v24 = vld [vmem:[%s21781_s25 + $0x30] sm:$0xff] }
 0x199   : > { %14668 = vmatmul.mubr.msk.bf16.gmra.mrb[168].mxu0 %vm1097_vm0, %v1038_v31  ;;  %v2890_v58 = vmax.f32 %v2634_v55, 0.0  ;;  %v16785_v31 = vld [vmem:[%s21781_s25 + $0x20] sm:$0xff] }
 0x19a   : > { %v3147_v43 = vadd.f32 %v3146_v28, %v2887_v42  ;;  %v2888_v36 = vmax.f32 %v2632_v34, 0.0  ;;  %14671 = vmatprep.mubr.msk.bf16.mxu0 %vm1097_vm0, %v1039_v35  ;;  %v16797_v28 = vld [vmem:[%s21781_s25 + $0x28] sm:$0xff] }
 0x19c   : > { %v3148_v51 = vadd.f32 %v3147_v43, %v2888_v36  ;;  %v14565_v39 = vpop.f32.mrb[64].mxu0  ;;  %v879_v43 = vld [vmem:[%s16257_s26 + $0x5b0] sm:$0xff] }
 0x19d   : > { %v1772_v53 = vpop.f32.mrb[65].mxu0  ;;  %v2637_v3 = vadd.f32 %v16761_v7, %v14565_v39 }
 0x19e   : > { %v3149_v60 = vadd.f32 %v3148_v51, %v2889_v37  ;;  %v2635_v61 = vadd.f32 %v16755_v59, %v1772_v53  ;;  %v14566_v62 = vpop.f32.mrb[66].mxu0  ;;  %v881_v37 = vld [vmem:[%s16257_s26 + $0x5c0] sm:$0xff]  ;;  %v882_v51 = vld [vmem:[%s16257_s26 + $0x5c8] sm:$0xff] }
 0x19f   : > { %v1775_v0 = vpop.f32.mrb[67].mxu0  ;;  %v2638_v11 = vadd.f32 %v16775_v2, %v14566_v62  ;;  %v2893_v13 = vmax.f32 %v2637_v3, 0.0  ;;  %v1045_v62 = vpack.c.bf16 %v882_v51, %v881_v37  ;;  %v16815_v3 = vld [vmem:[%s21781_s25 + $0x40] sm:$0xff]  ;;  %v16859_v51 = vld [vmem:[%s21781_s25 + $0x68] sm:$0xff] }
 0x1a0   : > { %v3150_v1 = vadd.f32 %v3149_v60, %v2890_v58  ;;  %v2636_v9 = vadd.f32 %v16767_v5, %v1775_v0  ;;  %v2891_v12 = vmax.f32 %v2635_v61, 0.0  ;;  %v3388_v58 = vpack.c.bf16 %v3380_v22, %v3380_v22 }
 0x1a1   : > { %14672 = vmatmul.mubr.msk.bf16.gmra.mrb[172].mxu0 %vm1097_vm0, %v1040_v45  ;;  %v2894_v29 = vmax.f32 %v2638_v11, 0.0  ;;  %v1044_v61 = vpack.c.bf16 %v880_v50, %v879_v43 }
 0x1a2   : > { %v3151_v10 = vrot.slane %v3150_v1, 4  ;;  %v2892_v15 = vmax.f32 %v2636_v9, 0.0  ;;  %14675 = vmatprep.mubr.msk.bf16.mxu0 %vm1097_vm0, %v1041_v63 }
 0x1a4   : > { %v3152_v6 = vadd.f32 %v3151_v10, %v3150_v1  ;;  %v3157_v30 = vadd.f32 %v2892_v15, %v2891_v12  ;;  %v14569_v14 = vpop.f32.mrb[68].mxu0 }
 0x1a5   : > { %v1788_v21 = vpop.f32.mrb[69].mxu0  ;;  %v2641_v33 = vadd.f32 %v16791_v24, %v14569_v14  ;;  %v16834_v14 = vld [vmem:[%s21781_s25 + $0x58] sm:$0xff] }
 0x1a6   : > { %v3153_v27 = vrot.slane %v3152_v6, 2  ;;  %v3158_v19 = vadd.f32 %v3157_v30, %v2893_v13  ;;  %v2639_v56 = vadd.f32 %v16785_v31, %v1788_v21  ;;  %v14570_v32 = vpop.f32.mrb[70].mxu0 }
 0x1a7   : > { %v1791_v35 = vpop.f32.mrb[71].mxu0  ;;  %v2642_v44 = vadd.f32 %v16805_v46, %v14570_v32  ;;  %v2897_v52 = vmax.f32 %v2641_v33, 0.0 }
 0x1a8   : > { %v3154_v41 = vadd.f32 %v3153_v27, %v3152_v6  ;;  %v2895_v49 = vmax.f32 %v2639_v56, 0.0  ;;  %v3159_v42 = vadd.f32 %v3158_v19, %v2894_v29  ;;  %v2640_v34 = vadd.f32 %v16797_v28, %v1791_v35  ;;  %v885_v27 = vld [vmem:[%s16257_s26 + $0x5e0] sm:$0xff]  ;;  %v886_v29 = vld [vmem:[%s16257_s26 + $0x5e8] sm:$0xff] }
 0x1a9   : > { %14676 = vmatmul.mubr.msk.bf16.gmra.mrb[176].mxu0 %vm1097_vm0, %v1042_v25  ;;  %v2898_v0 = vmax.f32 %v2642_v44, 0.0  ;;  %v3510_v6 = vunpack.c.l.b16 %v3388_v58  ;;  %v883_v25 = vld [vmem:[%s16257_s26 + $0x5d0] sm:$0xff] }
 0x1aa   : > { %v3155_v55 = vrot.slane %v3154_v41, 1  ;;  %v3160_v36 = vadd.f32 %v3159_v42, %v2895_v49  ;;  %v2896_v48 = vmax.f32 %v2640_v34, 0.0  ;;  %14679 = vmatprep.mubr.msk.bf16.mxu0 %vm1097_vm0, %v1043_v40  ;;  %v884_v40 = vld [vmem:[%s16257_s26 + $0x5d8] sm:$0xff]  ;;  %v16847_v34 = vld [vmem:[%s21781_s25 + $0x60] sm:$0xff]  ;;  %v16853_v44 = vld [vmem:[%s21781_s25 + $0x70] sm:$0xff] }
 0x1ac   : > { %v3156_v39 = vadd.f32 %v3155_v55, %v3154_v41  ;;  %v3161_v53 = vadd.f32 %v3160_v36, %v2896_v48  ;;  %v14573_v45 = vpop.f32.mrb[72].mxu0  ;;  %v1046_v41 = vpack.c.bf16 %v884_v40, %v883_v25  ;;  %v1047_v55 = vpack.c.bf16 %v886_v29, %v885_v27  ;;  %v16889_v40 = vld [vmem:[%s21781_s25 + $0x88] sm:$0xff] }
 0x1ad   : > { %v1804_v60 = vpop.f32.mrb[73].mxu0  ;;  %v2645_v10 = vadd.f32 %v16821_v18, %v14573_v45 }
 0x1ae   : > { %v3381_v63 = vmul.f32 0.00390625, %v3156_v39  ;;  %v3162_v1 = vadd.f32 %v3161_v53, %v2897_v52  ;;  %v2643_v9 = vadd.f32 %v16815_v3, %v1804_v60  ;;  %v14574_v57 = vpop.f32.mrb[74].mxu0  ;;  %v16866_v53 = vld [vmem:[%s21781_s25 + $0x78] sm:$0xff]  ;;  %v887_v60 = vld [vmem:[%s16257_s26 + $0x5f0] sm:$0xff] }
 0x1af   : > { %v1807_v12 = vpop.f32.mrb[75].mxu0  ;;  %v2646_v20 = vadd.f32 %v16834_v14, %v14574_v57  ;;  %v2901_v56 = vmax.f32 %v2645_v10, 0.0 }
 0x1b0   : > { %v3389_v11 = vpack.c.bf16 %v3381_v63, %v3381_v63  ;;  %v2899_v15 = vmax.f32 %v2643_v9, 0.0  ;;  %v3163_v4 = vadd.f32 %v3162_v1, %v2898_v0  ;;  %v2644_v17 = vadd.f32 %v16827_v16, %v1807_v12  ;;  %v890_v63 = vld [vmem:[%s16257_s26 + $0x608] sm:$0xff] }
 0x1b1   : > { %14680 = vmatmul.mubr.msk.bf16.gmra.mrb[180].mxu0 %vm1097_vm0, %v1044_v61  ;;  %v2902_v49 = vmax.f32 %v2646_v20, 0.0  ;;  %v888_v61 = vld [vmem:[%s16257_s26 + $0x5f8] sm:$0xff] }
 0x1b2   : > { %v3511_v13 = vunpack.c.l.b16 %v3389_v11  ;;  %v3164_v30 = vadd.f32 %v3163_v4, %v2899_v15  ;;  %v2900_v21 = vmax.f32 %v2644_v17, 0.0  ;;  %14683 = vmatprep.mubr.msk.bf16.mxu0 %vm1097_vm0, %v1045_v62  ;;  %v889_v62 = vld [vmem:[%s16257_s26 + $0x600] sm:$0xff]  ;;  %v1048_v10 = vpack.c.bf16 %v888_v61, %v887_v60  ;;  %v16913_v61 = vld [vmem:[%s21781_s25 + $0xb0] sm:$0xff] }
 0x1b3   : > { %v16877_v15 = vld [vmem:[%s21781_s25 + $0x80] sm:$0xff] }
 0x1b4   : > { %v16842_v19 = vsel %vm3518_vm1, %v3511_v13, %v3510_v6  ;;  %v3165_v32 = vadd.f32 %v3164_v30, %v2900_v21  ;;  %v14577_v33 = vpop.f32.mrb[76].mxu0  ;;  %v1049_v6 = vpack.c.bf16 %v890_v63, %v889_v62  ;;  %v16883_v30 = vld [vmem:[%s21781_s25 + $0x90] sm:$0xff] }
 0x1b5   : > { %v1820_v35 = vpop.f32.mrb[77].mxu0  ;;  %v2649_v48 = vadd.f32 %v16853_v44, %v14577_v33 }
 0x1b6   : > { %v3166_v42 = vadd.f32 %v3165_v32, %v2901_v56  ;;  %v2647_v22 = vadd.f32 %v16847_v34, %v1820_v35  ;;  %v14578_v43 = vpop.f32.mrb[78].mxu0  ;;  %v16896_v56 = vld [vmem:[%s21781_s25 + $0x98] sm:$0xff]  ;;  %v891_v35 = vld [vmem:[%s16257_s26 + $0x610] sm:$0xff] }
 0x1b7   : > { %v1823_v36 = vpop.f32.mrb[79].mxu0  ;;  %v2650_v45 = vadd.f32 %v16866_v53, %v14578_v43  ;;  %v2905_v0 = vmax.f32 %v2649_v48, 0.0 }
 0x1b8   : > { %v2903_v50 = vmax.f32 %v2647_v22, 0.0  ;;  %v3167_v37 = vadd.f32 %v3166_v42, %v2902_v49  ;;  %v2648_v39 = vadd.f32 %v16859_v51, %v1823_v36  ;;  %v893_v49 = vld [vmem:[%s16257_s26 + $0x620] sm:$0xff]  ;;  %v894_v42 = vld [vmem:[%s16257_s26 + $0x628] sm:$0xff] }
 0x1b9   : > { %14684 = vmatmul.mubr.msk.bf16.gmra.mrb[184].mxu0 %vm1097_vm0, %v1046_v41  ;;  %v2906_v12 = vmax.f32 %v2650_v45, 0.0  ;;  %v892_v41 = vld [vmem:[%s16257_s26 + $0x618] sm:$0xff] }
 0x1ba   : > { %v3168_v52 = vadd.f32 %v3167_v37, %v2903_v50  ;;  %v2904_v58 = vmax.f32 %v2648_v39, 0.0  ;;  %14687 = vmatprep.mubr.msk.bf16.mxu0 %vm1097_vm0, %v1047_v55  ;;  %v1050_v48 = vpack.c.bf16 %v892_v41, %v891_v35  ;;  %v16907_v39 = vld [vmem:[%s21781_s25 + $0xa0] sm:$0xff] }
 0x1bb   : > { %v16937_v35 = vld [vmem:[%s21781_s25 + $0xc0] sm:$0xff] }
 0x1bc   : > { %v3169_v1 = vadd.f32 %v3168_v52, %v2904_v58  ;;  %v14581_v9 = vpop.f32.mrb[80].mxu0  ;;  %v1051_v58 = vpack.c.bf16 %v894_v42, %v893_v49 }
 0x1bd   : > { %v1836_v57 = vpop.f32.mrb[81].mxu0  ;;  %v2653_v20 = vadd.f32 %v16883_v30, %v14581_v9 }
 0x1be   : > { %v3170_v11 = vadd.f32 %v3169_v1, %v2905_v0  ;;  %v2651_v4 = vadd.f32 %v16877_v15, %v1836_v57  ;;  %v14582_v17 = vpop.f32.mrb[82].mxu0  ;;  %v16919_v1 = vld [vmem:[%s21781_s25 + $0xa8] sm:$0xff] }
 0x1bf   : > { %v1839_v13 = vpop.f32.mrb[83].mxu0  ;;  %v2654_v32 = vadd.f32 %v16896_v56, %v14582_v17  ;;  %v2909_v22 = vmax.f32 %v2653_v20, 0.0  ;;  %v896_v17 = vld [vmem:[%s16257_s26 + $0x638] sm:$0xff] }
 0x1c0   : > { %v2907_v21 = vmax.f32 %v2651_v4, 0.0  ;;  %v3171_v25 = vadd.f32 %v3170_v11, %v2906_v12  ;;  %v2652_v27 = vadd.f32 %v16889_v40, %v1839_v13  ;;  %v895_v4 = vld [vmem:[%s16257_s26 + $0x630] sm:$0xff]  ;;  %v898_v13 = vld [vmem:[%s16257_s26 + $0x648] sm:$0xff] }
 0x1c1   : > { %14688 = vmatmul.mubr.msk.bf16.gmra.mrb[188].mxu0 %vm1097_vm0, %v1048_v10  ;;  %v2910_v50 = vmax.f32 %v2654_v32, 0.0  ;;  %v16926_v10 = vld [vmem:[%s21781_s25 + $0xb8] sm:$0xff] }
 0x1c2   : > { %v3172_v29 = vadd.f32 %v3171_v25, %v2907_v21  ;;  %v2908_v33 = vmax.f32 %v2652_v27, 0.0  ;;  %14691 = vmatprep.mubr.msk.bf16.mxu0 %vm1097_vm0, %v1049_v6  ;;  %v897_v6 = vld [vmem:[%s16257_s26 + $0x640] sm:$0xff] }
 0x1c3   : > { %v1053_v42 = vpack.c.bf16 %v898_v13, %v897_v6 }
 0x1c4   : > { %v3173_v43 = vadd.f32 %v3172_v29, %v2908_v33  ;;  %v14585_v55 = vpop.f32.mrb[84].mxu0  ;;  %v1052_v29 = vpack.c.bf16 %v896_v17, %v895_v4 }
 0x1c5   : > { %v1852_v36 = vpop.f32.mrb[85].mxu0  ;;  %v2657_v62 = vadd.f32 %v16913_v61, %v14585_v55 }
 0x1c6   : > { %v3174_v37 = vadd.f32 %v3173_v43, %v2909_v22  ;;  %v2655_v52 = vadd.f32 %v16907_v39, %v1852_v36  ;;  %v14586_v45 = vpop.f32.mrb[86].mxu0  ;;  %v16943_v43 = vld [vmem:[%s21781_s25 + $0xd0] sm:$0xff] }
 0x1c7   : > { %v1855_v60 = vpop.f32.mrb[87].mxu0  ;;  %v2658_v12 = vadd.f32 %v16926_v10, %v14586_v45  ;;  %v2913_v20 = vmax.f32 %v2657_v62, 0.0  ;;  %v901_v62 = vld [vmem:[%s16257_s26 + $0x660] sm:$0xff] }
 0x1c8   : > { %v2911_v63 = vmax.f32 %v2655_v52, 0.0  ;;  %v3175_v0 = vadd.f32 %v3174_v37, %v2910_v50  ;;  %v2656_v9 = vadd.f32 %v16919_v1, %v1855_v60  ;;  %v900_v60 = vld [vmem:[%s16257_s26 + $0x658] sm:$0xff] }
 0x1c9   : > { %14692 = vmatmul.mubr.msk.bf16.gmra.mrb[192].mxu0 %vm1097_vm0, %v1050_v48  ;;  %v2914_v32 = vmax.f32 %v2658_v12, 0.0 }
 0x1ca   : > { %v3176_v57 = vadd.f32 %v3175_v0, %v2911_v63  ;;  %v2912_v11 = vmax.f32 %v2656_v9, 0.0  ;;  %14695 = vmatprep.mubr.msk.bf16.mxu0 %vm1097_vm0, %v1051_v58  ;;  %v899_v58 = vld [vmem:[%s16257_s26 + $0x650] sm:$0xff]  ;;  %v902_v63 = vld [vmem:[%s16257_s26 + $0x668] sm:$0xff] }
 0x1cb   : > { %v1055_v6 = vpack.c.bf16 %v902_v63, %v901_v62  ;;  %v907_v63 = vld [vmem:[%s16257_s26 + $0x690] sm:$0xff] }
 0x1cc   : > { %v3177_v21 = vadd.f32 %v3176_v57, %v2912_v11  ;;  %v14589_v25 = vpop.f32.mrb[88].mxu0  ;;  %v1054_v11 = vpack.c.bf16 %v900_v60, %v899_v58 }
 0x1cd   : > { %v1868_v27 = vpop.f32.mrb[89].mxu0  ;;  %v2661_v55 = vadd.f32 %v16943_v43, %v14589_v25 }
 0x1ce   : > { %v3178_v33 = vadd.f32 %v3177_v21, %v2913_v20  ;;  %v2659_v41 = vadd.f32 %v16937_v35, %v1868_v27  ;;  %v14590_v49 = vpop.f32.mrb[90].mxu0 }
 0x1cf   : > { %v1871_v22 = vpop.f32.mrb[91].mxu0  ;;  %v2662_v52 = vadd.f32 %v14590_v49, %v16627_v54  ;;  %v2917_v0 = vmax.f32 %v2661_v55, 0.0  ;;  %v905_v49 = vld [vmem:[%s16257_s26 + $0x680] sm:$0xff] }
 0x1d0   : > { %v2915_v36 = vmax.f32 %v2659_v41, 0.0  ;;  %v3179_v48 = vadd.f32 %v3178_v33, %v2914_v32  ;;  %v2660_v50 = vadd.f32 %v16621_v47, %v1871_v22  ;;  %v903_v41 = vld [vmem:[%s16257_s26 + $0x670] sm:$0xff] }
 0x1d1   : > { %14696 = vmatmul.mubr.msk.bf16.gmra.mrb[196].mxu0 %vm1097_vm0, %v1052_v29  ;;  %v2918_v4 = vmax.f32 %v2662_v52, 0.0 }
 0x1d2   : > { %v3180_v37 = vadd.f32 %v3179_v48, %v2915_v36  ;;  %v2916_v45 = vmax.f32 %v2660_v50, 0.0  ;;  %14699 = vmatprep.mubr.msk.bf16.mxu0 %vm1097_vm0, %v1053_v42  ;;  %v906_v42 = vld [vmem:[%s16257_s26 + $0x688] sm:$0xff] }
 0x1d3   : > { %v1057_v52 = vpack.c.bf16 %v906_v42, %v905_v49 }
 0x1d4   : > { %v3181_v9 = vadd.f32 %v3180_v37, %v2916_v45  ;;  %v14593_v57 = vpop.f32.mrb[92].mxu0 }
 0x1d5   : > { %v1884_v12 = vpop.f32.mrb[93].mxu0  ;;  %v2665_v20 = vadd.f32 %v14593_v57, %v16646_v23 }
 0x1d6   : > { %v3182_v47 = vadd.f32 %v3181_v9, %v2917_v0  ;;  %v2663_v17 = vadd.f32 %v16637_v8, %v1884_v12  ;;  %v14594_v54 = vpop.f32.mrb[94].mxu0  ;;  %v904_v8 = vld [vmem:[%s16257_s26 + $0x678] sm:$0xff] }
 0x1d7   : > { %v1887_v13 = vpop.f32.mrb[95].mxu0  ;;  %v2666_v32 = vadd.f32 %v14594_v54, %v16657_v38  ;;  %v2921_v22 = vmax.f32 %v2665_v20, 0.0  ;;  %v1056_v48 = vpack.c.bf16 %v904_v8, %v903_v41 }
 0x1d8   : > { %v2919_v21 = vmax.f32 %v2663_v17, 0.0  ;;  %v3183_v25 = vadd.f32 %v3182_v47, %v2918_v4  ;;  %v2664_v27 = vadd.f32 %v16651_v26, %v1887_v13  ;;  %v909_v4 = vld [vmem:[%s16257_s26 + $0x6a0] sm:$0xff]  ;;  %v910_v47 = vld [vmem:[%s16257_s26 + $0x6a8] sm:$0xff] }
 0x1d9   : > { %14700 = vmatmul.mubr.msk.bf16.gmra.mrb[200].mxu0 %vm1097_vm0, %v1054_v11  ;;  %v2922_v50 = vmax.f32 %v2666_v32, 0.0  ;;  %v908_v11 = vld [vmem:[%s16257_s26 + $0x698] sm:$0xff] }
 0x1da   : > { %v3184_v29 = vadd.f32 %v3183_v25, %v2919_v21  ;;  %v2920_v33 = vmax.f32 %v2664_v27, 0.0  ;;  %14703 = vmatprep.mubr.msk.bf16.mxu0 %vm1097_vm0, %v1055_v6  ;;  %v1058_v21 = vpack.c.bf16 %v908_v11, %v907_v63  ;;  %v1059_v25 = vpack.c.bf16 %v910_v47, %v909_v4 }
 0x1dc   : > { %v3185_v55 = vadd.f32 %v3184_v29, %v2920_v33  ;;  %v14597_v23 = vpop.f32.mrb[96].mxu0 }
 0x1dd   : > { %v1900_v36 = vpop.f32.mrb[97].mxu0  ;;  %v2669_v60 = vadd.f32 %v16761_v7, %v14597_v23 }
 0x1de   : > { %v3186_v26 = vadd.f32 %v3185_v55, %v2921_v22  ;;  %v2667_v37 = vadd.f32 %v16755_v59, %v1900_v36  ;;  %v14598_v38 = vpop.f32.mrb[98].mxu0  ;;  %v911_v36 = vld [vmem:[%s16257_s26 + $0x6b0] sm:$0xff] }
 0x1df   : > { %v1903_v45 = vpop.f32.mrb[99].mxu0  ;;  %v2670_v57 = vadd.f32 %v16775_v2, %v14598_v38  ;;  %v2925_v54 = vmax.f32 %v2669_v60, 0.0  ;;  %v912_v38 = vld [vmem:[%s16257_s26 + $0x6b8] sm:$0xff] }
 0x1e0   : > { %v3187_v58 = vadd.f32 %v3186_v26, %v2922_v50  ;;  %v2668_v62 = vadd.f32 %v16767_v5, %v1903_v45  ;;  %v2923_v9 = vmax.f32 %v2667_v37, 0.0  ;;  %v914_v45 = vld [vmem:[%s16257_s26 + $0x6c8] sm:$0xff] }
 0x1e1   : > { %14704 = vmatmul.mubr.msk.bf16.gmra.mrb[204].mxu0 %vm1097_vm0, %v1056_v48  ;;  %v2926_v29 = vmax.f32 %v2670_v57, 0.0 }
 0x1e2   : > { %v3188_v0 = vrot.slane %v3187_v58, 4  ;;  %v2924_v12 = vmax.f32 %v2668_v62, 0.0  ;;  %14707 = vmatprep.mubr.msk.bf16.mxu0 %vm1097_vm0, %v1057_v52  ;;  %v913_v52 = vld [vmem:[%s16257_s26 + $0x6c0] sm:$0xff] }
 0x1e3   : > { %v1061_v57 = vpack.c.bf16 %v914_v45, %v913_v52 }
 0x1e4   : > { %v3189_v17 = vadd.f32 %v3188_v0, %v3187_v58  ;;  %v3194_v6 = vadd.f32 %v2924_v12, %v2923_v9  ;;  %v14601_v13 = vpop.f32.mrb[100].mxu0  ;;  %v1060_v9 = vpack.c.bf16 %v912_v38, %v911_v36 }
 0x1e5   : > { %v1916_v20 = vpop.f32.mrb[101].mxu0  ;;  %v2673_v8 = vadd.f32 %v16791_v24, %v14601_v13 }
 0x1e6   : > { %v3190_v27 = vrot.slane %v3189_v17, 2  ;;  %v3195_v32 = vadd.f32 %v3194_v6, %v2925_v54  ;;  %v2671_v33 = vadd.f32 %v16785_v31, %v1916_v20  ;;  %v14602_v41 = vpop.f32.mrb[102].mxu0 }
 0x1e7   : > { %v1919_v49 = vpop.f32.mrb[103].mxu0  ;;  %v2674_v26 = vadd.f32 %v16805_v46, %v14602_v41  ;;  %v2929_v60 = vmax.f32 %v2673_v8, 0.0  ;;  %v915_v41 = vld [vmem:[%s16257_s26 + $0x6d0] sm:$0xff]  ;;  %v916_v8 = vld [vmem:[%s16257_s26 + $0x6d8] sm:$0xff] }
 0x1e8   : > { %v3191_v42 = vadd.f32 %v3190_v27, %v3189_v17  ;;  %v2927_v22 = vmax.f32 %v2671_v33, 0.0  ;;  %v3196_v55 = vadd.f32 %v3195_v32, %v2926_v29  ;;  %v2672_v23 = vadd.f32 %v16797_v28, %v1919_v49  ;;  %v917_v49 = vld [vmem:[%s16257_s26 + $0x6e0] sm:$0xff] }
 0x1e9   : > { %14708 = vmatmul.mubr.msk.bf16.gmra.mrb[208].mxu0 %vm1097_vm0, %v1058_v21  ;;  %v2930_v11 = vmax.f32 %v2674_v26, 0.0 }
 0x1ea   : > { %v3192_v48 = vrot.slane %v3191_v42, 1  ;;  %v3197_v50 = vadd.f32 %v3196_v55, %v2927_v22  ;;  %v2928_v37 = vmax.f32 %v2672_v23, 0.0  ;;  %14711 = vmatprep.mubr.msk.bf16.mxu0 %vm1097_vm0, %v1059_v25 }
 0x1ec   : > { %v3193_v58 = vadd.f32 %v3192_v48, %v3191_v42  ;;  %v3198_v62 = vadd.f32 %v3197_v50, %v2928_v37  ;;  %v14605_v63 = vpop.f32.mrb[104].mxu0  ;;  %v918_v42 = vld [vmem:[%s16257_s26 + $0x6e8] sm:$0xff]  ;;  %v1062_v50 = vpack.c.bf16 %v916_v8, %v915_v41 }
 0x1ed   : > { %v1932_v0 = vpop.f32.mrb[105].mxu0  ;;  %v2677_v54 = vadd.f32 %v16821_v18, %v14605_v63  ;;  %v1063_v45 = vpack.c.bf16 %v918_v42, %v917_v49 }
 0x1ee   : > { %v3382_v12 = vmul.f32 0.00390625, %v3193_v58  ;;  %v3199_v4 = vadd.f32 %v3198_v62, %v2929_v60  ;;  %v2675_v47 = vadd.f32 %v16815_v3, %v1932_v0  ;;  %v14606_v17 = vpop.f32.mrb[106].mxu0 }
 0x1ef   : > { %v1935_v6 = vpop.f32.mrb[107].mxu0  ;;  %v2678_v32 = vadd.f32 %v16834_v14, %v14606_v17  ;;  %v2933_v55 = vmax.f32 %v2677_v54, 0.0 }
 0x1f0   : > { %v3390_v13 = vpack.c.bf16 %v3382_v12, %v3382_v12  ;;  %v2931_v20 = vmax.f32 %v2675_v47, 0.0  ;;  %v3200_v21 = vadd.f32 %v3199_v4, %v2930_v11  ;;  %v2676_v25 = vadd.f32 %v16827_v16, %v1935_v6  ;;  %v919_v12 = vld [vmem:[%s16257_s26 + $0x6f0] sm:$0xff]  ;;  %v920_v11 = vld [vmem:[%s16257_s26 + $0x6f8] sm:$0xff]  ;;  %v921_v4 = vld [vmem:[%s16257_s26 + $0x700] sm:$0xff] }
 0x1f1   : > { %14712 = vmatmul.mubr.msk.bf16.gmra.mrb[212].mxu0 %vm1097_vm0, %v1060_v9  ;;  %v2934_v26 = vmax.f32 %v2678_v32, 0.0  ;;  %v922_v47 = vld [vmem:[%s16257_s26 + $0x708] sm:$0xff] }
 0x1f2   : > { %v3512_v27 = vunpack.c.l.b16 %v3390_v13  ;;  %v3201_v29 = vadd.f32 %v3200_v21, %v2931_v20  ;;  %v2932_v33 = vmax.f32 %v2676_v25, 0.0  ;;  %14715 = vmatprep.mubr.msk.bf16.mxu0 %vm1097_vm0, %v1061_v57  ;;  %v1064_v20 = vpack.c.bf16 %v920_v11, %v919_v12 }
 0x1f3   : > { %v1065_v32 = vpack.c.bf16 %v922_v47, %v921_v4 }
 0x1f4   : > { %v16995_v22 = vsel %vm3520_vm2, %v3512_v27, %v16842_v19  ;;  %v3202_v23 = vadd.f32 %v3201_v29, %v2932_v33  ;;  %v14609_v36 = vpop.f32.mrb[108].mxu0 }
 0x1f5   : > { %v1948_v48 = vpop.f32.mrb[109].mxu0  ;;  %v2681_v60 = vadd.f32 %v16853_v44, %v14609_v36 }
 0x1f6   : > { %v3203_v37 = vadd.f32 %v3202_v23, %v2933_v55  ;;  %v2679_v38 = vadd.f32 %v16847_v34, %v1948_v48  ;;  %v14610_v52 = vpop.f32.mrb[110].mxu0  ;;  %v923_v48 = vld [vmem:[%s16257_s26 + $0x710] sm:$0xff] }
 0x1f7   : > { %v1951_v58 = vpop.f32.mrb[111].mxu0  ;;  %v2682_v9 = vadd.f32 %v16866_v53, %v14610_v52  ;;  %v2937_v17 = vmax.f32 %v2681_v60, 0.0 }
 0x1f8   : > { %v2935_v19 = vmax.f32 %v2679_v38, 0.0  ;;  %v3204_v62 = vadd.f32 %v3203_v37, %v2934_v26  ;;  %v2680_v63 = vadd.f32 %v16859_v51, %v1951_v58  ;;  %v925_v26 = vld [vmem:[%s16257_s26 + $0x720] sm:$0xff]  ;;  %v926_v37 = vld [vmem:[%s16257_s26 + $0x728] sm:$0xff] }
 0x1f9   : > { %14716 = vmatmul.mubr.msk.bf16.gmra.mrb[216].mxu0 %vm1097_vm0, %v1062_v50  ;;  %v2938_v21 = vmax.f32 %v2682_v9, 0.0  ;;  %v924_v50 = vld [vmem:[%s16257_s26 + $0x718] sm:$0xff]  ;;  %v1067_v9 = vpack.c.bf16 %v926_v37, %v925_v26  ;;  %v17032_v37 = vld [vmem:[%s21781_s25 + $0xc8] sm:$0xff] }
 0x1fa   : > { %v3205_v0 = vadd.f32 %v3204_v62, %v2935_v19  ;;  %v2936_v57 = vmax.f32 %v2680_v63, 0.0  ;;  %14719 = vmatprep.mubr.msk.bf16.mxu0 %vm1097_vm0, %v1063_v45  ;;  %v1066_v60 = vpack.c.bf16 %v924_v50, %v923_v48 }
 0x1fc   : > { %v3206_v54 = vadd.f32 %v3205_v0, %v2936_v57  ;;  %v14613_v6 = vpop.f32.mrb[112].mxu0 }
 0x1fd   : > { %v1964_v13 = vpop.f32.mrb[113].mxu0  ;;  %v2685_v41 = vadd.f32 %v16883_v30, %v14613_v6 }
 0x1fe   : > { %v3207_v25 = vadd.f32 %v3206_v54, %v2937_v17  ;;  %v2683_v27 = vadd.f32 %v16877_v15, %v1964_v13  ;;  %v14614_v29 = vpop.f32.mrb[114].mxu0  ;;  %v927_v13 = vld [vmem:[%s16257_s26 + $0x730] sm:$0xff] }
 0x1ff   : > { %v1967_v33 = vpop.f32.mrb[115].mxu0  ;;  %v2686_v23 = vadd.f32 %v16896_v56, %v14614_v29  ;;  %v2941_v38 = vmax.f32 %v2685_v41, 0.0 }
 0x200   : > { %v2939_v8 = vmax.f32 %v2683_v27, 0.0  ;;  %v3208_v49 = vadd.f32 %v3207_v25, %v2938_v21  ;;  %v2684_v42 = vadd.f32 %v16889_v40, %v1967_v33  ;;  %v929_v21 = vld [vmem:[%s16257_s26 + $0x740] sm:$0xff]  ;;  %v930_v25 = vld [vmem:[%s16257_s26 + $0x748] sm:$0xff] }
 0x201   : > { %14720 = vmatmul.mubr.msk.bf16.gmra.mrb[220].mxu0 %vm1097_vm0, %v1064_v20  ;;  %v2942_v19 = vmax.f32 %v2686_v23, 0.0  ;;  %v928_v20 = vld [vmem:[%s16257_s26 + $0x738] sm:$0xff]  ;;  %v1069_v23 = vpack.c.bf16 %v930_v25, %v929_v21  ;;  %v17056_v25 = vld [vmem:[%s21781_s25 + $0xf0] sm:$0xff] }
 0x202   : > { %v3209_v55 = vadd.f32 %v3208_v49, %v2939_v8  ;;  %v2940_v36 = vmax.f32 %v2684_v42, 0.0  ;;  %14723 = vmatprep.mubr.msk.bf16.mxu0 %vm1097_vm0, %v1065_v32  ;;  %v1068_v41 = vpack.c.bf16 %v928_v20, %v927_v13 }
 0x204   : > { %v3210_v52 = vadd.f32 %v3209_v55, %v2940_v36  ;;  %v14617_v45 = vpop.f32.mrb[116].mxu0 }
 0x205   : > { %v1980_v58 = vpop.f32.mrb[117].mxu0  ;;  %v2689_v12 = vadd.f32 %v16913_v61, %v14617_v45  ;;  %v17039_v45 = vld [vmem:[%s21781_s25 + $0xd8] sm:$0xff] }
 0x206   : > { %v3211_v62 = vadd.f32 %v3210_v52, %v2941_v38  ;;  %v2687_v63 = vadd.f32 %v16907_v39, %v1980_v58  ;;  %v14618_v0 = vpop.f32.mrb[118].mxu0 }
 0x207   : > { %v1983_v57 = vpop.f32.mrb[119].mxu0  ;;  %v2690_v54 = vadd.f32 %v16926_v10, %v14618_v0  ;;  %v2945_v27 = vmax.f32 %v2689_v12, 0.0  ;;  %v934_v0 = vld [vmem:[%s16257_s26 + $0x768] sm:$0xff] }
 0x208   : > { %v2943_v11 = vmax.f32 %v2687_v63, 0.0  ;;  %v3212_v4 = vadd.f32 %v3211_v62, %v2942_v19  ;;  %v2688_v47 = vadd.f32 %v16919_v1, %v1983_v57  ;;  %v931_v19 = vld [vmem:[%s16257_s26 + $0x750] sm:$0xff]  ;;  %v932_v62 = vld [vmem:[%s16257_s26 + $0x758] sm:$0xff]  ;;  %v933_v63 = vld [vmem:[%s16257_s26 + $0x760] sm:$0xff] }
 0x209   : > { %14724 = vmatmul.mubr.msk.bf16.gmra.mrb[224].mxu0 %vm1097_vm0, %v1066_v60  ;;  %v2946_v8 = vmax.f32 %v2690_v54, 0.0  ;;  %v17050_v54 = vld [vmem:[%s21781_s25 + $0xe0] sm:$0xff]  ;;  %v1071_v20 = vpack.c.bf16 %v934_v0, %v933_v63 }
 0x20a   : > { %v3213_v17 = vadd.f32 %v3212_v4, %v2943_v11  ;;  %v2944_v6 = vmax.f32 %v2688_v47, 0.0  ;;  %14727 = vmatprep.mubr.msk.bf16.mxu0 %vm1097_vm0, %v1067_v9  ;;  %v1070_v4 = vpack.c.bf16 %v932_v62, %v931_v19 }
 0x20c   : > { %v3214_v29 = vadd.f32 %v3213_v17, %v2944_v6  ;;  %v14621_v32 = vpop.f32.mrb[120].mxu0 }
 0x20d   : > { %v1996_v33 = vpop.f32.mrb[121].mxu0  ;;  %v2693_v48 = vadd.f32 %v16943_v43, %v14621_v32 }
 0x20e   : > { %v3215_v49 = vadd.f32 %v3214_v29, %v2945_v27  ;;  %v2691_v42 = vadd.f32 %v16937_v35, %v1996_v33  ;;  %v14622_v55 = vpop.f32.mrb[122].mxu0  ;;  %v17062_v33 = vld [vmem:[%s21781_s25 + $0xe8] sm:$0xff] }
 0x20f   : > { %v1999_v36 = vpop.f32.mrb[123].mxu0  ;;  %v2694_v58 = vadd.f32 %v17039_v45, %v14622_v55  ;;  %v2949_v9 = vmax.f32 %v2693_v48, 0.0  ;;  %v937_v48 = vld [vmem:[%s16257_s26 + $0x780] sm:$0xff] }
 0x210   : > { %v2947_v50 = vmax.f32 %v2691_v42, 0.0  ;;  %v3216_v26 = vadd.f32 %v3215_v49, %v2946_v8  ;;  %v2692_v38 = vadd.f32 %v17032_v37, %v1999_v36  ;;  %v17069_v49 = vld [vmem:[%s21781_s25 + $0xf8] sm:$0xff] }
 0x211   : > { %14728 = vmatmul.mubr.msk.bf16.gmra.mrb[228].mxu0 %vm1097_vm0, %v1068_v41  ;;  %v2950_v47 = vmax.f32 %v2694_v58, 0.0  ;;  %v936_v36 = vld [vmem:[%s16257_s26 + $0x778] sm:$0xff] }
 0x212   : > { %v3217_v52 = vadd.f32 %v3216_v26, %v2947_v50  ;;  %v2948_v60 = vmax.f32 %v2692_v38, 0.0  ;;  %14731 = vmatprep.mubr.msk.bf16.mxu0 %vm1097_vm0, %v1069_v23  ;;  %v935_v23 = vld [vmem:[%s16257_s26 + $0x770] sm:$0xff]  ;;  %v938_v50 = vld [vmem:[%s16257_s26 + $0x788] sm:$0xff] }
 0x214   : > { %v3218_v57 = vadd.f32 %v3217_v52, %v2948_v60  ;;  %v14625_v12 = vpop.f32.mrb[124].mxu0  ;;  %v1072_v60 = vpack.c.bf16 %v936_v36, %v935_v23 }
 0x215   : > { %v2012_v11 = vpop.f32.mrb[125].mxu0  ;;  %v2697_v27 = vadd.f32 %v17056_v25, %v14625_v12 }
 0x216   : > { %v3219_v17 = vadd.f32 %v3218_v57, %v2949_v9  ;;  %v2695_v6 = vadd.f32 %v17050_v54, %v2012_v11  ;;  %v14626_v13 = vpop.f32.mrb[126].mxu0  ;;  %v1073_v9 = vpack.c.bf16 %v938_v50, %v937_v48 }
 0x217   : > { %v2015_v21 = vpop.f32.mrb[127].mxu0  ;;  %v2698_v42 = vadd.f32 %v17069_v49, %v14626_v13  ;;  %v2953_v26 = vmax.f32 %v2697_v27, 0.0  ;;  %v942_v27 = vld [vmem:[%s16257_s26 + $0x7a8] sm:$0xff] }
 0x218   : > { %v2951_v29 = vmax.f32 %v2695_v6, 0.0  ;;  %v3220_v32 = vadd.f32 %v3219_v17, %v2950_v47  ;;  %v2696_v41 = vadd.f32 %v17062_v33, %v2015_v21  ;;  %v939_v47 = vld [vmem:[%s16257_s26 + $0x790] sm:$0xff]  ;;  %v941_v21 = vld [vmem:[%s16257_s26 + $0x7a0] sm:$0xff] }
 0x219   : > { %14732 = vmatmul.mubr.msk.bf16.gmra.mrb[232].mxu0 %vm1097_vm0, %v1070_v4  ;;  %v2954_v19 = vmax.f32 %v2698_v42, 0.0  ;;  %v1075_v42 = vpack.c.bf16 %v942_v27, %v941_v21 }
 0x21a   : > { %v3221_v8 = vadd.f32 %v3220_v32, %v2951_v29  ;;  %v2952_v55 = vmax.f32 %v2696_v41, 0.0  ;;  %14735 = vmatprep.mubr.msk.bf16.mxu0 %vm1097_vm0, %v1071_v20 }
 0x21c   : > { %v3222_v38 = vadd.f32 %v3221_v8, %v2952_v55  ;;  %v14629_v52 = vpop.f32.mrb[128].mxu0 }
 0x21d   : > { %v2028_v58 = vpop.f32.mrb[129].mxu0  ;;  %v2701_v11 = vadd.f32 %v16761_v7, %v14629_v52 }
 0x21e   : > { %v3223_v62 = vadd.f32 %v3222_v38, %v2953_v26  ;;  %v2699_v63 = vadd.f32 %v16755_v59, %v2028_v58  ;;  %v14630_v0 = vpop.f32.mrb[130].mxu0  ;;  %v940_v59 = vld [vmem:[%s16257_s26 + $0x798] sm:$0xff] }
 0x21f   : > { %v2031_v57 = vpop.f32.mrb[131].mxu0  ;;  %v2702_v13 = vadd.f32 %v16775_v2, %v14630_v0  ;;  %v2957_v32 = vmax.f32 %v2701_v11, 0.0 }
 0x220   : > { %v3224_v12 = vadd.f32 %v3223_v62, %v2954_v19  ;;  %v2700_v4 = vadd.f32 %v16767_v5, %v2031_v57  ;;  %v2955_v6 = vmax.f32 %v2699_v63, 0.0  ;;  %v1074_v5 = vpack.c.bf16 %v940_v59, %v939_v47  ;;  %v943_v19 = vld [vmem:[%s16257_s26 + $0x7b0] sm:$0xff]  ;;  %v945_v57 = vld [vmem:[%s16257_s26 + $0x7c0] sm:$0xff] }
 0x221   : > { %14736 = vmatmul.mubr.msk.bf16.gmra.mrb[236].mxu0 %vm1097_vm0, %v1072_v60  ;;  %v2958_v23 = vmax.f32 %v2702_v13, 0.0 }
 0x222   : > { %v3225_v17 = vrot.slane %v3224_v12, 4  ;;  %v2956_v20 = vmax.f32 %v2700_v4, 0.0  ;;  %14739 = vmatprep.mubr.msk.bf16.mxu0 %vm1097_vm0, %v1073_v9 }
 0x224   : > { %v3226_v29 = vadd.f32 %v3225_v17, %v3224_v12  ;;  %v3231_v41 = vadd.f32 %v2956_v20, %v2955_v6  ;;  %v14633_v8 = vpop.f32.mrb[132].mxu0  ;;  %v946_v12 = vld [vmem:[%s16257_s26 + $0x7c8] sm:$0xff] }
 0x225   : > { %v2044_v7 = vpop.f32.mrb[133].mxu0  ;;  %v2705_v50 = vadd.f32 %v16791_v24, %v14633_v8 }
 0x226   : > { %v3227_v55 = vrot.slane %v3226_v29, 2  ;;  %v3232_v36 = vadd.f32 %v3231_v41, %v2957_v32  ;;  %v2703_v2 = vadd.f32 %v16785_v31, %v2044_v7  ;;  %v14634_v48 = vpop.f32.mrb[134].mxu0  ;;  %v944_v31 = vld [vmem:[%s16257_s26 + $0x7b8] sm:$0xff] }
 0x227   : > { %v2047_v26 = vpop.f32.mrb[135].mxu0  ;;  %v2706_v0 = vadd.f32 %v16805_v46, %v14634_v48  ;;  %v2961_v11 = vmax.f32 %v2705_v50, 0.0  ;;  %v1076_v6 = vpack.c.bf16 %v944_v31, %v943_v19 }
 0x228   : > { %v3228_v38 = vadd.f32 %v3227_v55, %v3226_v29  ;;  %v2959_v52 = vmax.f32 %v2703_v2, 0.0  ;;  %v3233_v58 = vadd.f32 %v3232_v36, %v2958_v23  ;;  %v2704_v60 = vadd.f32 %v16797_v28, %v2047_v26  ;;  %v947_v23 = vld [vmem:[%s16257_s26 + $0x7d0] sm:$0xff]  ;;  %v948_v36 = vld [vmem:[%s16257_s26 + $0x7d8] sm:$0xff]  ;;  %v950_v2 = vld [vmem:[%s16257_s26 + $0x7e8] sm:$0xff] }
 0x229   : > { %14740 = vmatmul.mubr.msk.bf16.gmra.mrb[240].mxu0 %vm1097_vm0, %v1074_v5  ;;  %v1077_v28 = vpack.c.bf16 %v946_v12, %v945_v57  ;;  %v2962_v20 = vmax.f32 %v2706_v0, 0.0 }
 0x22a   : > { %v3229_v62 = vrot.slane %v3228_v38, 1  ;;  %v3234_v63 = vadd.f32 %v3233_v58, %v2959_v52  ;;  %v2960_v9 = vmax.f32 %v2704_v60, 0.0  ;;  %14743 = vmatprep.mubr.msk.bf16.mxu0 %vm1097_vm0, %v1075_v42  ;;  %v1078_v52 = vpack.c.bf16 %v948_v36, %v947_v23 }
 0x22c   : > { %v3230_v24 = vadd.f32 %v3229_v62, %v3228_v38  ;;  %v3235_v4 = vadd.f32 %v3234_v63, %v2960_v9  ;;  %v14637_v47 = vpop.f32.mrb[136].mxu0 }
 0x22d   : > { %v2060_v17 = vpop.f32.mrb[137].mxu0  ;;  %v2709_v27 = vadd.f32 %v16821_v18, %v14637_v47  ;;  %v949_v18 = vld [vmem:[%s16257_s26 + $0x7e0] sm:$0xff] }
 0x22e   : > { %v3383_v13 = vmul.f32 0.00390625, %v3230_v24  ;;  %v3236_v59 = vadd.f32 %v3235_v4, %v2961_v11  ;;  %v2707_v21 = vadd.f32 %v16815_v3, %v2060_v17  ;;  %v14638_v46 = vpop.f32.mrb[138].mxu0  ;;  %v1079_v62 = vpack.c.bf16 %v950_v2, %v949_v18  ;;  %v951_v11 = vld [vmem:[%s16257_s26 + $0x7f0] sm:$0xff]  ;;  %v952_v4 = vld [vmem:[%s16257_s26 + $0x7f8] sm:$0xff]  ;;  %s12816_s26 = sshll.u32 %s17931_s24, 4  ;;  %s12817_s26 = int_to_ptr.vmem [resolvable:$true] %s12816_s26 }
 0x22f   : > { %v2063_v29 = vpop.f32.mrb[139].mxu0  ;;  %v2710_v55 = vadd.f32 %v16834_v14, %v14638_v46  ;;  %v2965_v50 = vmax.f32 %v2709_v27, 0.0  ;;  %s15990_s21 = scalar_lea.vmem %s12817_s26, 1024 }
 0x230   : > { %v3391_v32 = vpack.c.bf16 %v3383_v13, %v3383_v13  ;;  %v2963_v41 = vmax.f32 %v2707_v21, 0.0  ;;  %v3237_v8 = vadd.f32 %v3236_v59, %v2962_v20  ;;  %v2708_v7 = vadd.f32 %v16827_v16, %v2063_v29  ;;  %p15991_p0 = scmp.ne.s32.totalorder %s12817_s26, %s15990_s21 }
 0x231   : > { %14744 = vmatmul.mubr.msk.bf16.gmra.mrb[244].mxu0 %vm1097_vm0, %v1076_v6  ;;  %v2966_v58 = vmax.f32 %v2710_v55, 0.0 }
 0x232   : > { %v3513_v5 = vunpack.c.l.b16 %v3391_v32  ;;  %v3238_v42 = vadd.f32 %v3237_v8, %v2963_v41  ;;  %v2964_v3 = vmax.f32 %v2708_v7, 0.0  ;;  %14747 = vmatprep.mubr.msk.bf16.mxu0 %vm1097_vm0, %v1077_v28  ;;  %v1080_v28 = vpack.c.bf16 %v952_v4, %v951_v11  ;;  %p15992_p1 = pnand %p15991_p0, %p16229_p6 }
 0x234   : > { %v17108_v48 = vsel %vm3522_vm3, %v3513_v5, %v16995_v22  ;;  %v3239_v26 = vadd.f32 %v3238_v42, %v2964_v3  ;;  %v14641_v16 = vpop.f32.mrb[140].mxu0  ;;  %p15993_p2 = pneg %p15992_p1 }
 0x235   : > { %v2076_v38 = vpop.f32.mrb[141].mxu0  ;;  %v2713_v0 = vadd.f32 %v16853_v44, %v14641_v16 }
 0x236   : > { %v3240_v60 = vadd.f32 %v3239_v26, %v2965_v50  ;;  %v2711_v14 = vadd.f32 %v16847_v34, %v2076_v38  ;;  %v14642_v19 = vpop.f32.mrb[142].mxu0 }
 0x237   : > { %v2079_v63 = vpop.f32.mrb[143].mxu0  ;;  %v2714_v12 = vadd.f32 %v16866_v53, %v14642_v19  ;;  %v2969_v34 = vmax.f32 %v2713_v0, 0.0 }
 0x238   : > { %v2967_v9 = vmax.f32 %v2711_v14, 0.0  ;;  %v3241_v31 = vadd.f32 %v3240_v60, %v2966_v58  ;;  %v2712_v22 = vadd.f32 %v16859_v51, %v2079_v63 }
 0x239   : > { %14748 = vmatmul.mubr.msk.bf16.gmra.mrb[248].mxu0 %vm1097_vm0, %v1078_v52  ;;  %v2970_v44 = vmax.f32 %v2714_v12, 0.0 }
 0x23a   : > { %v3242_v57 = vadd.f32 %v3241_v31, %v2967_v9  ;;  %v2968_v24 = vmax.f32 %v2712_v22, 0.0  ;;  %14751 = vmatprep.mubr.msk.bf16.mxu0 %vm1097_vm0, %v1079_v62 }
 0x23c   : > { %v3243_v47 = vadd.f32 %v3242_v57, %v2968_v24  ;;  %v14645_v17 = vpop.f32.mrb[144].mxu0 }
 0x23d   : > { %v2092_v6 = vpop.f32.mrb[145].mxu0  ;;  %v2717_v21 = vadd.f32 %v16883_v30, %v14645_v17 }
 0x23e   : > { %v3244_v13 = vadd.f32 %v3243_v47, %v2969_v34  ;;  %v2715_v20 = vadd.f32 %v16877_v15, %v2092_v6  ;;  %v14646_v51 = vpop.f32.mrb[146].mxu0 }
 0x23f   : > { %v2095_v59 = vpop.f32.mrb[147].mxu0  ;;  %v2718_v32 = vadd.f32 %v16896_v56, %v14646_v51  ;;  %v2973_v8 = vmax.f32 %v2717_v21, 0.0 }
 0x240   : > { %v2971_v46 = vmax.f32 %v2715_v20, 0.0  ;;  %v3245_v53 = vadd.f32 %v3244_v13, %v2970_v44  ;;  %v2716_v27 = vadd.f32 %v16889_v40, %v2095_v59 }
 0x241   : > { %14752 = vmatmul.mubr.msk.bf16.gmra.mrb[252].mxu0 %vm1097_vm0, %v1080_v28  ;;  %v2974_v55 = vmax.f32 %v2718_v32, 0.0 }
 0x242   : > { %v3246_v29 = vadd.f32 %v3245_v53, %v2971_v46  ;;  %v2972_v41 = vmax.f32 %v2716_v27, 0.0 }
 0x244   : > { %v3247_v7 = vadd.f32 %v3246_v29, %v2972_v41  ;;  %v14649_v5 = vpop.f32.mrb[148].mxu0  ;;  %v17138_v29 = vld [vmem:[%s21781_s25] sm:$0xff] }
 0x245   : > { %v2108_v42 = vpop.f32.mrb[149].mxu0  ;;  %v2721_v36 = vadd.f32 %v16913_v61, %v14649_v5  ;;  %v17144_v5 = vld [vmem:[%s21781_s25 + $0x10] sm:$0xff] }
 0x246   : > { %v3248_v15 = vadd.f32 %v3247_v7, %v2973_v8  ;;  %v2719_v3 = vadd.f32 %v16907_v39, %v2108_v42  ;;  %v14650_v23 = vpop.f32.mrb[150].mxu0 }
 0x247   : > { %v2111_v30 = vpop.f32.mrb[151].mxu0  ;;  %v2722_v56 = vadd.f32 %v16926_v10, %v14650_v23  ;;  %v2977_v16 = vmax.f32 %v2721_v36, 0.0 }
 0x248   : > { %v2975_v18 = vmax.f32 %v2719_v3, 0.0  ;;  %v3249_v40 = vadd.f32 %v3248_v15, %v2974_v55  ;;  %v2720_v2 = vadd.f32 %v16919_v1, %v2111_v30  ;;  %v17150_v55 = vld [vmem:[%s21781_s25 + $0x8] sm:$0xff]  ;;  %v17156_v30 = vld [vmem:[%s21781_s25 + $0x18] sm:$0xff] }
 0x249   : > { %v2978_v60 = vmax.f32 %v2722_v56, 0.0 }
 0x24a   : > { %v3250_v50 = vadd.f32 %v3249_v40, %v2975_v18  ;;  %v2976_v26 = vmax.f32 %v2720_v2, 0.0 }
 0x24c   : > { %v3251_v38 = vadd.f32 %v3250_v50, %v2976_v26  ;;  %v14653_v52 = vpop.f32.mrb[152].mxu0 }
 0x24d   : > { %v2124_v58 = vpop.f32.mrb[153].mxu0  ;;  %v2725_v61 = vadd.f32 %v16943_v43, %v14653_v52 }
 0x24e   : > { %v3252_v14 = vadd.f32 %v3251_v38, %v2977_v16  ;;  %v2723_v39 = vadd.f32 %v16937_v35, %v2124_v58  ;;  %v14654_v19 = vpop.f32.mrb[154].mxu0  ;;  %v17162_v58 = vld [vmem:[%s21781_s25 + $0x20] sm:$0xff] }
 0x24f   : > { %v2127_v62 = vpop.f32.mrb[155].mxu0  ;;  %v2726_v10 = vadd.f32 %v17039_v45, %v14654_v19  ;;  %v2981_v22 = vmax.f32 %v2725_v61, 0.0 }
 0x250   : > { %v2979_v63 = vmax.f32 %v2723_v39, 0.0  ;;  %v3253_v0 = vadd.f32 %v3252_v14, %v2978_v60  ;;  %v2724_v1 = vadd.f32 %v17032_v37, %v2127_v62  ;;  %v17168_v39 = vld [vmem:[%s21781_s25 + $0x30] sm:$0xff] }
 0x251   : > { %v2982_v11 = vmax.f32 %v2726_v10, 0.0 }
 0x252   : > { %v3254_v9 = vadd.f32 %v3253_v0, %v2979_v63  ;;  %v2980_v31 = vmax.f32 %v2724_v1, 0.0  ;;  %v17174_v1 = vld [vmem:[%s21781_s25 + $0x28] sm:$0xff] }
 0x254   : > { %v3255_v57 = vadd.f32 %v3254_v9, %v2980_v31  ;;  %v14657_v12 = vpop.f32.mrb[156].mxu0 }
 0x255   : > { %v2140_v24 = vpop.f32.mrb[157].mxu0  ;;  %v2729_v43 = vadd.f32 %v17056_v25, %v14657_v12 }
 0x256   : > { %v3256_v4 = vadd.f32 %v3255_v57, %v2981_v22  ;;  %v2727_v35 = vadd.f32 %v17050_v54, %v2140_v24  ;;  %v14658_v34 = vpop.f32.mrb[158].mxu0  ;;  %v17180_v22 = vld [vmem:[%s21781_s25 + $0x38] sm:$0xff] }
 0x257   : > { %v2143_v47 = vpop.f32.mrb[159].mxu0  ;;  %v2730_v13 = vadd.f32 %v17069_v49, %v14658_v34  ;;  %v2985_v51 = vmax.f32 %v2729_v43, 0.0 }
 0x258   : > { %v2983_v17 = vmax.f32 %v2727_v35, 0.0  ;;  %v3257_v6 = vadd.f32 %v3256_v4, %v2982_v11  ;;  %v2728_v28 = vadd.f32 %v17062_v33, %v2143_v47 }
 0x259   : > { %v2986_v53 = vmax.f32 %v2730_v13, 0.0  ;;  %v17192_v13 = vld [vmem:[%s21781_s25 + $0x50] sm:$0xff] }
 0x25a   : > { %v3258_v44 = vadd.f32 %v3257_v6, %v2983_v17  ;;  %v2984_v20 = vmax.f32 %v2728_v28, 0.0  ;;  %v17186_v6 = vld [vmem:[%s21781_s25 + $0x40] sm:$0xff] }
 0x25c   : > { %v3259_v59 = vadd.f32 %v3258_v44, %v2984_v20  ;;  %v14661_v21 = vpop.f32.mrb[160].mxu0 }
 0x25d   : > { %v2156_v46 = vpop.f32.mrb[161].mxu0  ;;  %v2733_v42 = vadd.f32 %v17144_v5, %v14661_v21 }
 0x25e   : > { %v3260_v27 = vadd.f32 %v3259_v59, %v2985_v51  ;;  %v2731_v32 = vadd.f32 %v17138_v29, %v2156_v46  ;;  %v14662_v41 = vpop.f32.mrb[162].mxu0 }
 0x25f   : > { %v2159_v8 = vpop.f32.mrb[163].mxu0  ;;  %v2734_v36 = vadd.f32 %v17156_v30, %v14662_v41  ;;  %v2989_v2 = vmax.f32 %v2733_v42, 0.0 }
 0x260   : > { %v3261_v7 = vadd.f32 %v3260_v27, %v2986_v53  ;;  %v2732_v15 = vadd.f32 %v17150_v55, %v2159_v8  ;;  %v2987_v23 = vmax.f32 %v2731_v32, 0.0  ;;  %v17198_v53 = vld [vmem:[%s21781_s25 + $0x48] sm:$0xff]  ;;  %v17204_v8 = vld [vmem:[%s21781_s25 + $0x58] sm:$0xff] }
 0x261   : > { %v2990_v38 = vmax.f32 %v2734_v36, 0.0 }
 0x262   : > { %v3262_v3 = vrot.slane %v3261_v7, 4  ;;  %v2988_v18 = vmax.f32 %v2732_v15, 0.0 }
 0x264   : > { %v3263_v40 = vadd.f32 %v3262_v3, %v3261_v7  ;;  %v3268_v50 = vadd.f32 %v2988_v18, %v2987_v23  ;;  %v14665_v56 = vpop.f32.mrb[164].mxu0 }
 0x265   : > { %v2172_v26 = vpop.f32.mrb[165].mxu0  ;;  %v2737_v19 = vadd.f32 %v17168_v39, %v14665_v56 }
 0x266   : > { %v3264_v16 = vrot.slane %v3263_v40, 2  ;;  %v3269_v52 = vadd.f32 %v3268_v50, %v2989_v2  ;;  %v2735_v60 = vadd.f32 %v17162_v58, %v2172_v26  ;;  %v14666_v14 = vpop.f32.mrb[166].mxu0  ;;  %v17213_v50 = vld [vmem:[%s21781_s25 + $0x60] sm:$0xff] }
 0x267   : > { %v2175_v62 = vpop.f32.mrb[167].mxu0  ;;  %v2738_v57 = vadd.f32 %v17180_v22, %v14666_v14  ;;  %v2993_v11 = vmax.f32 %v2737_v19, 0.0  ;;  %v17225_v14 = vld [vmem:[%s21781_s25 + $0x68] sm:$0xff] }
 0x268   : > { %v3265_v61 = vadd.f32 %v3264_v16, %v3263_v40  ;;  %v2991_v63 = vmax.f32 %v2735_v60, 0.0  ;;  %v3270_v0 = vadd.f32 %v3269_v52, %v2990_v38  ;;  %v2736_v9 = vadd.f32 %v17174_v1, %v2175_v62 }
 0x269   : > { %v2994_v43 = vmax.f32 %v2738_v57, 0.0 }
 0x26a   : > { %v3266_v10 = vrot.slane %v3265_v61, 1  ;;  %v3271_v31 = vadd.f32 %v3270_v0, %v2991_v63  ;;  %v2992_v12 = vmax.f32 %v2736_v9, 0.0 }
 0x26c   : > { %v3267_v24 = vadd.f32 %v3266_v10, %v3265_v61  ;;  %v3272_v4 = vadd.f32 %v3271_v31, %v2992_v12  ;;  %v14669_v35 = vpop.f32.mrb[168].mxu0  ;;  %v17231_v61 = vld [vmem:[%s21781_s25 + $0x78] sm:$0xff] }
 0x26d   : > { %v2188_v34 = vpop.f32.mrb[169].mxu0  ;;  %v2741_v20 = vadd.f32 %v17192_v13, %v14669_v35 }
 0x26e   : > { %v3384_v47 = vmul.f32 0.00390625, %v3267_v24  ;;  %v3273_v17 = vadd.f32 %v3272_v4, %v2993_v11  ;;  %v2739_v28 = vadd.f32 %v17186_v6, %v2188_v34  ;;  %v14670_v44 = vpop.f32.mrb[170].mxu0  ;;  %v17237_v11 = vld [vmem:[%s21781_s25 + $0x80] sm:$0xff] }
 0x26f   : > { %v2191_v51 = vpop.f32.mrb[171].mxu0  ;;  %v2742_v7 = vadd.f32 %v17204_v8, %v14670_v44  ;;  %v2997_v3 = vmax.f32 %v2741_v20, 0.0  ;;  %v17249_v44 = vld [vmem:[%s21781_s25 + $0x88] sm:$0xff] }
 0x270   : > { %v3392_v59 = vpack.c.bf16 %v3384_v47, %v3384_v47  ;;  %v2995_v21 = vmax.f32 %v2739_v28, 0.0  ;;  %v3274_v46 = vadd.f32 %v3273_v17, %v2994_v43  ;;  %v2740_v27 = vadd.f32 %v17198_v53, %v2191_v51  ;;  %v17243_v47 = vld [vmem:[%s21781_s25 + $0x90] sm:$0xff] }
 0x271   : > { %v2998_v40 = vmax.f32 %v2742_v7, 0.0 }
 0x272   : > { %v3514_v32 = vunpack.c.l.b16 %v3392_v59  ;;  %v3275_v41 = vadd.f32 %v3274_v46, %v2995_v21  ;;  %v2996_v42 = vmax.f32 %v2740_v27, 0.0  ;;  %v17255_v59 = vld [vmem:[%s21781_s25 + $0x98] sm:$0xff] }
 0x274   : > { %v17208_v15 = vsel %vm3524_vm4, %v3514_v32, %v17108_v48  ;;  %v3276_v23 = vadd.f32 %v3275_v41, %v2996_v42  ;;  %v14673_v36 = vpop.f32.mrb[172].mxu0  ;;  %v17219_v48 = vld [vmem:[%s21781_s25 + $0x70] sm:$0xff] }
 0x275   : > { %v2204_v18 = vpop.f32.mrb[173].mxu0  ;;  %v2745_v38 = vadd.f32 %v17219_v48, %v14673_v36 }
 0x276   : > { %v3277_v2 = vadd.f32 %v3276_v23, %v2997_v3  ;;  %v2743_v56 = vadd.f32 %v17213_v50, %v2204_v18  ;;  %v14674_v26 = vpop.f32.mrb[174].mxu0  ;;  %v17261_v23 = vld [vmem:[%s21781_s25 + $0xa0] sm:$0xff] }
 0x277   : > { %v2207_v16 = vpop.f32.mrb[175].mxu0  ;;  %v2746_v63 = vadd.f32 %v17231_v61, %v14674_v26  ;;  %v3001_v9 = vmax.f32 %v2745_v38, 0.0  ;;  %v17273_v38 = vld [vmem:[%s21781_s25 + $0xa8] sm:$0xff] }
 0x278   : > { %v2999_v52 = vmax.f32 %v2743_v56, 0.0  ;;  %v3278_v60 = vadd.f32 %v3277_v2, %v2998_v40  ;;  %v2744_v19 = vadd.f32 %v17225_v14, %v2207_v16  ;;  %v17267_v2 = vld [vmem:[%s21781_s25 + $0xb0] sm:$0xff] }
 0x279   : > { %v3002_v12 = vmax.f32 %v2746_v63, 0.0 }
 0x27a   : > { %v3279_v62 = vadd.f32 %v3278_v60, %v2999_v52  ;;  %v3000_v0 = vmax.f32 %v2744_v19, 0.0  ;;  %v17279_v19 = vld [vmem:[%s21781_s25 + $0xb8] sm:$0xff] }
 0x27c   : > { %v3280_v10 = vadd.f32 %v3279_v62, %v3000_v0  ;;  %v14677_v31 = vpop.f32.mrb[176].mxu0 }
 0x27d   : > { %v2220_v57 = vpop.f32.mrb[177].mxu0  ;;  %v2749_v43 = vadd.f32 %v17243_v47, %v14677_v31 }
 0x27e   : > { %v3281_v24 = vadd.f32 %v3280_v10, %v3001_v9  ;;  %v2747_v4 = vadd.f32 %v17237_v11, %v2220_v57  ;;  %v14678_v35 = vpop.f32.mrb[178].mxu0 }
 0x27f   : > { %v2223_v34 = vpop.f32.mrb[179].mxu0  ;;  %v2750_v21 = vadd.f32 %v17255_v59, %v14678_v35  ;;  %v3005_v27 = vmax.f32 %v2749_v43, 0.0  ;;  %v17291_v43 = vld [vmem:[%s21781_s25 + $0xd0] sm:$0xff] }
 0x280   : > { %v3003_v17 = vmax.f32 %v2747_v4, 0.0  ;;  %v3282_v28 = vadd.f32 %v3281_v24, %v3002_v12  ;;  %v2748_v20 = vadd.f32 %v17249_v44, %v2223_v34  ;;  %v17285_v24 = vld [vmem:[%s21781_s25 + $0xc0] sm:$0xff] }
 0x281   : > { %v3006_v42 = vmax.f32 %v2750_v21, 0.0 }
 0x282   : > { %v3283_v51 = vadd.f32 %v3282_v28, %v3003_v17  ;;  %v3004_v46 = vmax.f32 %v2748_v20, 0.0 }
 0x284   : > { %v3284_v32 = vadd.f32 %v3283_v51, %v3004_v46  ;;  %v14681_v41 = vpop.f32.mrb[180].mxu0 }
 0x285   : > { %v2236_v7 = vpop.f32.mrb[181].mxu0  ;;  %v2753_v56 = vadd.f32 %v17267_v2, %v14681_v41  ;;  %v3400_v41 = vld [vmem:[%s21782_s16 + $0x20] sm:$0xff] }
 0x286   : > { %v3285_v3 = vadd.f32 %v3284_v32, %v3005_v27  ;;  %v2751_v36 = vadd.f32 %v17261_v23, %v2236_v7  ;;  %v14682_v18 = vpop.f32.mrb[182].mxu0  ;;  %v3396_v32 = vld [vmem:[%s21782_s16] sm:$0xff] }
 0x287   : > { %v2239_v40 = vpop.f32.mrb[183].mxu0  ;;  %v2754_v62 = vadd.f32 %v17279_v19, %v14682_v18  ;;  %v3009_v0 = vmax.f32 %v2753_v56, 0.0 }
 0x288   : > { %v3007_v26 = vmax.f32 %v2751_v36, 0.0  ;;  %v3286_v16 = vadd.f32 %v3285_v3, %v3006_v42  ;;  %v2752_v52 = vadd.f32 %v17273_v38, %v2239_v40  ;;  %v13067_v36 = vcombine.high %v3396_v32, %v3400_v41 }
 0x289   : > { %v3010_v57 = vmax.f32 %v2754_v62, 0.0  ;;  %v13066_v40 = vcombine.low %v3396_v32, %v3400_v41  ;;  %v3408_v62 = vld [vmem:[%s21782_s16 + $0x60] sm:$0xff] }
 0x28a   : > { %v3287_v60 = vadd.f32 %v3286_v16, %v3007_v26  ;;  %v3008_v63 = vmax.f32 %v2752_v52, 0.0  ;;  %3854 = vmatprep.subr.bf16.mxu1 %v13067_v36 }
 0x28b   : > { %3855 = vmatpush1.bf16.msra.mxu1 %v13066_v40 }
 0x28c   : > { %v3288_v9 = vadd.f32 %v3287_v60, %v3008_v63  ;;  %v14685_v10 = vpop.f32.mrb[184].mxu0  ;;  %v3404_v60 = vld [vmem:[%s21782_s16 + $0x40] sm:$0xff] }
 0x28d   : > { %v2252_v31 = vpop.f32.mrb[185].mxu0  ;;  %v2757_v17 = vadd.f32 %v17291_v43, %v14685_v10  ;;  %v13075_v10 = vcombine.high %v3404_v60, %v3408_v62 }
 0x28e   : > { %v3289_v12 = vadd.f32 %v3288_v9, %v3009_v0  ;;  %v2755_v4 = vadd.f32 %v17285_v24, %v2252_v31  ;;  %v14686_v35 = vpop.f32.mrb[186].mxu0 }
 0x28f   : > { %v2255_v34 = vpop.f32.mrb[187].mxu0  ;;  %v2758_v46 = vadd.f32 %v17039_v45, %v14686_v35  ;;  %v3013_v7 = vmax.f32 %v2757_v17, 0.0  ;;  %3856 = vmatprep.subr.bf16.mxu1 %v13075_v10  ;;  %v3416_v35 = vld [vmem:[%s21782_s16 + $0xa0] sm:$0xff] }
 0x290   : > { %v3011_v28 = vmax.f32 %v2755_v4, 0.0  ;;  %v3290_v20 = vadd.f32 %v3289_v12, %v3010_v57  ;;  %v2756_v51 = vadd.f32 %v17032_v37, %v2255_v34  ;;  %v14893_v12 = vld [vmem:[%s21715_s6 + $0x8] ss:$16 sps:$4 sm:$0xff]   ;;  %v14895_v4 = vld [vmem:[%s21715_s6 + $0xc] ss:$16 sps:$4 sm:$0xff]  }
 0x291   : > { %v3014_v56 = vmax.f32 %v2758_v46, 0.0  ;;  %8660 = vmatprep.subr.bf16.mxu0 %v14895_v4 }
 0x292   : > { %v3291_v21 = vadd.f32 %v3290_v20, %v3011_v28  ;;  %v3012_v27 = vmax.f32 %v2756_v51, 0.0  ;;  %8661 = vmatpush1.bf16.msra.mxu0 %v14893_v12 }
 0x294   : > { %v3292_v42 = vadd.f32 %v3291_v21, %v3012_v27  ;;  %v14689_v3 = vpop.f32.mrb[188].mxu0 }
 0x295   : > { %v2268_v18 = vpop.f32.mrb[189].mxu0  ;;  %v2761_v16 = vadd.f32 %v17056_v25, %v14689_v3 }
 0x296   : > { %v3293_v37 = vadd.f32 %v3292_v42, %v3013_v7  ;;  %v2759_v26 = vadd.f32 %v17050_v54, %v2268_v18  ;;  %v14690_v45 = vpop.f32.mrb[190].mxu0  ;;  %v13074_v54 = vcombine.low %v3404_v60, %v3408_v62  ;;  %v3420_v7 = vld [vmem:[%s21782_s16 + $0xc0] sm:$0xff] }
 0x297   : > { %v2271_v52 = vpop.f32.mrb[191].mxu0  ;;  %v2762_v57 = vadd.f32 %v17069_v49, %v14690_v45  ;;  %v3017_v49 = vmax.f32 %v2761_v16, 0.0  ;;  %v3424_v42 = vld [vmem:[%s21782_s16 + $0xe0] sm:$0xff] }
 0x298   : > { %v3015_v63 = vmax.f32 %v2759_v26, 0.0  ;;  %v3294_v0 = vadd.f32 %v3293_v37, %v3014_v56  ;;  %v2760_v9 = vadd.f32 %v17062_v33, %v2271_v52  ;;  %3857 = vmatpush1.bf16.msra.mxu1 %v13074_v54  ;;  %v3412_v33 = vld [vmem:[%s21782_s16 + $0x80] sm:$0xff]  ;;  %v13091_v40 = vcombine.high %v3420_v7, %v3424_v42 }
 0x299   : > { %v13083_v28 = vcombine.high %v3412_v33, %v3416_v35  ;;  %v13082_v51 = vcombine.low %v3412_v33, %v3416_v35  ;;  %v3018_v21 = vmax.f32 %v2762_v57, 0.0  ;;  %v13090_v56 = vcombine.low %v3420_v7, %v3424_v42  ;;  %v3428_v52 = vld [vmem:[%s21782_s16 + $0x100] sm:$0xff] }
 0x29a   : > { %v3295_v31 = vadd.f32 %v3294_v0, %v3015_v63  ;;  %v3016_v25 = vmax.f32 %v2760_v9, 0.0  ;;  %v3432_v60 = vld [vmem:[%s21782_s16 + $0x120] sm:$0xff] }
 0x29b   : > { %3858 = vmatprep.subr.bf16.mxu1 %v13083_v28  ;;  %v13099_v10 = vcombine.high %v3428_v52, %v3432_v60 }
 0x29c   : > { %v3296_v34 = vadd.f32 %v3295_v31, %v3016_v25  ;;  %v14693_v17 = vpop.f32.mrb[192].mxu0  ;;  %3859 = vmatpush1.bf16.msra.mxu1 %v13082_v51  ;;  %v13098_v31 = vcombine.low %v3428_v52, %v3432_v60 }
 0x29d   : > { %v2284_v20 = vpop.f32.mrb[193].mxu0  ;;  %v2765_v36 = vadd.f32 %v17144_v5, %v14693_v17  ;;  %3860 = vmatprep.subr.bf16.mxu1 %v13091_v40  ;;  %v3440_v17 = vld [vmem:[%s21782_s16 + $0x160] sm:$0xff] }
 0x29e   : > { %v3297_v46 = vadd.f32 %v3296_v34, %v3017_v49  ;;  %v2763_v27 = vadd.f32 %v17138_v29, %v2284_v20  ;;  %v14694_v32 = vpop.f32.mrb[194].mxu0  ;;  %v3436_v34 = vld [vmem:[%s21782_s16 + $0x140] sm:$0xff] }
 0x29f   : > { %v2287_v41 = vpop.f32.mrb[195].mxu0  ;;  %v2766_v45 = vadd.f32 %v17156_v30, %v14694_v32  ;;  %v3021_v63 = vmax.f32 %v2765_v36, 0.0  ;;  %v3448_v36 = vld [vmem:[%s21782_s16 + $0x1a0] sm:$0xff] }
 0x2a0   : > { %v3298_v3 = vadd.f32 %v3297_v46, %v3018_v21  ;;  %v2764_v18 = vadd.f32 %v17150_v55, %v2287_v41  ;;  %v3019_v26 = vmax.f32 %v2763_v27, 0.0  ;;  %3861 = vmatpush1.bf16.msra.mxu1 %v13090_v56  ;;  %v13107_v46 = vcombine.high %v3436_v34, %v3440_v17 }
 0x2a1   : > { %v3022_v25 = vmax.f32 %v2766_v45, 0.0  ;;  %3862 = vmatprep.subr.bf16.mxu1 %v13099_v10  ;;  %v13106_v27 = vcombine.low %v3436_v34, %v3440_v17 }
 0x2a2   : > { %v3299_v37 = vrot.slane %v3298_v3, 4  ;;  %v3020_v16 = vmax.f32 %v2764_v18, 0.0 }
 0x2a4   : > { %v3300_v62 = vadd.f32 %v3299_v37, %v3298_v3  ;;  %v3305_v0 = vadd.f32 %v3020_v16, %v3019_v26  ;;  %v14697_v9 = vpop.f32.mrb[196].mxu0  ;;  %3863 = vmatpush1.bf16.msra.mxu1 %v13098_v31  ;;  %v3444_v3 = vld [vmem:[%s21782_s16 + $0x180] sm:$0xff] }
 0x2a5   : > { %v2300_v54 = vpop.f32.mrb[197].mxu0  ;;  %v2769_v35 = vadd.f32 %v17168_v39, %v14697_v9  ;;  %3864 = vmatprep.subr.bf16.mxu1 %v13107_v46  ;;  %v13115_v26 = vcombine.high %v3444_v3, %v3448_v36  ;;  %v13114_v16 = vcombine.low %v3444_v3, %v3448_v36  ;;  %v3456_v31 = vld [vmem:[%s21782_s16 + $0x1e0] sm:$0xff]  ;;  %v14898_v3 = vld [vmem:[%s21715_s6 + $0x2c] ss:$16 sps:$4 sm:$0xff]  }
 0x2a6   : > { %v3301_v57 = vrot.slane %v3300_v62, 2  ;;  %v3306_v12 = vadd.f32 %v3305_v0, %v3021_v63  ;;  %v2767_v4 = vadd.f32 %v17162_v58, %v2300_v54  ;;  %v14698_v33 = vpop.f32.mrb[198].mxu0  ;;  %v3452_v54 = vld [vmem:[%s21782_s16 + $0x1c0] sm:$0xff]  ;;  %8662 = vmatprep.subr.bf16.mxu0 %v14898_v3 }
 0x2a7   : > { %v2303_v49 = vpop.f32.mrb[199].mxu0  ;;  %v2770_v7 = vadd.f32 %v17180_v22, %v14698_v33  ;;  %v3025_v40 = vmax.f32 %v2769_v35, 0.0  ;;  %v13123_v33 = vcombine.high %v3452_v54, %v3456_v31  ;;  %v13122_v35 = vcombine.low %v3452_v54, %v3456_v31 }
 0x2a8   : > { %v3302_v28 = vadd.f32 %v3301_v57, %v3300_v62  ;;  %v3023_v20 = vmax.f32 %v2767_v4, 0.0  ;;  %v3307_v51 = vadd.f32 %v3306_v12, %v3022_v25  ;;  %v2768_v21 = vadd.f32 %v17174_v1, %v2303_v49  ;;  %3865 = vmatpush1.bf16.msra.mxu1 %v13106_v27 }
 0x2a9   : > { %v3026_v60 = vmax.f32 %v2770_v7, 0.0  ;;  %3866 = vmatprep.subr.bf16.mxu1 %v13115_v26 }
 0x2aa   : > { %v3303_v32 = vrot.slane %v3302_v28, 1  ;;  %v3308_v41 = vadd.f32 %v3307_v51, %v3023_v20  ;;  %v3024_v42 = vmax.f32 %v2768_v21, 0.0  ;;  %v17369_v20 = vld [vmem:[%s21782_s16 + $0x8] sm:$0xff] }
 0x2ab   : > { %v17374_v51 = vld [vmem:[%s21782_s16 + $0x28] sm:$0xff] }
 0x2ac   : > { %v3304_v18 = vadd.f32 %v3303_v32, %v3302_v28  ;;  %v3309_v56 = vadd.f32 %v3308_v41, %v3024_v42  ;;  %v14701_v37 = vpop.f32.mrb[200].mxu0  ;;  %3867 = vmatpush1.bf16.msra.mxu1 %v13114_v16  ;;  %v13069_v41 = vcombine.high %v17369_v20, %v17374_v51  ;;  %v14896_v42 = vld [vmem:[%s21715_s6 + $0x28] ss:$16 sps:$4 sm:$0xff]  }
 0x2ad   : > { %v2316_v45 = vpop.f32.mrb[201].mxu0  ;;  %v2773_v9 = vadd.f32 %v17192_v13, %v14701_v37  ;;  %3868 = vmatprep.subr.bf16.mxu1 %v13123_v33  ;;  %v21738_v37 = vmov 0   ;;  %8663 = vmatpush1.bf16.msra.mxu0 %v14896_v42 }
 0x2ae   : > { %v3385_v52 = vmul.f32 0.00390625, %v3304_v18  ;;  %v3310_v62 = vadd.f32 %v3309_v56, %v3025_v40  ;;  %v2771_v63 = vadd.f32 %v17186_v6, %v2316_v45  ;;  %v14702_v0 = vpop.f32.mrb[202].mxu0  ;;  %3886 = vmatprep.mubr.bf16.mxu1 %v21738_v37 }
 0x2af   : > { %v2319_v10 = vpop.f32.mrb[203].mxu0  ;;  %v2774_v17 = vadd.f32 %v17204_v8, %v14702_v0  ;;  %v3029_v46 = vmax.f32 %v2773_v9, 0.0 }
 0x2b0   : > { %v3393_v57 = vpack.c.bf16 %v3385_v52, %v3385_v52  ;;  %v3027_v25 = vmax.f32 %v2771_v63, 0.0  ;;  %v3311_v12 = vadd.f32 %v3310_v62, %v3026_v60  ;;  %v2772_v4 = vadd.f32 %v17198_v53, %v2319_v10  ;;  %3869 = vmatpush1.bf16.msra.mxu1 %v13122_v35 }
 0x2b1   : > { %v3030_v36 = vmax.f32 %v2774_v17, 0.0  ;;  %3895 = vmatprep.subr.bf16.mxu1 %v13069_v41 }
 0x2b2   : > { %v3515_v49 = vunpack.c.l.b16 %v3393_v57  ;;  %v3312_v34 = vadd.f32 %v3311_v12, %v3027_v25  ;;  %v3028_v28 = vmax.f32 %v2772_v4, 0.0 }
 0x2b4   : > { %v17377_v21 = vsel %vm3526_vm5, %v3515_v49, %v17208_v15  ;;  %v3313_v27 = vadd.f32 %v3312_v34, %v3028_v28  ;;  %v14705_v32 = vpop.f32.mrb[204].mxu0  ;;  %v13068_v15 = vcombine.low %v17369_v20, %v17374_v51  ;;  %v3429_v20 = vld [vmem:[%s21782_s16 + $0x108] sm:$0xff] }
 0x2b5   : > { %v2332_v7 = vpop.f32.mrb[205].mxu0  ;;  %v2777_v45 = vadd.f32 %v17219_v48, %v14705_v32  ;;  %v3433_v51 = vld [vmem:[%s21782_s16 + $0x128] sm:$0xff] }
 0x2b6   : > { %v3314_v18 = vadd.f32 %v3313_v27, %v3029_v46  ;;  %v2775_v40 = vadd.f32 %v17213_v50, %v2332_v7  ;;  %v14706_v56 = vpop.f32.mrb[206].mxu0 }
 0x2b7   : > { %v2335_v26 = vpop.f32.mrb[207].mxu0  ;;  %v2778_v63 = vadd.f32 %v17231_v61, %v14706_v56  ;;  %v3033_v9 = vmax.f32 %v2777_v45, 0.0 }
 0x2b8   : > { %v3031_v16 = vmax.f32 %v2775_v40, 0.0  ;;  %v3315_v52 = vadd.f32 %v3314_v18, %v3030_v36  ;;  %v2776_v60 = vadd.f32 %v17225_v14, %v2335_v26 }
 0x2b9   : > { %v3034_v57 = vmax.f32 %v2778_v63, 0.0 }
 0x2ba   : > { %v3316_v62 = vadd.f32 %v3315_v52, %v3031_v16  ;;  %v3032_v0 = vmax.f32 %v2776_v60, 0.0 }
 0x2bc   : > { %v3317_v10 = vadd.f32 %v3316_v62, %v3032_v0  ;;  %v14709_v54 = vpop.f32.mrb[208].mxu0 }
 0x2bd   : > { %v2348_v31 = vpop.f32.mrb[209].mxu0  ;;  %v2781_v35 = vadd.f32 %v17243_v47, %v14709_v54 }
 0x2be   : > { %v3318_v25 = vadd.f32 %v3317_v10, %v3033_v9  ;;  %v2779_v12 = vadd.f32 %v17237_v11, %v2348_v31  ;;  %v14710_v4 = vpop.f32.mrb[210].mxu0 }
 0x2bf   : > { %v2351_v33 = vpop.f32.mrb[211].mxu0  ;;  %v2782_v46 = vadd.f32 %v17255_v59, %v14710_v4  ;;  %v3037_v32 = vmax.f32 %v2781_v35, 0.0 }
 0x2c0   : > { %v3035_v49 = vmax.f32 %v2779_v12, 0.0  ;;  %v3319_v34 = vadd.f32 %v3318_v25, %v3034_v57  ;;  %v2780_v17 = vadd.f32 %v17249_v44, %v2351_v33 }
 0x2c1   : > { %v3038_v3 = vmax.f32 %v2782_v46, 0.0  ;;  %v17413_v46 = vld [vmem:[%s21781_s25 + $0xd8] sm:$0xff] }
 0x2c2   : > { %v3320_v28 = vadd.f32 %v3319_v34, %v3035_v49  ;;  %v3036_v27 = vmax.f32 %v2780_v17, 0.0  ;;  %v17407_v34 = vld [vmem:[%s21781_s25 + $0xc8] sm:$0xff] }
 0x2c4   : > { %v3321_v41 = vadd.f32 %v3320_v28, %v3036_v27  ;;  %v14713_v7 = vpop.f32.mrb[212].mxu0 }
 0x2c5   : > { %v2364_v42 = vpop.f32.mrb[213].mxu0  ;;  %v2785_v26 = vadd.f32 %v17267_v2, %v14713_v7 }
 0x2c6   : > { %v3322_v36 = vadd.f32 %v3321_v41, %v3037_v32  ;;  %v2783_v18 = vadd.f32 %v17261_v23, %v2364_v42  ;;  %v14714_v40 = vpop.f32.mrb[214].mxu0 }
 0x2c7   : > { %v2367_v56 = vpop.f32.mrb[215].mxu0  ;;  %v2786_v62 = vadd.f32 %v17279_v19, %v14714_v40  ;;  %v3041_v0 = vmax.f32 %v2785_v26, 0.0  ;;  %v17425_v26 = vld [vmem:[%s21781_s25 + $0xe0] sm:$0xff] }
 0x2c8   : > { %v3039_v45 = vmax.f32 %v2783_v18, 0.0  ;;  %v3323_v16 = vadd.f32 %v3322_v36, %v3038_v3  ;;  %v2784_v52 = vadd.f32 %v17273_v38, %v2367_v56  ;;  %v14899_v3 = vld [vmem:[%s21715_s6 + $0x48] ss:$16 sps:$4 sm:$0xff]   ;;  %v14901_v36 = vld [vmem:[%s21715_s6 + $0x4c] ss:$16 sps:$4 sm:$0xff]  }
 0x2c9   : > { %v3042_v31 = vmax.f32 %v2786_v62, 0.0  ;;  %8664 = vmatprep.subr.bf16.mxu0 %v14901_v36 }
 0x2ca   : > { %v3324_v60 = vadd.f32 %v3323_v16, %v3039_v45  ;;  %v3040_v63 = vmax.f32 %v2784_v52, 0.0  ;;  %8665 = vmatpush1.bf16.msra.mxu0 %v14899_v3 }
 0x2cc   : > { %v3325_v9 = vadd.f32 %v3324_v60, %v3040_v63  ;;  %v14717_v10 = vpop.f32.mrb[216].mxu0  ;;  %v17431_v60 = vld [vmem:[%s21781_s25 + $0xf0] sm:$0xff] }
 0x2cd   : > { %v2380_v54 = vpop.f32.mrb[217].mxu0  ;;  %v2789_v33 = vadd.f32 %v17291_v43, %v14717_v10 }
 0x2ce   : > { %v3326_v57 = vadd.f32 %v3325_v9, %v3041_v0  ;;  %v2787_v25 = vadd.f32 %v17285_v24, %v2380_v54  ;;  %v14718_v12 = vpop.f32.mrb[218].mxu0  ;;  %v17437_v9 = vld [vmem:[%s21781_s25 + $0xe8] sm:$0xff] }
 0x2cf   : > { %v2383_v4 = vpop.f32.mrb[219].mxu0  ;;  %v2790_v27 = vadd.f32 %v17413_v46, %v14718_v12  ;;  %v3045_v41 = vmax.f32 %v2789_v33, 0.0 }
 0x2d0   : > { %v3043_v35 = vmax.f32 %v2787_v25, 0.0  ;;  %v3327_v49 = vadd.f32 %v3326_v57, %v3042_v31  ;;  %v2788_v17 = vadd.f32 %v17407_v34, %v2383_v4  ;;  %v17443_v31 = vld [vmem:[%s21781_s25 + $0xf8] sm:$0xff]  ;;  %s20320_s25 = scalar_lea.vmem [#allocation2], %s17909_s27  ;;  %s12788_s27 = scalar_lea.sflag [#allocation6], %s17883_s20 }
 0x2d1   : > { %v3046_v40 = vmax.f32 %v2790_v27, 0.0 }
 0x2d2   : > { %v3328_v28 = vadd.f32 %v3327_v49, %v3043_v35  ;;  %v3044_v32 = vmax.f32 %v2788_v17, 0.0 }
 0x2d4   : > { %v3329_v7 = vadd.f32 %v3328_v28, %v3044_v32  ;;  %v14721_v42 = vpop.f32.mrb[220].mxu0 }
 0x2d5   : > { %v2396_v18 = vpop.f32.mrb[221].mxu0  ;;  %v2793_v62 = vadd.f32 %v17431_v60, %v14721_v42 }
 0x2d6   : > { %v3330_v56 = vadd.f32 %v3329_v7, %v3045_v41  ;;  %v2791_v45 = vadd.f32 %v17425_v26, %v2396_v18  ;;  %v14722_v16 = vpop.f32.mrb[222].mxu0 }
 0x2d7   : > { %v2399_v52 = vpop.f32.mrb[223].mxu0  ;;  %v2794_v57 = vadd.f32 %v17443_v31, %v14722_v16  ;;  %v3049_v12 = vmax.f32 %v2793_v62, 0.0 }
 0x2d8   : > { %v3047_v63 = vmax.f32 %v2791_v45, 0.0  ;;  %v3331_v0 = vadd.f32 %v3330_v56, %v3046_v40  ;;  %v2792_v10 = vadd.f32 %v17437_v9, %v2399_v52 }
 0x2d9   : > { %v3050_v49 = vmax.f32 %v2794_v57, 0.0 }
 0x2da   : > { %v3332_v54 = vadd.f32 %v3331_v0, %v3047_v63  ;;  %v3048_v25 = vmax.f32 %v2792_v10, 0.0 }
 0x2dc   : > { %v3333_v4 = vadd.f32 %v3332_v54, %v3048_v25  ;;  %v14725_v33 = vpop.f32.mrb[224].mxu0 }
 0x2dd   : > { %v2412_v35 = vpop.f32.mrb[225].mxu0  ;;  %v2797_v7 = vadd.f32 %v17144_v5, %v14725_v33 }
 0x2de   : > { %v3334_v17 = vadd.f32 %v3333_v4, %v3049_v12  ;;  %v2795_v28 = vadd.f32 %v17138_v29, %v2412_v35  ;;  %v14726_v27 = vpop.f32.mrb[226].mxu0 }
 0x2df   : > { %v2415_v32 = vpop.f32.mrb[227].mxu0  ;;  %v2798_v18 = vadd.f32 %v17156_v30, %v14726_v27  ;;  %v3053_v45 = vmax.f32 %v2797_v7, 0.0 }
 0x2e0   : > { %v3335_v41 = vadd.f32 %v3334_v17, %v3050_v49  ;;  %v2796_v42 = vadd.f32 %v17150_v55, %v2415_v32  ;;  %v3051_v36 = vmax.f32 %v2795_v28, 0.0 }
 0x2e1   : > { %v3054_v0 = vmax.f32 %v2798_v18, 0.0 }
 0x2e2   : > { %v3336_v3 = vrot.slane %v3335_v41, 4  ;;  %v3052_v40 = vmax.f32 %v2796_v42, 0.0 }
 0x2e4   : > { %v3337_v56 = vadd.f32 %v3336_v3, %v3335_v41  ;;  %v3342_v16 = vadd.f32 %v3052_v40, %v3051_v36  ;;  %v14729_v52 = vpop.f32.mrb[228].mxu0 }
 0x2e5   : > { %v2428_v62 = vpop.f32.mrb[229].mxu0  ;;  %v2801_v5 = vadd.f32 %v17168_v39, %v14729_v52 }
 0x2e6   : > { %v3338_v63 = vrot.slane %v3337_v56, 2  ;;  %v3343_v29 = vadd.f32 %v3342_v16, %v3053_v45  ;;  %v2799_v10 = vadd.f32 %v17162_v58, %v2428_v62  ;;  %v14730_v54 = vpop.f32.mrb[230].mxu0 }
 0x2e7   : > { %v2431_v57 = vpop.f32.mrb[231].mxu0  ;;  %v2802_v35 = vadd.f32 %v17180_v22, %v14730_v54  ;;  %v3057_v28 = vmax.f32 %v2801_v5, 0.0 }
 0x2e8   : > { %v3339_v55 = vadd.f32 %v3338_v63, %v3337_v56  ;;  %v3055_v25 = vmax.f32 %v2799_v10, 0.0  ;;  %v3344_v12 = vadd.f32 %v3343_v29, %v3054_v0  ;;  %v2800_v30 = vadd.f32 %v17174_v1, %v2431_v57 }
 0x2e9   : > { %v3058_v7 = vmax.f32 %v2802_v35, 0.0 }
 0x2ea   : > { %v3340_v4 = vrot.slane %v3339_v55, 1  ;;  %v3345_v33 = vadd.f32 %v3344_v12, %v3055_v25  ;;  %v3056_v49 = vmax.f32 %v2800_v30, 0.0 }
 0x2ec   : > { %v3341_v17 = vadd.f32 %v3340_v4, %v3339_v55  ;;  %v3346_v27 = vadd.f32 %v3345_v33, %v3056_v49  ;;  %v14733_v32 = vpop.f32.mrb[232].mxu0 }
 0x2ed   : > { %v2444_v41 = vpop.f32.mrb[233].mxu0  ;;  %v2805_v36 = vadd.f32 %v17192_v13, %v14733_v32  ;;  %v14902_v13 = vld [vmem:[%s21715_s6 + $0x68] ss:$16 sps:$4 sm:$0xff]  }
 0x2ee   : > { %v3386_v58 = vmul.f32 0.00390625, %v3341_v17  ;;  %v3347_v42 = vadd.f32 %v3346_v27, %v3057_v28  ;;  %v2803_v39 = vadd.f32 %v17186_v6, %v2444_v41  ;;  %v14734_v3 = vpop.f32.mrb[234].mxu0 }
 0x2ef   : > { %v2447_v18 = vpop.f32.mrb[235].mxu0  ;;  %v2806_v52 = vadd.f32 %v17204_v8, %v14734_v3  ;;  %v3061_v0 = vmax.f32 %v2805_v36, 0.0 }
 0x2f0   : > { %v3394_v1 = vpack.c.bf16 %v3386_v58, %v3386_v58  ;;  %v3059_v40 = vmax.f32 %v2803_v39, 0.0  ;;  %v3348_v56 = vadd.f32 %v3347_v42, %v3058_v7  ;;  %v2804_v22 = vadd.f32 %v17198_v53, %v2447_v18  ;;  %v14904_v53 = vld [vmem:[%s21715_s6 + $0x6c] ss:$16 sps:$4 sm:$0xff]  }
 0x2f1   : > { %v3062_v54 = vmax.f32 %v2806_v52, 0.0  ;;  %8666 = vmatprep.subr.bf16.mxu0 %v14904_v53 }
 0x2f2   : > { %v3516_v45 = vunpack.c.l.b16 %v3394_v1  ;;  %v3349_v16 = vadd.f32 %v3348_v56, %v3059_v40  ;;  %v3060_v62 = vmax.f32 %v2804_v22, 0.0  ;;  %8667 = vmatpush1.bf16.msra.mxu0 %v14902_v13 }
 0x2f4   : > { %v17459_v63 = vsel %vm3528_vm6, %v3516_v45, %v17377_v21  ;;  %v3350_v6 = vadd.f32 %v3349_v16, %v3060_v62  ;;  %v14737_v29 = vpop.f32.mrb[236].mxu0 }
 0x2f5   : > { %v2460_v10 = vpop.f32.mrb[237].mxu0  ;;  %v2809_v55 = vadd.f32 %v17219_v48, %v14737_v29 }
 0x2f6   : > { %v3351_v5 = vadd.f32 %v3350_v6, %v3061_v0  ;;  %v2807_v8 = vadd.f32 %v17213_v50, %v2460_v10  ;;  %v14738_v57 = vpop.f32.mrb[238].mxu0 }
 0x2f7   : > { %v2463_v21 = vpop.f32.mrb[239].mxu0  ;;  %v2810_v33 = vadd.f32 %v17231_v61, %v14738_v57  ;;  %v3065_v49 = vmax.f32 %v2809_v55, 0.0 }
 0x2f8   : > { %v3063_v25 = vmax.f32 %v2807_v8, 0.0  ;;  %v3352_v12 = vadd.f32 %v3351_v5, %v3062_v54  ;;  %v2808_v30 = vadd.f32 %v17225_v14, %v2463_v21 }
 0x2f9   : > { %v3066_v32 = vmax.f32 %v2810_v33, 0.0 }
 0x2fa   : > { %v3353_v4 = vadd.f32 %v3352_v12, %v3063_v25  ;;  %v3064_v35 = vmax.f32 %v2808_v30, 0.0 }
 0x2fc   : > { %v3354_v17 = vadd.f32 %v3353_v4, %v3064_v35  ;;  %v14741_v28 = vpop.f32.mrb[240].mxu0 }
 0x2fd   : > { %v2476_v27 = vpop.f32.mrb[241].mxu0  ;;  %v2813_v48 = vadd.f32 %v17243_v47, %v14741_v28 }
 0x2fe   : > { %v3355_v50 = vadd.f32 %v3354_v17, %v3065_v49  ;;  %v2811_v41 = vadd.f32 %v17237_v11, %v2476_v27  ;;  %v14742_v58 = vpop.f32.mrb[242].mxu0  ;;  %v14905_v49 = vld [vmem:[%s21715_s6 + $0x88] ss:$16 sps:$4 sm:$0xff]  }
 0x2ff   : > { %v2479_v7 = vpop.f32.mrb[243].mxu0  ;;  %v2814_v61 = vadd.f32 %v17255_v59, %v14742_v58  ;;  %v3069_v18 = vmax.f32 %v2813_v48, 0.0 }
 0x300   : > { %v3067_v42 = vmax.f32 %v2811_v41, 0.0  ;;  %v3356_v39 = vadd.f32 %v3355_v50, %v3066_v32  ;;  %v2812_v14 = vadd.f32 %v17249_v44, %v2479_v7 }
 0x301   : > { %v3070_v22 = vmax.f32 %v2814_v61, 0.0 }
 0x302   : > { %v3357_v3 = vadd.f32 %v3356_v39, %v3067_v42  ;;  %v3068_v36 = vmax.f32 %v2812_v14, 0.0 }
 0x304   : > { %v3358_v1 = vadd.f32 %v3357_v3, %v3068_v36  ;;  %v14745_v40 = vpop.f32.mrb[244].mxu0 }
 0x305   : > { %v2492_v56 = vpop.f32.mrb[245].mxu0  ;;  %v2817_v47 = vadd.f32 %v17267_v2, %v14745_v40 }
 0x306   : > { %v3359_v45 = vadd.f32 %v3358_v1, %v3069_v18  ;;  %v2815_v11 = vadd.f32 %v17261_v23, %v2492_v56  ;;  %v14746_v16 = vpop.f32.mrb[246].mxu0 }
 0x307   : > { %v2495_v52 = vpop.f32.mrb[247].mxu0  ;;  %v2818_v59 = vadd.f32 %v17279_v19, %v14746_v16  ;;  %v3073_v13 = vmax.f32 %v2817_v47, 0.0  ;;  %v14910_v47 = vld [vmem:[%s21715_s6 + $0xac] ss:$16 sps:$4 sm:$0xff]  }
 0x308   : > { %v3071_v62 = vmax.f32 %v2815_v11, 0.0  ;;  %v3360_v0 = vadd.f32 %v3359_v45, %v3070_v22  ;;  %v2816_v44 = vadd.f32 %v17273_v38, %v2495_v52  ;;  %v14908_v52 = vld [vmem:[%s21715_s6 + $0xa8] ss:$16 sps:$4 sm:$0xff]  }
 0x309   : > { %v3074_v5 = vmax.f32 %v2818_v59, 0.0 }
 0x30a   : > { %v3361_v6 = vadd.f32 %v3360_v0, %v3071_v62  ;;  %v3072_v29 = vmax.f32 %v2816_v44, 0.0  ;;  %v3413_v44 = vld [vmem:[%s21782_s16 + $0x88] sm:$0xff] }
 0x30c   : > { %v3362_v53 = vadd.f32 %v3361_v6, %v3072_v29  ;;  %v14749_v10 = vpop.f32.mrb[248].mxu0  ;;  %v3417_v6 = vld [vmem:[%s21782_s16 + $0xa8] sm:$0xff] }
 0x30d   : > { %v2508_v54 = vpop.f32.mrb[249].mxu0  ;;  %v2821_v2 = vadd.f32 %v17291_v43, %v14749_v10  ;;  %v13085_v59 = vcombine.high %v3413_v44, %v3417_v6  ;;  %v3421_v29 = vld [vmem:[%s21782_s16 + $0xc8] sm:$0xff] }
 0x30e   : > { %v3363_v8 = vadd.f32 %v3362_v53, %v3073_v13  ;;  %v2819_v23 = vadd.f32 %v17285_v24, %v2508_v54  ;;  %v14750_v57 = vpop.f32.mrb[250].mxu0  ;;  %v14907_v24 = vld [vmem:[%s21715_s6 + $0x8c] ss:$16 sps:$4 sm:$0xff]   ;;  %v13084_v53 = vcombine.low %v3413_v44, %v3417_v6  ;;  %v13101_v54 = vcombine.high %v3429_v20, %v3433_v51 }
 0x30f   : > { %v2511_v21 = vpop.f32.mrb[251].mxu0  ;;  %v2822_v19 = vadd.f32 %v17413_v46, %v14750_v57  ;;  %v3077_v4 = vmax.f32 %v2821_v2, 0.0  ;;  %8668 = vmatprep.subr.bf16.mxu0 %v14907_v24  ;;  %v3425_v13 = vld [vmem:[%s21782_s16 + $0xe8] sm:$0xff]  ;;  %v3406_v24 = vld [vmem:[%s21782_s16 + $0x50] sm:$0xff]  ;;  %v3407_v44 = vld [vmem:[%s21782_s16 + $0x58] sm:$0xff] }
 0x310   : > { %v3075_v55 = vmax.f32 %v2819_v23, 0.0  ;;  %v3364_v25 = vadd.f32 %v3363_v8, %v3074_v5  ;;  %v2820_v38 = vadd.f32 %v17407_v34, %v2511_v21  ;;  %8669 = vmatpush1.bf16.msra.mxu0 %v14905_v49  ;;  %v13093_v10 = vcombine.high %v3421_v29, %v3425_v13  ;;  %v3437_v5 = vld [vmem:[%s21782_s16 + $0x148] sm:$0xff]  ;;  %v3411_v6 = vld [vmem:[%s21782_s16 + $0x78] sm:$0xff] }
 0x311   : > { %v3078_v17 = vmax.f32 %v2822_v19, 0.0  ;;  %8670 = vmatprep.subr.bf16.mxu0 %v14910_v47  ;;  %v3441_v8 = vld [vmem:[%s21782_s16 + $0x168] sm:$0xff]  ;;  %v13100_v23 = vcombine.low %v3429_v20, %v3433_v51  ;;  %v13080_v20 = vcombine.low %v3407_v44, %v3411_v6 }
 0x312   : > { %v3365_v12 = vadd.f32 %v3364_v25, %v3075_v55  ;;  %v3076_v30 = vmax.f32 %v2820_v38, 0.0  ;;  %v13109_v57 = vcombine.high %v3437_v5, %v3441_v8  ;;  %v3445_v21 = vld [vmem:[%s21782_s16 + $0x188] sm:$0xff]  ;;  %v13108_v55 = vcombine.low %v3437_v5, %v3441_v8 }
 0x313   : > { %v3449_v2 = vld [vmem:[%s21782_s16 + $0x1a8] sm:$0xff] }
 0x314   : > { %v3366_v33 = vadd.f32 %v3365_v12, %v3076_v30  ;;  %v14753_v35 = vpop.f32.mrb[252].mxu0  ;;  %8671 = vmatpush1.bf16.msra.mxu0 %v14908_v52  ;;  %v13117_v25 = vcombine.high %v3445_v21, %v3449_v2  ;;  %v3453_v38 = vld [vmem:[%s21782_s16 + $0x1c8] sm:$0xff]  ;;  %v13116_v19 = vcombine.low %v3445_v21, %v3449_v2  ;;  %v3403_v52 = vld [vmem:[%s21782_s16 + $0x38] sm:$0xff] }
 0x315   : > { %v2524_v43 = vpop.f32.mrb[253].mxu0  ;;  %v2825_v32 = vadd.f32 %v17431_v60, %v14753_v35  ;;  %v3457_v12 = vld [vmem:[%s21782_s16 + $0x1e8] sm:$0xff] }
 0x316   : > { %v3367_v28 = vadd.f32 %v3366_v33, %v3077_v4  ;;  %v2823_v34 = vadd.f32 %v17425_v26, %v2524_v43  ;;  %v14754_v27 = vpop.f32.mrb[254].mxu0  ;;  %v13125_v30 = vcombine.high %v3453_v38, %v3457_v12  ;;  %v3398_v4 = vld [vmem:[%s21782_s16 + $0x10] sm:$0xff]  ;;  %v13124_v35 = vcombine.low %v3453_v38, %v3457_v12 }
 0x317   : > { %v2527_v46 = vpop.f32.mrb[255].mxu0  ;;  %v2826_v48 = vadd.f32 %v17443_v31, %v14754_v27  ;;  %v3081_v39 = vmax.f32 %v2825_v32, 0.0  ;;  %v3409_v31 = vld [vmem:[%s21782_s16 + $0x68] sm:$0xff]  ;;  %v3402_v33 = vld [vmem:[%s21782_s16 + $0x30] sm:$0xff] }
 0x318   : > { %v3079_v50 = vmax.f32 %v2823_v34, 0.0  ;;  %v3368_v41 = vadd.f32 %v3367_v28, %v3078_v17  ;;  %v2824_v58 = vadd.f32 %v17437_v9, %v2527_v46  ;;  %v3405_v9 = vld [vmem:[%s21782_s16 + $0x48] sm:$0xff]  ;;  %v13071_v49 = vcombine.high %v3398_v4, %v3402_v33  ;;  %v3410_v43 = vld [vmem:[%s21782_s16 + $0x70] sm:$0xff] }
 0x319   : > { %v3082_v3 = vmax.f32 %v2826_v48, 0.0  ;;  %v13077_v0 = vcombine.high %v3405_v9, %v3409_v31  ;;  %v13070_v17 = vcombine.low %v3398_v4, %v3402_v33  ;;  %v14911_v28 = vld [vmem:[%s21715_s6 + $0xc8] ss:$16 sps:$4 sm:$0xff]   ;;  %v14913_v34 = vld [vmem:[%s21715_s6 + $0xcc] ss:$16 sps:$4 sm:$0xff]   ;;  %v13079_v27 = vcombine.high %v3406_v24, %v3410_v43  ;;  %v3414_v46 = vld [vmem:[%s21782_s16 + $0x90] sm:$0xff] }
 0x31a   : > { %v3369_v7 = vadd.f32 %v3368_v41, %v3079_v50  ;;  %v3080_v42 = vmax.f32 %v2824_v58, 0.0  ;;  %v3418_v32 = vld [vmem:[%s21782_s16 + $0xb0] sm:$0xff]  ;;  %8672 = vmatprep.subr.bf16.mxu0 %v14913_v34  ;;  %v13078_v50 = vcombine.low %v3406_v24, %v3410_v43 }
 0x31b   : > { %8673 = vmatpush1.bf16.msra.mxu0 %v14911_v28  ;;  %v13087_v41 = vcombine.high %v3414_v46, %v3418_v32  ;;  %v3422_v58 = vld [vmem:[%s21782_s16 + $0xd0] sm:$0xff]  ;;  %v13086_v48 = vcombine.low %v3414_v46, %v3418_v32  ;;  %v4034_v28 = vld [vmem:[%s21783_s4 + $0x40] sm:$0xff] }
 0x31c   : > { %v3370_v14 = vadd.f32 %v3369_v7, %v3080_v42  ;;  %v3426_v7 = vld [vmem:[%s21782_s16 + $0xf0] sm:$0xff]  ;;  %v4042_v46 = vld [vmem:[%s21783_s4 + $0x80] sm:$0xff] }
 0x31d   : > { %v13095_v42 = vcombine.high %v3422_v58, %v3426_v7  ;;  %v4050_v32 = vld [vmem:[%s21783_s4 + $0xc0] sm:$0xff] }
 0x31e   : > { %v3371_v61 = vadd.f32 %v3370_v14, %v3081_v39  ;;  %v3430_v39 = vld [vmem:[%s21782_s16 + $0x110] sm:$0xff] }
 0x31f   : > { %v3434_v14 = vld [vmem:[%s21782_s16 + $0x130] sm:$0xff] }
 0x320   : > { %v3372_v36 = vadd.f32 %v3371_v61, %v3082_v3  ;;  %v13094_v3 = vcombine.low %v3422_v58, %v3426_v7  ;;  %v13103_v61 = vcombine.high %v3430_v39, %v3434_v14  ;;  %v14919_v58 = vld [vmem:[%s21715_s6 + $0x10c] ss:$16 sps:$4 sm:$0xff]   ;;  %v13147_v7 = vcombine.high %v4042_v46, %v4050_v32 }
 0x322   : > { %v3373_v26 = vrot.slane %v3372_v36, 4 }
 0x324   : > { %v3374_v18 = vadd.f32 %v3373_v26, %v3372_v36  ;;  %v3438_v36 = vld [vmem:[%s21782_s16 + $0x150] sm:$0xff] }
 0x325   : > { %v3442_v26 = vld [vmem:[%s21782_s16 + $0x170] sm:$0xff] }
 0x326   : > { %v3375_v1 = vrot.slane %v3374_v18, 2 }
 0x328   : > { %v3376_v40 = vadd.f32 %v3375_v1, %v3374_v18  ;;  %v13102_v18 = vcombine.low %v3430_v39, %v3434_v14  ;;  %v13111_v1 = vcombine.high %v3438_v36, %v3442_v26  ;;  %v13146_v39 = vcombine.low %v4042_v46, %v4050_v32 }
 0x32a   : > { %v3377_v56 = vrot.slane %v3376_v40, 1 }
 0x32c   : > { %v3378_v22 = vadd.f32 %v3377_v56, %v3376_v40  ;;  %v3446_v40 = vld [vmem:[%s21782_s16 + $0x190] sm:$0xff] }
 0x32d   : > { %v3450_v56 = vld [vmem:[%s21782_s16 + $0x1b0] sm:$0xff] }
 0x32e   : > { %v3387_v60 = vmul.f32 0.00390625, %v3378_v22  ;;  %v13110_v22 = vcombine.low %v3438_v36, %v3442_v26 }
 0x330   : > { %v3395_v45 = vpack.c.bf16 %v3387_v60, %v3387_v60  ;;  %v13119_v60 = vcombine.high %v3446_v40, %v3450_v56 }
 0x332   : > { %v3517_v11 = vunpack.c.l.b16 %v3395_v45  ;;  %v3454_v45 = vld [vmem:[%s21782_s16 + $0x1d0] sm:$0xff] }
 0x334   : > { %v3531_v16 = vsel %vm3530_vm7, %v3517_v11, %v17459_v63  ;;  %v13076_v63 = vcombine.low %v3405_v9, %v3409_v31  ;;  %v3458_v11 = vld [vmem:[%s21782_s16 + $0x1f0] sm:$0xff]  ;;  %v13118_v9 = vcombine.low %v3446_v40, %v3450_v56 }
 0x335   : > { %v17506_v62 = vpack.c.b16 %v3531_v16, %v3531_v16  ;;  %v13127_v31 = vcombine.high %v3454_v45, %v3458_v11  ;;  %v3399_v16 = vld [vmem:[%s21782_s16 + $0x18] sm:$0xff]  ;;  %v13126_v47 = vcombine.low %v3454_v45, %v3458_v11 }
 0x337   : > { %3887 = vmatmul.mubr.bf16.vlgmr.msra.gmra.mrb[0].mxu1 %v17506_v62 }
 0x338   : > { %3896 = vmatpush1.bf16.msra.mxu1 %v13068_v15  ;;  %3927 = vmatprep.mubr.bf16.mxu1 %v21738_v37  ;;  %v13092_v15 = vcombine.low %v3421_v29, %v3425_v13  ;;  %v14916_v29 = vld [vmem:[%s21715_s6 + $0xec] ss:$16 sps:$4 sm:$0xff]   ;;  %v13081_v13 = vcombine.high %v3407_v44, %v3411_v6 }
 0x339   : > { %3897 = vmatprep.subr.bf16.mxu1 %v13077_v0  ;;  %v13073_v0 = vcombine.high %v3399_v16, %v3403_v52  ;;  %8674 = vmatprep.subr.bf16.mxu0 %v14916_v29 }
 0x33c   : > { %3898 = vmatpush1.bf16.msra.mxu1 %v13076_v63  ;;  %v13072_v63 = vcombine.low %v3399_v16, %v3403_v52 }
 0x33d   : > { %3899 = vmatprep.subr.bf16.mxu1 %v13085_v59  ;;  %v14914_v59 = vld [vmem:[%s21715_s6 + $0xe8] ss:$16 sps:$4 sm:$0xff]  }
 0x33e   : > { %8675 = vmatpush1.bf16.msra.mxu0 %v14914_v59  ;;  %v4035_v59 = vld [vmem:[%s21783_s4 + $0x48] sm:$0xff] }
 0x33f   : > { %8676 = vmatprep.subr.bf16.mxu0 %v14919_v58 }
 0x340   : > { %3900 = vmatpush1.bf16.msra.mxu1 %v13084_v53  ;;  %v3415_v53 = vld [vmem:[%s21782_s16 + $0x98] sm:$0xff] }
 0x341   : > { %3901 = vmatprep.subr.bf16.mxu1 %v13093_v10  ;;  %v3419_v10 = vld [vmem:[%s21782_s16 + $0xb8] sm:$0xff] }
 0x342   : > { %v13089_v51 = vcombine.high %v3415_v53, %v3419_v10  ;;  %v13088_v5 = vcombine.low %v3415_v53, %v3419_v10  ;;  %v4043_v53 = vld [vmem:[%s21783_s4 + $0x88] sm:$0xff] }
 0x343   : > { %v4051_v10 = vld [vmem:[%s21783_s4 + $0xc8] sm:$0xff] }
 0x344   : > { %3902 = vmatpush1.bf16.msra.mxu1 %v13092_v15  ;;  %v3423_v15 = vld [vmem:[%s21782_s16 + $0xd8] sm:$0xff] }
 0x345   : > { %3903 = vmatprep.subr.bf16.mxu1 %v13101_v54  ;;  %v3427_v54 = vld [vmem:[%s21782_s16 + $0xf8] sm:$0xff] }
 0x346   : > { %v13097_v8 = vcombine.high %v3423_v15, %v3427_v54  ;;  %v13096_v21 = vcombine.low %v3423_v15, %v3427_v54  ;;  %v14922_v15 = vld [vmem:[%s21715_s6 + $0x12c] ss:$16 sps:$4 sm:$0xff]   ;;  %v13149_v54 = vcombine.high %v4043_v53, %v4051_v10 }
 0x348   : > { %3904 = vmatpush1.bf16.msra.mxu1 %v13100_v23  ;;  %v3431_v23 = vld [vmem:[%s21782_s16 + $0x118] sm:$0xff] }
 0x349   : > { %3905 = vmatprep.subr.bf16.mxu1 %v13109_v57  ;;  %v3435_v57 = vld [vmem:[%s21782_s16 + $0x138] sm:$0xff] }
 0x34a   : > { %v13105_v2 = vcombine.high %v3431_v23, %v3435_v57  ;;  %v13104_v38 = vcombine.low %v3431_v23, %v3435_v57  ;;  %v13148_v23 = vcombine.low %v4043_v53, %v4051_v10 }
 0x34c   : > { %3906 = vmatpush1.bf16.msra.mxu1 %v13108_v55  ;;  %v3439_v55 = vld [vmem:[%s21782_s16 + $0x158] sm:$0xff] }
 0x34d   : > { %3907 = vmatprep.subr.bf16.mxu1 %v13117_v25  ;;  %v3443_v25 = vld [vmem:[%s21782_s16 + $0x178] sm:$0xff] }
 0x34e   : > { %v13113_v12 = vcombine.high %v3439_v55, %v3443_v25  ;;  %v13112_v4 = vcombine.low %v3439_v55, %v3443_v25 }
 0x350   : > { %3908 = vmatpush1.bf16.msra.mxu1 %v13116_v19  ;;  %v3447_v19 = vld [vmem:[%s21782_s16 + $0x198] sm:$0xff] }
 0x351   : > { %3909 = vmatprep.subr.bf16.mxu1 %v13125_v30  ;;  %v3451_v30 = vld [vmem:[%s21782_s16 + $0x1b8] sm:$0xff] }
 0x352   : > { %v13121_v33 = vcombine.high %v3447_v19, %v3451_v30  ;;  %v13120_v24 = vcombine.low %v3447_v19, %v3451_v30 }
 0x354   : > { %3910 = vmatpush1.bf16.msra.mxu1 %v13124_v35  ;;  %v3455_v35 = vld [vmem:[%s21782_s16 + $0x1d8] sm:$0xff] }
 0x355   : > { %3936 = vmatprep.subr.bf16.mxu1 %v13071_v49  ;;  %v3459_v49 = vld [vmem:[%s21782_s16 + $0x1f8] sm:$0xff] }
 0x356   : > { %v13129_v43 = vcombine.high %v3455_v35, %v3459_v49  ;;  %v13128_v34 = vcombine.low %v3455_v35, %v3459_v49 }
 0x357   : > { %3928 = vmatmul.mubr.bf16.vlgmr.msra.gmra.mrb[4].mxu1 %v17506_v62 }
 0x358   : > { %3937 = vmatpush1.bf16.msra.mxu1 %v13070_v17  ;;  %3968 = vmatprep.mubr.bf16.mxu1 %v21738_v37  ;;  %v4026_v17 = vld [vmem:[%s21783_s4] sm:$0xff] }
 0x359   : > { %3938 = vmatprep.subr.bf16.mxu1 %v13079_v27  ;;  %v13131_v27 = vcombine.high %v4026_v17, %v4034_v28 }
 0x35c   : > { %3939 = vmatpush1.bf16.msra.mxu1 %v13078_v50  ;;  %v13130_v50 = vcombine.low %v4026_v17, %v4034_v28 }
 0x35d   : > { %3940 = vmatprep.subr.bf16.mxu1 %v13087_v41  ;;  %v14917_v41 = vld [vmem:[%s21715_s6 + $0x108] ss:$16 sps:$4 sm:$0xff]  }
 0x35e   : > { %8677 = vmatpush1.bf16.msra.mxu0 %v14917_v41  ;;  %v4036_v41 = vld [vmem:[%s21783_s4 + $0x50] sm:$0xff] }
 0x35f   : > { %8678 = vmatprep.subr.bf16.mxu0 %v14922_v15 }
 0x360   : > { %3941 = vmatpush1.bf16.msra.mxu1 %v13086_v48  ;;  %v4058_v48 = vld [vmem:[%s21783_s4 + $0x100] sm:$0xff] }
 0x361   : > { %3942 = vmatprep.subr.bf16.mxu1 %v13095_v42  ;;  %v4066_v42 = vld [vmem:[%s21783_s4 + $0x140] sm:$0xff] }
 0x362   : > { %v13163_v14 = vcombine.high %v4058_v48, %v4066_v42  ;;  %v13162_v36 = vcombine.low %v4058_v48, %v4066_v42  ;;  %v4044_v48 = vld [vmem:[%s21783_s4 + $0x90] sm:$0xff] }
 0x363   : > { %v4052_v42 = vld [vmem:[%s21783_s4 + $0xd0] sm:$0xff] }
 0x364   : > { %3943 = vmatpush1.bf16.msra.mxu1 %v13094_v3  ;;  %v4074_v3 = vld [vmem:[%s21783_s4 + $0x180] sm:$0xff] }
 0x365   : > { %3944 = vmatprep.subr.bf16.mxu1 %v13103_v61  ;;  %v4082_v61 = vld [vmem:[%s21783_s4 + $0x1c0] sm:$0xff] }
 0x366   : > { %v13179_v26 = vcombine.high %v4074_v3, %v4082_v61  ;;  %v13178_v40 = vcombine.low %v4074_v3, %v4082_v61  ;;  %v14925_v3 = vld [vmem:[%s21715_s6 + $0x14c] ss:$16 sps:$4 sm:$0xff]   ;;  %v13151_v61 = vcombine.high %v4044_v48, %v4052_v42 }
 0x368   : > { %3945 = vmatpush1.bf16.msra.mxu1 %v13102_v18  ;;  %v4090_v18 = vld [vmem:[%s21783_s4 + $0x200] sm:$0xff] }
 0x369   : > { %3946 = vmatprep.subr.bf16.mxu1 %v13111_v1  ;;  %v4098_v1 = vld [vmem:[%s21783_s4 + $0x240] sm:$0xff] }
 0x36a   : > { %v13195_v56 = vcombine.high %v4090_v18, %v4098_v1  ;;  %v13194_v45 = vcombine.low %v4090_v18, %v4098_v1  ;;  %v13150_v18 = vcombine.low %v4044_v48, %v4052_v42  ;;  %v14932_v48 = vld [vmem:[%s21715_s6 + $0x1a8] ss:$16 sps:$4 sm:$0xff]   ;;  %v14934_v42 = vld [vmem:[%s21715_s6 + $0x1ac] ss:$16 sps:$4 sm:$0xff]  }
 0x36c   : > { %3947 = vmatpush1.bf16.msra.mxu1 %v13110_v22  ;;  %v4106_v22 = vld [vmem:[%s21783_s4 + $0x280] sm:$0xff] }
 0x36d   : > { %3948 = vmatprep.subr.bf16.mxu1 %v13119_v60  ;;  %v4114_v60 = vld [vmem:[%s21783_s4 + $0x2c0] sm:$0xff] }
 0x36e   : > { %v13211_v11 = vcombine.high %v4106_v22, %v4114_v60  ;;  %v13210_v16 = vcombine.low %v4106_v22, %v4114_v60 }
 0x370   : > { %3949 = vmatpush1.bf16.msra.mxu1 %v13118_v9  ;;  %v4122_v9 = vld [vmem:[%s21783_s4 + $0x300] sm:$0xff] }
 0x371   : > { %3950 = vmatprep.subr.bf16.mxu1 %v13127_v31  ;;  %v4130_v31 = vld [vmem:[%s21783_s4 + $0x340] sm:$0xff] }
 0x372   : > { %v13227_v52 = vcombine.high %v4122_v9, %v4130_v31  ;;  %v13226_v44 = vcombine.low %v4122_v9, %v4130_v31 }
 0x374   : > { %3951 = vmatpush1.bf16.msra.mxu1 %v13126_v47  ;;  %v4138_v47 = vld [vmem:[%s21783_s4 + $0x380] sm:$0xff] }
 0x375   : > { %3977 = vmatprep.subr.bf16.mxu1 %v13073_v0  ;;  %v4146_v0 = vld [vmem:[%s21783_s4 + $0x3c0] sm:$0xff] }
 0x376   : > { %v13243_v6 = vcombine.high %v4138_v47, %v4146_v0  ;;  %v13242_v29 = vcombine.low %v4138_v47, %v4146_v0 }
 0x377   : > { %3969 = vmatmul.mubr.bf16.vlgmr.msra.gmra.mrb[8].mxu1 %v17506_v62 }
 0x378   : > { %3978 = vmatpush1.bf16.msra.mxu1 %v13072_v63  ;;  %4009 = vmatprep.mubr.bf16.mxu1 %v21738_v37  ;;  %v4027_v63 = vld [vmem:[%s21783_s4 + $0x8] sm:$0xff] }
 0x379   : > { %3979 = vmatprep.subr.bf16.mxu1 %v13081_v13  ;;  %v13133_v13 = vcombine.high %v4027_v63, %v4035_v59 }
 0x37c   : > { %3980 = vmatpush1.bf16.msra.mxu1 %v13080_v20  ;;  %v13132_v20 = vcombine.low %v4027_v63, %v4035_v59 }
 0x37d   : > { %3981 = vmatprep.subr.bf16.mxu1 %v13089_v51  ;;  %v14920_v51 = vld [vmem:[%s21715_s6 + $0x128] ss:$16 sps:$4 sm:$0xff]  }
 0x37e   : > { %8679 = vmatpush1.bf16.msra.mxu0 %v14920_v51  ;;  %v4037_v51 = vld [vmem:[%s21783_s4 + $0x58] sm:$0xff] }
 0x37f   : > { %8680 = vmatprep.subr.bf16.mxu0 %v14925_v3  ;;  %v4133_v3 = vld [vmem:[%s21783_s4 + $0x358] sm:$0xff] }
 0x380   : > { %3982 = vmatpush1.bf16.msra.mxu1 %v13088_v5  ;;  %v4059_v5 = vld [vmem:[%s21783_s4 + $0x108] sm:$0xff] }
 0x381   : > { %3983 = vmatprep.subr.bf16.mxu1 %v13097_v8  ;;  %v4067_v8 = vld [vmem:[%s21783_s4 + $0x148] sm:$0xff] }
 0x382   : > { %v13165_v57 = vcombine.high %v4059_v5, %v4067_v8  ;;  %v13164_v55 = vcombine.low %v4059_v5, %v4067_v8  ;;  %v4045_v5 = vld [vmem:[%s21783_s4 + $0x98] sm:$0xff] }
 0x383   : > { %v4053_v8 = vld [vmem:[%s21783_s4 + $0xd8] sm:$0xff] }
 0x384   : > { %3984 = vmatpush1.bf16.msra.mxu1 %v13096_v21  ;;  %v4075_v21 = vld [vmem:[%s21783_s4 + $0x188] sm:$0xff] }
 0x385   : > { %3985 = vmatprep.subr.bf16.mxu1 %v13105_v2  ;;  %v4083_v2 = vld [vmem:[%s21783_s4 + $0x1c8] sm:$0xff] }
 0x386   : > { %v13181_v25 = vcombine.high %v4075_v21, %v4083_v2  ;;  %v13180_v19 = vcombine.low %v4075_v21, %v4083_v2  ;;  %v14928_v21 = vld [vmem:[%s21715_s6 + $0x16c] ss:$16 sps:$4 sm:$0xff]   ;;  %v13153_v2 = vcombine.high %v4045_v5, %v4053_v8 }
 0x388   : > { %3986 = vmatpush1.bf16.msra.mxu1 %v13104_v38  ;;  %v4091_v38 = vld [vmem:[%s21783_s4 + $0x208] sm:$0xff] }
 0x389   : > { %3987 = vmatprep.subr.bf16.mxu1 %v13113_v12  ;;  %v4099_v12 = vld [vmem:[%s21783_s4 + $0x248] sm:$0xff] }
 0x38a   : > { %v13197_v30 = vcombine.high %v4091_v38, %v4099_v12  ;;  %v13196_v35 = vcombine.low %v4091_v38, %v4099_v12  ;;  %v13152_v38 = vcombine.low %v4045_v5, %v4053_v8 }
 0x38c   : > { %3988 = vmatpush1.bf16.msra.mxu1 %v13112_v4  ;;  %v4107_v4 = vld [vmem:[%s21783_s4 + $0x288] sm:$0xff] }
 0x38d   : > { %3989 = vmatprep.subr.bf16.mxu1 %v13121_v33  ;;  %v4115_v33 = vld [vmem:[%s21783_s4 + $0x2c8] sm:$0xff] }
 0x38e   : > { %v13213_v49 = vcombine.high %v4107_v4, %v4115_v33  ;;  %v13212_v17 = vcombine.low %v4107_v4, %v4115_v33  ;;  %v21737_v4 = vlaneseq }
 0x390   : > { %3990 = vmatpush1.bf16.msra.mxu1 %v13120_v24  ;;  %v4123_v24 = vld [vmem:[%s21783_s4 + $0x308] sm:$0xff] }
 0x391   : > { %3991 = vmatprep.subr.bf16.mxu1 %v13129_v43  ;;  %v4131_v43 = vld [vmem:[%s21783_s4 + $0x348] sm:$0xff] }
 0x392   : > { %v13229_v28 = vcombine.high %v4123_v24, %v4131_v43  ;;  %v13228_v46 = vcombine.low %v4123_v24, %v4131_v43  ;;  %v4101_v24 = vld [vmem:[%s21783_s4 + $0x258] sm:$0xff]  ;;  %v17868_v43 = vshrl.u32 %v21737_v4, 7 }
 0x394   : > { %3992 = vmatpush1.bf16.msra.mxu1 %v13128_v34  ;;  %v4139_v34 = vld [vmem:[%s21783_s4 + $0x388] sm:$0xff] }
 0x395   : > { %4878 = vmatprep.subr.bf16.mxu1 %v13131_v27  ;;  %v4147_v27 = vld [vmem:[%s21783_s4 + $0x3c8] sm:$0xff] }
 0x396   : > { %v13245_v32 = vcombine.high %v4139_v34, %v4147_v27  ;;  %v13244_v58 = vcombine.low %v4139_v34, %v4147_v27  ;;  %v14931_v34 = vld [vmem:[%s21715_s6 + $0x18c] ss:$16 sps:$4 sm:$0xff]  }
 0x397   : > { %4010 = vmatmul.mubr.bf16.vlgmr.msra.gmra.mrb[12].mxu1 %v17506_v62 }
 0x398   : > { %4879 = vmatpush1.bf16.msra.mxu1 %v13130_v50  ;;  %4910 = vmatprep.mubr.bf16.mxu1 %v21738_v37  ;;  %v4028_v50 = vld [vmem:[%s21783_s4 + $0x10] sm:$0xff] }
 0x399   : > { %4880 = vmatprep.subr.bf16.mxu1 %v13147_v7  ;;  %v13135_v7 = vcombine.high %v4028_v50, %v4036_v41 }
 0x39c   : > { %4881 = vmatpush1.bf16.msra.mxu1 %v13146_v39  ;;  %v13134_v39 = vcombine.low %v4028_v50, %v4036_v41  ;;  %v17886_v50 = vsub.s32 0, %v17868_v43 }
 0x39d   : > { %4882 = vmatprep.subr.bf16.mxu1 %v13163_v14  ;;  %v14923_v14 = vld [vmem:[%s21715_s6 + $0x148] ss:$16 sps:$4 sm:$0xff]  }
 0x39e   : > { %8681 = vmatpush1.bf16.msra.mxu0 %v14923_v14  ;;  %21784 = vst [vmem:[#allocation14_spill] sm:$0xff] %v17886_v50  ;;  %v4125_v14 = vld [vmem:[%s21783_s4 + $0x318] sm:$0xff] }
 0x39f   : > { %8682 = vmatprep.subr.bf16.mxu0 %v14928_v21 }
 0x3a0   : > { %4883 = vmatpush1.bf16.msra.mxu1 %v13162_v36  ;;  %v4060_v36 = vld [vmem:[%s21783_s4 + $0x110] sm:$0xff] }
 0x3a1   : > { %4884 = vmatprep.subr.bf16.mxu1 %v13179_v26  ;;  %v4068_v26 = vld [vmem:[%s21783_s4 + $0x150] sm:$0xff] }
 0x3a2   : > { %v13167_v1 = vcombine.high %v4060_v36, %v4068_v26  ;;  %v13166_v22 = vcombine.low %v4060_v36, %v4068_v26 }
 0x3a4   : > { %4885 = vmatpush1.bf16.msra.mxu1 %v13178_v40  ;;  %v4076_v40 = vld [vmem:[%s21783_s4 + $0x190] sm:$0xff] }
 0x3a5   : > { %4886 = vmatprep.subr.bf16.mxu1 %v13195_v56  ;;  %v4084_v56 = vld [vmem:[%s21783_s4 + $0x1d0] sm:$0xff] }
 0x3a6   : > { %v13183_v60 = vcombine.high %v4076_v40, %v4084_v56  ;;  %v13182_v9 = vcombine.low %v4076_v40, %v4084_v56  ;;  %v14935_v40 = vld [vmem:[%s21715_s6 + $0x1c8] ss:$16 sps:$4 sm:$0xff]  }
 0x3a8   : > { %4887 = vmatpush1.bf16.msra.mxu1 %v13194_v45  ;;  %v4092_v45 = vld [vmem:[%s21783_s4 + $0x210] sm:$0xff] }
 0x3a9   : > { %4888 = vmatprep.subr.bf16.mxu1 %v13211_v11  ;;  %v4100_v11 = vld [vmem:[%s21783_s4 + $0x250] sm:$0xff] }
 0x3aa   : > { %v13199_v31 = vcombine.high %v4092_v45, %v4100_v11  ;;  %v13198_v47 = vcombine.low %v4092_v45, %v4100_v11 }
 0x3ac   : > { %4889 = vmatpush1.bf16.msra.mxu1 %v13210_v16  ;;  %v4108_v16 = vld [vmem:[%s21783_s4 + $0x290] sm:$0xff] }
 0x3ad   : > { %4890 = vmatprep.subr.bf16.mxu1 %v13227_v52  ;;  %v4116_v52 = vld [vmem:[%s21783_s4 + $0x2d0] sm:$0xff] }
 0x3ae   : > { %v13215_v0 = vcombine.high %v4108_v16, %v4116_v52  ;;  %v13214_v63 = vcombine.low %v4108_v16, %v4116_v52  ;;  %v13232_v16 = vcombine.low %v4125_v14, %v4133_v3  ;;  %v14940_v52 = vld [vmem:[%s21715_s6 + $0x1ec] ss:$16 sps:$4 sm:$0xff]  }
 0x3b0   : > { %4891 = vmatpush1.bf16.msra.mxu1 %v13226_v44  ;;  %v4124_v44 = vld [vmem:[%s21783_s4 + $0x310] sm:$0xff] }
 0x3b1   : > { %4892 = vmatprep.subr.bf16.mxu1 %v13243_v6  ;;  %v4132_v6 = vld [vmem:[%s21783_s4 + $0x350] sm:$0xff] }
 0x3b2   : > { %v13231_v59 = vcombine.high %v4124_v44, %v4132_v6  ;;  %v13230_v53 = vcombine.low %v4124_v44, %v4132_v6  ;;  %v14938_v44 = vld [vmem:[%s21715_s6 + $0x1e8] ss:$16 sps:$4 sm:$0xff]   ;;  %v4030_v6 = vld [vmem:[%s21783_s4 + $0x20] sm:$0xff] }
 0x3b4   : > { %4893 = vmatpush1.bf16.msra.mxu1 %v13242_v29  ;;  %v4140_v29 = vld [vmem:[%s21783_s4 + $0x390] sm:$0xff] }
 0x3b5   : > { %4919 = vmatprep.subr.bf16.mxu1 %v13133_v13  ;;  %v4148_v13 = vld [vmem:[%s21783_s4 + $0x3d0] sm:$0xff] }
 0x3b6   : > { %v13247_v10 = vcombine.high %v4140_v29, %v4148_v13  ;;  %v13246_v15 = vcombine.low %v4140_v29, %v4148_v13  ;;  %v14943_v29 = vld [vmem:[%s21715_s6 + $0x20c] ss:$16 sps:$4 sm:$0xff]  }
 0x3b7   : > { %4911 = vmatmul.mubr.bf16.vlgmr.msra.gmra.mrb[16].mxu1 %v17506_v62 }
 0x3b8   : > { %4920 = vmatpush1.bf16.msra.mxu1 %v13132_v20  ;;  %4951 = vmatprep.mubr.bf16.mxu1 %v21738_v37  ;;  %v4029_v20 = vld [vmem:[%s21783_s4 + $0x18] sm:$0xff] }
 0x3b9   : > { %4921 = vmatprep.subr.bf16.mxu1 %v13149_v54  ;;  %v13137_v54 = vcombine.high %v4029_v20, %v4037_v51 }
 0x3bc   : > { %4922 = vmatpush1.bf16.msra.mxu1 %v13148_v23  ;;  %v13136_v23 = vcombine.low %v4029_v20, %v4037_v51 }
 0x3bd   : > { %4923 = vmatprep.subr.bf16.mxu1 %v13165_v57  ;;  %v14926_v57 = vld [vmem:[%s21715_s6 + $0x168] ss:$16 sps:$4 sm:$0xff]  }
 0x3be   : > { %8683 = vmatpush1.bf16.msra.mxu0 %v14926_v57  ;;  %v4086_v57 = vld [vmem:[%s21783_s4 + $0x1e0] sm:$0xff] }
 0x3bf   : > { %8684 = vmatprep.subr.bf16.mxu0 %v14931_v34 }
 0x3c0   : > { %4924 = vmatpush1.bf16.msra.mxu1 %v13164_v55  ;;  %v4061_v55 = vld [vmem:[%s21783_s4 + $0x118] sm:$0xff] }
 0x3c1   : > { %4925 = vmatprep.subr.bf16.mxu1 %v13181_v25  ;;  %v4069_v25 = vld [vmem:[%s21783_s4 + $0x158] sm:$0xff] }
 0x3c2   : > { %v13169_v12 = vcombine.high %v4061_v55, %v4069_v25  ;;  %v13168_v33 = vcombine.low %v4061_v55, %v4069_v25  ;;  %v4094_v55 = vld [vmem:[%s21783_s4 + $0x220] sm:$0xff] }
 0x3c3   : > { %v4102_v25 = vld [vmem:[%s21783_s4 + $0x260] sm:$0xff] }
 0x3c4   : > { %4926 = vmatpush1.bf16.msra.mxu1 %v13180_v19  ;;  %v4077_v19 = vld [vmem:[%s21783_s4 + $0x198] sm:$0xff] }
 0x3c5   : > { %4927 = vmatprep.subr.bf16.mxu1 %v13197_v30  ;;  %v4085_v30 = vld [vmem:[%s21783_s4 + $0x1d8] sm:$0xff] }
 0x3c8   : > { %4928 = vmatpush1.bf16.msra.mxu1 %v13196_v35  ;;  %v13185_v35 = vcombine.high %v4077_v19, %v4085_v30 }
 0x3c9   : > { %4929 = vmatprep.subr.bf16.mxu1 %v13213_v49  ;;  %v4093_v49 = vld [vmem:[%s21783_s4 + $0x218] sm:$0xff] }
 0x3ca   : > { %v13201_v27 = vcombine.high %v4093_v49, %v4101_v24  ;;  %v13200_v41 = vcombine.low %v4093_v49, %v4101_v24  ;;  %v17983_v49 = vsub.s32 3, %v17868_v43 }
 0x3cc   : > { %4930 = vmatpush1.bf16.msra.mxu1 %v13212_v17  ;;  %v13184_v17 = vcombine.low %v4077_v19, %v4085_v30  ;;  %v4110_v19 = vld [vmem:[%s21783_s4 + $0x2a0] sm:$0xff]  ;;  %21788 = vst [vmem:[#allocation17_spill] sm:$0xff] %v17983_v49 }
 0x3cd   : > { %4931 = vmatprep.subr.bf16.mxu1 %v13229_v28  ;;  %v14929_v28 = vld [vmem:[%s21715_s6 + $0x188] ss:$16 sps:$4 sm:$0xff]   ;;  %v4118_v30 = vld [vmem:[%s21783_s4 + $0x2e0] sm:$0xff] }
 0x3ce   : > { %8685 = vmatpush1.bf16.msra.mxu0 %v14929_v28  ;;  %v13219_v24 = vcombine.high %v4110_v19, %v4118_v30  ;;  %v4134_v28 = vld [vmem:[%s21783_s4 + $0x360] sm:$0xff] }
 0x3cf   : > { %8686 = vmatprep.subr.bf16.mxu0 %v14934_v42  ;;  %v4150_v42 = vld [vmem:[%s21783_s4 + $0x3e0] sm:$0xff] }
 0x3d0   : > { %4932 = vmatpush1.bf16.msra.mxu1 %v13228_v46  ;;  %v4109_v46 = vld [vmem:[%s21783_s4 + $0x298] sm:$0xff] }
 0x3d1   : > { %4933 = vmatprep.subr.bf16.mxu1 %v13245_v32  ;;  %v4117_v32 = vld [vmem:[%s21783_s4 + $0x2d8] sm:$0xff] }
 0x3d2   : > { %8687 = vmatpush1.bf16.msra.mxu0 %v14932_v48  ;;  %v13216_v36 = vcombine.low %v4109_v46, %v4117_v32  ;;  %v4142_v48 = vld [vmem:[%s21783_s4 + $0x3a0] sm:$0xff] }
 0x3d4   : > { %4934 = vmatpush1.bf16.msra.mxu1 %v13244_v58  ;;  %v17891_v58 = vld [vmem:[%s21785_s17] sm:$0xff]  ;;  %s16088_s17 = smov [#allocation5]  }
 0x3d5   : > { %4960 = vmatprep.subr.bf16.mxu1 %v13135_v7  ;;  %v17894_v7 = vsub.s32 1, %v17868_v43  ;;  %s15994_s29 = sshll.u32 %s16088_s17, 4  ;;  %s15995_s29 = int_to_ptr.vmem [resolvable:$false] %s15994_s29 }
 0x3d6   : > { %s15996_s16 = scalar_lea.vmem %s15995_s29, 2048  ;;  %p15997_p3 = scmp.lt.s32.totalorder %s12817_s26, %s15995_s29 }
 0x3d7   : > { %4952 = vmatmul.mubr.bf16.vlgmr.msra.gmra.mrb[20].mxu1 %v17506_v62  ;;  %21786 = vst [vmem:[#allocation15_spill] sm:$0xff] %v17894_v7  ;;  %v3469_v26 = vrot.slane %v17891_v58, %v17894_v7  ;;  %p15998_p4 = scmp.lt.s32.totalorder %s15996_s16, %s15990_s21 }
 0x3d8   : > { %4961 = vmatpush1.bf16.msra.mxu1 %v13134_v39  ;;  %4992 = vmatprep.mubr.bf16.mxu1 %v21738_v37  ;;  %v13217_v39 = vcombine.high %v4109_v46, %v4117_v32  ;;  %v13218_v46 = vcombine.low %v4110_v19, %v4118_v30 }
 0x3d9   : > { %4962 = vmatprep.subr.bf16.mxu1 %v13151_v61  ;;  %v3465_v61 = vrot.slane %v17891_v58, %v17886_v50  ;;  %p15999_p5 = por %p15998_p4, %p15997_p3 }
 0x3db   : > { %p16000_p7 = pnand %p15999_p5, %p15993_p2 }
 0x3dc   : > { %4963 = vmatpush1.bf16.msra.mxu1 %v13150_v18  ;;  %v14937_v18 = vld [vmem:[%s21715_s6 + $0x1cc] ss:$16 sps:$4 sm:$0xff]  }
 0x3dd   : > { %4964 = vmatprep.subr.bf16.mxu1 %v13167_v1  ;;  %v13233_v1 = vcombine.high %v4125_v14, %v4133_v3  ;;  %8688 = vmatprep.subr.bf16.mxu0 %v14937_v18  ;;  %v13251_v18 = vcombine.high %v4142_v48, %v4150_v42 }
 0x3de   : > { %8689 = vmatpush1.bf16.msra.mxu0 %v14935_v40  ;;  %v4039_v40 = vld [vmem:[%s21783_s4 + $0x68] sm:$0xff] }
 0x3df   : > { %8690 = vmatprep.subr.bf16.mxu0 %v14940_v52 }
 0x3e0   : > { %4965 = vmatpush1.bf16.msra.mxu1 %v13166_v22  ;;  %v4141_v22 = vld [vmem:[%s21783_s4 + $0x398] sm:$0xff] }
 0x3e1   : > { %4966 = vmatprep.subr.bf16.mxu1 %v13183_v60  ;;  %v4149_v60 = vld [vmem:[%s21783_s4 + $0x3d8] sm:$0xff] }
 0x3e2   : > { %8691 = vmatpush1.bf16.msra.mxu0 %v14938_v44  ;;  %v4087_v44 = vld [vmem:[%s21783_s4 + $0x1e8] sm:$0xff] }
 0x3e3   : > { %8701 = vmatprep.subr.bf16.mxu0 %v14943_v29  ;;  %v4103_v29 = vld [vmem:[%s21783_s4 + $0x268] sm:$0xff] }
 0x3e4   : > { %4967 = vmatpush1.bf16.msra.mxu1 %v13182_v9 }
 0x3e5   : > { %4968 = vmatprep.subr.bf16.mxu1 %v13199_v31 }
 0x3e8   : > { %4969 = vmatpush1.bf16.msra.mxu1 %v13198_v47 }
 0x3e9   : > { %4970 = vmatprep.subr.bf16.mxu1 %v13215_v0  ;;  %v13249_v0 = vcombine.high %v4141_v22, %v4149_v60 }
 0x3ec   : > { %4971 = vmatpush1.bf16.msra.mxu1 %v13214_v63  ;;  %v4038_v63 = vld [vmem:[%s21783_s4 + $0x60] sm:$0xff] }
 0x3ed   : > { %4972 = vmatprep.subr.bf16.mxu1 %v13231_v59  ;;  %v13248_v59 = vcombine.low %v4141_v22, %v4149_v60  ;;  %v13139_v13 = vcombine.high %v4030_v6, %v4038_v63  ;;  %v13138_v20 = vcombine.low %v4030_v6, %v4038_v63  ;;  %v4047_v60 = vld [vmem:[%s21783_s4 + $0xa8] sm:$0xff] }
 0x3f0   : > { %4973 = vmatpush1.bf16.msra.mxu1 %v13230_v53  ;;  %v4046_v53 = vld [vmem:[%s21783_s4 + $0xa0] sm:$0xff] }
 0x3f1   : > { %4974 = vmatprep.subr.bf16.mxu1 %v13247_v10  ;;  %v4054_v10 = vld [vmem:[%s21783_s4 + $0xe0] sm:$0xff] }
 0x3f2   : > { %v13155_v51 = vcombine.high %v4046_v53, %v4054_v10  ;;  %v13154_v5 = vcombine.low %v4046_v53, %v4054_v10  ;;  %v4111_v10 = vld [vmem:[%s21783_s4 + $0x2a8] sm:$0xff] }
 0x3f4   : > { %4975 = vmatpush1.bf16.msra.mxu1 %v13246_v15  ;;  %v4062_v15 = vld [vmem:[%s21783_s4 + $0x120] sm:$0xff] }
 0x3f5   : > { %5001 = vmatprep.subr.bf16.mxu1 %v13137_v54  ;;  %v4070_v54 = vld [vmem:[%s21783_s4 + $0x160] sm:$0xff] }
 0x3f6   : > { %v13171_v8 = vcombine.high %v4062_v15, %v4070_v54  ;;  %v13170_v21 = vcombine.low %v4062_v15, %v4070_v54  ;;  %v18045_v54 = vsub.s32 5, %v17868_v43 }
 0x3f7   : > { %4993 = vmatmul.mubr.bf16.vlgmr.msra.gmra.mrb[24].mxu1 %v17506_v62 }
 0x3f8   : > { %5002 = vmatpush1.bf16.msra.mxu1 %v13136_v23  ;;  %5033 = vmatprep.mubr.bf16.mxu1 %v21738_v37  ;;  %v4078_v23 = vld [vmem:[%s21783_s4 + $0x1a0] sm:$0xff]  ;;  %21790 = vst [vmem:[#allocation19_spill] sm:$0xff] %v18045_v54 }
 0x3f9   : > { %5003 = vmatprep.subr.bf16.mxu1 %v13153_v2  ;;  %v13187_v2 = vcombine.high %v4078_v23, %v4086_v57 }
 0x3fc   : > { %5004 = vmatpush1.bf16.msra.mxu1 %v13152_v38  ;;  %v13186_v38 = vcombine.low %v4078_v23, %v4086_v57  ;;  %v4135_v23 = vld [vmem:[%s21783_s4 + $0x368] sm:$0xff] }
 0x3fd   : > { %5005 = vmatprep.subr.bf16.mxu1 %v13169_v12  ;;  %v13203_v12 = vcombine.high %v4094_v55, %v4102_v25 }
 0x400   : > { %5006 = vmatpush1.bf16.msra.mxu1 %v13168_v33  ;;  %v17980_v33 = vsub.s32 2, %v17868_v43 }
 0x401   : > { %5007 = vmatprep.subr.bf16.mxu1 %v13185_v35  ;;  %v13202_v35 = vcombine.low %v4094_v55, %v4102_v25 }
 0x402   : > { %21787 = vst [vmem:[#allocation16_spill] sm:$0xff] %v17980_v33  ;;  %v3473_v34 = vrot.slane %v17891_v58, %v17980_v33 }
 0x404   : > { %5008 = vmatpush1.bf16.msra.mxu1 %v13184_v17  ;;  %v4126_v17 = vld [vmem:[%s21783_s4 + $0x320] sm:$0xff] }
 0x405   : > { %5009 = vmatprep.subr.bf16.mxu1 %v13201_v27  ;;  %v3477_v27 = vrot.slane %v17891_v58, %v17983_v49  ;;  %v13235_v32 = vcombine.high %v4126_v17, %v4134_v28 }
 0x408   : > { %5010 = vmatpush1.bf16.msra.mxu1 %v13200_v41 }
 0x409   : > { %5011 = vmatprep.subr.bf16.mxu1 %v13217_v39 }
 0x40a   : > { %v3888_v56 = vpop.f32.mrb[0].mxu1 }
 0x40b   : > { %v3889_v45 = vadd.f32 %v3888_v56, %v3465_v61  ;;  %v3890_v11 = vpop.f32.mrb[1].mxu1  ;;  %v13250_v56 = vcombine.low %v4142_v48, %v4150_v42  ;;  %v4048_v48 = vld [vmem:[%s21783_s4 + $0xb0] sm:$0xff] }
 0x40c   : > { %v3891_v9 = vadd.f32 %v3890_v11, %v3469_v26  ;;  %5012 = vmatpush1.bf16.msra.mxu1 %v13216_v36  ;;  %v3892_v31 = vpop.f32.mrb[2].mxu1  ;;  %v13234_v36 = vcombine.low %v4126_v17, %v4134_v28  ;;  %v4056_v42 = vld [vmem:[%s21783_s4 + $0xf0] sm:$0xff] }
 0x40d   : > { %4018 = vst [vmem:[%s17931_s24] sm:$0xff] %v3889_v45  ;;  %v3893_v47 = vpop.f32.mrb[3].mxu1  ;;  %5013 = vmatprep.subr.bf16.mxu1 %v13233_v1  ;;  %v4031_v1 = vld [vmem:[%s21783_s4 + $0x28] sm:$0xff] }
 0x40e   : > { %4019 = vst [vmem:[%s17931_s24 + $0x8] sm:$0xff] %v3891_v9  ;;  %v13141_v22 = vcombine.high %v4031_v1, %v4039_v40  ;;  %v4055_v45 = vld [vmem:[%s21783_s4 + $0xe8] sm:$0xff]  ;;  %v13140_v11 = vcombine.low %v4031_v1, %v4039_v40  ;;  %v4088_v1 = vld [vmem:[%s21783_s4 + $0x1f0] sm:$0xff] }
 0x40f   : > { %v13157_v9 = vcombine.high %v4047_v60, %v4055_v45  ;;  %v4063_v31 = vld [vmem:[%s21783_s4 + $0x128] sm:$0xff]  ;;  %v13156_v52 = vcombine.low %v4047_v60, %v4055_v45  ;;  %v4104_v60 = vld [vmem:[%s21783_s4 + $0x270] sm:$0xff] }
 0x410   : > { %5014 = vmatpush1.bf16.msra.mxu1 %v13232_v16  ;;  %v4071_v16 = vld [vmem:[%s21783_s4 + $0x168] sm:$0xff] }
 0x411   : > { %5015 = vmatprep.subr.bf16.mxu1 %v13249_v0  ;;  %v13173_v47 = vcombine.high %v4063_v31, %v4071_v16  ;;  %v4079_v0 = vld [vmem:[%s21783_s4 + $0x1a8] sm:$0xff]  ;;  %v13172_v6 = vcombine.low %v4063_v31, %v4071_v16  ;;  %v4120_v31 = vld [vmem:[%s21783_s4 + $0x2f0] sm:$0xff]  ;;  %v18104_v16 = vsub.s32 6, %v17868_v43 }
 0x412   : > { %v13189_v63 = vcombine.high %v4079_v0, %v4087_v44 }
 0x413   : > { %21791 = vst [vmem:[#allocation20_spill] sm:$0xff] %v18104_v16 }
 0x414   : > { %5016 = vmatpush1.bf16.msra.mxu1 %v13248_v59  ;;  %v4095_v59 = vld [vmem:[%s21783_s4 + $0x228] sm:$0xff] }
 0x415   : > { %5042 = vmatprep.subr.bf16.mxu1 %v13139_v13  ;;  %v13188_v13 = vcombine.low %v4079_v0, %v4087_v44  ;;  %v13205_v53 = vcombine.high %v4095_v59, %v4103_v29  ;;  %v13204_v15 = vcombine.low %v4095_v59, %v4103_v29  ;;  %v4128_v44 = vld [vmem:[%s21783_s4 + $0x330] sm:$0xff] }
 0x417   : > { %5034 = vmatmul.mubr.bf16.vlgmr.msra.gmra.mrb[28].mxu1 %v17506_v62 }
 0x418   : > { %5043 = vmatpush1.bf16.msra.mxu1 %v13138_v20  ;;  %5074 = vmatprep.mubr.bf16.mxu1 %v21738_v37  ;;  %v4119_v20 = vld [vmem:[%s21783_s4 + $0x2e8] sm:$0xff] }
 0x419   : > { %5044 = vmatprep.subr.bf16.mxu1 %v13155_v51  ;;  %v18042_v51 = vsub.s32 4, %v17868_v43 }
 0x41b   : > { %21789 = vst [vmem:[#allocation18_spill] sm:$0xff] %v18042_v51  ;;  %v3481_v57 = vrot.slane %v17891_v58, %v18042_v51 }
 0x41c   : > { %5045 = vmatpush1.bf16.msra.mxu1 %v13154_v5  ;;  %v13221_v5 = vcombine.high %v4111_v10, %v4119_v20 }
 0x41d   : > { %5046 = vmatprep.subr.bf16.mxu1 %v13171_v8  ;;  %v4127_v8 = vld [vmem:[%s21783_s4 + $0x328] sm:$0xff] }
 0x41e   : > { %v13237_v55 = vcombine.high %v4127_v8, %v4135_v23  ;;  %v13236_v17 = vcombine.low %v4127_v8, %v4135_v23 }
 0x420   : > { %5047 = vmatpush1.bf16.msra.mxu1 %v13170_v21  ;;  %v3485_v21 = vrot.slane %v17891_v58, %v18045_v54 }
 0x421   : > { %5048 = vmatprep.subr.bf16.mxu1 %v13187_v2  ;;  %v13220_v2 = vcombine.low %v4111_v10, %v4119_v20  ;;  %v4152_v10 = vld [vmem:[%s21783_s4 + $0x3f0] sm:$0xff] }
 0x424   : > { %5049 = vmatpush1.bf16.msra.mxu1 %v13186_v38  ;;  %v4143_v38 = vld [vmem:[%s21783_s4 + $0x3a8] sm:$0xff] }
 0x425   : > { %5050 = vmatprep.subr.bf16.mxu1 %v13203_v12  ;;  %v4151_v12 = vld [vmem:[%s21783_s4 + $0x3e8] sm:$0xff] }
 0x428   : > { %5051 = vmatpush1.bf16.msra.mxu1 %v13202_v35 }
 0x429   : > { %5052 = vmatprep.subr.bf16.mxu1 %v13219_v24 }
 0x42a   : > { %v3929_v41 = vpop.f32.mrb[4].mxu1 }
 0x42b   : > { %v3930_v39 = vadd.f32 %v3929_v41, %v3473_v34  ;;  %v3931_v14 = vpop.f32.mrb[5].mxu1  ;;  %v13253_v34 = vcombine.high %v4143_v38, %v4151_v12 }
 0x42c   : > { %v3932_v3 = vadd.f32 %v3931_v14, %v3477_v27  ;;  %v3933_v61 = vpop.f32.mrb[6].mxu1  ;;  %5053 = vmatpush1.bf16.msra.mxu1 %v13218_v46  ;;  %v4032_v27 = vld [vmem:[%s21783_s4 + $0x30] sm:$0xff]  ;;  %v13159_v14 = vcombine.high %v4048_v48, %v4056_v42 }
 0x42d   : > { %4020 = vst [vmem:[%s17931_s24 + $0x10] sm:$0xff] %v3930_v39  ;;  %v3934_v26 = vpop.f32.mrb[7].mxu1  ;;  %5054 = vmatprep.subr.bf16.mxu1 %v13235_v32  ;;  %v4040_v46 = vld [vmem:[%s21783_s4 + $0x70] sm:$0xff]  ;;  %v13252_v32 = vcombine.low %v4143_v38, %v4151_v12  ;;  %v4049_v38 = vld [vmem:[%s21783_s4 + $0xb8] sm:$0xff] }
 0x42e   : > { %4021 = vst [vmem:[%s17931_s24 + $0x18] sm:$0xff] %v3932_v3  ;;  %v13143_v41 = vcombine.high %v4032_v27, %v4040_v46  ;;  %v13142_v39 = vcombine.low %v4032_v27, %v4040_v46  ;;  %v4064_v3 = vld [vmem:[%s21783_s4 + $0x130] sm:$0xff]  ;;  %v4057_v12 = vld [vmem:[%s21783_s4 + $0xf8] sm:$0xff] }
 0x42f   : > { %v4072_v61 = vld [vmem:[%s21783_s4 + $0x170] sm:$0xff]  ;;  %v4089_v27 = vld [vmem:[%s21783_s4 + $0x1f8] sm:$0xff] }
 0x430   : > { %5055 = vmatpush1.bf16.msra.mxu1 %v13234_v36  ;;  %v13158_v36 = vcombine.low %v4048_v48, %v4056_v42  ;;  %v13175_v26 = vcombine.high %v4064_v3, %v4072_v61  ;;  %v13174_v40 = vcombine.low %v4064_v3, %v4072_v61  ;;  %v4105_v48 = vld [vmem:[%s21783_s4 + $0x278] sm:$0xff] }
 0x431   : > { %5056 = vmatprep.subr.bf16.mxu1 %v13251_v18  ;;  %v4080_v18 = vld [vmem:[%s21783_s4 + $0x1b0] sm:$0xff]  ;;  %v4121_v3 = vld [vmem:[%s21783_s4 + $0x2f8] sm:$0xff] }
 0x432   : > { %v13190_v45 = vcombine.low %v4080_v18, %v4088_v1 }
 0x434   : > { %5057 = vmatpush1.bf16.msra.mxu1 %v13250_v56  ;;  %v13191_v56 = vcombine.high %v4080_v18, %v4088_v1  ;;  %v4129_v18 = vld [vmem:[%s21783_s4 + $0x338] sm:$0xff] }
 0x435   : > { %5083 = vmatprep.subr.bf16.mxu1 %v13141_v22  ;;  %v4096_v22 = vld [vmem:[%s21783_s4 + $0x230] sm:$0xff]  ;;  %v4137_v1 = vld [vmem:[%s21783_s4 + $0x378] sm:$0xff] }
 0x437   : > { %5075 = vmatmul.mubr.bf16.vlgmr.msra.gmra.mrb[32].mxu1 %v17506_v62 }
 0x438   : > { %5084 = vmatpush1.bf16.msra.mxu1 %v13140_v11  ;;  %5115 = vmatprep.mubr.bf16.mxu1 %v21738_v37  ;;  %v13207_v11 = vcombine.high %v4096_v22, %v4104_v60 }
 0x439   : > { %5085 = vmatprep.subr.bf16.mxu1 %v13157_v9  ;;  %v4112_v9 = vld [vmem:[%s21783_s4 + $0x2b0] sm:$0xff] }
 0x43a   : > { %v13223_v0 = vcombine.high %v4112_v9, %v4120_v31 }
 0x43c   : > { %5086 = vmatpush1.bf16.msra.mxu1 %v13156_v52  ;;  %v13206_v52 = vcombine.low %v4096_v22, %v4104_v60  ;;  %v13241_v60 = vcombine.high %v4129_v18, %v4137_v1 }
 0x43d   : > { %5087 = vmatprep.subr.bf16.mxu1 %v13173_v47  ;;  %v18107_v47 = vsub.s32 7, %v17868_v43  ;;  %v13222_v43 = vcombine.low %v4112_v9, %v4120_v31  ;;  %v4153_v9 = vld [vmem:[%s21783_s4 + $0x3f8] sm:$0xff] }
 0x43f   : > { %21792 = vst [vmem:[#allocation21_spill] sm:$0xff] %v18107_v47  ;;  %v3493_v59 = vrot.slane %v17891_v58, %v18107_v47 }
 0x440   : > { %5088 = vmatpush1.bf16.msra.mxu1 %v13172_v6  ;;  %v4136_v6 = vld [vmem:[%s21783_s4 + $0x370] sm:$0xff] }
 0x441   : > { %5089 = vmatprep.subr.bf16.mxu1 %v13189_v63  ;;  %v3489_v63 = vrot.slane %v17891_v58, %v18104_v16  ;;  %v13239_v29 = vcombine.high %v4128_v44, %v4136_v6  ;;  %v13238_v23 = vcombine.low %v4128_v44, %v4136_v6  ;;  %v13240_v6 = vcombine.low %v4129_v18, %v4137_v1  ;;  %v14980_v18 = vld [vmem:[%s21715_s6 + $0x2e8] ss:$16 sps:$4 sm:$0xff]   ;;  %v14983_v1 = vld [vmem:[%s21715_s6 + $0xc0] ss:$16 sps:$4 sm:$0xff]  }
 0x444   : > { %5090 = vmatpush1.bf16.msra.mxu1 %v13188_v13 }
 0x445   : > { %5091 = vmatprep.subr.bf16.mxu1 %v13205_v53  ;;  %v4144_v53 = vld [vmem:[%s21783_s4 + $0x3b0] sm:$0xff] }
 0x448   : > { %5092 = vmatpush1.bf16.msra.mxu1 %v13204_v15 }
 0x449   : > { %5093 = vmatprep.subr.bf16.mxu1 %v13221_v5 }
 0x44a   : > { %v3970_v25 = vpop.f32.mrb[8].mxu1 }
 0x44b   : > { %v3971_v19 = vadd.f32 %v3970_v25, %v3481_v57  ;;  %v3972_v30 = vpop.f32.mrb[9].mxu1  ;;  %v13255_v57 = vcombine.high %v4144_v53, %v4152_v10 }
 0x44c   : > { %v3973_v35 = vadd.f32 %v3972_v30, %v3485_v21  ;;  %v3974_v24 = vpop.f32.mrb[10].mxu1  ;;  %5094 = vmatpush1.bf16.msra.mxu1 %v13220_v2  ;;  %v4033_v21 = vld [vmem:[%s21783_s4 + $0x38] sm:$0xff]  ;;  %v13161_v30 = vcombine.high %v4049_v38, %v4057_v12 }
 0x44d   : > { %4022 = vst [vmem:[%s17931_s24 + $0x20] sm:$0xff] %v3971_v19  ;;  %v3975_v28 = vpop.f32.mrb[11].mxu1  ;;  %5095 = vmatprep.subr.bf16.mxu1 %v13237_v55  ;;  %v4041_v2 = vld [vmem:[%s21783_s4 + $0x78] sm:$0xff]  ;;  %v13254_v55 = vcombine.low %v4144_v53, %v4152_v10 }
 0x44e   : > { %4023 = vst [vmem:[%s17931_s24 + $0x28] sm:$0xff] %v3973_v35  ;;  %v13145_v25 = vcombine.high %v4033_v21, %v4041_v2  ;;  %v13144_v19 = vcombine.low %v4033_v21, %v4041_v2  ;;  %v4065_v35 = vld [vmem:[%s21783_s4 + $0x138] sm:$0xff]  ;;  %v14953_v2 = vld [vmem:[%s21715_s6 + $0x20] ss:$16 sps:$4 sm:$0xff]  }
 0x44f   : > { %v4073_v24 = vld [vmem:[%s21783_s4 + $0x178] sm:$0xff] }
 0x450   : > { %5096 = vmatpush1.bf16.msra.mxu1 %v13236_v17  ;;  %v13160_v17 = vcombine.low %v4049_v38, %v4057_v12  ;;  %v13177_v28 = vcombine.high %v4065_v35, %v4073_v24  ;;  %v13176_v46 = vcombine.low %v4065_v35, %v4073_v24  ;;  %v14941_v53 = vld [vmem:[%s21715_s6 + $0x208] ss:$16 sps:$4 sm:$0xff]   ;;  %v14959_v38 = vld [vmem:[%s21715_s6 + $0x40] ss:$16 sps:$4 sm:$0xff]   ;;  %v14964_v12 = vld [vmem:[%s21715_s6 + $0x28c] ss:$16 sps:$4 sm:$0xff]  }
 0x451   : > { %5097 = vmatprep.subr.bf16.mxu1 %v13253_v34  ;;  %v4081_v34 = vld [vmem:[%s21783_s4 + $0x1b8] sm:$0xff]  ;;  %v14965_v35 = vld [vmem:[%s21715_s6 + $0x60] ss:$16 sps:$4 sm:$0xff]  }
 0x452   : > { %v13192_v42 = vcombine.low %v4081_v34, %v4089_v27  ;;  %v14950_v21 = vld [vmem:[%s21715_s6 + $0x248] ss:$16 sps:$4 sm:$0xff]   ;;  %v14970_v24 = vld [vmem:[%s21715_s6 + $0x2ac] ss:$16 sps:$4 sm:$0xff]  }
 0x454   : > { %5098 = vmatpush1.bf16.msra.mxu1 %v13252_v32  ;;  %v13193_v32 = vcombine.high %v4081_v34, %v4089_v27  ;;  %v14971_v34 = vld [vmem:[%s21715_s6 + $0x80] ss:$16 sps:$4 sm:$0xff]   ;;  %v14976_v27 = vld [vmem:[%s21715_s6 + $0x2cc] ss:$16 sps:$4 sm:$0xff]  }
 0x455   : > { %5124 = vmatprep.subr.bf16.mxu1 %v13143_v41  ;;  %v4097_v41 = vld [vmem:[%s21783_s4 + $0x238] sm:$0xff] }
 0x456   : > { %v13208_v61 = vcombine.low %v4097_v41, %v4105_v48 }
 0x457   : > { %5116 = vmatmul.mubr.bf16.vlgmr.msra.gmra.mrb[36].mxu1 %v17506_v62 }
 0x458   : > { %5125 = vmatpush1.bf16.msra.mxu1 %v13142_v39  ;;  %5156 = vmatprep.mubr.bf16.mxu1 %v21738_v37  ;;  %v13209_v39 = vcombine.high %v4097_v41, %v4105_v48  ;;  %v14977_v48 = vld [vmem:[%s21715_s6 + $0xa0] ss:$16 sps:$4 sm:$0xff]  }
 0x459   : > { %5126 = vmatprep.subr.bf16.mxu1 %v13159_v14  ;;  %v4113_v14 = vld [vmem:[%s21783_s4 + $0x2b8] sm:$0xff] }
 0x45a   : > { %v13224_v22 = vcombine.low %v4113_v14, %v4121_v3 }
 0x45c   : > { %5127 = vmatpush1.bf16.msra.mxu1 %v13158_v36  ;;  %v18168_v36 = vld [vmem:[%s21793_s5] sm:$0xff] }
 0x45d   : > { %5128 = vmatprep.subr.bf16.mxu1 %v13175_v26  ;;  %v13225_v26 = vcombine.high %v4113_v14, %v4121_v3  ;;  %v4173_v41 = vrot.slane %v18168_v36, %v17983_v49 }
 0x460   : > { %5129 = vmatpush1.bf16.msra.mxu1 %v13174_v40  ;;  %v4161_v40 = vrot.slane %v18168_v36, %v17886_v50 }
 0x461   : > { %5130 = vmatprep.subr.bf16.mxu1 %v13191_v56  ;;  %v4165_v56 = vrot.slane %v18168_v36, %v17894_v7 }
 0x464   : > { %5131 = vmatpush1.bf16.msra.mxu1 %v13190_v45 }
 0x465   : > { %5132 = vmatprep.subr.bf16.mxu1 %v13207_v11  ;;  %v4145_v11 = vld [vmem:[%s21783_s4 + $0x3b8] sm:$0xff] }
 0x466   : > { %v13256_v10 = vcombine.low %v4145_v11, %v4153_v9 }
 0x468   : > { %5133 = vmatpush1.bf16.msra.mxu1 %v13206_v52 }
 0x469   : > { %5134 = vmatprep.subr.bf16.mxu1 %v13223_v0 }
 0x46a   : > { %v4011_v13 = vpop.f32.mrb[12].mxu1 }
 0x46b   : > { %v4012_v20 = vadd.f32 %v4011_v13, %v3489_v63  ;;  %v4013_v15 = vpop.f32.mrb[13].mxu1 }
 0x46c   : > { %v4014_v5 = vadd.f32 %v4013_v15, %v3493_v59  ;;  %v4015_v8 = vpop.f32.mrb[14].mxu1  ;;  %5135 = vmatpush1.bf16.msra.mxu1 %v13222_v43  ;;  %v13257_v43 = vcombine.high %v4145_v11, %v4153_v9  ;;  %v14946_v15 = vld [vmem:[%s21715_s6 + $0x22c] ss:$16 sps:$4 sm:$0xff]   ;;  %v14986_v11 = vld [vmem:[%s21715_s6 + $0x308] ss:$16 sps:$4 sm:$0xff]  }
 0x46d   : > { %4024 = vst [vmem:[%s17931_s24 + $0x30] sm:$0xff] %v4012_v20  ;;  %v4016_v58 = vpop.f32.mrb[15].mxu1  ;;  %5136 = vmatprep.subr.bf16.mxu1 %v13239_v29  ;;  %v14944_v8 = vld [vmem:[%s21715_s6 + $0x228] ss:$16 sps:$4 sm:$0xff]   ;;  %v14989_v9 = vld [vmem:[%s21715_s6 + $0xe0] ss:$16 sps:$4 sm:$0xff]  }
 0x46e   : > { %4025 = vst [vmem:[%s17931_s24 + $0x38] sm:$0xff] %v4014_v5  ;;  %v14949_v5 = vld [vmem:[%s21715_s6 + $0x4] ss:$16 sps:$4 sm:$0xff]   ;;  %v14952_v58 = vld [vmem:[%s21715_s6 + $0x24c] ss:$16 sps:$4 sm:$0xff]  }
 0x470   : > { %5137 = vmatpush1.bf16.msra.mxu1 %v13238_v23  ;;  %v14947_v23 = vld [vmem:[%s21715_s6] ss:$16 sps:$4 sm:$0xff]  }
 0x471   : > { %5138 = vmatprep.subr.bf16.mxu1 %v13255_v57  ;;  %v14955_v57 = vld [vmem:[%s21715_s6 + $0x24] ss:$16 sps:$4 sm:$0xff]  }
 0x474   : > { %5139 = vmatpush1.bf16.msra.mxu1 %v13254_v55  ;;  %v14958_v55 = vld [vmem:[%s21715_s6 + $0x26c] ss:$16 sps:$4 sm:$0xff]  }
 0x475   : > { %5165 = vmatprep.subr.bf16.mxu1 %v13145_v25  ;;  %v14956_v25 = vld [vmem:[%s21715_s6 + $0x268] ss:$16 sps:$4 sm:$0xff]  }
 0x477   : > { %5157 = vmatmul.mubr.bf16.vlgmr.msra.gmra.mrb[40].mxu1 %v17506_v62 }
 0x478   : > { %5166 = vmatpush1.bf16.msra.mxu1 %v13144_v19  ;;  %5197 = vmatprep.mubr.bf16.mxu1 %v21738_v37  ;;  %v14967_v19 = vld [vmem:[%s21715_s6 + $0x64] ss:$16 sps:$4 sm:$0xff]  }
 0x479   : > { %5167 = vmatprep.subr.bf16.mxu1 %v13161_v30  ;;  %v14962_v30 = vld [vmem:[%s21715_s6 + $0x288] ss:$16 sps:$4 sm:$0xff]  }
 0x47c   : > { %5168 = vmatpush1.bf16.msra.mxu1 %v13160_v17  ;;  %v14973_v17 = vld [vmem:[%s21715_s6 + $0x84] ss:$16 sps:$4 sm:$0xff]  }
 0x47d   : > { %5169 = vmatprep.subr.bf16.mxu1 %v13177_v28  ;;  %v14968_v28 = vld [vmem:[%s21715_s6 + $0x2a8] ss:$16 sps:$4 sm:$0xff]  }
 0x480   : > { %5170 = vmatpush1.bf16.msra.mxu1 %v13176_v46  ;;  %v14979_v46 = vld [vmem:[%s21715_s6 + $0xa4] ss:$16 sps:$4 sm:$0xff]  }
 0x481   : > { %5171 = vmatprep.subr.bf16.mxu1 %v13193_v32  ;;  %v14974_v32 = vld [vmem:[%s21715_s6 + $0x2c8] ss:$16 sps:$4 sm:$0xff]  }
 0x484   : > { %5172 = vmatpush1.bf16.msra.mxu1 %v13192_v42  ;;  %v14982_v42 = vld [vmem:[%s21715_s6 + $0x2ec] ss:$16 sps:$4 sm:$0xff]  }
 0x485   : > { %5173 = vmatprep.subr.bf16.mxu1 %v13209_v39  ;;  %v14985_v39 = vld [vmem:[%s21715_s6 + $0xc4] ss:$16 sps:$4 sm:$0xff]  }
 0x488   : > { %5174 = vmatpush1.bf16.msra.mxu1 %v13208_v61 }
 0x489   : > { %5175 = vmatprep.subr.bf16.mxu1 %v13225_v26 }
 0x48a   : > { %v4912_v45 = vpop.f32.mrb[16].mxu1 }
 0x48b   : > { %v4913_v31 = vadd.f32 %v4912_v45, %v4161_v40  ;;  %v4914_v52 = vpop.f32.mrb[17].mxu1 }
 0x48c   : > { %v4915_v0 = vadd.f32 %v4914_v52, %v4165_v56  ;;  %v4916_v44 = vpop.f32.mrb[18].mxu1  ;;  %5176 = vmatpush1.bf16.msra.mxu1 %v13224_v22  ;;  %v14988_v56 = vld [vmem:[%s21715_s6 + $0x30c] ss:$16 sps:$4 sm:$0xff]   ;;  %v14991_v22 = vld [vmem:[%s21715_s6 + $0xe4] ss:$16 sps:$4 sm:$0xff]  }
 0x48d   : > { %v5206_v63 = vmax.f32 %v4913_v31, 0.0  ;;  %v4917_v59 = vpop.f32.mrb[19].mxu1  ;;  %5177 = vmatprep.subr.bf16.mxu1 %v13241_v60  ;;  %v14994_v31 = vld [vmem:[%s21715_s6 + $0x32c] ss:$16 sps:$4 sm:$0xff]   ;;  %v14997_v52 = vld [vmem:[%s21715_s6 + $0x104] ss:$16 sps:$4 sm:$0xff]  }
 0x48e   : > { %v5207_v29 = vmax.f32 %v4915_v0, 0.0  ;;  %v14992_v0 = vld [vmem:[%s21715_s6 + $0x328] ss:$16 sps:$4 sm:$0xff]   ;;  %v14995_v44 = vld [vmem:[%s21715_s6 + $0x100] ss:$16 sps:$4 sm:$0xff]  }
 0x48f   : > { %v18189_v20 = vpack.c.bf16 %v5206_v63, %v5206_v63  ;;  %v15003_v63 = vld [vmem:[%s21715_s6 + $0x124] ss:$16 sps:$4 sm:$0xff]   ;;  %v14998_v59 = vld [vmem:[%s21715_s6 + $0x348] ss:$16 sps:$4 sm:$0xff]  }
 0x490   : > { %v5223_v13 = vpack.c.bf16 %v5207_v29, %v5207_v29  ;;  %5178 = vmatpush1.bf16.msra.mxu1 %v13240_v6  ;;  %v15000_v6 = vld [vmem:[%s21715_s6 + $0x34c] ss:$16 sps:$4 sm:$0xff]  }
 0x491   : > { %5179 = vmatprep.subr.bf16.mxu1 %v13257_v43  ;;  %v15001_v43 = vld [vmem:[%s21715_s6 + $0x120] ss:$16 sps:$4 sm:$0xff]   ;;  %v15006_v29 = vld [vmem:[%s21715_s6 + $0x36c] ss:$16 sps:$4 sm:$0xff]  }
 0x492   : > { %8692 = vmatprep.mubr.bf16.mxu0 %v5223_v13 }
 0x493   : > { %8693 = vmatmul.mubr.bf16.vlgmr.msra.gmra.mrb[0].mxu0 %v18189_v20 }
 0x494   : > { %8702 = vmatpush1.bf16.msra.mxu0 %v14941_v53  ;;  %5180 = vmatpush1.bf16.msra.mxu1 %v13256_v10  ;;  %v15004_v53 = vld [vmem:[%s21715_s6 + $0x368] ss:$16 sps:$4 sm:$0xff]   ;;  %v15007_v10 = vld [vmem:[%s21715_s6 + $0x140] ss:$16 sps:$4 sm:$0xff]  }
 0x495   : > { %8703 = vmatprep.subr.bf16.mxu0 %v14946_v15  ;;  %8332 = vmatprep.subr.bf16.mxu1 %v14949_v5  ;;  %v15012_v15 = vld [vmem:[%s21715_s6 + $0x38c] ss:$16 sps:$4 sm:$0xff]   ;;  %v15015_v5 = vld [vmem:[%s21715_s6 + $0x164] ss:$16 sps:$4 sm:$0xff]  }
 0x497   : > { %5198 = vmatmul.mubr.bf16.vlgmr.msra.gmra.mrb[44].mxu1 %v17506_v62  ;;  %v14961_v62 = vld [vmem:[%s21715_s6 + $0x44] ss:$16 sps:$4 sm:$0xff]  }
 0x498   : > { %8704 = vmatpush1.bf16.msra.mxu0 %v14944_v8  ;;  %8333 = vmatpush1.bf16.msra.mxu1 %v14947_v23  ;;  %v15010_v8 = vld [vmem:[%s21715_s6 + $0x388] ss:$16 sps:$4 sm:$0xff]   ;;  %v15013_v23 = vld [vmem:[%s21715_s6 + $0x160] ss:$16 sps:$4 sm:$0xff]  }
 0x499   : > { %8364 = vmatprep.mubr.bf16.mxu1 %v5223_v13  ;;  %8705 = vmatprep.subr.bf16.mxu0 %v14952_v58  ;;  %v15009_v13 = vld [vmem:[%s21715_s6 + $0x144] ss:$16 sps:$4 sm:$0xff]   ;;  %v15018_v58 = vld [vmem:[%s21715_s6 + $0x3ac] ss:$16 sps:$4 sm:$0xff]  }
 0x49a   : > { %8334 = vmatprep.subr.bf16.mxu1 %v14955_v57  ;;  %v15021_v57 = vld [vmem:[%s21715_s6 + $0x184] ss:$16 sps:$4 sm:$0xff]  }
 0x49c   : > { %8706 = vmatpush1.bf16.msra.mxu0 %v14950_v21  ;;  %8335 = vmatpush1.bf16.msra.mxu1 %v14953_v2  ;;  %v15016_v21 = vld [vmem:[%s21715_s6 + $0x3a8] ss:$16 sps:$4 sm:$0xff]   ;;  %v15019_v2 = vld [vmem:[%s21715_s6 + $0x180] ss:$16 sps:$4 sm:$0xff]  }
 0x49d   : > { %8707 = vmatprep.subr.bf16.mxu0 %v14958_v55  ;;  %8336 = vmatprep.subr.bf16.mxu1 %v14961_v62  ;;  %v4169_v55 = vrot.slane %v18168_v36, %v17980_v33  ;;  %v15024_v62 = vld [vmem:[%s21715_s6 + $0x3cc] ss:$16 sps:$4 sm:$0xff]  }
 0x4a0   : > { %8708 = vmatpush1.bf16.msra.mxu0 %v14956_v25  ;;  %8337 = vmatpush1.bf16.msra.mxu1 %v14959_v38  ;;  %v15027_v25 = vld [vmem:[%s21715_s6 + $0x1a4] ss:$16 sps:$4 sm:$0xff]   ;;  %v15022_v38 = vld [vmem:[%s21715_s6 + $0x3c8] ss:$16 sps:$4 sm:$0xff]  }
 0x4a1   : > { %8709 = vmatprep.subr.bf16.mxu0 %v14964_v12  ;;  %8338 = vmatprep.subr.bf16.mxu1 %v14967_v19  ;;  %v4181_v12 = vrot.slane %v18168_v36, %v18045_v54  ;;  %v15025_v19 = vld [vmem:[%s21715_s6 + $0x1a0] ss:$16 sps:$4 sm:$0xff]  }
 0x4a4   : > { %8710 = vmatpush1.bf16.msra.mxu0 %v14962_v30  ;;  %8339 = vmatpush1.bf16.msra.mxu1 %v14965_v35  ;;  %v15030_v35 = vld [vmem:[%s21715_s6 + $0x3ec] ss:$16 sps:$4 sm:$0xff]  }
 0x4a5   : > { %8711 = vmatprep.subr.bf16.mxu0 %v14970_v24  ;;  %8340 = vmatprep.subr.bf16.mxu1 %v14973_v17  ;;  %v15033_v24 = vld [vmem:[%s21715_s6 + $0x1c4] ss:$16 sps:$4 sm:$0xff]  }
 0x4a8   : > { %8712 = vmatpush1.bf16.msra.mxu0 %v14968_v28  ;;  %8341 = vmatpush1.bf16.msra.mxu1 %v14971_v34 }
 0x4a9   : > { %8713 = vmatprep.subr.bf16.mxu0 %v14976_v27  ;;  %8342 = vmatprep.subr.bf16.mxu1 %v14979_v46  ;;  %v15028_v46 = vld [vmem:[%s21715_s6 + $0x3e8] ss:$16 sps:$4 sm:$0xff]  }
 0x4aa   : > { %v18273_v14 = vpop.f32.mrb[20].mxu1 }
 0x4ab   : > { %v4955_v3 = vpop.f32.mrb[21].mxu1  ;;  %v4954_v30 = vadd.f32 %v18273_v14, %v4169_v55  ;;  %v15076_v55 = vld [vmem:[%s21715_s6 + $0x4e8] ss:$16 sps:$4 sm:$0xff]  }
 0x4ac   : > { %v4956_v61 = vadd.f32 %v4955_v3, %v4173_v41  ;;  %8714 = vmatpush1.bf16.msra.mxu0 %v14974_v32  ;;  %v4957_v26 = vpop.f32.mrb[22].mxu1  ;;  %8343 = vmatpush1.bf16.msra.mxu1 %v14977_v48  ;;  %v15031_v32 = vld [vmem:[%s21715_s6 + $0x1c0] ss:$16 sps:$4 sm:$0xff]  }
 0x4ad   : > { %v4958_v40 = vpop.f32.mrb[23].mxu1  ;;  %8715 = vmatprep.subr.bf16.mxu0 %v14982_v42  ;;  %8344 = vmatprep.subr.bf16.mxu1 %v14985_v39  ;;  %v5208_v41 = vmax.f32 %v4954_v30, 0.0  ;;  %v15036_v42 = vld [vmem:[%s21715_s6 + $0x40c] ss:$16 sps:$4 sm:$0xff]   ;;  %v15039_v39 = vld [vmem:[%s21715_s6 + $0x1e4] ss:$16 sps:$4 sm:$0xff]  }
 0x4ae   : > { %v5209_v60 = vmax.f32 %v4956_v61, 0.0  ;;  %v15034_v61 = vld [vmem:[%s21715_s6 + $0x408] ss:$16 sps:$4 sm:$0xff]   ;;  %v15045_v40 = vld [vmem:[%s21715_s6 + $0x204] ss:$16 sps:$4 sm:$0xff]  }
 0x4af   : > { %v18398_v26 = vpack.c.bf16 %v5208_v41, %v5208_v41  ;;  %v15085_v30 = vld [vmem:[%s21715_s6 + $0x2e0] ss:$16 sps:$4 sm:$0xff]  }
 0x4b0   : > { %v18287_v45 = vpack.c.bf16 %v5209_v60, %v5209_v60  ;;  %8716 = vmatpush1.bf16.msra.mxu0 %v14980_v18  ;;  %8345 = vmatpush1.bf16.msra.mxu1 %v14983_v1  ;;  %v15037_v18 = vld [vmem:[%s21715_s6 + $0x1e0] ss:$16 sps:$4 sm:$0xff]   ;;  %v15042_v1 = vld [vmem:[%s21715_s6 + $0x42c] ss:$16 sps:$4 sm:$0xff]  }
 0x4b1   : > { %8717 = vmatprep.subr.bf16.mxu0 %v14988_v56  ;;  %8346 = vmatprep.subr.bf16.mxu1 %v14991_v22  ;;  %v15040_v56 = vld [vmem:[%s21715_s6 + $0x428] ss:$16 sps:$4 sm:$0xff]   ;;  %v15043_v22 = vld [vmem:[%s21715_s6 + $0x200] ss:$16 sps:$4 sm:$0xff]   ;;  %v15048_v60 = vld [vmem:[%s21715_s6 + $0x44c] ss:$16 sps:$4 sm:$0xff]  }
 0x4b2   : > { %8733 = vmatprep.mubr.bf16.mxu0 %v18287_v45  ;;  %v15097_v41 = vld [vmem:[%s21715_s6 + $0x320] ss:$16 sps:$4 sm:$0xff]  }
 0x4b4   : > { %8718 = vmatpush1.bf16.msra.mxu0 %v14986_v11  ;;  %8347 = vmatpush1.bf16.msra.mxu1 %v14989_v9  ;;  %v15051_v11 = vld [vmem:[%s21715_s6 + $0x224] ss:$16 sps:$4 sm:$0xff]   ;;  %v15046_v9 = vld [vmem:[%s21715_s6 + $0x448] ss:$16 sps:$4 sm:$0xff]  }
 0x4b5   : > { %8719 = vmatprep.subr.bf16.mxu0 %v14994_v31  ;;  %8348 = vmatprep.subr.bf16.mxu1 %v14997_v52  ;;  %v15049_v31 = vld [vmem:[%s21715_s6 + $0x220] ss:$16 sps:$4 sm:$0xff]   ;;  %v15054_v52 = vld [vmem:[%s21715_s6 + $0x46c] ss:$16 sps:$4 sm:$0xff]  }
 0x4b8   : > { %8720 = vmatpush1.bf16.msra.mxu0 %v14992_v0  ;;  %8349 = vmatpush1.bf16.msra.mxu1 %v14995_v44  ;;  %v15052_v0 = vld [vmem:[%s21715_s6 + $0x468] ss:$16 sps:$4 sm:$0xff]   ;;  %v15060_v44 = vld [vmem:[%s21715_s6 + $0x48c] ss:$16 sps:$4 sm:$0xff]  }
 0x4b9   : > { %8721 = vmatprep.subr.bf16.mxu0 %v15000_v6  ;;  %8350 = vmatprep.subr.bf16.mxu1 %v15003_v63  ;;  %v15063_v6 = vld [vmem:[%s21715_s6 + $0x264] ss:$16 sps:$4 sm:$0xff]   ;;  %v15058_v63 = vld [vmem:[%s21715_s6 + $0x488] ss:$16 sps:$4 sm:$0xff]  }
 0x4bc   : > { %8722 = vmatpush1.bf16.msra.mxu0 %v14998_v59  ;;  %8351 = vmatpush1.bf16.msra.mxu1 %v15001_v43  ;;  %v15061_v59 = vld [vmem:[%s21715_s6 + $0x260] ss:$16 sps:$4 sm:$0xff]   ;;  %v15066_v43 = vld [vmem:[%s21715_s6 + $0x4ac] ss:$16 sps:$4 sm:$0xff]  }
 0x4bd   : > { %8723 = vmatprep.subr.bf16.mxu0 %v15006_v29  ;;  %8352 = vmatprep.subr.bf16.mxu1 %v15009_v13  ;;  %v15069_v29 = vld [vmem:[%s21715_s6 + $0x284] ss:$16 sps:$4 sm:$0xff]   ;;  %v15064_v13 = vld [vmem:[%s21715_s6 + $0x4a8] ss:$16 sps:$4 sm:$0xff]  }
 0x4c0   : > { %8724 = vmatpush1.bf16.msra.mxu0 %v15004_v53  ;;  %8353 = vmatpush1.bf16.msra.mxu1 %v15007_v10  ;;  %v15067_v53 = vld [vmem:[%s21715_s6 + $0x280] ss:$16 sps:$4 sm:$0xff]   ;;  %v15072_v10 = vld [vmem:[%s21715_s6 + $0x4cc] ss:$16 sps:$4 sm:$0xff]  }
 0x4c1   : > { %8725 = vmatprep.subr.bf16.mxu0 %v15012_v15  ;;  %8354 = vmatprep.subr.bf16.mxu1 %v15015_v5  ;;  %v15075_v15 = vld [vmem:[%s21715_s6 + $0x2a4] ss:$16 sps:$4 sm:$0xff]   ;;  %v15070_v5 = vld [vmem:[%s21715_s6 + $0x4c8] ss:$16 sps:$4 sm:$0xff]  }
 0x4c4   : > { %8726 = vmatpush1.bf16.msra.mxu0 %v15010_v8  ;;  %8355 = vmatpush1.bf16.msra.mxu1 %v15013_v23  ;;  %v15073_v8 = vld [vmem:[%s21715_s6 + $0x2a0] ss:$16 sps:$4 sm:$0xff]   ;;  %v15078_v23 = vld [vmem:[%s21715_s6 + $0x4ec] ss:$16 sps:$4 sm:$0xff]  }
 0x4c5   : > { %8727 = vmatprep.subr.bf16.mxu0 %v15018_v58  ;;  %8356 = vmatprep.subr.bf16.mxu1 %v15021_v57  ;;  %v15081_v57 = vld [vmem:[%s21715_s6 + $0x2c4] ss:$16 sps:$4 sm:$0xff]  }
 0x4c8   : > { %8728 = vmatpush1.bf16.msra.mxu0 %v15016_v21  ;;  %8357 = vmatpush1.bf16.msra.mxu1 %v15019_v2 }
 0x4c9   : > { %8729 = vmatprep.subr.bf16.mxu0 %v15024_v62  ;;  %8358 = vmatprep.subr.bf16.mxu1 %v15027_v25  ;;  %v15079_v25 = vld [vmem:[%s21715_s6 + $0x2c0] ss:$16 sps:$4 sm:$0xff]  }
 0x4ca   : > { %v18379_v17 = vpop.f32.mrb[24].mxu1 }
 0x4cb   : > { %v4996_v28 = vpop.f32.mrb[25].mxu1 }
 0x4cc   : > { %v4997_v34 = vadd.f32 %v4996_v28, %v4181_v12  ;;  %8730 = vmatpush1.bf16.msra.mxu0 %v15022_v38  ;;  %v4998_v27 = vpop.f32.mrb[26].mxu1  ;;  %8359 = vmatpush1.bf16.msra.mxu1 %v15025_v19  ;;  %v15084_v38 = vld [vmem:[%s21715_s6 + $0x50c] ss:$16 sps:$4 sm:$0xff]   ;;  %v15087_v12 = vld [vmem:[%s21715_s6 + $0x2e4] ss:$16 sps:$4 sm:$0xff]  }
 0x4cd   : > { %v4999_v48 = vpop.f32.mrb[27].mxu1  ;;  %8731 = vmatprep.subr.bf16.mxu0 %v15030_v35  ;;  %8360 = vmatprep.subr.bf16.mxu1 %v15033_v24  ;;  %v15082_v19 = vld [vmem:[%s21715_s6 + $0x508] ss:$16 sps:$4 sm:$0xff]   ;;  %v15090_v35 = vld [vmem:[%s21715_s6 + $0x52c] ss:$16 sps:$4 sm:$0xff]  }
 0x4ce   : > { %v5211_v14 = vmax.f32 %v4997_v34, 0.0  ;;  %v15093_v24 = vld [vmem:[%s21715_s6 + $0x304] ss:$16 sps:$4 sm:$0xff]   ;;  %v15088_v28 = vld [vmem:[%s21715_s6 + $0x528] ss:$16 sps:$4 sm:$0xff]  }
 0x4cf   : > { %v15091_v34 = vld [vmem:[%s21715_s6 + $0x300] ss:$16 sps:$4 sm:$0xff]   ;;  %v15096_v27 = vld [vmem:[%s21715_s6 + $0x54c] ss:$16 sps:$4 sm:$0xff]  }
 0x4d0   : > { %v18393_v3 = vpack.c.bf16 %v5211_v14, %v5211_v14  ;;  %8732 = vmatpush1.bf16.msra.mxu0 %v15028_v46  ;;  %8361 = vmatpush1.bf16.msra.mxu1 %v15031_v32  ;;  %v15099_v46 = vld [vmem:[%s21715_s6 + $0x324] ss:$16 sps:$4 sm:$0xff]   ;;  %v15094_v32 = vld [vmem:[%s21715_s6 + $0x548] ss:$16 sps:$4 sm:$0xff]   ;;  %v15102_v48 = vld [vmem:[%s21715_s6 + $0x56c] ss:$16 sps:$4 sm:$0xff]  }
 0x4d1   : > { %8742 = vmatprep.subr.bf16.mxu0 %v15036_v42  ;;  %8362 = vmatprep.subr.bf16.mxu1 %v15039_v39  ;;  %v15105_v42 = vld [vmem:[%s21715_s6 + $0x344] ss:$16 sps:$4 sm:$0xff]   ;;  %v15100_v39 = vld [vmem:[%s21715_s6 + $0x568] ss:$16 sps:$4 sm:$0xff]   ;;  %v15103_v14 = vld [vmem:[%s21715_s6 + $0x340] ss:$16 sps:$4 sm:$0xff]  }
 0x4d3   : > { %8734 = vmatmul.mubr.bf16.vlgmr.msra.gmra.mrb[0].mxu0 %v18398_v26 }
 0x4d4   : > { %8743 = vmatpush1.bf16.msra.mxu0 %v15034_v61  ;;  %8774 = vmatprep.mubr.bf16.mxu0 %v18393_v3  ;;  %v15108_v61 = vld [vmem:[%s21715_s6 + $0x58c] ss:$16 sps:$4 sm:$0xff]  }
 0x4d5   : > { %8363 = vmatpush1.bf16.msra.mxu1 %v15037_v18  ;;  %8744 = vmatprep.subr.bf16.mxu0 %v15042_v1  ;;  %v15111_v18 = vld [vmem:[%s21715_s6 + $0x364] ss:$16 sps:$4 sm:$0xff]   ;;  %v15106_v1 = vld [vmem:[%s21715_s6 + $0x588] ss:$16 sps:$4 sm:$0xff]  }
 0x4d6   : > { %8373 = vmatprep.subr.bf16.mxu1 %v15045_v40  ;;  %v15109_v40 = vld [vmem:[%s21715_s6 + $0x360] ss:$16 sps:$4 sm:$0xff]  }
 0x4d8   : > { %8365 = vmatmul.mubr.bf16.vlgmr.msra.gmra.mrb[48].mxu1 %v18189_v20  ;;  %8745 = vmatpush1.bf16.msra.mxu0 %v15040_v56  ;;  %v15057_v20 = vld [vmem:[%s21715_s6 + $0x244] ss:$16 sps:$4 sm:$0xff]   ;;  %v15114_v56 = vld [vmem:[%s21715_s6 + $0x5ac] ss:$16 sps:$4 sm:$0xff]  }
 0x4d9   : > { %8374 = vmatpush1.bf16.msra.mxu1 %v15043_v22  ;;  %8405 = vmatprep.mubr.bf16.mxu1 %v18287_v45  ;;  %v15055_v45 = vld [vmem:[%s21715_s6 + $0x240] ss:$16 sps:$4 sm:$0xff]   ;;  %v15117_v22 = vld [vmem:[%s21715_s6 + $0x384] ss:$16 sps:$4 sm:$0xff]  }
 0x4da   : > { %8746 = vmatprep.subr.bf16.mxu0 %v15048_v60  ;;  %8375 = vmatprep.subr.bf16.mxu1 %v15051_v11  ;;  %v15112_v60 = vld [vmem:[%s21715_s6 + $0x5a8] ss:$16 sps:$4 sm:$0xff]   ;;  %v4177_v11 = vrot.slane %v18168_v36, %v18042_v51 }
 0x4dc   : > { %8747 = vmatpush1.bf16.msra.mxu0 %v15046_v9  ;;  %v15115_v9 = vld [vmem:[%s21715_s6 + $0x380] ss:$16 sps:$4 sm:$0xff]  }
 0x4dd   : > { %8376 = vmatpush1.bf16.msra.mxu1 %v15049_v31  ;;  %8748 = vmatprep.subr.bf16.mxu0 %v15054_v52  ;;  %v15120_v31 = vld [vmem:[%s21715_s6 + $0x5cc] ss:$16 sps:$4 sm:$0xff]   ;;  %v4189_v52 = vrot.slane %v18168_v36, %v18107_v47 }
 0x4de   : > { %8377 = vmatprep.subr.bf16.mxu1 %v15057_v20  ;;  %v15123_v20 = vld [vmem:[%s21715_s6 + $0x3a4] ss:$16 sps:$4 sm:$0xff]  }
 0x4e0   : > { %8749 = vmatpush1.bf16.msra.mxu0 %v15052_v0  ;;  %v15118_v0 = vld [vmem:[%s21715_s6 + $0x5c8] ss:$16 sps:$4 sm:$0xff]  }
 0x4e1   : > { %8378 = vmatpush1.bf16.msra.mxu1 %v15055_v45  ;;  %8750 = vmatprep.subr.bf16.mxu0 %v15060_v44  ;;  %v4995_v45 = vadd.f32 %v18379_v17, %v4177_v11  ;;  %v15121_v44 = vld [vmem:[%s21715_s6 + $0x3a0] ss:$16 sps:$4 sm:$0xff]  }
 0x4e2   : > { %8379 = vmatprep.subr.bf16.mxu1 %v15063_v6  ;;  %v15126_v6 = vld [vmem:[%s21715_s6 + $0x5ec] ss:$16 sps:$4 sm:$0xff]  }
 0x4e4   : > { %8751 = vmatpush1.bf16.msra.mxu0 %v15058_v63 }
 0x4e5   : > { %8380 = vmatpush1.bf16.msra.mxu1 %v15061_v59  ;;  %8752 = vmatprep.subr.bf16.mxu0 %v15066_v43  ;;  %v15129_v43 = vld [vmem:[%s21715_s6 + $0x3c4] ss:$16 sps:$4 sm:$0xff]  }
 0x4e6   : > { %8381 = vmatprep.subr.bf16.mxu1 %v15069_v29 }
 0x4e8   : > { %8753 = vmatpush1.bf16.msra.mxu0 %v15064_v13  ;;  %v15124_v13 = vld [vmem:[%s21715_s6 + $0x5e8] ss:$16 sps:$4 sm:$0xff]  }
 0x4e9   : > { %8382 = vmatpush1.bf16.msra.mxu1 %v15067_v53  ;;  %8754 = vmatprep.subr.bf16.mxu0 %v15072_v10  ;;  %v5210_v53 = vmax.f32 %v4995_v45, 0.0  ;;  %v15183_v45 = vld [vmem:[%s21715_s6 + $0x4e4] ss:$16 sps:$4 sm:$0xff]  }
 0x4ea   : > { %v18482_v58 = vpop.f32.mrb[28].mxu1  ;;  %8383 = vmatprep.subr.bf16.mxu1 %v15075_v15  ;;  %v15127_v15 = vld [vmem:[%s21715_s6 + $0x3c0] ss:$16 sps:$4 sm:$0xff]  }
 0x4eb   : > { %v18487_v21 = vpop.f32.mrb[29].mxu1 }
 0x4ec   : > { %8755 = vmatpush1.bf16.msra.mxu0 %v15070_v5  ;;  %v5039_v2 = vpop.f32.mrb[30].mxu1  ;;  %v5038_v63 = vadd.f32 %v18487_v21, %v4189_v52  ;;  %v15132_v5 = vld [vmem:[%s21715_s6 + $0x60c] ss:$16 sps:$4 sm:$0xff]   ;;  %v18610_v21 = vpack.c.bf16 %v5210_v53, %v5210_v53 }
 0x4ed   : > { %8384 = vmatpush1.bf16.msra.mxu1 %v15073_v8  ;;  %v5040_v62 = vpop.f32.mrb[31].mxu1  ;;  %8756 = vmatprep.subr.bf16.mxu0 %v15078_v23  ;;  %v15135_v23 = vld [vmem:[%s21715_s6 + $0x3e4] ss:$16 sps:$4 sm:$0xff]   ;;  %v15133_v2 = vld [vmem:[%s21715_s6 + $0x3e0] ss:$16 sps:$4 sm:$0xff]  }
 0x4ee   : > { %8385 = vmatprep.subr.bf16.mxu1 %v15081_v57  ;;  %v5213_v8 = vmax.f32 %v5038_v63, 0.0  ;;  %v15130_v57 = vld [vmem:[%s21715_s6 + $0x608] ss:$16 sps:$4 sm:$0xff]   ;;  %v15186_v63 = vld [vmem:[%s21715_s6 + $0x72c] ss:$16 sps:$4 sm:$0xff]  }
 0x4ef   : > { %v15192_v53 = vld [vmem:[%s21715_s6 + $0x74c] ss:$16 sps:$4 sm:$0xff]  }
 0x4f0   : > { %8757 = vmatpush1.bf16.msra.mxu0 %v15076_v55  ;;  %v15138_v55 = vld [vmem:[%s21715_s6 + $0x62c] ss:$16 sps:$4 sm:$0xff]   ;;  %v18618_v62 = vpack.c.bf16 %v5213_v8, %v5213_v8 }
 0x4f1   : > { %8386 = vmatpush1.bf16.msra.mxu1 %v15079_v25  ;;  %8758 = vmatprep.subr.bf16.mxu0 %v15084_v38  ;;  %v15141_v25 = vld [vmem:[%s21715_s6 + $0x404] ss:$16 sps:$4 sm:$0xff]   ;;  %v15136_v38 = vld [vmem:[%s21715_s6 + $0x628] ss:$16 sps:$4 sm:$0xff]   ;;  %v15198_v8 = vld [vmem:[%s21715_s6 + $0x76c] ss:$16 sps:$4 sm:$0xff]  }
 0x4f2   : > { %8387 = vmatprep.subr.bf16.mxu1 %v15087_v12  ;;  %v15139_v12 = vld [vmem:[%s21715_s6 + $0x400] ss:$16 sps:$4 sm:$0xff]  }
 0x4f4   : > { %8759 = vmatpush1.bf16.msra.mxu0 %v15082_v19  ;;  %v15144_v19 = vld [vmem:[%s21715_s6 + $0x64c] ss:$16 sps:$4 sm:$0xff]  }
 0x4f5   : > { %8388 = vmatpush1.bf16.msra.mxu1 %v15085_v30  ;;  %8760 = vmatprep.subr.bf16.mxu0 %v15090_v35  ;;  %v15147_v30 = vld [vmem:[%s21715_s6 + $0x424] ss:$16 sps:$4 sm:$0xff]   ;;  %v15142_v35 = vld [vmem:[%s21715_s6 + $0x648] ss:$16 sps:$4 sm:$0xff]  }
 0x4f6   : > { %8389 = vmatprep.subr.bf16.mxu1 %v15093_v24  ;;  %v15145_v24 = vld [vmem:[%s21715_s6 + $0x420] ss:$16 sps:$4 sm:$0xff]  }
 0x4f8   : > { %8761 = vmatpush1.bf16.msra.mxu0 %v15088_v28  ;;  %v15150_v28 = vld [vmem:[%s21715_s6 + $0x66c] ss:$16 sps:$4 sm:$0xff]  }
 0x4f9   : > { %8390 = vmatpush1.bf16.msra.mxu1 %v15091_v34  ;;  %8762 = vmatprep.subr.bf16.mxu0 %v15096_v27  ;;  %v15148_v34 = vld [vmem:[%s21715_s6 + $0x668] ss:$16 sps:$4 sm:$0xff]   ;;  %v15156_v27 = vld [vmem:[%s21715_s6 + $0x68c] ss:$16 sps:$4 sm:$0xff]  }
 0x4fa   : > { %8391 = vmatprep.subr.bf16.mxu1 %v15099_v46  ;;  %v15159_v46 = vld [vmem:[%s21715_s6 + $0x464] ss:$16 sps:$4 sm:$0xff]  }
 0x4fc   : > { %8763 = vmatpush1.bf16.msra.mxu0 %v15094_v32  ;;  %v15154_v32 = vld [vmem:[%s21715_s6 + $0x688] ss:$16 sps:$4 sm:$0xff]  }
 0x4fd   : > { %8392 = vmatpush1.bf16.msra.mxu1 %v15097_v41  ;;  %8764 = vmatprep.subr.bf16.mxu0 %v15102_v48  ;;  %v15157_v41 = vld [vmem:[%s21715_s6 + $0x460] ss:$16 sps:$4 sm:$0xff]   ;;  %v15162_v48 = vld [vmem:[%s21715_s6 + $0x6ac] ss:$16 sps:$4 sm:$0xff]  }
 0x4fe   : > { %8393 = vmatprep.subr.bf16.mxu1 %v15105_v42  ;;  %v15165_v42 = vld [vmem:[%s21715_s6 + $0x484] ss:$16 sps:$4 sm:$0xff]  }
 0x500   : > { %8765 = vmatpush1.bf16.msra.mxu0 %v15100_v39  ;;  %v15160_v39 = vld [vmem:[%s21715_s6 + $0x6a8] ss:$16 sps:$4 sm:$0xff]  }
 0x501   : > { %8394 = vmatpush1.bf16.msra.mxu1 %v15103_v14  ;;  %8766 = vmatprep.subr.bf16.mxu0 %v15108_v61  ;;  %v15163_v14 = vld [vmem:[%s21715_s6 + $0x480] ss:$16 sps:$4 sm:$0xff]   ;;  %v15168_v61 = vld [vmem:[%s21715_s6 + $0x6cc] ss:$16 sps:$4 sm:$0xff]  }
 0x502   : > { %8395 = vmatprep.subr.bf16.mxu1 %v15111_v18  ;;  %v15171_v18 = vld [vmem:[%s21715_s6 + $0x4a4] ss:$16 sps:$4 sm:$0xff]  }
 0x504   : > { %8767 = vmatpush1.bf16.msra.mxu0 %v15106_v1  ;;  %v15166_v1 = vld [vmem:[%s21715_s6 + $0x6c8] ss:$16 sps:$4 sm:$0xff]  }
 0x505   : > { %8396 = vmatpush1.bf16.msra.mxu1 %v15109_v40  ;;  %8768 = vmatprep.subr.bf16.mxu0 %v15114_v56  ;;  %v15169_v40 = vld [vmem:[%s21715_s6 + $0x4a0] ss:$16 sps:$4 sm:$0xff]   ;;  %v15174_v56 = vld [vmem:[%s21715_s6 + $0x6ec] ss:$16 sps:$4 sm:$0xff]  }
 0x506   : > { %8397 = vmatprep.subr.bf16.mxu1 %v15117_v22 }
 0x508   : > { %8769 = vmatpush1.bf16.msra.mxu0 %v15112_v60  ;;  %v15177_v60 = vld [vmem:[%s21715_s6 + $0x4c4] ss:$16 sps:$4 sm:$0xff]  }
 0x509   : > { %8398 = vmatpush1.bf16.msra.mxu1 %v15115_v9  ;;  %8770 = vmatprep.subr.bf16.mxu0 %v15120_v31  ;;  %v15172_v31 = vld [vmem:[%s21715_s6 + $0x6e8] ss:$16 sps:$4 sm:$0xff]  }
 0x50a   : > { %v18588_v59 = vpop.f32.mrb[32].mxu1  ;;  %8399 = vmatprep.subr.bf16.mxu1 %v15123_v20  ;;  %v15175_v20 = vld [vmem:[%s21715_s6 + $0x4c0] ss:$16 sps:$4 sm:$0xff]  }
 0x50b   : > { %v18593_v17 = vpop.f32.mrb[33].mxu1 }
 0x50c   : > { %8771 = vmatpush1.bf16.msra.mxu0 %v15118_v0  ;;  %v5080_v29 = vpop.f32.mrb[34].mxu1  ;;  %v15180_v0 = vld [vmem:[%s21715_s6 + $0x70c] ss:$16 sps:$4 sm:$0xff]  }
 0x50d   : > { %8400 = vmatpush1.bf16.msra.mxu1 %v15121_v44  ;;  %v5081_v10 = vpop.f32.mrb[35].mxu1  ;;  %8772 = vmatprep.subr.bf16.mxu0 %v15126_v6  ;;  %v15178_v44 = vld [vmem:[%s21715_s6 + $0x708] ss:$16 sps:$4 sm:$0xff]   ;;  %v15181_v6 = vld [vmem:[%s21715_s6 + $0x4e0] ss:$16 sps:$4 sm:$0xff]  }
 0x50e   : > { %8401 = vmatprep.subr.bf16.mxu1 %v15129_v43  ;;  %v15189_v43 = vld [vmem:[%s21715_s6 + $0x504] ss:$16 sps:$4 sm:$0xff]   ;;  %v15184_v29 = vld [vmem:[%s21715_s6 + $0x728] ss:$16 sps:$4 sm:$0xff]  }
 0x50f   : > { %v15195_v10 = vld [vmem:[%s21715_s6 + $0x524] ss:$16 sps:$4 sm:$0xff]  }
 0x510   : > { %8773 = vmatpush1.bf16.msra.mxu0 %v15124_v13  ;;  %v15187_v13 = vld [vmem:[%s21715_s6 + $0x500] ss:$16 sps:$4 sm:$0xff]  }
 0x511   : > { %8402 = vmatpush1.bf16.msra.mxu1 %v15127_v15  ;;  %8783 = vmatprep.subr.bf16.mxu0 %v15132_v5  ;;  %v15190_v15 = vld [vmem:[%s21715_s6 + $0x748] ss:$16 sps:$4 sm:$0xff]   ;;  %v15193_v5 = vld [vmem:[%s21715_s6 + $0x520] ss:$16 sps:$4 sm:$0xff]  }
 0x512   : > { %8403 = vmatprep.subr.bf16.mxu1 %v15135_v23  ;;  %v15201_v23 = vld [vmem:[%s21715_s6 + $0x544] ss:$16 sps:$4 sm:$0xff]  }
 0x513   : > { %8775 = vmatmul.mubr.bf16.vlgmr.msra.gmra.mrb[0].mxu0 %v18610_v21 }
 0x514   : > { %8784 = vmatpush1.bf16.msra.mxu0 %v15130_v57  ;;  %8815 = vmatprep.mubr.bf16.mxu0 %v18618_v62  ;;  %v15196_v57 = vld [vmem:[%s21715_s6 + $0x768] ss:$16 sps:$4 sm:$0xff]  }
 0x515   : > { %8404 = vmatpush1.bf16.msra.mxu1 %v15133_v2  ;;  %8785 = vmatprep.subr.bf16.mxu0 %v15138_v55  ;;  %v15199_v2 = vld [vmem:[%s21715_s6 + $0x540] ss:$16 sps:$4 sm:$0xff]   ;;  %v15204_v55 = vld [vmem:[%s21715_s6 + $0x78c] ss:$16 sps:$4 sm:$0xff]  }
 0x516   : > { %8414 = vmatprep.subr.bf16.mxu1 %v15141_v25  ;;  %v15207_v25 = vld [vmem:[%s21715_s6 + $0x564] ss:$16 sps:$4 sm:$0xff]  }
 0x518   : > { %8406 = vmatmul.mubr.bf16.vlgmr.msra.gmra.mrb[48].mxu1 %v18398_v26  ;;  %8786 = vmatpush1.bf16.msra.mxu0 %v15136_v38  ;;  %v15153_v26 = vld [vmem:[%s21715_s6 + $0x444] ss:$16 sps:$4 sm:$0xff]   ;;  %v15202_v38 = vld [vmem:[%s21715_s6 + $0x788] ss:$16 sps:$4 sm:$0xff]  }
 0x519   : > { %8415 = vmatpush1.bf16.msra.mxu1 %v15139_v12  ;;  %8446 = vmatprep.mubr.bf16.mxu1 %v18393_v3  ;;  %v15151_v3 = vld [vmem:[%s21715_s6 + $0x440] ss:$16 sps:$4 sm:$0xff]  }
 0x51a   : > { %8787 = vmatprep.subr.bf16.mxu0 %v15144_v19  ;;  %8416 = vmatprep.subr.bf16.mxu1 %v15147_v30  ;;  %v15205_v12 = vld [vmem:[%s21715_s6 + $0x560] ss:$16 sps:$4 sm:$0xff]   ;;  %v15210_v19 = vld [vmem:[%s21715_s6 + $0x7ac] ss:$16 sps:$4 sm:$0xff]   ;;  %v15213_v30 = vld [vmem:[%s21715_s6 + $0x584] ss:$16 sps:$4 sm:$0xff]  }
 0x51c   : > { %8788 = vmatpush1.bf16.msra.mxu0 %v15142_v35  ;;  %v18778_v35 = vld [vmem:[%s21793_s5 + $0x8] sm:$0xff] }
 0x51d   : > { %8417 = vmatpush1.bf16.msra.mxu1 %v15145_v24  ;;  %8789 = vmatprep.subr.bf16.mxu0 %v15150_v28  ;;  %v15208_v24 = vld [vmem:[%s21715_s6 + $0x7a8] ss:$16 sps:$4 sm:$0xff]   ;;  %v4185_v28 = vrot.slane %v18168_v36, %v18104_v16 }
 0x51e   : > { %8418 = vmatprep.subr.bf16.mxu1 %v15153_v26  ;;  %v15211_v26 = vld [vmem:[%s21715_s6 + $0x580] ss:$16 sps:$4 sm:$0xff]   ;;  %v15214_v36 = vld [vmem:[%s21715_s6 + $0x7c8] ss:$16 sps:$4 sm:$0xff]  }
 0x520   : > { %8790 = vmatpush1.bf16.msra.mxu0 %v15148_v34  ;;  %v15216_v34 = vld [vmem:[%s21715_s6 + $0x7cc] ss:$16 sps:$4 sm:$0xff]  }
 0x521   : > { %8419 = vmatpush1.bf16.msra.mxu1 %v15151_v3  ;;  %8791 = vmatprep.subr.bf16.mxu0 %v15156_v27  ;;  %v4197_v3 = vrot.slane %v18778_v35, %v17894_v7  ;;  %v15219_v27 = vld [vmem:[%s21715_s6 + $0x5a4] ss:$16 sps:$4 sm:$0xff]  }
 0x522   : > { %8420 = vmatprep.subr.bf16.mxu1 %v15159_v46  ;;  %v5036_v46 = vadd.f32 %v18482_v58, %v4185_v28 }
 0x524   : > { %8792 = vmatpush1.bf16.msra.mxu0 %v15154_v32  ;;  %v15217_v32 = vld [vmem:[%s21715_s6 + $0x5a0] ss:$16 sps:$4 sm:$0xff]  }
 0x525   : > { %8421 = vmatpush1.bf16.msra.mxu1 %v15157_v41  ;;  %8793 = vmatprep.subr.bf16.mxu0 %v15162_v48  ;;  %v15222_v41 = vld [vmem:[%s21715_s6 + $0x7ec] ss:$16 sps:$4 sm:$0xff]   ;;  %v5079_v48 = vadd.f32 %v18593_v17, %v4197_v3  ;;  %v15223_v17 = vld [vmem:[%s21715_s6 + $0x5c0] ss:$16 sps:$4 sm:$0xff]  }
 0x526   : > { %8422 = vmatprep.subr.bf16.mxu1 %v15165_v42 }
 0x528   : > { %8794 = vmatpush1.bf16.msra.mxu0 %v15160_v39  ;;  %v15225_v39 = vld [vmem:[%s21715_s6 + $0x5c4] ss:$16 sps:$4 sm:$0xff]  }
 0x529   : > { %8423 = vmatpush1.bf16.msra.mxu1 %v15163_v14  ;;  %8795 = vmatprep.subr.bf16.mxu0 %v15168_v61  ;;  %v15220_v61 = vld [vmem:[%s21715_s6 + $0x7e8] ss:$16 sps:$4 sm:$0xff]  }
 0x52a   : > { %v18696_v22 = vpop.f32.mrb[36].mxu1  ;;  %8424 = vmatprep.subr.bf16.mxu1 %v15171_v18  ;;  %v5212_v18 = vmax.f32 %v5036_v46, 0.0  ;;  %v15271_v46 = vld [vmem:[%s21715_s6 + $0x6c0] ss:$16 sps:$4 sm:$0xff]  }
 0x52b   : > { %v18701_v11 = vpop.f32.mrb[37].mxu1 }
 0x52c   : > { %8796 = vmatpush1.bf16.msra.mxu0 %v15166_v1  ;;  %v5121_v9 = vpop.f32.mrb[38].mxu1 }
 0x52d   : > { %8425 = vmatpush1.bf16.msra.mxu1 %v15169_v40  ;;  %v5122_v52 = vpop.f32.mrb[39].mxu1  ;;  %8797 = vmatprep.subr.bf16.mxu0 %v15174_v56  ;;  %v15228_v40 = vld [vmem:[%s21715_s6 + $0x80c] ss:$16 sps:$4 sm:$0xff]   ;;  %v5215_v56 = vmax.f32 %v5079_v48, 0.0  ;;  %v15226_v9 = vld [vmem:[%s21715_s6 + $0x808] ss:$16 sps:$4 sm:$0xff]  }
 0x52e   : > { %8426 = vmatprep.subr.bf16.mxu1 %v15177_v60  ;;  %v15231_v60 = vld [vmem:[%s21715_s6 + $0x5e4] ss:$16 sps:$4 sm:$0xff]   ;;  %v15229_v52 = vld [vmem:[%s21715_s6 + $0x5e0] ss:$16 sps:$4 sm:$0xff]   ;;  %v15274_v48 = vld [vmem:[%s21715_s6 + $0x908] ss:$16 sps:$4 sm:$0xff]  }
 0x530   : > { %8798 = vmatpush1.bf16.msra.mxu0 %v15172_v31  ;;  %v18829_v31 = vpack.c.bf16 %v5212_v18, %v5212_v18  ;;  %v15280_v18 = vld [vmem:[%s21715_s6 + $0x928] ss:$16 sps:$4 sm:$0xff]  }
 0x531   : > { %8427 = vmatpush1.bf16.msra.mxu1 %v15175_v20  ;;  %8799 = vmatprep.subr.bf16.mxu0 %v15180_v0  ;;  %v15234_v20 = vld [vmem:[%s21715_s6 + $0x82c] ss:$16 sps:$4 sm:$0xff]   ;;  %v18837_v0 = vpack.c.bf16 %v5215_v56, %v5215_v56  ;;  %v15286_v56 = vld [vmem:[%s21715_s6 + $0x948] ss:$16 sps:$4 sm:$0xff]  }
 0x532   : > { %8428 = vmatprep.subr.bf16.mxu1 %v15183_v45  ;;  %v15237_v45 = vld [vmem:[%s21715_s6 + $0x604] ss:$16 sps:$4 sm:$0xff]  }
 0x534   : > { %8800 = vmatpush1.bf16.msra.mxu0 %v15178_v44  ;;  %v15232_v44 = vld [vmem:[%s21715_s6 + $0x828] ss:$16 sps:$4 sm:$0xff]  }
 0x535   : > { %8429 = vmatpush1.bf16.msra.mxu1 %v15181_v6  ;;  %8801 = vmatprep.subr.bf16.mxu0 %v15186_v63  ;;  %v15235_v6 = vld [vmem:[%s21715_s6 + $0x600] ss:$16 sps:$4 sm:$0xff]   ;;  %v15240_v63 = vld [vmem:[%s21715_s6 + $0x84c] ss:$16 sps:$4 sm:$0xff]  }
 0x536   : > { %8430 = vmatprep.subr.bf16.mxu1 %v15189_v43  ;;  %v15243_v43 = vld [vmem:[%s21715_s6 + $0x624] ss:$16 sps:$4 sm:$0xff]  }
 0x538   : > { %8802 = vmatpush1.bf16.msra.mxu0 %v15184_v29  ;;  %v15238_v29 = vld [vmem:[%s21715_s6 + $0x848] ss:$16 sps:$4 sm:$0xff]  }
 0x539   : > { %8431 = vmatpush1.bf16.msra.mxu1 %v15187_v13  ;;  %8803 = vmatprep.subr.bf16.mxu0 %v15192_v53  ;;  %v15241_v13 = vld [vmem:[%s21715_s6 + $0x620] ss:$16 sps:$4 sm:$0xff]   ;;  %v15246_v53 = vld [vmem:[%s21715_s6 + $0x86c] ss:$16 sps:$4 sm:$0xff]  }
 0x53a   : > { %8432 = vmatprep.subr.bf16.mxu1 %v15195_v10  ;;  %v15244_v10 = vld [vmem:[%s21715_s6 + $0x868] ss:$16 sps:$4 sm:$0xff]  }
 0x53c   : > { %8804 = vmatpush1.bf16.msra.mxu0 %v15190_v15  ;;  %v15252_v15 = vld [vmem:[%s21715_s6 + $0x88c] ss:$16 sps:$4 sm:$0xff]  }
 0x53d   : > { %8433 = vmatpush1.bf16.msra.mxu1 %v15193_v5  ;;  %8805 = vmatprep.subr.bf16.mxu0 %v15198_v8  ;;  %v15255_v5 = vld [vmem:[%s21715_s6 + $0x664] ss:$16 sps:$4 sm:$0xff]   ;;  %v15250_v8 = vld [vmem:[%s21715_s6 + $0x888] ss:$16 sps:$4 sm:$0xff]  }
 0x53e   : > { %8434 = vmatprep.subr.bf16.mxu1 %v15201_v23  ;;  %v15253_v23 = vld [vmem:[%s21715_s6 + $0x660] ss:$16 sps:$4 sm:$0xff]  }
 0x540   : > { %8806 = vmatpush1.bf16.msra.mxu0 %v15196_v57  ;;  %v15258_v57 = vld [vmem:[%s21715_s6 + $0x8ac] ss:$16 sps:$4 sm:$0xff]  }
 0x541   : > { %8435 = vmatpush1.bf16.msra.mxu1 %v15199_v2  ;;  %8807 = vmatprep.subr.bf16.mxu0 %v15204_v55  ;;  %v15261_v2 = vld [vmem:[%s21715_s6 + $0x684] ss:$16 sps:$4 sm:$0xff]   ;;  %v15256_v55 = vld [vmem:[%s21715_s6 + $0x8a8] ss:$16 sps:$4 sm:$0xff]  }
 0x542   : > { %8436 = vmatprep.subr.bf16.mxu1 %v15207_v25  ;;  %v15259_v25 = vld [vmem:[%s21715_s6 + $0x680] ss:$16 sps:$4 sm:$0xff]  }
 0x544   : > { %8808 = vmatpush1.bf16.msra.mxu0 %v15202_v38  ;;  %v15264_v38 = vld [vmem:[%s21715_s6 + $0x8cc] ss:$16 sps:$4 sm:$0xff]  }
 0x545   : > { %8437 = vmatpush1.bf16.msra.mxu1 %v15205_v12  ;;  %8809 = vmatprep.subr.bf16.mxu0 %v15210_v19  ;;  %v15267_v12 = vld [vmem:[%s21715_s6 + $0x6a4] ss:$16 sps:$4 sm:$0xff]   ;;  %v15262_v19 = vld [vmem:[%s21715_s6 + $0x8c8] ss:$16 sps:$4 sm:$0xff]  }
 0x546   : > { %8438 = vmatprep.subr.bf16.mxu1 %v15213_v30  ;;  %v15265_v30 = vld [vmem:[%s21715_s6 + $0x6a0] ss:$16 sps:$4 sm:$0xff]  }
 0x548   : > { %8810 = vmatpush1.bf16.msra.mxu0 %v15208_v24  ;;  %v15270_v24 = vld [vmem:[%s21715_s6 + $0x8ec] ss:$16 sps:$4 sm:$0xff]  }
 0x549   : > { %8439 = vmatpush1.bf16.msra.mxu1 %v15211_v26  ;;  %8811 = vmatprep.subr.bf16.mxu0 %v15216_v34  ;;  %v15273_v26 = vld [vmem:[%s21715_s6 + $0x6c4] ss:$16 sps:$4 sm:$0xff]  }
 0x54a   : > { %v18807_v42 = vpop.f32.mrb[40].mxu1  ;;  %8440 = vmatprep.subr.bf16.mxu1 %v15219_v27  ;;  %v15268_v27 = vld [vmem:[%s21715_s6 + $0x8e8] ss:$16 sps:$4 sm:$0xff]  }
 0x54b   : > { %v18812_v58 = vpop.f32.mrb[41].mxu1 }
 0x54c   : > { %8812 = vmatpush1.bf16.msra.mxu0 %v15214_v36  ;;  %v5162_v14 = vpop.f32.mrb[42].mxu1 }
 0x54d   : > { %8441 = vmatpush1.bf16.msra.mxu1 %v15217_v32  ;;  %v5163_v1 = vpop.f32.mrb[43].mxu1  ;;  %8813 = vmatprep.subr.bf16.mxu0 %v15222_v41  ;;  %v15276_v32 = vld [vmem:[%s21715_s6 + $0x90c] ss:$16 sps:$4 sm:$0xff]   ;;  %v15279_v41 = vld [vmem:[%s21715_s6 + $0x6e4] ss:$16 sps:$4 sm:$0xff]  }
 0x54e   : > { %8442 = vmatprep.subr.bf16.mxu1 %v15225_v39  ;;  %v15277_v39 = vld [vmem:[%s21715_s6 + $0x6e0] ss:$16 sps:$4 sm:$0xff]   ;;  %v15282_v14 = vld [vmem:[%s21715_s6 + $0x92c] ss:$16 sps:$4 sm:$0xff]  }
 0x54f   : > { %v15283_v1 = vld [vmem:[%s21715_s6 + $0x700] ss:$16 sps:$4 sm:$0xff]  }
 0x550   : > { %8814 = vmatpush1.bf16.msra.mxu0 %v15220_v61  ;;  %v15285_v61 = vld [vmem:[%s21715_s6 + $0x704] ss:$16 sps:$4 sm:$0xff]  }
 0x551   : > { %8443 = vmatpush1.bf16.msra.mxu1 %v15223_v17  ;;  %8824 = vmatprep.subr.bf16.mxu0 %v15228_v40  ;;  %v15288_v17 = vld [vmem:[%s21715_s6 + $0x94c] ss:$16 sps:$4 sm:$0xff]   ;;  %v15291_v40 = vld [vmem:[%s21715_s6 + $0x724] ss:$16 sps:$4 sm:$0xff]  }
 0x552   : > { %8444 = vmatprep.subr.bf16.mxu1 %v15231_v60  ;;  %v15289_v60 = vld [vmem:[%s21715_s6 + $0x720] ss:$16 sps:$4 sm:$0xff]  }
 0x553   : > { %8816 = vmatmul.mubr.bf16.vlgmr.msra.gmra.mrb[0].mxu0 %v18829_v31 }
 0x554   : > { %8825 = vmatpush1.bf16.msra.mxu0 %v15226_v9  ;;  %8856 = vmatprep.mubr.bf16.mxu0 %v18837_v0  ;;  %v15294_v9 = vld [vmem:[%s21715_s6 + $0x96c] ss:$16 sps:$4 sm:$0xff]  }
 0x555   : > { %8445 = vmatpush1.bf16.msra.mxu1 %v15229_v52  ;;  %8826 = vmatprep.subr.bf16.mxu0 %v15234_v20  ;;  %v15297_v52 = vld [vmem:[%s21715_s6 + $0x744] ss:$16 sps:$4 sm:$0xff]   ;;  %v15292_v20 = vld [vmem:[%s21715_s6 + $0x968] ss:$16 sps:$4 sm:$0xff]  }
 0x556   : > { %8455 = vmatprep.subr.bf16.mxu1 %v15237_v45  ;;  %v15295_v45 = vld [vmem:[%s21715_s6 + $0x740] ss:$16 sps:$4 sm:$0xff]  }
 0x558   : > { %8447 = vmatmul.mubr.bf16.vlgmr.msra.gmra.mrb[48].mxu1 %v18610_v21  ;;  %8827 = vmatpush1.bf16.msra.mxu0 %v15232_v44  ;;  %v15249_v21 = vld [vmem:[%s21715_s6 + $0x644] ss:$16 sps:$4 sm:$0xff]   ;;  %v15300_v44 = vld [vmem:[%s21715_s6 + $0x98c] ss:$16 sps:$4 sm:$0xff]  }
 0x559   : > { %8456 = vmatpush1.bf16.msra.mxu1 %v15235_v6  ;;  %8487 = vmatprep.mubr.bf16.mxu1 %v18618_v62  ;;  %v15247_v62 = vld [vmem:[%s21715_s6 + $0x640] ss:$16 sps:$4 sm:$0xff]   ;;  %v15303_v6 = vld [vmem:[%s21715_s6 + $0x764] ss:$16 sps:$4 sm:$0xff]  }
 0x55a   : > { %8828 = vmatprep.subr.bf16.mxu0 %v15240_v63  ;;  %8457 = vmatprep.subr.bf16.mxu1 %v15243_v43  ;;  %v15298_v63 = vld [vmem:[%s21715_s6 + $0x988] ss:$16 sps:$4 sm:$0xff]   ;;  %v15301_v43 = vld [vmem:[%s21715_s6 + $0x760] ss:$16 sps:$4 sm:$0xff]  }
 0x55c   : > { %8829 = vmatpush1.bf16.msra.mxu0 %v15238_v29  ;;  %v15306_v29 = vld [vmem:[%s21715_s6 + $0x9ac] ss:$16 sps:$4 sm:$0xff]  }
 0x55d   : > { %8458 = vmatpush1.bf16.msra.mxu1 %v15241_v13  ;;  %8830 = vmatprep.subr.bf16.mxu0 %v15246_v53  ;;  %v15309_v13 = vld [vmem:[%s21715_s6 + $0x784] ss:$16 sps:$4 sm:$0xff]   ;;  %v15304_v53 = vld [vmem:[%s21715_s6 + $0x9a8] ss:$16 sps:$4 sm:$0xff]  }
 0x55e   : > { %8459 = vmatprep.subr.bf16.mxu1 %v15249_v21  ;;  %v4193_v21 = vrot.slane %v18778_v35, %v17886_v50 }
 0x560   : > { %8831 = vmatpush1.bf16.msra.mxu0 %v15244_v10  ;;  %v15307_v10 = vld [vmem:[%s21715_s6 + $0x780] ss:$16 sps:$4 sm:$0xff]  }
 0x561   : > { %8460 = vmatpush1.bf16.msra.mxu1 %v15247_v62  ;;  %8832 = vmatprep.subr.bf16.mxu0 %v15252_v15  ;;  %v15312_v62 = vld [vmem:[%s21715_s6 + $0x9cc] ss:$16 sps:$4 sm:$0xff]   ;;  %v4205_v15 = vrot.slane %v18778_v35, %v17983_v49 }
 0x562   : > { %8461 = vmatprep.subr.bf16.mxu1 %v15255_v5  ;;  %v15315_v5 = vld [vmem:[%s21715_s6 + $0x7a4] ss:$16 sps:$4 sm:$0xff]  }
 0x564   : > { %8833 = vmatpush1.bf16.msra.mxu0 %v15250_v8  ;;  %v15310_v8 = vld [vmem:[%s21715_s6 + $0x9c8] ss:$16 sps:$4 sm:$0xff]  }
 0x565   : > { %8462 = vmatpush1.bf16.msra.mxu1 %v15253_v23  ;;  %8834 = vmatprep.subr.bf16.mxu0 %v15258_v57  ;;  %v5077_v23 = vadd.f32 %v18588_v59, %v4193_v21  ;;  %v15313_v57 = vld [vmem:[%s21715_s6 + $0x7a0] ss:$16 sps:$4 sm:$0xff]   ;;  %v15316_v59 = vld [vmem:[%s21715_s6 + $0x9e8] ss:$16 sps:$4 sm:$0xff]  }
 0x566   : > { %8463 = vmatprep.subr.bf16.mxu1 %v15261_v2  ;;  %v15318_v2 = vld [vmem:[%s21715_s6 + $0x9ec] ss:$16 sps:$4 sm:$0xff]   ;;  %v15367_v21 = vld [vmem:[%s21715_s6 + $0x8c0] ss:$16 sps:$4 sm:$0xff]  }
 0x568   : > { %8835 = vmatpush1.bf16.msra.mxu0 %v15256_v55  ;;  %v5120_v55 = vadd.f32 %v18701_v11, %v4205_v15  ;;  %v15324_v11 = vld [vmem:[%s21715_s6 + $0xa0c] ss:$16 sps:$4 sm:$0xff]   ;;  %v15370_v15 = vld [vmem:[%s21715_s6 + $0xb08] ss:$16 sps:$4 sm:$0xff]  }
 0x569   : > { %8464 = vmatpush1.bf16.msra.mxu1 %v15259_v25  ;;  %8836 = vmatprep.subr.bf16.mxu0 %v15264_v38  ;;  %v15321_v25 = vld [vmem:[%s21715_s6 + $0x7c4] ss:$16 sps:$4 sm:$0xff]   ;;  %v5214_v38 = vmax.f32 %v5077_v23, 0.0 }
 0x56a   : > { %v18915_v28 = vpop.f32.mrb[44].mxu1  ;;  %8465 = vmatprep.subr.bf16.mxu1 %v15267_v12  ;;  %v15319_v12 = vld [vmem:[%s21715_s6 + $0x7c0] ss:$16 sps:$4 sm:$0xff]   ;;  %v15381_v23 = vld [vmem:[%s21715_s6 + $0x904] ss:$16 sps:$4 sm:$0xff]  }
 0x56b   : > { %v18920_v34 = vpop.f32.mrb[45].mxu1 }
 0x56c   : > { %8837 = vmatpush1.bf16.msra.mxu0 %v15262_v19  ;;  %v5203_v3 = vpop.f32.mrb[46].mxu1  ;;  %v5217_v19 = vmax.f32 %v5120_v55, 0.0  ;;  %v15384_v55 = vld [vmem:[%s21715_s6 + $0xb4c] ss:$16 sps:$4 sm:$0xff]  }
 0x56d   : > { %8466 = vmatpush1.bf16.msra.mxu1 %v15265_v30  ;;  %v5204_v36 = vpop.f32.mrb[47].mxu1  ;;  %8838 = vmatprep.subr.bf16.mxu0 %v15270_v24  ;;  %v15327_v30 = vld [vmem:[%s21715_s6 + $0x7e4] ss:$16 sps:$4 sm:$0xff]   ;;  %v15322_v24 = vld [vmem:[%s21715_s6 + $0xa08] ss:$16 sps:$4 sm:$0xff]  }
 0x56e   : > { %8467 = vmatprep.subr.bf16.mxu1 %v15273_v26  ;;  %v19039_v26 = vpack.c.bf16 %v5214_v38, %v5214_v38  ;;  %v15325_v3 = vld [vmem:[%s21715_s6 + $0x7e0] ss:$16 sps:$4 sm:$0xff]   ;;  %v19047_v36 = vpack.c.bf16 %v5217_v19, %v5217_v19  ;;  %v15388_v19 = vld [vmem:[%s21715_s6 + $0xb68] ss:$16 sps:$4 sm:$0xff]  }
 0x56f   : > { %v15385_v38 = vld [vmem:[%s21715_s6 + $0x920] ss:$16 sps:$4 sm:$0xff]  }
 0x570   : > { %8839 = vmatpush1.bf16.msra.mxu0 %v15268_v27  ;;  %v15330_v27 = vld [vmem:[%s21715_s6 + $0xa2c] ss:$16 sps:$4 sm:$0xff]  }
 0x571   : > { %8468 = vmatpush1.bf16.msra.mxu1 %v15271_v46  ;;  %8840 = vmatprep.subr.bf16.mxu0 %v15276_v32  ;;  %v15333_v46 = vld [vmem:[%s21715_s6 + $0x804] ss:$16 sps:$4 sm:$0xff]   ;;  %v15328_v32 = vld [vmem:[%s21715_s6 + $0xa28] ss:$16 sps:$4 sm:$0xff]  }
 0x572   : > { %8469 = vmatprep.subr.bf16.mxu1 %v15279_v41  ;;  %v15331_v41 = vld [vmem:[%s21715_s6 + $0x800] ss:$16 sps:$4 sm:$0xff]  }
 0x574   : > { %8841 = vmatpush1.bf16.msra.mxu0 %v15274_v48  ;;  %v15336_v48 = vld [vmem:[%s21715_s6 + $0xa4c] ss:$16 sps:$4 sm:$0xff]  }
 0x575   : > { %8470 = vmatpush1.bf16.msra.mxu1 %v15277_v39  ;;  %8842 = vmatprep.subr.bf16.mxu0 %v15282_v14  ;;  %v15339_v39 = vld [vmem:[%s21715_s6 + $0x824] ss:$16 sps:$4 sm:$0xff]   ;;  %v15334_v14 = vld [vmem:[%s21715_s6 + $0xa48] ss:$16 sps:$4 sm:$0xff]  }
 0x576   : > { %8471 = vmatprep.subr.bf16.mxu1 %v15285_v61  ;;  %v15337_v61 = vld [vmem:[%s21715_s6 + $0x820] ss:$16 sps:$4 sm:$0xff]  }
 0x578   : > { %8843 = vmatpush1.bf16.msra.mxu0 %v15280_v18  ;;  %v15342_v18 = vld [vmem:[%s21715_s6 + $0xa6c] ss:$16 sps:$4 sm:$0xff]  }
 0x579   : > { %8472 = vmatpush1.bf16.msra.mxu1 %v15283_v1  ;;  %8844 = vmatprep.subr.bf16.mxu0 %v15288_v17  ;;  %v15340_v1 = vld [vmem:[%s21715_s6 + $0xa68] ss:$16 sps:$4 sm:$0xff]   ;;  %v15348_v17 = vld [vmem:[%s21715_s6 + $0xa8c] ss:$16 sps:$4 sm:$0xff]  }
 0x57a   : > { %8473 = vmatprep.subr.bf16.mxu1 %v15291_v40  ;;  %v15351_v40 = vld [vmem:[%s21715_s6 + $0x864] ss:$16 sps:$4 sm:$0xff]  }
 0x57c   : > { %8845 = vmatpush1.bf16.msra.mxu0 %v15286_v56  ;;  %v15346_v56 = vld [vmem:[%s21715_s6 + $0xa88] ss:$16 sps:$4 sm:$0xff]  }
 0x57d   : > { %8474 = vmatpush1.bf16.msra.mxu1 %v15289_v60  ;;  %8846 = vmatprep.subr.bf16.mxu0 %v15294_v9  ;;  %v15349_v60 = vld [vmem:[%s21715_s6 + $0x860] ss:$16 sps:$4 sm:$0xff]   ;;  %v15354_v9 = vld [vmem:[%s21715_s6 + $0xaac] ss:$16 sps:$4 sm:$0xff]  }
 0x57e   : > { %8475 = vmatprep.subr.bf16.mxu1 %v15297_v52  ;;  %v15357_v52 = vld [vmem:[%s21715_s6 + $0x884] ss:$16 sps:$4 sm:$0xff]  }
 0x580   : > { %8847 = vmatpush1.bf16.msra.mxu0 %v15292_v20  ;;  %v15352_v20 = vld [vmem:[%s21715_s6 + $0xaa8] ss:$16 sps:$4 sm:$0xff]  }
 0x581   : > { %8476 = vmatpush1.bf16.msra.mxu1 %v15295_v45  ;;  %8848 = vmatprep.subr.bf16.mxu0 %v15300_v44  ;;  %v15355_v45 = vld [vmem:[%s21715_s6 + $0x880] ss:$16 sps:$4 sm:$0xff]   ;;  %v15360_v44 = vld [vmem:[%s21715_s6 + $0xacc] ss:$16 sps:$4 sm:$0xff]  }
 0x582   : > { %8477 = vmatprep.subr.bf16.mxu1 %v15303_v6  ;;  %v15363_v6 = vld [vmem:[%s21715_s6 + $0x8a4] ss:$16 sps:$4 sm:$0xff]  }
 0x584   : > { %8849 = vmatpush1.bf16.msra.mxu0 %v15298_v63  ;;  %v15358_v63 = vld [vmem:[%s21715_s6 + $0xac8] ss:$16 sps:$4 sm:$0xff]  }
 0x585   : > { %8478 = vmatpush1.bf16.msra.mxu1 %v15301_v43  ;;  %8850 = vmatprep.subr.bf16.mxu0 %v15306_v29  ;;  %v15361_v43 = vld [vmem:[%s21715_s6 + $0x8a0] ss:$16 sps:$4 sm:$0xff]   ;;  %v15366_v29 = vld [vmem:[%s21715_s6 + $0xaec] ss:$16 sps:$4 sm:$0xff]  }
 0x586   : > { %8479 = vmatprep.subr.bf16.mxu1 %v15309_v13  ;;  %v15369_v13 = vld [vmem:[%s21715_s6 + $0x8c4] ss:$16 sps:$4 sm:$0xff]  }
 0x588   : > { %8851 = vmatpush1.bf16.msra.mxu0 %v15304_v53  ;;  %v15364_v53 = vld [vmem:[%s21715_s6 + $0xae8] ss:$16 sps:$4 sm:$0xff]  }
 0x589   : > { %8480 = vmatpush1.bf16.msra.mxu1 %v15307_v10  ;;  %8852 = vmatprep.subr.bf16.mxu0 %v15312_v62  ;;  %v15372_v10 = vld [vmem:[%s21715_s6 + $0xb0c] ss:$16 sps:$4 sm:$0xff]   ;;  %v15375_v62 = vld [vmem:[%s21715_s6 + $0x8e4] ss:$16 sps:$4 sm:$0xff]  }
 0x58a   : > { %8481 = vmatprep.subr.bf16.mxu1 %v15315_v5  ;;  %v15373_v5 = vld [vmem:[%s21715_s6 + $0x8e0] ss:$16 sps:$4 sm:$0xff]  }
 0x58c   : > { %8853 = vmatpush1.bf16.msra.mxu0 %v15310_v8  ;;  %v15378_v8 = vld [vmem:[%s21715_s6 + $0xb2c] ss:$16 sps:$4 sm:$0xff]  }
 0x58d   : > { %8482 = vmatpush1.bf16.msra.mxu1 %v15313_v57  ;;  %8854 = vmatprep.subr.bf16.mxu0 %v15318_v2  ;;  %v15376_v57 = vld [vmem:[%s21715_s6 + $0xb28] ss:$16 sps:$4 sm:$0xff]   ;;  %v15379_v2 = vld [vmem:[%s21715_s6 + $0x900] ss:$16 sps:$4 sm:$0xff]  }
 0x58e   : > { %8483 = vmatprep.subr.bf16.mxu1 %v15321_v25  ;;  %v15387_v25 = vld [vmem:[%s21715_s6 + $0x924] ss:$16 sps:$4 sm:$0xff]  }
 0x590   : > { %8855 = vmatpush1.bf16.msra.mxu0 %v15316_v59  ;;  %v15382_v59 = vld [vmem:[%s21715_s6 + $0xb48] ss:$16 sps:$4 sm:$0xff]  }
 0x591   : > { %8484 = vmatpush1.bf16.msra.mxu1 %v15319_v12  ;;  %8865 = vmatprep.subr.bf16.mxu0 %v15324_v11  ;;  %v15390_v12 = vld [vmem:[%s21715_s6 + $0xb6c] ss:$16 sps:$4 sm:$0xff]   ;;  %v15393_v11 = vld [vmem:[%s21715_s6 + $0x944] ss:$16 sps:$4 sm:$0xff]  }
 0x592   : > { %8485 = vmatprep.subr.bf16.mxu1 %v15327_v30  ;;  %v15391_v30 = vld [vmem:[%s21715_s6 + $0x940] ss:$16 sps:$4 sm:$0xff]  }
 0x593   : > { %8857 = vmatmul.mubr.bf16.vlgmr.msra.gmra.mrb[0].mxu0 %v19039_v26 }
 0x594   : > { %8866 = vmatpush1.bf16.msra.mxu0 %v15322_v24  ;;  %8897 = vmatprep.mubr.bf16.mxu0 %v19047_v36  ;;  %v15396_v24 = vld [vmem:[%s21715_s6 + $0xb8c] ss:$16 sps:$4 sm:$0xff]  }
 0x595   : > { %8486 = vmatpush1.bf16.msra.mxu1 %v15325_v3  ;;  %8867 = vmatprep.subr.bf16.mxu0 %v15330_v27  ;;  %v15399_v3 = vld [vmem:[%s21715_s6 + $0x964] ss:$16 sps:$4 sm:$0xff]   ;;  %v15394_v27 = vld [vmem:[%s21715_s6 + $0xb88] ss:$16 sps:$4 sm:$0xff]  }
 0x596   : > { %8496 = vmatprep.subr.bf16.mxu1 %v15333_v46  ;;  %v15397_v46 = vld [vmem:[%s21715_s6 + $0x960] ss:$16 sps:$4 sm:$0xff]  }
 0x598   : > { %8488 = vmatmul.mubr.bf16.vlgmr.msra.gmra.mrb[48].mxu1 %v18829_v31  ;;  %8868 = vmatpush1.bf16.msra.mxu0 %v15328_v32  ;;  %v15345_v31 = vld [vmem:[%s21715_s6 + $0x844] ss:$16 sps:$4 sm:$0xff]   ;;  %v15402_v32 = vld [vmem:[%s21715_s6 + $0xbac] ss:$16 sps:$4 sm:$0xff]  }
 0x599   : > { %8497 = vmatpush1.bf16.msra.mxu1 %v15331_v41  ;;  %8528 = vmatprep.mubr.bf16.mxu1 %v18837_v0  ;;  %v15343_v0 = vld [vmem:[%s21715_s6 + $0x840] ss:$16 sps:$4 sm:$0xff]   ;;  %v15405_v41 = vld [vmem:[%s21715_s6 + $0x984] ss:$16 sps:$4 sm:$0xff]  }
 0x59a   : > { %8869 = vmatprep.subr.bf16.mxu0 %v15336_v48  ;;  %8498 = vmatprep.subr.bf16.mxu1 %v15339_v39  ;;  %v15400_v48 = vld [vmem:[%s21715_s6 + $0xba8] ss:$16 sps:$4 sm:$0xff]   ;;  %v4201_v39 = vrot.slane %v18778_v35, %v17980_v33 }
 0x59c   : > { %8870 = vmatpush1.bf16.msra.mxu0 %v15334_v14  ;;  %v15403_v14 = vld [vmem:[%s21715_s6 + $0x980] ss:$16 sps:$4 sm:$0xff]  }
 0x59d   : > { %8499 = vmatpush1.bf16.msra.mxu1 %v15337_v61  ;;  %8871 = vmatprep.subr.bf16.mxu0 %v15342_v18  ;;  %v15408_v61 = vld [vmem:[%s21715_s6 + $0xbcc] ss:$16 sps:$4 sm:$0xff]   ;;  %v4213_v18 = vrot.slane %v18778_v35, %v18045_v54 }
 0x59e   : > { %8500 = vmatprep.subr.bf16.mxu1 %v15345_v31  ;;  %v15411_v31 = vld [vmem:[%s21715_s6 + $0x9a4] ss:$16 sps:$4 sm:$0xff]  }
 0x5a0   : > { %8872 = vmatpush1.bf16.msra.mxu0 %v15340_v1  ;;  %v15406_v1 = vld [vmem:[%s21715_s6 + $0xbc8] ss:$16 sps:$4 sm:$0xff]  }
 0x5a1   : > { %8501 = vmatpush1.bf16.msra.mxu1 %v15343_v0  ;;  %8873 = vmatprep.subr.bf16.mxu0 %v15348_v17  ;;  %v5118_v0 = vadd.f32 %v18696_v22, %v4201_v39  ;;  %v15409_v17 = vld [vmem:[%s21715_s6 + $0x9a0] ss:$16 sps:$4 sm:$0xff]   ;;  %v15412_v22 = vld [vmem:[%s21715_s6 + $0xbe8] ss:$16 sps:$4 sm:$0xff]   ;;  %v15471_v39 = vld [vmem:[%s21715_s6 + $0xae4] ss:$16 sps:$4 sm:$0xff]  }
 0x5a2   : > { %8502 = vmatprep.subr.bf16.mxu1 %v15351_v40  ;;  %v15414_v40 = vld [vmem:[%s21715_s6 + $0xbec] ss:$16 sps:$4 sm:$0xff]  }
 0x5a4   : > { %8874 = vmatpush1.bf16.msra.mxu0 %v15346_v56  ;;  %v5161_v56 = vadd.f32 %v18812_v58, %v4213_v18  ;;  %v15420_v58 = vld [vmem:[%s21715_s6 + $0xc0c] ss:$16 sps:$4 sm:$0xff]  }
 0x5a5   : > { %8503 = vmatpush1.bf16.msra.mxu1 %v15349_v60  ;;  %8875 = vmatprep.subr.bf16.mxu0 %v15354_v9  ;;  %v15417_v60 = vld [vmem:[%s21715_s6 + $0x9c4] ss:$16 sps:$4 sm:$0xff]   ;;  %v5216_v9 = vmax.f32 %v5118_v0, 0.0  ;;  %v15474_v18 = vld [vmem:[%s21715_s6 + $0xd2c] ss:$16 sps:$4 sm:$0xff]  }
 0x5a6   : > { %8504 = vmatprep.subr.bf16.mxu1 %v15357_v52  ;;  %v15415_v52 = vld [vmem:[%s21715_s6 + $0x9c0] ss:$16 sps:$4 sm:$0xff]  }
 0x5a7   : > { %v15475_v0 = vld [vmem:[%s21715_s6 + $0xb00] ss:$16 sps:$4 sm:$0xff]  }
 0x5a8   : > { %8876 = vmatpush1.bf16.msra.mxu0 %v15352_v20  ;;  %v5219_v20 = vmax.f32 %v5161_v56, 0.0  ;;  %v15478_v56 = vld [vmem:[%s21715_s6 + $0xd48] ss:$16 sps:$4 sm:$0xff]  }
 0x5a9   : > { %8505 = vmatpush1.bf16.msra.mxu1 %v15355_v45  ;;  %8877 = vmatprep.subr.bf16.mxu0 %v15360_v44  ;;  %v15423_v45 = vld [vmem:[%s21715_s6 + $0x9e4] ss:$16 sps:$4 sm:$0xff]   ;;  %v15418_v44 = vld [vmem:[%s21715_s6 + $0xc08] ss:$16 sps:$4 sm:$0xff]  }
 0x5aa   : > { %8506 = vmatprep.subr.bf16.mxu1 %v15363_v6  ;;  %v19245_v6 = vpack.c.bf16 %v5216_v9, %v5216_v9  ;;  %v15489_v9 = vld [vmem:[%s21715_s6 + $0xb44] ss:$16 sps:$4 sm:$0xff]  }
 0x5ac   : > { %8878 = vmatpush1.bf16.msra.mxu0 %v15358_v63  ;;  %v15421_v63 = vld [vmem:[%s21715_s6 + $0x9e0] ss:$16 sps:$4 sm:$0xff]  }
 0x5ad   : > { %8507 = vmatpush1.bf16.msra.mxu1 %v15361_v43  ;;  %8879 = vmatprep.subr.bf16.mxu0 %v15366_v29  ;;  %v15426_v43 = vld [vmem:[%s21715_s6 + $0xc2c] ss:$16 sps:$4 sm:$0xff]   ;;  %v19253_v29 = vpack.c.bf16 %v5219_v20, %v5219_v20 }
 0x5ae   : > { %8508 = vmatprep.subr.bf16.mxu1 %v15369_v13  ;;  %v15429_v13 = vld [vmem:[%s21715_s6 + $0xa04] ss:$16 sps:$4 sm:$0xff]   ;;  %v15492_v20 = vld [vmem:[%s21715_s6 + $0xd8c] ss:$16 sps:$4 sm:$0xff]  }
 0x5b0   : > { %8880 = vmatpush1.bf16.msra.mxu0 %v15364_v53  ;;  %v15424_v53 = vld [vmem:[%s21715_s6 + $0xc28] ss:$16 sps:$4 sm:$0xff]  }
 0x5b1   : > { %8509 = vmatpush1.bf16.msra.mxu1 %v15367_v21  ;;  %8881 = vmatprep.subr.bf16.mxu0 %v15372_v10  ;;  %v15427_v21 = vld [vmem:[%s21715_s6 + $0xa00] ss:$16 sps:$4 sm:$0xff]   ;;  %v15432_v10 = vld [vmem:[%s21715_s6 + $0xc4c] ss:$16 sps:$4 sm:$0xff]  }
 0x5b2   : > { %8510 = vmatprep.subr.bf16.mxu1 %v15375_v62  ;;  %v15435_v62 = vld [vmem:[%s21715_s6 + $0xa24] ss:$16 sps:$4 sm:$0xff]  }
 0x5b4   : > { %8882 = vmatpush1.bf16.msra.mxu0 %v15370_v15  ;;  %v15430_v15 = vld [vmem:[%s21715_s6 + $0xc48] ss:$16 sps:$4 sm:$0xff]  }
 0x5b5   : > { %8511 = vmatpush1.bf16.msra.mxu1 %v15373_v5  ;;  %8883 = vmatprep.subr.bf16.mxu0 %v15378_v8  ;;  %v15433_v5 = vld [vmem:[%s21715_s6 + $0xa20] ss:$16 sps:$4 sm:$0xff]   ;;  %v15438_v8 = vld [vmem:[%s21715_s6 + $0xc6c] ss:$16 sps:$4 sm:$0xff]  }
 0x5b6   : > { %8512 = vmatprep.subr.bf16.mxu1 %v15381_v23  ;;  %v15436_v23 = vld [vmem:[%s21715_s6 + $0xc68] ss:$16 sps:$4 sm:$0xff]  }
 0x5b8   : > { %8884 = vmatpush1.bf16.msra.mxu0 %v15376_v57  ;;  %v15444_v57 = vld [vmem:[%s21715_s6 + $0xc8c] ss:$16 sps:$4 sm:$0xff]  }
 0x5b9   : > { %8513 = vmatpush1.bf16.msra.mxu1 %v15379_v2  ;;  %8885 = vmatprep.subr.bf16.mxu0 %v15384_v55  ;;  %v15447_v2 = vld [vmem:[%s21715_s6 + $0xa64] ss:$16 sps:$4 sm:$0xff]   ;;  %v15442_v55 = vld [vmem:[%s21715_s6 + $0xc88] ss:$16 sps:$4 sm:$0xff]  }
 0x5ba   : > { %8514 = vmatprep.subr.bf16.mxu1 %v15387_v25  ;;  %v15445_v25 = vld [vmem:[%s21715_s6 + $0xa60] ss:$16 sps:$4 sm:$0xff]  }
 0x5bc   : > { %8886 = vmatpush1.bf16.msra.mxu0 %v15382_v59  ;;  %v15450_v59 = vld [vmem:[%s21715_s6 + $0xcac] ss:$16 sps:$4 sm:$0xff]  }
 0x5bd   : > { %8515 = vmatpush1.bf16.msra.mxu1 %v15385_v38  ;;  %8887 = vmatprep.subr.bf16.mxu0 %v15390_v12  ;;  %v15453_v38 = vld [vmem:[%s21715_s6 + $0xa84] ss:$16 sps:$4 sm:$0xff]   ;;  %v15448_v12 = vld [vmem:[%s21715_s6 + $0xca8] ss:$16 sps:$4 sm:$0xff]  }
 0x5be   : > { %8516 = vmatprep.subr.bf16.mxu1 %v15393_v11  ;;  %v15451_v11 = vld [vmem:[%s21715_s6 + $0xa80] ss:$16 sps:$4 sm:$0xff]  }
 0x5c0   : > { %8888 = vmatpush1.bf16.msra.mxu0 %v15388_v19  ;;  %v15456_v19 = vld [vmem:[%s21715_s6 + $0xccc] ss:$16 sps:$4 sm:$0xff]  }
 0x5c1   : > { %8517 = vmatpush1.bf16.msra.mxu1 %v15391_v30  ;;  %8889 = vmatprep.subr.bf16.mxu0 %v15396_v24  ;;  %v15459_v30 = vld [vmem:[%s21715_s6 + $0xaa4] ss:$16 sps:$4 sm:$0xff]   ;;  %v15454_v24 = vld [vmem:[%s21715_s6 + $0xcc8] ss:$16 sps:$4 sm:$0xff]  }
 0x5c2   : > { %8518 = vmatprep.subr.bf16.mxu1 %v15399_v3  ;;  %v15457_v3 = vld [vmem:[%s21715_s6 + $0xaa0] ss:$16 sps:$4 sm:$0xff]  }
 0x5c4   : > { %8890 = vmatpush1.bf16.msra.mxu0 %v15394_v27  ;;  %v15462_v27 = vld [vmem:[%s21715_s6 + $0xcec] ss:$16 sps:$4 sm:$0xff]  }
 0x5c5   : > { %8519 = vmatpush1.bf16.msra.mxu1 %v15397_v46  ;;  %8891 = vmatprep.subr.bf16.mxu0 %v15402_v32  ;;  %v15465_v46 = vld [vmem:[%s21715_s6 + $0xac4] ss:$16 sps:$4 sm:$0xff]   ;;  %v15460_v32 = vld [vmem:[%s21715_s6 + $0xce8] ss:$16 sps:$4 sm:$0xff]  }
 0x5c6   : > { %8520 = vmatprep.subr.bf16.mxu1 %v15405_v41  ;;  %v15463_v41 = vld [vmem:[%s21715_s6 + $0xac0] ss:$16 sps:$4 sm:$0xff]  }
 0x5c8   : > { %8892 = vmatpush1.bf16.msra.mxu0 %v15400_v48  ;;  %v15468_v48 = vld [vmem:[%s21715_s6 + $0xd0c] ss:$16 sps:$4 sm:$0xff]  }
 0x5c9   : > { %8521 = vmatpush1.bf16.msra.mxu1 %v15403_v14  ;;  %8893 = vmatprep.subr.bf16.mxu0 %v15408_v61  ;;  %v15466_v14 = vld [vmem:[%s21715_s6 + $0xd08] ss:$16 sps:$4 sm:$0xff]   ;;  %v15469_v61 = vld [vmem:[%s21715_s6 + $0xae0] ss:$16 sps:$4 sm:$0xff]  }
 0x5ca   : > { %8522 = vmatprep.subr.bf16.mxu1 %v15411_v31  ;;  %v15477_v31 = vld [vmem:[%s21715_s6 + $0xb04] ss:$16 sps:$4 sm:$0xff]  }
 0x5cc   : > { %8894 = vmatpush1.bf16.msra.mxu0 %v15406_v1  ;;  %v15472_v1 = vld [vmem:[%s21715_s6 + $0xd28] ss:$16 sps:$4 sm:$0xff]  }
 0x5cd   : > { %8523 = vmatpush1.bf16.msra.mxu1 %v15409_v17  ;;  %8895 = vmatprep.subr.bf16.mxu0 %v15414_v40  ;;  %v15480_v17 = vld [vmem:[%s21715_s6 + $0xd4c] ss:$16 sps:$4 sm:$0xff]   ;;  %v15483_v40 = vld [vmem:[%s21715_s6 + $0xb24] ss:$16 sps:$4 sm:$0xff]  }
 0x5ce   : > { %8524 = vmatprep.subr.bf16.mxu1 %v15417_v60  ;;  %v15481_v60 = vld [vmem:[%s21715_s6 + $0xb20] ss:$16 sps:$4 sm:$0xff]  }
 0x5d0   : > { %8896 = vmatpush1.bf16.msra.mxu0 %v15412_v22  ;;  %v15486_v22 = vld [vmem:[%s21715_s6 + $0xd6c] ss:$16 sps:$4 sm:$0xff]  }
 0x5d1   : > { %8525 = vmatpush1.bf16.msra.mxu1 %v15415_v52  ;;  %8906 = vmatprep.subr.bf16.mxu0 %v15420_v58  ;;  %v15484_v52 = vld [vmem:[%s21715_s6 + $0xd68] ss:$16 sps:$4 sm:$0xff]   ;;  %v15487_v58 = vld [vmem:[%s21715_s6 + $0xb40] ss:$16 sps:$4 sm:$0xff]  }
 0x5d2   : > { %8526 = vmatprep.subr.bf16.mxu1 %v15423_v45  ;;  %v15495_v45 = vld [vmem:[%s21715_s6 + $0xb64] ss:$16 sps:$4 sm:$0xff]  }
 0x5d3   : > { %8898 = vmatmul.mubr.bf16.vlgmr.msra.gmra.mrb[0].mxu0 %v19245_v6 }
 0x5d4   : > { %8907 = vmatpush1.bf16.msra.mxu0 %v15418_v44  ;;  %8938 = vmatprep.mubr.bf16.mxu0 %v19253_v29  ;;  %v15490_v44 = vld [vmem:[%s21715_s6 + $0xd88] ss:$16 sps:$4 sm:$0xff]  }
 0x5d5   : > { %8527 = vmatpush1.bf16.msra.mxu1 %v15421_v63  ;;  %8908 = vmatprep.subr.bf16.mxu0 %v15426_v43  ;;  %v15493_v63 = vld [vmem:[%s21715_s6 + $0xb60] ss:$16 sps:$4 sm:$0xff]   ;;  %v15498_v43 = vld [vmem:[%s21715_s6 + $0xdac] ss:$16 sps:$4 sm:$0xff]  }
 0x5d6   : > { %8537 = vmatprep.subr.bf16.mxu1 %v15429_v13  ;;  %v15501_v13 = vld [vmem:[%s21715_s6 + $0xb84] ss:$16 sps:$4 sm:$0xff]  }
 0x5d8   : > { %8529 = vmatmul.mubr.bf16.vlgmr.msra.gmra.mrb[48].mxu1 %v19039_v26  ;;  %8909 = vmatpush1.bf16.msra.mxu0 %v15424_v53  ;;  %v15441_v26 = vld [vmem:[%s21715_s6 + $0xa44] ss:$16 sps:$4 sm:$0xff]   ;;  %v15496_v53 = vld [vmem:[%s21715_s6 + $0xda8] ss:$16 sps:$4 sm:$0xff]  }
 0x5d9   : > { %8538 = vmatpush1.bf16.msra.mxu1 %v15427_v21  ;;  %8569 = vmatprep.mubr.bf16.mxu1 %v19047_v36  ;;  %v15439_v36 = vld [vmem:[%s21715_s6 + $0xa40] ss:$16 sps:$4 sm:$0xff]   ;;  %v4209_v21 = vrot.slane %v18778_v35, %v18042_v51 }
 0x5da   : > { %8910 = vmatprep.subr.bf16.mxu0 %v15432_v10  ;;  %8539 = vmatprep.subr.bf16.mxu1 %v15435_v62  ;;  %v15499_v10 = vld [vmem:[%s21715_s6 + $0xb80] ss:$16 sps:$4 sm:$0xff]   ;;  %v15504_v62 = vld [vmem:[%s21715_s6 + $0xdcc] ss:$16 sps:$4 sm:$0xff]  }
 0x5dc   : > { %8911 = vmatpush1.bf16.msra.mxu0 %v15430_v15  ;;  %v4221_v15 = vrot.slane %v18778_v35, %v18107_v47  ;;  %v15510_v35 = vld [vmem:[%s21715_s6 + $0xdec] ss:$16 sps:$4 sm:$0xff]  }
 0x5dd   : > { %8540 = vmatpush1.bf16.msra.mxu1 %v15433_v5  ;;  %8912 = vmatprep.subr.bf16.mxu0 %v15438_v8  ;;  %v15507_v5 = vld [vmem:[%s21715_s6 + $0xba4] ss:$16 sps:$4 sm:$0xff]   ;;  %v15502_v8 = vld [vmem:[%s21715_s6 + $0xdc8] ss:$16 sps:$4 sm:$0xff]  }
 0x5de   : > { %8541 = vmatprep.subr.bf16.mxu1 %v15441_v26  ;;  %v5159_v26 = vadd.f32 %v18807_v42, %v4209_v21  ;;  %v15508_v42 = vld [vmem:[%s21715_s6 + $0xde8] ss:$16 sps:$4 sm:$0xff]   ;;  %v15570_v21 = vld [vmem:[%s21715_s6 + $0xf2c] ss:$16 sps:$4 sm:$0xff]  }
 0x5e0   : > { %8913 = vmatpush1.bf16.msra.mxu0 %v15436_v23  ;;  %v15505_v23 = vld [vmem:[%s21715_s6 + $0xba0] ss:$16 sps:$4 sm:$0xff]  }
 0x5e1   : > { %8542 = vmatpush1.bf16.msra.mxu1 %v15439_v36  ;;  %8914 = vmatprep.subr.bf16.mxu0 %v15444_v57  ;;  %v5202_v36 = vadd.f32 %v18920_v34, %v4221_v15  ;;  %v15513_v57 = vld [vmem:[%s21715_s6 + $0xbc4] ss:$16 sps:$4 sm:$0xff]   ;;  %v15516_v34 = vld [vmem:[%s21715_s6 + $0xe0c] ss:$16 sps:$4 sm:$0xff]   ;;  %v15571_v15 = vld [vmem:[%s21715_s6 + $0xd00] ss:$16 sps:$4 sm:$0xff]  }
 0x5e2   : > { %8543 = vmatprep.subr.bf16.mxu1 %v15447_v2  ;;  %v5218_v2 = vmax.f32 %v5159_v26, 0.0  ;;  %v15574_v26 = vld [vmem:[%s21715_s6 + $0xf48] ss:$16 sps:$4 sm:$0xff]  }
 0x5e4   : > { %8915 = vmatpush1.bf16.msra.mxu0 %v15442_v55  ;;  %v15511_v55 = vld [vmem:[%s21715_s6 + $0xbc0] ss:$16 sps:$4 sm:$0xff]  }
 0x5e5   : > { %8544 = vmatpush1.bf16.msra.mxu1 %v15445_v25  ;;  %8916 = vmatprep.subr.bf16.mxu0 %v15450_v59  ;;  %v5221_v25 = vmax.f32 %v5202_v36, 0.0  ;;  %v15519_v59 = vld [vmem:[%s21715_s6 + $0xbe4] ss:$16 sps:$4 sm:$0xff]  }
 0x5e6   : > { %8545 = vmatprep.subr.bf16.mxu1 %v15453_v38  ;;  %v15514_v38 = vld [vmem:[%s21715_s6 + $0xe08] ss:$16 sps:$4 sm:$0xff]   ;;  %v15585_v36 = vld [vmem:[%s21715_s6 + $0xd44] ss:$16 sps:$4 sm:$0xff]  }
 0x5e8   : > { %8917 = vmatpush1.bf16.msra.mxu0 %v15448_v12  ;;  %v19451_v12 = vpack.c.bf16 %v5218_v2, %v5218_v2  ;;  %v15588_v2 = vld [vmem:[%s21715_s6 + $0xf8c] ss:$16 sps:$4 sm:$0xff]  }
 0x5e9   : > { %8546 = vmatpush1.bf16.msra.mxu1 %v15451_v11  ;;  %8918 = vmatprep.subr.bf16.mxu0 %v15456_v19  ;;  %v15517_v11 = vld [vmem:[%s21715_s6 + $0xbe0] ss:$16 sps:$4 sm:$0xff]   ;;  %v15522_v19 = vld [vmem:[%s21715_s6 + $0xe2c] ss:$16 sps:$4 sm:$0xff]  }
 0x5ea   : > { %8547 = vmatprep.subr.bf16.mxu1 %v15459_v30  ;;  %v19459_v30 = vpack.c.bf16 %v5221_v25, %v5221_v25  ;;  %v15589_v25 = vld [vmem:[%s21715_s6 + $0xd60] ss:$16 sps:$4 sm:$0xff]  }
 0x5ec   : > { %8919 = vmatpush1.bf16.msra.mxu0 %v15454_v24  ;;  %v15525_v24 = vld [vmem:[%s21715_s6 + $0xc04] ss:$16 sps:$4 sm:$0xff]  }
 0x5ed   : > { %8548 = vmatpush1.bf16.msra.mxu1 %v15457_v3  ;;  %8920 = vmatprep.subr.bf16.mxu0 %v15462_v27  ;;  %v15520_v3 = vld [vmem:[%s21715_s6 + $0xe28] ss:$16 sps:$4 sm:$0xff]   ;;  %v15523_v27 = vld [vmem:[%s21715_s6 + $0xc00] ss:$16 sps:$4 sm:$0xff]  }
 0x5ee   : > { %8549 = vmatprep.subr.bf16.mxu1 %v15465_v46  ;;  %v15528_v46 = vld [vmem:[%s21715_s6 + $0xe4c] ss:$16 sps:$4 sm:$0xff]  }
 0x5f0   : > { %8921 = vmatpush1.bf16.msra.mxu0 %v15460_v32  ;;  %v15531_v32 = vld [vmem:[%s21715_s6 + $0xc24] ss:$16 sps:$4 sm:$0xff]  }
 0x5f1   : > { %8550 = vmatpush1.bf16.msra.mxu1 %v15463_v41  ;;  %8922 = vmatprep.subr.bf16.mxu0 %v15468_v48  ;;  %v15526_v41 = vld [vmem:[%s21715_s6 + $0xe48] ss:$16 sps:$4 sm:$0xff]   ;;  %v15529_v48 = vld [vmem:[%s21715_s6 + $0xc20] ss:$16 sps:$4 sm:$0xff]  }
 0x5f2   : > { %8551 = vmatprep.subr.bf16.mxu1 %v15471_v39  ;;  %v15534_v39 = vld [vmem:[%s21715_s6 + $0xe6c] ss:$16 sps:$4 sm:$0xff]  }
 0x5f4   : > { %8923 = vmatpush1.bf16.msra.mxu0 %v15466_v14  ;;  %v15532_v14 = vld [vmem:[%s21715_s6 + $0xe68] ss:$16 sps:$4 sm:$0xff]  }
 0x5f5   : > { %8552 = vmatpush1.bf16.msra.mxu1 %v15469_v61  ;;  %8924 = vmatprep.subr.bf16.mxu0 %v15474_v18  ;;  %v15540_v61 = vld [vmem:[%s21715_s6 + $0xe8c] ss:$16 sps:$4 sm:$0xff]   ;;  %v15543_v18 = vld [vmem:[%s21715_s6 + $0xc64] ss:$16 sps:$4 sm:$0xff]  }
 0x5f6   : > { %8553 = vmatprep.subr.bf16.mxu1 %v15477_v31  ;;  %v15538_v31 = vld [vmem:[%s21715_s6 + $0xe88] ss:$16 sps:$4 sm:$0xff]  }
 0x5f8   : > { %8925 = vmatpush1.bf16.msra.mxu0 %v15472_v1  ;;  %v15541_v1 = vld [vmem:[%s21715_s6 + $0xc60] ss:$16 sps:$4 sm:$0xff]  }
 0x5f9   : > { %8554 = vmatpush1.bf16.msra.mxu1 %v15475_v0  ;;  %8926 = vmatprep.subr.bf16.mxu0 %v15480_v17  ;;  %v15546_v0 = vld [vmem:[%s21715_s6 + $0xeac] ss:$16 sps:$4 sm:$0xff]   ;;  %v15549_v17 = vld [vmem:[%s21715_s6 + $0xc84] ss:$16 sps:$4 sm:$0xff]  }
 0x5fa   : > { %8555 = vmatprep.subr.bf16.mxu1 %v15483_v40  ;;  %v15544_v40 = vld [vmem:[%s21715_s6 + $0xea8] ss:$16 sps:$4 sm:$0xff]  }
 0x5fc   : > { %8927 = vmatpush1.bf16.msra.mxu0 %v15478_v56  ;;  %v15547_v56 = vld [vmem:[%s21715_s6 + $0xc80] ss:$16 sps:$4 sm:$0xff]  }
 0x5fd   : > { %8556 = vmatpush1.bf16.msra.mxu1 %v15481_v60  ;;  %8928 = vmatprep.subr.bf16.mxu0 %v15486_v22  ;;  %v15552_v60 = vld [vmem:[%s21715_s6 + $0xecc] ss:$16 sps:$4 sm:$0xff]   ;;  %v15555_v22 = vld [vmem:[%s21715_s6 + $0xca4] ss:$16 sps:$4 sm:$0xff]  }
 0x5fe   : > { %8557 = vmatprep.subr.bf16.mxu1 %v15489_v9  ;;  %v15550_v9 = vld [vmem:[%s21715_s6 + $0xec8] ss:$16 sps:$4 sm:$0xff]  }
 0x600   : > { %8929 = vmatpush1.bf16.msra.mxu0 %v15484_v52  ;;  %v15553_v52 = vld [vmem:[%s21715_s6 + $0xca0] ss:$16 sps:$4 sm:$0xff]  }
 0x601   : > { %8558 = vmatpush1.bf16.msra.mxu1 %v15487_v58  ;;  %8930 = vmatprep.subr.bf16.mxu0 %v15492_v20  ;;  %v15558_v58 = vld [vmem:[%s21715_s6 + $0xeec] ss:$16 sps:$4 sm:$0xff]   ;;  %v15561_v20 = vld [vmem:[%s21715_s6 + $0xcc4] ss:$16 sps:$4 sm:$0xff]  }
 0x602   : > { %8559 = vmatprep.subr.bf16.mxu1 %v15495_v45  ;;  %v15556_v45 = vld [vmem:[%s21715_s6 + $0xee8] ss:$16 sps:$4 sm:$0xff]  }
 0x604   : > { %8931 = vmatpush1.bf16.msra.mxu0 %v15490_v44  ;;  %v15559_v44 = vld [vmem:[%s21715_s6 + $0xcc0] ss:$16 sps:$4 sm:$0xff]  }
 0x605   : > { %8560 = vmatpush1.bf16.msra.mxu1 %v15493_v63  ;;  %8932 = vmatprep.subr.bf16.mxu0 %v15498_v43  ;;  %v15564_v63 = vld [vmem:[%s21715_s6 + $0xf0c] ss:$16 sps:$4 sm:$0xff]   ;;  %v15567_v43 = vld [vmem:[%s21715_s6 + $0xce4] ss:$16 sps:$4 sm:$0xff]  }
 0x606   : > { %8561 = vmatprep.subr.bf16.mxu1 %v15501_v13  ;;  %v15562_v13 = vld [vmem:[%s21715_s6 + $0xf08] ss:$16 sps:$4 sm:$0xff]  }
 0x608   : > { %8933 = vmatpush1.bf16.msra.mxu0 %v15496_v53  ;;  %v15565_v53 = vld [vmem:[%s21715_s6 + $0xce0] ss:$16 sps:$4 sm:$0xff]  }
 0x609   : > { %8562 = vmatpush1.bf16.msra.mxu1 %v15499_v10  ;;  %8934 = vmatprep.subr.bf16.mxu0 %v15504_v62  ;;  %v15573_v10 = vld [vmem:[%s21715_s6 + $0xd04] ss:$16 sps:$4 sm:$0xff]   ;;  %v15568_v62 = vld [vmem:[%s21715_s6 + $0xf28] ss:$16 sps:$4 sm:$0xff]  }
 0x60a   : > { %8563 = vmatprep.subr.bf16.mxu1 %v15507_v5  ;;  %v15576_v5 = vld [vmem:[%s21715_s6 + $0xf4c] ss:$16 sps:$4 sm:$0xff]  }
 0x60c   : > { %8935 = vmatpush1.bf16.msra.mxu0 %v15502_v8  ;;  %v15579_v8 = vld [vmem:[%s21715_s6 + $0xd24] ss:$16 sps:$4 sm:$0xff]  }
 0x60d   : > { %8564 = vmatpush1.bf16.msra.mxu1 %v15505_v23  ;;  %8936 = vmatprep.subr.bf16.mxu0 %v15510_v35  ;;  %v15577_v23 = vld [vmem:[%s21715_s6 + $0xd20] ss:$16 sps:$4 sm:$0xff]   ;;  %v15582_v35 = vld [vmem:[%s21715_s6 + $0xf6c] ss:$16 sps:$4 sm:$0xff]  }
 0x60e   : > { %8565 = vmatprep.subr.bf16.mxu1 %v15513_v57  ;;  %v15580_v57 = vld [vmem:[%s21715_s6 + $0xf68] ss:$16 sps:$4 sm:$0xff]  }
 0x610   : > { %8937 = vmatpush1.bf16.msra.mxu0 %v15508_v42  ;;  %v15583_v42 = vld [vmem:[%s21715_s6 + $0xd40] ss:$16 sps:$4 sm:$0xff]  }
 0x611   : > { %8566 = vmatpush1.bf16.msra.mxu1 %v15511_v55  ;;  %8947 = vmatprep.subr.bf16.mxu0 %v15516_v34  ;;  %v15591_v55 = vld [vmem:[%s21715_s6 + $0xd64] ss:$16 sps:$4 sm:$0xff]   ;;  %v15586_v34 = vld [vmem:[%s21715_s6 + $0xf88] ss:$16 sps:$4 sm:$0xff]  }
 0x612   : > { %8567 = vmatprep.subr.bf16.mxu1 %v15519_v59  ;;  %v15594_v59 = vld [vmem:[%s21715_s6 + $0xfac] ss:$16 sps:$4 sm:$0xff]  }
 0x613   : > { %8939 = vmatmul.mubr.bf16.vlgmr.msra.gmra.mrb[0].mxu0 %v19451_v12 }
 0x614   : > { %8948 = vmatpush1.bf16.msra.mxu0 %v15514_v38  ;;  %8979 = vmatprep.mubr.bf16.mxu0 %v19459_v30  ;;  %v15597_v38 = vld [vmem:[%s21715_s6 + $0xd84] ss:$16 sps:$4 sm:$0xff]  }
 0x615   : > { %8568 = vmatpush1.bf16.msra.mxu1 %v15517_v11  ;;  %8949 = vmatprep.subr.bf16.mxu0 %v15522_v19  ;;  %v15592_v11 = vld [vmem:[%s21715_s6 + $0xfa8] ss:$16 sps:$4 sm:$0xff]  }
 0x616   : > { %8578 = vmatprep.subr.bf16.mxu1 %v15525_v24  ;;  %v15965_v19 = vld [vmem:[%s21793_s5 + $0x8] sm:$0xff] }
 0x617   : > { %v4217_v24 = vrot.slane %v15965_v19, %v18104_v16  ;;  %v15672_v19 = vld [vmem:[%s21717_s8 + $0x34] ss:$8 sps:$4 sm:$0xff]  }
 0x618   : > { %8570 = vmatmul.mubr.bf16.vlgmr.msra.gmra.mrb[48].mxu1 %v19245_v6  ;;  %8950 = vmatpush1.bf16.msra.mxu0 %v15520_v3  ;;  %v15537_v6 = vld [vmem:[%s21715_s6 + $0xc44] ss:$16 sps:$4 sm:$0xff]   ;;  %v15595_v3 = vld [vmem:[%s21715_s6 + $0xd80] ss:$16 sps:$4 sm:$0xff]  }
 0x619   : > { %8579 = vmatpush1.bf16.msra.mxu1 %v15523_v27  ;;  %8610 = vmatprep.mubr.bf16.mxu1 %v19253_v29  ;;  %v15535_v29 = vld [vmem:[%s21715_s6 + $0xc40] ss:$16 sps:$4 sm:$0xff]   ;;  %v15600_v27 = vld [vmem:[%s21715_s6 + $0xfcc] ss:$16 sps:$4 sm:$0xff]  }
 0x61a   : > { %8951 = vmatprep.subr.bf16.mxu0 %v15528_v46  ;;  %8580 = vmatprep.subr.bf16.mxu1 %v15531_v32  ;;  %v15603_v46 = vld [vmem:[%s21715_s6 + $0xda4] ss:$16 sps:$4 sm:$0xff]   ;;  %v15598_v32 = vld [vmem:[%s21715_s6 + $0xfc8] ss:$16 sps:$4 sm:$0xff]  }
 0x61c   : > { %8952 = vmatpush1.bf16.msra.mxu0 %v15526_v41  ;;  %v5200_v41 = vadd.f32 %v18915_v28, %v4217_v24  ;;  %v15604_v28 = vld [vmem:[%s21715_s6 + $0xfe8] ss:$16 sps:$4 sm:$0xff]  }
 0x61d   : > { %8581 = vmatpush1.bf16.msra.mxu1 %v15529_v48  ;;  %8953 = vmatprep.subr.bf16.mxu0 %v15534_v39  ;;  %v15601_v48 = vld [vmem:[%s21715_s6 + $0xda0] ss:$16 sps:$4 sm:$0xff]   ;;  %v15606_v39 = vld [vmem:[%s21715_s6 + $0xfec] ss:$16 sps:$4 sm:$0xff]  }
 0x61e   : > { %8582 = vmatprep.subr.bf16.mxu1 %v15537_v6  ;;  %v15609_v6 = vld [vmem:[%s21715_s6 + $0xdc4] ss:$16 sps:$4 sm:$0xff]   ;;  %v15670_v24 = vld [vmem:[%s21717_s8 + $0x30] ss:$8 sps:$4 sm:$0xff]  }
 0x620   : > { %8954 = vmatpush1.bf16.msra.mxu0 %v15532_v14  ;;  %v5220_v14 = vmax.f32 %v5200_v41, 0.0  ;;  %v15681_v41 = vld [vmem:[%s21717_s8 + $0x64] ss:$8 sps:$4 sm:$0xff]  }
 0x621   : > { %8583 = vmatpush1.bf16.msra.mxu1 %v15535_v29  ;;  %8955 = vmatprep.subr.bf16.mxu0 %v15540_v61  ;;  %v15607_v29 = vld [vmem:[%s21715_s6 + $0xdc0] ss:$16 sps:$4 sm:$0xff]   ;;  %v15612_v61 = vld [vmem:[%s21715_s6 + $0xde4] ss:$16 sps:$4 sm:$0xff]  }
 0x622   : > { %8584 = vmatprep.subr.bf16.mxu1 %v15543_v18  ;;  %v19650_v18 = vpack.c.bf16 %v5220_v14, %v5220_v14  ;;  %v15685_v14 = vld [vmem:[%s21717_s8 + $0x80] ss:$8 sps:$4 sm:$0xff]  }
 0x624   : > { %8956 = vmatpush1.bf16.msra.mxu0 %v15538_v31  ;;  %v15610_v31 = vld [vmem:[%s21715_s6 + $0xde0] ss:$16 sps:$4 sm:$0xff]  }
 0x625   : > { %8585 = vmatpush1.bf16.msra.mxu1 %v15541_v1  ;;  %8957 = vmatprep.subr.bf16.mxu0 %v15546_v0  ;;  %v15615_v1 = vld [vmem:[%s21715_s6 + $0xe04] ss:$16 sps:$4 sm:$0xff]   ;;  %v15613_v0 = vld [vmem:[%s21715_s6 + $0xe00] ss:$16 sps:$4 sm:$0xff]  }
 0x626   : > { %8586 = vmatprep.subr.bf16.mxu1 %v15549_v17  ;;  %v15618_v17 = vld [vmem:[%s21715_s6 + $0xe24] ss:$16 sps:$4 sm:$0xff]  }
 0x628   : > { %8958 = vmatpush1.bf16.msra.mxu0 %v15544_v40  ;;  %v15616_v40 = vld [vmem:[%s21715_s6 + $0xe20] ss:$16 sps:$4 sm:$0xff]  }
 0x629   : > { %8587 = vmatpush1.bf16.msra.mxu1 %v15547_v56  ;;  %8959 = vmatprep.subr.bf16.mxu0 %v15552_v60  ;;  %v15621_v56 = vld [vmem:[%s21715_s6 + $0xe44] ss:$16 sps:$4 sm:$0xff]   ;;  %v15619_v60 = vld [vmem:[%s21715_s6 + $0xe40] ss:$16 sps:$4 sm:$0xff]  }
 0x62a   : > { %8588 = vmatprep.subr.bf16.mxu1 %v15555_v22  ;;  %v15627_v22 = vld [vmem:[%s21715_s6 + $0xe84] ss:$16 sps:$4 sm:$0xff]  }
 0x62c   : > { %8960 = vmatpush1.bf16.msra.mxu0 %v15550_v9  ;;  %v15625_v9 = vld [vmem:[%s21715_s6 + $0xe80] ss:$16 sps:$4 sm:$0xff]  }
 0x62d   : > { %8589 = vmatpush1.bf16.msra.mxu1 %v15553_v52  ;;  %8961 = vmatprep.subr.bf16.mxu0 %v15558_v58  ;;  %v15630_v52 = vld [vmem:[%s21715_s6 + $0xea4] ss:$16 sps:$4 sm:$0xff]   ;;  %v15628_v58 = vld [vmem:[%s21715_s6 + $0xea0] ss:$16 sps:$4 sm:$0xff]  }
 0x62e   : > { %8590 = vmatprep.subr.bf16.mxu1 %v15561_v20  ;;  %v15633_v20 = vld [vmem:[%s21715_s6 + $0xec4] ss:$16 sps:$4 sm:$0xff]  }
 0x630   : > { %8962 = vmatpush1.bf16.msra.mxu0 %v15556_v45  ;;  %v15631_v45 = vld [vmem:[%s21715_s6 + $0xec0] ss:$16 sps:$4 sm:$0xff]  }
 0x631   : > { %8591 = vmatpush1.bf16.msra.mxu1 %v15559_v44  ;;  %8963 = vmatprep.subr.bf16.mxu0 %v15564_v63  ;;  %v15636_v44 = vld [vmem:[%s21715_s6 + $0xee4] ss:$16 sps:$4 sm:$0xff]   ;;  %v15634_v63 = vld [vmem:[%s21715_s6 + $0xee0] ss:$16 sps:$4 sm:$0xff]  }
 0x632   : > { %8592 = vmatprep.subr.bf16.mxu1 %v15567_v43  ;;  %v15639_v43 = vld [vmem:[%s21715_s6 + $0xf04] ss:$16 sps:$4 sm:$0xff]  }
 0x634   : > { %8964 = vmatpush1.bf16.msra.mxu0 %v15562_v13  ;;  %v15637_v13 = vld [vmem:[%s21715_s6 + $0xf00] ss:$16 sps:$4 sm:$0xff]  }
 0x635   : > { %8593 = vmatpush1.bf16.msra.mxu1 %v15565_v53  ;;  %8965 = vmatprep.subr.bf16.mxu0 %v15570_v21  ;;  %v15642_v53 = vld [vmem:[%s21715_s6 + $0xf24] ss:$16 sps:$4 sm:$0xff]   ;;  %v15640_v21 = vld [vmem:[%s21715_s6 + $0xf20] ss:$16 sps:$4 sm:$0xff]  }
 0x636   : > { %8594 = vmatprep.subr.bf16.mxu1 %v15573_v10  ;;  %v15645_v10 = vld [vmem:[%s21715_s6 + $0xf44] ss:$16 sps:$4 sm:$0xff]  }
 0x638   : > { %8966 = vmatpush1.bf16.msra.mxu0 %v15568_v62  ;;  %v15643_v62 = vld [vmem:[%s21715_s6 + $0xf40] ss:$16 sps:$4 sm:$0xff]  }
 0x639   : > { %8595 = vmatpush1.bf16.msra.mxu1 %v15571_v15  ;;  %8967 = vmatprep.subr.bf16.mxu0 %v15576_v5  ;;  %v15648_v15 = vld [vmem:[%s21715_s6 + $0xf64] ss:$16 sps:$4 sm:$0xff]   ;;  %v15646_v5 = vld [vmem:[%s21715_s6 + $0xf60] ss:$16 sps:$4 sm:$0xff]  }
 0x63a   : > { %8596 = vmatprep.subr.bf16.mxu1 %v15579_v8  ;;  %v15651_v8 = vld [vmem:[%s21715_s6 + $0xf84] ss:$16 sps:$4 sm:$0xff]  }
 0x63c   : > { %8968 = vmatpush1.bf16.msra.mxu0 %v15574_v26  ;;  %v15649_v26 = vld [vmem:[%s21715_s6 + $0xf80] ss:$16 sps:$4 sm:$0xff]  }
 0x63d   : > { %8597 = vmatpush1.bf16.msra.mxu1 %v15577_v23  ;;  %8969 = vmatprep.subr.bf16.mxu0 %v15582_v35  ;;  %v15654_v23 = vld [vmem:[%s21715_s6 + $0xfa4] ss:$16 sps:$4 sm:$0xff]   ;;  %v15652_v35 = vld [vmem:[%s21715_s6 + $0xfa0] ss:$16 sps:$4 sm:$0xff]  }
 0x63e   : > { %8598 = vmatprep.subr.bf16.mxu1 %v15585_v36  ;;  %v15657_v36 = vld [vmem:[%s21715_s6 + $0xfc4] ss:$16 sps:$4 sm:$0xff]  }
 0x640   : > { %8970 = vmatpush1.bf16.msra.mxu0 %v15580_v57  ;;  %v15655_v57 = vld [vmem:[%s21715_s6 + $0xfc0] ss:$16 sps:$4 sm:$0xff]  }
 0x641   : > { %8599 = vmatpush1.bf16.msra.mxu1 %v15583_v42  ;;  %8971 = vmatprep.subr.bf16.mxu0 %v15588_v2  ;;  %v15660_v42 = vld [vmem:[%s21715_s6 + $0xfe4] ss:$16 sps:$4 sm:$0xff]   ;;  %v15658_v2 = vld [vmem:[%s21715_s6 + $0xfe0] ss:$16 sps:$4 sm:$0xff]  }
 0x642   : > { %8600 = vmatprep.subr.bf16.mxu1 %v15591_v55  ;;  %v15661_v55 = vld [vmem:[%s21717_s8] ss:$8 sps:$4 sm:$0xff]  }
 0x644   : > { %8972 = vmatpush1.bf16.msra.mxu0 %v15586_v34  ;;  %v15663_v34 = vld [vmem:[%s21717_s8 + $0x4] ss:$8 sps:$4 sm:$0xff]  }
 0x645   : > { %8601 = vmatpush1.bf16.msra.mxu1 %v15589_v25  ;;  %8973 = vmatprep.subr.bf16.mxu0 %v15594_v59  ;;  %v15666_v25 = vld [vmem:[%s21717_s8 + $0x14] ss:$8 sps:$4 sm:$0xff]   ;;  %v15664_v59 = vld [vmem:[%s21717_s8 + $0x10] ss:$8 sps:$4 sm:$0xff]  }
 0x646   : > { %8602 = vmatprep.subr.bf16.mxu1 %v15597_v38  ;;  %v15669_v38 = vld [vmem:[%s21717_s8 + $0x24] ss:$8 sps:$4 sm:$0xff]  }
 0x648   : > { %8974 = vmatpush1.bf16.msra.mxu0 %v15592_v11  ;;  %v15667_v11 = vld [vmem:[%s21717_s8 + $0x20] ss:$8 sps:$4 sm:$0xff]  }
 0x649   : > { %8603 = vmatpush1.bf16.msra.mxu1 %v15595_v3  ;;  %8975 = vmatprep.subr.bf16.mxu0 %v15600_v27  ;;  %v15675_v3 = vld [vmem:[%s21717_s8 + $0x44] ss:$8 sps:$4 sm:$0xff]   ;;  %v15673_v27 = vld [vmem:[%s21717_s8 + $0x40] ss:$8 sps:$4 sm:$0xff]  }
 0x64a   : > { %8604 = vmatprep.subr.bf16.mxu1 %v15603_v46  ;;  %v15678_v46 = vld [vmem:[%s21717_s8 + $0x54] ss:$8 sps:$4 sm:$0xff]  }
 0x64c   : > { %8976 = vmatpush1.bf16.msra.mxu0 %v15598_v32  ;;  %v15676_v32 = vld [vmem:[%s21717_s8 + $0x50] ss:$8 sps:$4 sm:$0xff]  }
 0x64d   : > { %8605 = vmatpush1.bf16.msra.mxu1 %v15601_v48  ;;  %8977 = vmatprep.subr.bf16.mxu0 %v15606_v39  ;;  %v15679_v48 = vld [vmem:[%s21717_s8 + $0x60] ss:$8 sps:$4 sm:$0xff]   ;;  %v15684_v39 = vld [vmem:[%s21717_s8 + $0x74] ss:$8 sps:$4 sm:$0xff]  }
 0x64e   : > { %8606 = vmatprep.subr.bf16.mxu1 %v15609_v6  ;;  %v15682_v6 = vld [vmem:[%s21717_s8 + $0x70] ss:$8 sps:$4 sm:$0xff]  }
 0x650   : > { %8978 = vmatpush1.bf16.msra.mxu0 %v15604_v28  ;;  %v15687_v28 = vld [vmem:[%s21717_s8 + $0x84] ss:$8 sps:$4 sm:$0xff]  }
 0x651   : > { %8607 = vmatpush1.bf16.msra.mxu1 %v15607_v29  ;;  %v15690_v29 = vld [vmem:[%s21717_s8 + $0x94] ss:$8 sps:$4 sm:$0xff]  }
 0x652   : > { %8608 = vmatprep.subr.bf16.mxu1 %v15612_v61  ;;  %v15688_v61 = vld [vmem:[%s21717_s8 + $0x90] ss:$8 sps:$4 sm:$0xff]  }
 0x653   : > { %8980 = vmatmul.mubr.bf16.vlgmr.msra.gmra.mrb[0].mxu0 %v19650_v18 }
 0x655   : > { %8609 = vmatpush1.bf16.msra.mxu1 %v15610_v31  ;;  %v15691_v31 = vld [vmem:[%s21717_s8 + $0xa0] ss:$8 sps:$4 sm:$0xff]  }
 0x656   : > { %8619 = vmatprep.subr.bf16.mxu1 %v15615_v1  ;;  %v15696_v1 = vld [vmem:[%s21717_s8 + $0xb4] ss:$8 sps:$4 sm:$0xff]  }
 0x658   : > { %8611 = vmatmul.mubr.bf16.vlgmr.msra.gmra.mrb[48].mxu1 %v19451_v12  ;;  %v15624_v12 = vld [vmem:[%s21715_s6 + $0xe64] ss:$16 sps:$4 sm:$0xff]  }
 0x659   : > { %8620 = vmatpush1.bf16.msra.mxu1 %v15613_v0  ;;  %8651 = vmatprep.mubr.bf16.mxu1 %v19459_v30  ;;  %v15622_v30 = vld [vmem:[%s21715_s6 + $0xe60] ss:$16 sps:$4 sm:$0xff]  }
 0x65a   : > { %8621 = vmatprep.subr.bf16.mxu1 %v15618_v17  ;;  %v15694_v0 = vld [vmem:[%s21717_s8 + $0xb0] ss:$8 sps:$4 sm:$0xff]   ;;  %v15699_v17 = vld [vmem:[%s21717_s8 + $0xc4] ss:$8 sps:$4 sm:$0xff]  }
 0x65d   : > { %8622 = vmatpush1.bf16.msra.mxu1 %v15616_v40  ;;  %v15697_v40 = vld [vmem:[%s21717_s8 + $0xc0] ss:$8 sps:$4 sm:$0xff]  }
 0x65e   : > { %8623 = vmatprep.subr.bf16.mxu1 %v15621_v56  ;;  %v15702_v56 = vld [vmem:[%s21717_s8 + $0xd4] ss:$8 sps:$4 sm:$0xff]  }
 0x661   : > { %8624 = vmatpush1.bf16.msra.mxu1 %v15619_v60  ;;  %v15700_v60 = vld [vmem:[%s21717_s8 + $0xd0] ss:$8 sps:$4 sm:$0xff]  }
 0x662   : > { %8625 = vmatprep.subr.bf16.mxu1 %v15624_v12  ;;  %v15705_v12 = vld [vmem:[%s21717_s8 + $0xe4] ss:$8 sps:$4 sm:$0xff]  }
 0x665   : > { %8626 = vmatpush1.bf16.msra.mxu1 %v15622_v30  ;;  %v15703_v30 = vld [vmem:[%s21717_s8 + $0xe0] ss:$8 sps:$4 sm:$0xff]  }
 0x666   : > { %8627 = vmatprep.subr.bf16.mxu1 %v15627_v22  ;;  %v15708_v22 = vld [vmem:[%s21717_s8 + $0xf4] ss:$8 sps:$4 sm:$0xff]  }
 0x669   : > { %8628 = vmatpush1.bf16.msra.mxu1 %v15625_v9  ;;  %v15706_v9 = vld [vmem:[%s21717_s8 + $0xf0] ss:$8 sps:$4 sm:$0xff]  }
 0x66a   : > { %8629 = vmatprep.subr.bf16.mxu1 %v15630_v52  ;;  %v15711_v52 = vld [vmem:[%s21717_s8 + $0x104] ss:$8 sps:$4 sm:$0xff]  }
 0x66d   : > { %8630 = vmatpush1.bf16.msra.mxu1 %v15628_v58 }
 0x66e   : > { %8631 = vmatprep.subr.bf16.mxu1 %v15633_v20 }
 0x671   : > { %8632 = vmatpush1.bf16.msra.mxu1 %v15631_v45 }
 0x672   : > { %8633 = vmatprep.subr.bf16.mxu1 %v15636_v44 }
 0x675   : > { %8634 = vmatpush1.bf16.msra.mxu1 %v15634_v63  ;;  %v19859_v63 = vld [vmem:[%s21718_s9 + $0x4] ss:$12 sps:$4 sm:$0xff]  }
 0x676   : > { %8635 = vmatprep.subr.bf16.mxu1 %v15639_v43  ;;  %v19864_v43 = vld [vmem:[%s21718_s9] ss:$12 sps:$4 sm:$0xff]   ;;  %9807 = vmatprep.subr.bf16.mxu0 %v19859_v63 }
 0x677   : > { %9808 = vmatpush1.bf16.msra.mxu0 %v19864_v43 }
 0x679   : > { %8636 = vmatpush1.bf16.msra.mxu1 %v15637_v13  ;;  %v19869_v13 = vld [vmem:[%s21718_s9 + $0x1c] ss:$12 sps:$4 sm:$0xff]  }
 0x67a   : > { %8637 = vmatprep.subr.bf16.mxu1 %v15642_v53  ;;  %v19876_v53 = vld [vmem:[%s21718_s9 + $0x18] ss:$12 sps:$4 sm:$0xff]   ;;  %9809 = vmatprep.subr.bf16.mxu0 %v19869_v13 }
 0x67b   : > { %9810 = vmatpush1.bf16.msra.mxu0 %v19876_v53 }
 0x67d   : > { %8638 = vmatpush1.bf16.msra.mxu1 %v15640_v21  ;;  %v19882_v21 = vld [vmem:[%s21718_s9 + $0x34] ss:$12 sps:$4 sm:$0xff]  }
 0x67e   : > { %8639 = vmatprep.subr.bf16.mxu1 %v15645_v10  ;;  %v19888_v10 = vld [vmem:[%s21718_s9 + $0x30] ss:$12 sps:$4 sm:$0xff]   ;;  %9811 = vmatprep.subr.bf16.mxu0 %v19882_v21 }
 0x67f   : > { %9812 = vmatpush1.bf16.msra.mxu0 %v19888_v10 }
 0x681   : > { %8640 = vmatpush1.bf16.msra.mxu1 %v15643_v62  ;;  %v19894_v62 = vld [vmem:[%s21718_s9 + $0x4c] ss:$12 sps:$4 sm:$0xff]  }
 0x682   : > { %8641 = vmatprep.subr.bf16.mxu1 %v15648_v15  ;;  %v19900_v15 = vld [vmem:[%s21718_s9 + $0x48] ss:$12 sps:$4 sm:$0xff]   ;;  %9813 = vmatprep.subr.bf16.mxu0 %v19894_v62 }
 0x683   : > { %9814 = vmatpush1.bf16.msra.mxu0 %v19900_v15 }
 0x685   : > { %8642 = vmatpush1.bf16.msra.mxu1 %v15646_v5  ;;  %v19906_v5 = vld [vmem:[%s21718_s9 + $0x64] ss:$12 sps:$4 sm:$0xff]  }
 0x686   : > { %8643 = vmatprep.subr.bf16.mxu1 %v15651_v8  ;;  %v19912_v8 = vld [vmem:[%s21718_s9 + $0x60] ss:$12 sps:$4 sm:$0xff]   ;;  %9815 = vmatprep.subr.bf16.mxu0 %v19906_v5 }
 0x687   : > { %9816 = vmatpush1.bf16.msra.mxu0 %v19912_v8 }
 0x689   : > { %8644 = vmatpush1.bf16.msra.mxu1 %v15649_v26  ;;  %v19918_v26 = vld [vmem:[%s21718_s9 + $0x7c] ss:$12 sps:$4 sm:$0xff]  }
 0x68a   : > { %8645 = vmatprep.subr.bf16.mxu1 %v15654_v23  ;;  %v19924_v23 = vld [vmem:[%s21718_s9 + $0x78] ss:$12 sps:$4 sm:$0xff]   ;;  %9817 = vmatprep.subr.bf16.mxu0 %v19918_v26 }
 0x68b   : > { %9818 = vmatpush1.bf16.msra.mxu0 %v19924_v23 }
 0x68d   : > { %8646 = vmatpush1.bf16.msra.mxu1 %v15652_v35  ;;  %v19930_v35 = vld [vmem:[%s21718_s9 + $0x94] ss:$12 sps:$4 sm:$0xff]  }
 0x68e   : > { %8647 = vmatprep.subr.bf16.mxu1 %v15657_v36  ;;  %v19936_v36 = vld [vmem:[%s21718_s9 + $0x90] ss:$12 sps:$4 sm:$0xff]   ;;  %9819 = vmatprep.subr.bf16.mxu0 %v19930_v35 }
 0x68f   : > { %9820 = vmatpush1.bf16.msra.mxu0 %v19936_v36 }
 0x691   : > { %8648 = vmatpush1.bf16.msra.mxu1 %v15655_v57  ;;  %v19942_v57 = vld [vmem:[%s21718_s9 + $0xac] ss:$12 sps:$4 sm:$0xff]  }
 0x692   : > { %8649 = vmatprep.subr.bf16.mxu1 %v15660_v42  ;;  %v19948_v42 = vld [vmem:[%s21718_s9 + $0xa8] ss:$12 sps:$4 sm:$0xff]   ;;  %9821 = vmatprep.subr.bf16.mxu0 %v19942_v57 }
 0x693   : > { %9822 = vmatpush1.bf16.msra.mxu0 %v19948_v42 }
 0x695   : > { %8650 = vmatpush1.bf16.msra.mxu1 %v15658_v2  ;;  %v19954_v2 = vld [vmem:[%s21718_s9 + $0xc4] ss:$12 sps:$4 sm:$0xff]  }
 0x696   : > { %9399 = vmatprep.subr.bf16.mxu1 %v15663_v34  ;;  %9823 = vmatprep.subr.bf16.mxu0 %v19954_v2  ;;  %v19966_v34 = vld [vmem:[%s21718_s9 + $0xdc] ss:$12 sps:$4 sm:$0xff]  }
 0x698   : > { %8652 = vmatmul.mubr.bf16.vlgmr.msra.gmra.mrb[48].mxu1 %v19650_v18  ;;  %v15693_v18 = vld [vmem:[%s21717_s8 + $0xa4] ss:$8 sps:$4 sm:$0xff]  }
 0x699   : > { %9400 = vmatpush1.bf16.msra.mxu1 %v15661_v55  ;;  %v19960_v55 = vld [vmem:[%s21718_s9 + $0xc0] ss:$12 sps:$4 sm:$0xff]  }
 0x69a   : > { %9401 = vmatprep.subr.bf16.mxu1 %v15666_v25  ;;  %9824 = vmatpush1.bf16.msra.mxu0 %v19960_v55  ;;  %v19972_v25 = vld [vmem:[%s21718_s9 + $0xd8] ss:$12 sps:$4 sm:$0xff]  }
 0x69b   : > { %9825 = vmatprep.subr.bf16.mxu0 %v19966_v34 }
 0x69d   : > { %9402 = vmatpush1.bf16.msra.mxu1 %v15664_v59  ;;  %v19978_v59 = vld [vmem:[%s21718_s9 + $0xf4] ss:$12 sps:$4 sm:$0xff]  }
 0x69e   : > { %9403 = vmatprep.subr.bf16.mxu1 %v15669_v38  ;;  %9826 = vmatpush1.bf16.msra.mxu0 %v19972_v25  ;;  %v19984_v38 = vld [vmem:[%s21718_s9 + $0xf0] ss:$12 sps:$4 sm:$0xff]  }
 0x69f   : > { %9827 = vmatprep.subr.bf16.mxu0 %v19978_v59 }
 0x6a1   : > { %9404 = vmatpush1.bf16.msra.mxu1 %v15667_v11  ;;  %v19990_v11 = vld [vmem:[%s21718_s9 + $0x10c] ss:$12 sps:$4 sm:$0xff]  }
 0x6a2   : > { %9405 = vmatprep.subr.bf16.mxu1 %v15672_v19  ;;  %9828 = vmatpush1.bf16.msra.mxu0 %v19984_v38  ;;  %v19996_v19 = vld [vmem:[%s21718_s9 + $0x108] ss:$12 sps:$4 sm:$0xff]  }
 0x6a3   : > { %9829 = vmatprep.subr.bf16.mxu0 %v19990_v11 }
 0x6a5   : > { %9406 = vmatpush1.bf16.msra.mxu1 %v15670_v24  ;;  %v20003_v24 = vld [vmem:[%s21716_s7] sm:$0xf] }
 0x6a6   : > { %9407 = vmatprep.subr.bf16.mxu1 %v15675_v3  ;;  %9830 = vmatpush1.bf16.msra.mxu0 %v19996_v19  ;;  %v5755_v3 = vrot.slane %v20003_v24, %v17886_v50 }
 0x6a9   : > { %9408 = vmatpush1.bf16.msra.mxu1 %v15673_v27  ;;  %v5767_v27 = vrot.slane %v20003_v24, %v17983_v49 }
 0x6aa   : > { %9409 = vmatprep.subr.bf16.mxu1 %v15678_v46  ;;  %v5759_v46 = vrot.slane %v20003_v24, %v17894_v7 }
 0x6ad   : > { %9410 = vmatpush1.bf16.msra.mxu1 %v15676_v32 }
 0x6ae   : > { %9411 = vmatprep.subr.bf16.mxu1 %v15681_v41 }
 0x6b1   : > { %9412 = vmatpush1.bf16.msra.mxu1 %v15679_v48 }
 0x6b2   : > { %9413 = vmatprep.subr.bf16.mxu1 %v15684_v39 }
 0x6b5   : > { %9414 = vmatpush1.bf16.msra.mxu1 %v15682_v6 }
 0x6b6   : > { %9415 = vmatprep.subr.bf16.mxu1 %v15687_v28 }
 0x6b9   : > { %9416 = vmatpush1.bf16.msra.mxu1 %v15685_v14 }
 0x6ba   : > { %9417 = vmatprep.subr.bf16.mxu1 %v15690_v29 }
 0x6bd   : > { %9418 = vmatpush1.bf16.msra.mxu1 %v15688_v61  ;;  %v15709_v61 = vld [vmem:[%s21717_s8 + $0x100] ss:$8 sps:$4 sm:$0xff]  }
 0x6be   : > { %9419 = vmatprep.subr.bf16.mxu1 %v15693_v18 }
 0x6c1   : > { %9420 = vmatpush1.bf16.msra.mxu1 %v15691_v31  ;;  %v15714_v31 = vld [vmem:[%s21717_s8 + $0x114] ss:$8 sps:$4 sm:$0xff]  }
 0x6c2   : > { %9421 = vmatprep.subr.bf16.mxu1 %v15696_v1 }
 0x6c5   : > { %9422 = vmatpush1.bf16.msra.mxu1 %v15694_v0  ;;  %v15712_v0 = vld [vmem:[%s21717_s8 + $0x110] ss:$8 sps:$4 sm:$0xff]  }
 0x6c6   : > { %9423 = vmatprep.subr.bf16.mxu1 %v15699_v17  ;;  %v15717_v17 = vld [vmem:[%s21717_s8 + $0x124] ss:$8 sps:$4 sm:$0xff]  }
 0x6c9   : > { %9424 = vmatpush1.bf16.msra.mxu1 %v15697_v40  ;;  %v15715_v40 = vld [vmem:[%s21717_s8 + $0x120] ss:$8 sps:$4 sm:$0xff]  }
 0x6ca   : > { %9425 = vmatprep.subr.bf16.mxu1 %v15702_v56  ;;  %v15720_v56 = vld [vmem:[%s21717_s8 + $0x134] ss:$8 sps:$4 sm:$0xff]  }
 0x6cd   : > { %9426 = vmatpush1.bf16.msra.mxu1 %v15700_v60  ;;  %v15718_v60 = vld [vmem:[%s21717_s8 + $0x130] ss:$8 sps:$4 sm:$0xff]  }
 0x6ce   : > { %9427 = vmatprep.subr.bf16.mxu1 %v15705_v12  ;;  %v15723_v12 = vld [vmem:[%s21717_s8 + $0x144] ss:$8 sps:$4 sm:$0xff]  }
 0x6d1   : > { %9428 = vmatpush1.bf16.msra.mxu1 %v15703_v30  ;;  %v15721_v30 = vld [vmem:[%s21717_s8 + $0x140] ss:$8 sps:$4 sm:$0xff]  }
 0x6d2   : > { %9429 = vmatprep.subr.bf16.mxu1 %v15708_v22  ;;  %v15726_v22 = vld [vmem:[%s21717_s8 + $0x154] ss:$8 sps:$4 sm:$0xff]  }
 0x6d5   : > { %9430 = vmatpush1.bf16.msra.mxu1 %v15706_v9  ;;  %v15724_v9 = vld [vmem:[%s21717_s8 + $0x150] ss:$8 sps:$4 sm:$0xff]  }
 0x6d6   : > { %9440 = vmatprep.subr.bf16.mxu1 %v15711_v52  ;;  %v15729_v52 = vld [vmem:[%s21717_s8 + $0x164] ss:$8 sps:$4 sm:$0xff]  }
 0x726   : > { %v19854_v58 = vpop.f32.mrb[0].mxu0 }
 0x727   : > { %v8983_v20 = vpop.f32.mrb[1].mxu0 }
 0x728   : > { %v8985_v45 = vpop.f32.mrb[2].mxu0  ;;  %v14758_v39 = vadd.f32 %v8983_v20, %v5767_v27  ;;  %v15727_v20 = vld [vmem:[%s21717_s8 + $0x160] ss:$8 sps:$4 sm:$0xff]  }
 0x729   : > { %v8986_v44 = vpop.f32.mrb[3].mxu0  ;;  %v15732_v45 = vld [vmem:[%s21717_s8 + $0x174] ss:$8 sps:$4 sm:$0xff]   ;;  %v15733_v27 = vld [vmem:[%s21717_s8 + $0x180] ss:$8 sps:$4 sm:$0xff]  }
 0x72a   : > { %v9002_v1 = vpack.c.bf16 %v14758_v39, %v14758_v39  ;;  %v15730_v44 = vld [vmem:[%s21717_s8 + $0x170] ss:$8 sps:$4 sm:$0xff]   ;;  %v15744_v39 = vld [vmem:[%s21717_s8 + $0x1b4] ss:$8 sps:$4 sm:$0xff]  }
 0x76b   : > { %v8653_v32 = vpop.f32.mrb[48].mxu1 }
 0x76c   : > { %v14755_v41 = vadd.f32 %v8653_v32, %v5755_v3  ;;  %v8655_v48 = vpop.f32.mrb[49].mxu1  ;;  %v15735_v3 = vld [vmem:[%s21717_s8 + $0x184] ss:$8 sps:$4 sm:$0xff]   ;;  %v15736_v32 = vld [vmem:[%s21717_s8 + $0x190] ss:$8 sps:$4 sm:$0xff]  }
 0x76d   : > { %v14756_v6 = vadd.f32 %v8655_v48, %v5759_v46  ;;  %v8657_v28 = vpop.f32.mrb[50].mxu1  ;;  %v15738_v46 = vld [vmem:[%s21717_s8 + $0x194] ss:$8 sps:$4 sm:$0xff]   ;;  %v15739_v48 = vld [vmem:[%s21717_s8 + $0x1a0] ss:$8 sps:$4 sm:$0xff]  }
 0x76e   : > { %v8658_v14 = vpop.f32.mrb[51].mxu1  ;;  %v8999_v18 = vpack.c.bf16 %v14755_v41, %v14755_v41  ;;  %v15741_v41 = vld [vmem:[%s21717_s8 + $0x1a4] ss:$8 sps:$4 sm:$0xff]  }
 0x76f   : > { %v9000_v29 = vpack.c.bf16 %v14756_v6, %v14756_v6  ;;  %v15742_v6 = vld [vmem:[%s21717_s8 + $0x1b0] ss:$8 sps:$4 sm:$0xff]   ;;  %v15747_v28 = vld [vmem:[%s21717_s8 + $0x1c4] ss:$8 sps:$4 sm:$0xff]   ;;  %v15745_v14 = vld [vmem:[%s21717_s8 + $0x1c0] ss:$8 sps:$4 sm:$0xff]  }
 0x771   : > { %9431 = vmatprep.mubr.bf16.mxu1 %v9000_v29  ;;  %v15750_v29 = vld [vmem:[%s21717_s8 + $0x1d4] ss:$8 sps:$4 sm:$0xff]  }
 0x772   : > { %9432 = vmatmul.mubr.bf16.vlgmr.msra.gmra.mrb[52].mxu1 %v8999_v18  ;;  %v15753_v18 = vld [vmem:[%s21717_s8 + $0x1e4] ss:$8 sps:$4 sm:$0xff]  }
 0x773   : > { %9441 = vmatpush1.bf16.msra.mxu1 %v15709_v61  ;;  %9472 = vmatprep.mubr.bf16.mxu1 %v9002_v1  ;;  %v15748_v61 = vld [vmem:[%s21717_s8 + $0x1d0] ss:$8 sps:$4 sm:$0xff]   ;;  %v5763_v1 = vrot.slane %v20003_v24, %v17980_v33  ;;  %v20115_v24 = vld [vmem:[%s21718_s9 + $0x8] ss:$12 sps:$4 sm:$0xff]   ;;  %v8991_v33 = vld [vmem:[%s20320_s25] sm:$0xff] }
 0x774   : > { %9442 = vmatprep.subr.bf16.mxu1 %v15714_v31  ;;  %v15751_v31 = vld [vmem:[%s21717_s8 + $0x1e0] ss:$8 sps:$4 sm:$0xff]  }
 0x777   : > { %9443 = vmatpush1.bf16.msra.mxu1 %v15712_v0  ;;  %v15756_v0 = vld [vmem:[%s21717_s8 + $0x1f4] ss:$8 sps:$4 sm:$0xff]  }
 0x778   : > { %9444 = vmatprep.subr.bf16.mxu1 %v15717_v17  ;;  %v15754_v17 = vld [vmem:[%s21717_s8 + $0x1f0] ss:$8 sps:$4 sm:$0xff]  }
 0x77b   : > { %9445 = vmatpush1.bf16.msra.mxu1 %v15715_v40  ;;  %v14757_v40 = vadd.f32 %v19854_v58, %v5763_v1  ;;  %v20127_v58 = vld [vmem:[%s21718_s9 + $0x20] ss:$12 sps:$4 sm:$0xff]  }
 0x77c   : > { %9446 = vmatprep.subr.bf16.mxu1 %v15720_v56  ;;  %v20110_v56 = vld [vmem:[%s21718_s9 + $0xc8] ss:$12 sps:$4 sm:$0xff]  }
 0x77d   : > { %21794 = vst [vmem:[#allocation22_spill] sm:$0xff] %v20110_v56 }
 0x77f   : > { %9447 = vmatpush1.bf16.msra.mxu1 %v15718_v60  ;;  %v9001_v60 = vpack.c.bf16 %v14757_v40, %v14757_v40 }
 0x780   : > { %9448 = vmatprep.subr.bf16.mxu1 %v15723_v12  ;;  %v20121_v12 = vld [vmem:[%s21718_s9 + $0xe0] ss:$12 sps:$4 sm:$0xff]  }
 0x783   : > { %9449 = vmatpush1.bf16.msra.mxu1 %v15721_v30  ;;  %v20133_v30 = vld [vmem:[%s21718_s9 + $0xf8] ss:$12 sps:$4 sm:$0xff]  }
 0x784   : > { %9450 = vmatprep.subr.bf16.mxu1 %v15726_v22  ;;  %v20139_v22 = vld [vmem:[%s21718_s9 + $0x38] ss:$12 sps:$4 sm:$0xff]  }
 0x787   : > { %9451 = vmatpush1.bf16.msra.mxu1 %v15724_v9  ;;  %v20145_v9 = vld [vmem:[%s21718_s9 + $0x110] ss:$12 sps:$4 sm:$0xff]  }
 0x788   : > { %9452 = vmatprep.subr.bf16.mxu1 %v15729_v52  ;;  %v20151_v52 = vld [vmem:[%s21718_s9 + $0x50] ss:$12 sps:$4 sm:$0xff]  }
 0x78b   : > { %9453 = vmatpush1.bf16.msra.mxu1 %v15727_v20  ;;  %v20158_v20 = vld [vmem:[%s21718_s9 + $0x124] ss:$12 sps:$4 sm:$0xff]  }
 0x78c   : > { %9454 = vmatprep.subr.bf16.mxu1 %v15732_v45  ;;  %v20163_v45 = vld [vmem:[%s21718_s9 + $0x128] ss:$12 sps:$4 sm:$0xff]   ;;  %9831 = vmatprep.subr.bf16.mxu0 %v20158_v20 }
 0x78f   : > { %9455 = vmatpush1.bf16.msra.mxu1 %v15730_v44  ;;  %v20168_v44 = vld [vmem:[%s21718_s9 + $0x120] ss:$12 sps:$4 sm:$0xff]  }
 0x790   : > { %9456 = vmatprep.subr.bf16.mxu1 %v15735_v3  ;;  %v20173_v3 = vld [vmem:[%s21718_s9 + $0x68] ss:$12 sps:$4 sm:$0xff]   ;;  %9832 = vmatpush1.bf16.msra.mxu0 %v20168_v44 }
 0x793   : > { %9457 = vmatpush1.bf16.msra.mxu1 %v15733_v27  ;;  %v20182_v27 = vld [vmem:[%s21718_s9 + $0x13c] ss:$12 sps:$4 sm:$0xff]  }
 0x794   : > { %9458 = vmatprep.subr.bf16.mxu1 %v15738_v46  ;;  %v20187_v46 = vld [vmem:[%s21718_s9 + $0x140] ss:$12 sps:$4 sm:$0xff]   ;;  %9833 = vmatprep.subr.bf16.mxu0 %v20182_v27 }
 0x797   : > { %9459 = vmatpush1.bf16.msra.mxu1 %v15736_v32  ;;  %v20192_v32 = vld [vmem:[%s21718_s9 + $0x138] ss:$12 sps:$4 sm:$0xff]  }
 0x798   : > { %9460 = vmatprep.subr.bf16.mxu1 %v15741_v41  ;;  %v20197_v41 = vld [vmem:[%s21718_s9 + $0x80] ss:$12 sps:$4 sm:$0xff]   ;;  %9834 = vmatpush1.bf16.msra.mxu0 %v20192_v32 }
 0x79b   : > { %9461 = vmatpush1.bf16.msra.mxu1 %v15739_v48  ;;  %v20202_v48 = vld [vmem:[%s21718_s9 + $0x154] ss:$12 sps:$4 sm:$0xff]  }
 0x79c   : > { %9462 = vmatprep.subr.bf16.mxu1 %v15744_v39  ;;  %v20207_v39 = vld [vmem:[%s21718_s9 + $0x158] ss:$12 sps:$4 sm:$0xff]   ;;  %9835 = vmatprep.subr.bf16.mxu0 %v20202_v48 }
 0x79f   : > { %9463 = vmatpush1.bf16.msra.mxu1 %v15742_v6  ;;  %v20216_v6 = vld [vmem:[%s21718_s9 + $0x150] ss:$12 sps:$4 sm:$0xff]  }
 0x7a0   : > { %9464 = vmatprep.subr.bf16.mxu1 %v15747_v28  ;;  %v20221_v28 = vld [vmem:[%s21718_s9 + $0x98] ss:$12 sps:$4 sm:$0xff]   ;;  %9836 = vmatpush1.bf16.msra.mxu0 %v20216_v6 }
 0x7a3   : > { %9465 = vmatpush1.bf16.msra.mxu1 %v15745_v14  ;;  %v20228_v14 = vld [vmem:[%s21718_s9 + $0x16c] ss:$12 sps:$4 sm:$0xff]  }
 0x7a4   : > { %9466 = vmatprep.subr.bf16.mxu1 %v15750_v29  ;;  %21795 = vst [vmem:[#allocation23_spill] sm:$0xff] %v20228_v14  ;;  %v20233_v29 = vld [vmem:[%s21718_s9 + $0x170] ss:$12 sps:$4 sm:$0xff]   ;;  %9837 = vmatprep.subr.bf16.mxu0 %v20228_v14 }
 0x7a7   : > { %9467 = vmatpush1.bf16.msra.mxu1 %v15748_v61  ;;  %v20240_v61 = vld [vmem:[%s21718_s9 + $0x168] ss:$12 sps:$4 sm:$0xff]  }
 0x7a8   : > { %9468 = vmatprep.subr.bf16.mxu1 %v15753_v18  ;;  %21796 = vst [vmem:[#allocation24_spill] sm:$0xff] %v20240_v61  ;;  %v20245_v18 = vld [vmem:[%s21718_s9 + $0xb0] ss:$12 sps:$4 sm:$0xff]   ;;  %9838 = vmatpush1.bf16.msra.mxu0 %v20240_v61 }
 0x7a9   : > { %9913 = vmatprep.subr.bf16.mxu0 %v19859_v63 }
 0x7ab   : > { %9469 = vmatpush1.bf16.msra.mxu1 %v15751_v31  ;;  %v9067_v31 = vld [vmem:[%s21719_s10] sm:$0x3] }
 0x7ac   : > { %9470 = vmatprep.subr.bf16.mxu1 %v15756_v0  ;;  %v9072_v1 = vrot.slane %v9067_v31, %v17886_v50  ;;  %v9076_v0 = vrot.slane %v9067_v31, %v17894_v7 }
 0x7af   : > { %9471 = vmatpush1.bf16.msra.mxu1 %v15754_v17 }
 0x7b0   : > { %14319 = vmatprep.subr.bf16.mxu1 %v20110_v56 }
 0x7b2   : > { %9473 = vmatmul.mubr.bf16.vlgmr.msra.gmra.mrb[52].mxu1 %v9001_v60 }
 0x7b3   : > { %14320 = vmatpush3.bf16.msra.mxu1 %v20115_v24 }
 0x7b4   : > { %14321 = vmatprep.subr.bf16.mxu1 %v20121_v12 }
 0x7b7   : > { %14322 = vmatpush3.bf16.msra.mxu1 %v20127_v58 }
 0x7b8   : > { %14323 = vmatprep.subr.bf16.mxu1 %v20133_v30 }
 0x7bb   : > { %14324 = vmatpush3.bf16.msra.mxu1 %v20139_v22 }
 0x7bc   : > { %14325 = vmatprep.subr.bf16.mxu1 %v20145_v9 }
 0x7bf   : > { %14326 = vmatpush3.bf16.msra.mxu1 %v20151_v52 }
 0x7c0   : > { %14327 = vmatprep.subr.bf16.mxu1 %v20163_v45 }
 0x7c3   : > { %14328 = vmatpush3.bf16.msra.mxu1 %v20173_v3 }
 0x7c4   : > { %14329 = vmatprep.subr.bf16.mxu1 %v20187_v46 }
 0x7c7   : > { %14330 = vmatpush3.bf16.msra.mxu1 %v20197_v41 }
 0x7c8   : > { %14331 = vmatprep.subr.bf16.mxu1 %v20207_v39 }
 0x7cb   : > { %14332 = vmatpush3.bf16.msra.mxu1 %v20221_v28 }
 0x7cc   : > { %14333 = vmatprep.subr.bf16.mxu1 %v20233_v29 }
 0x7cf   : > { %14334 = vmatpush3.bf16.msra.mxu1 %v20245_v18 }
 0x7d0   : > { %14341 = vmatprep.subr.bf16.mxu1 %v20110_v56 }
 0x885   : > { %v9474_v17 = vpop.f32.mrb[52].mxu1 }
 0x886   : > { %v20258_v40 = vadd.f32 %v9474_v17, %v9072_v1  ;;  %v9476_v60 = vpop.f32.mrb[53].mxu1 }
 0x887   : > { %v20260_v4 = vadd.f32 %v9476_v60, %v9076_v0  ;;  %v9478_v37 = vpop.f32.mrb[54].mxu1 }
 0x888   : > { %21797 = vst [vmem:[#allocation25_spill] sm:$0xff] %v20258_v40  ;;  %15869 = vtanh.f32 %v20258_v40  ;;  %v9479_v47 = vpop.f32.mrb[55].mxu1 }
 0x889   : > { %15871 = vtanh.f32 %v20260_v4  ;;  %v20316_v47 = vld [vmem:[%s21720_s11] ss:$0 sm:$0xff] }
 0x892   : > { %v15870_v54 = vpop.eup %15869 }
 0x893   : > { %v15872_v16 = vpop.eup %15871  ;;  %v9485_v49 = vpack.c.bf16 %v15870_v54, %v15870_v54 }
 0x894   : > { %v9486_v51 = vpack.c.bf16 %v15872_v16, %v15872_v16 }
 0x896   : > { %9839 = vmatprep.mubr.bf16.mxu0 %v9486_v51  ;;  %9880 = vmatprep.mubr.bf16.mxu1 %v9486_v51 }
 0x897   : > { %9840 = vmatmul.mubr.bf16.vlgmr.msra.gmra.mrb[4].mxu0 %v9485_v49  ;;  %9881 = vmatmul.mubr.bf16.vlgmr.msra.gmra.mrb[56].mxu1 %v9485_v49 }
 0x898   : > { %9914 = vmatpush1.bf16.msra.mxu0 %v19864_v43  ;;  %14342 = vmatpush3.bf16.msra.mxu1 %v20115_v24 }
 0x899   : > { %9915 = vmatprep.subr.bf16.mxu0 %v19869_v13  ;;  %14343 = vmatprep.subr.bf16.mxu1 %v20121_v12 }
 0x89c   : > { %9916 = vmatpush1.bf16.msra.mxu0 %v19876_v53  ;;  %14344 = vmatpush3.bf16.msra.mxu1 %v20127_v58 }
 0x89d   : > { %9917 = vmatprep.subr.bf16.mxu0 %v19882_v21  ;;  %14345 = vmatprep.subr.bf16.mxu1 %v20133_v30 }
 0x8a0   : > { %9918 = vmatpush1.bf16.msra.mxu0 %v19888_v10  ;;  %14346 = vmatpush3.bf16.msra.mxu1 %v20139_v22 }
 0x8a1   : > { %9919 = vmatprep.subr.bf16.mxu0 %v19894_v62  ;;  %14347 = vmatprep.subr.bf16.mxu1 %v20145_v9 }
 0x8a4   : > { %9920 = vmatpush1.bf16.msra.mxu0 %v19900_v15  ;;  %14348 = vmatpush3.bf16.msra.mxu1 %v20151_v52 }
 0x8a5   : > { %9921 = vmatprep.subr.bf16.mxu0 %v19906_v5  ;;  %14349 = vmatprep.subr.bf16.mxu1 %v20163_v45 }
 0x8a8   : > { %9922 = vmatpush1.bf16.msra.mxu0 %v19912_v8  ;;  %14350 = vmatpush3.bf16.msra.mxu1 %v20173_v3 }
 0x8a9   : > { %9923 = vmatprep.subr.bf16.mxu0 %v19918_v26  ;;  %14351 = vmatprep.subr.bf16.mxu1 %v20187_v46 }
 0x8ac   : > { %9924 = vmatpush1.bf16.msra.mxu0 %v19924_v23  ;;  %14352 = vmatpush3.bf16.msra.mxu1 %v20197_v41 }
 0x8ad   : > { %9925 = vmatprep.subr.bf16.mxu0 %v19930_v35  ;;  %14353 = vmatprep.subr.bf16.mxu1 %v20207_v39 }
 0x8b0   : > { %9926 = vmatpush1.bf16.msra.mxu0 %v19936_v36  ;;  %14354 = vmatpush3.bf16.msra.mxu1 %v20221_v28 }
 0x8b1   : > { %9927 = vmatprep.subr.bf16.mxu0 %v19942_v57  ;;  %14355 = vmatprep.subr.bf16.mxu1 %v20233_v29 }
 0x8b4   : > { %9928 = vmatpush1.bf16.msra.mxu0 %v19948_v42  ;;  %14356 = vmatpush3.bf16.msra.mxu1 %v20245_v18 }
 0x8b5   : > { %9929 = vmatprep.subr.bf16.mxu0 %v19954_v2  ;;  %10012 = vmatprep.subr.bf16.mxu1 %v19859_v63 }
 0x8b8   : > { %9930 = vmatpush1.bf16.msra.mxu0 %v19960_v55 }
 0x8b9   : > { %9931 = vmatprep.subr.bf16.mxu0 %v19966_v34 }
 0x8bc   : > { %9932 = vmatpush1.bf16.msra.mxu0 %v19972_v25 }
 0x8bd   : > { %9933 = vmatprep.subr.bf16.mxu0 %v19978_v59 }
 0x8c0   : > { %9934 = vmatpush1.bf16.msra.mxu0 %v19984_v38 }
 0x8c1   : > { %9935 = vmatprep.subr.bf16.mxu0 %v19990_v11 }
 0x8c4   : > { %9936 = vmatpush1.bf16.msra.mxu0 %v19996_v19 }
 0x8c5   : > { %9937 = vmatprep.subr.bf16.mxu0 %v20158_v20 }
 0x8c8   : > { %9938 = vmatpush1.bf16.msra.mxu0 %v20168_v44 }
 0x8c9   : > { %9939 = vmatprep.subr.bf16.mxu0 %v20182_v27 }
 0x8cc   : > { %9940 = vmatpush1.bf16.msra.mxu0 %v20192_v32 }
 0x8cd   : > { %9941 = vmatprep.subr.bf16.mxu0 %v20202_v48 }
 0x8d0   : > { %9942 = vmatpush1.bf16.msra.mxu0 %v20216_v6 }
 0x8d1   : > { %9943 = vmatprep.subr.bf16.mxu0 %v20228_v14 }
 0x8d4   : > { %9944 = vmatpush1.bf16.msra.mxu0 %v20240_v61 }
 0x8d5   : > { %14363 = vmatprep.subr.bf16.mxu0 %v20110_v56 }
 0x96a   : > { %v9841_v37 = vpop.f32.mrb[4].mxu0  ;;  %v14335_v49 = vpop.f32.mrb[56].mxu1 }
 0x96b   : > { %v9907_v51 = vadd.f32 %v20258_v40, %v9841_v37  ;;  %v9843_v54 = vpop.f32.mrb[5].mxu0  ;;  %v14336_v16 = vpop.f32.mrb[57].mxu1 }
 0x96c   : > { %v9908_v31 = vadd.f32 %v20260_v4, %v9843_v54  ;;  %v14337_v1 = vadd.f32 %v14336_v16, %v14335_v49  ;;  %v9845_v0 = vpop.f32.mrb[6].mxu0  ;;  %v14338_v17 = vpop.f32.mrb[58].mxu1 }
 0x96d   : > { %15873 = vtanh.f32 %v9907_v51  ;;  %v9846_v60 = vpop.f32.mrb[7].mxu0  ;;  %v14339_v7 = vpop.f32.mrb[59].mxu1 }
 0x96e   : > { %15875 = vtanh.f32 %v9908_v31  ;;  %v9895_v37 = vadd.f32 %v14337_v1, %v20316_v47  ;;  %v21799_v7 = vld [vmem:[#allocation22_spill] sm:$0xff] }
 0x970   : > { %v20324_v50 = vadd.f32 %v9895_v37, %v8991_v33 }
 0x972   : > { %21798 = vst [vmem:[#allocation26_spill] sm:$0xff] %v20324_v50  ;;  %9897 = vmax.xlane.f32.xlu0 %v20324_v50 }
 0x977   : > { %v15874_v40 = vpop.eup %15873 }
 0x978   : > { %v15876_v56 = vpop.eup %15875  ;;  %v9911_v49 = vpack.c.bf16 %v15874_v40, %v15874_v40  ;;  %v21800_v40 = vld [vmem:[#allocation25_spill] sm:$0xff] }
 0x979   : > { %v9912_v54 = vpack.c.bf16 %v15876_v56, %v15876_v56 }
 0x97b   : > { %9945 = vmatprep.mubr.bf16.mxu0 %v9912_v54  ;;  %9986 = vmatprep.mubr.bf16.mxu1 %v9912_v54 }
 0x97c   : > { %9946 = vmatmul.mubr.bf16.vlgmr.msra.gmra.mrb[8].mxu0 %v9911_v49  ;;  %9987 = vmatmul.mubr.bf16.vlgmr.msra.gmra.mrb[60].mxu1 %v9911_v49  ;;  %v8992_v49 = vld [vmem:[%s20320_s25 + $0x8] sm:$0xff] }
 0x97d   : > { %10013 = vmatpush1.bf16.msra.mxu1 %v19864_v43  ;;  %14364 = vmatpush3.bf16.msra.mxu0 %v20115_v24 }
 0x97e   : > { %10014 = vmatprep.subr.bf16.mxu1 %v19869_v13  ;;  %14365 = vmatprep.subr.bf16.mxu0 %v20121_v12 }
 0x981   : > { %10015 = vmatpush1.bf16.msra.mxu1 %v19876_v53  ;;  %14366 = vmatpush3.bf16.msra.mxu0 %v20127_v58 }
 0x982   : > { %10016 = vmatprep.subr.bf16.mxu1 %v19882_v21  ;;  %14367 = vmatprep.subr.bf16.mxu0 %v20133_v30 }
 0x985   : > { %10017 = vmatpush1.bf16.msra.mxu1 %v19888_v10  ;;  %14368 = vmatpush3.bf16.msra.mxu0 %v20139_v22 }
 0x986   : > { %10018 = vmatprep.subr.bf16.mxu1 %v19894_v62  ;;  %14369 = vmatprep.subr.bf16.mxu0 %v20145_v9 }
 0x989   : > { %10019 = vmatpush1.bf16.msra.mxu1 %v19900_v15  ;;  %14370 = vmatpush3.bf16.msra.mxu0 %v20151_v52 }
 0x98a   : > { %10020 = vmatprep.subr.bf16.mxu1 %v19906_v5  ;;  %14371 = vmatprep.subr.bf16.mxu0 %v20163_v45 }
 0x98d   : > { %10021 = vmatpush1.bf16.msra.mxu1 %v19912_v8  ;;  %14372 = vmatpush3.bf16.msra.mxu0 %v20173_v3 }
 0x98e   : > { %10022 = vmatprep.subr.bf16.mxu1 %v19918_v26  ;;  %14373 = vmatprep.subr.bf16.mxu0 %v20187_v46 }
 0x991   : > { %10023 = vmatpush1.bf16.msra.mxu1 %v19924_v23  ;;  %14374 = vmatpush3.bf16.msra.mxu0 %v20197_v41 }
 0x992   : > { %10024 = vmatprep.subr.bf16.mxu1 %v19930_v35  ;;  %14375 = vmatprep.subr.bf16.mxu0 %v20207_v39 }
 0x995   : > { %10025 = vmatpush1.bf16.msra.mxu1 %v19936_v36  ;;  %14376 = vmatpush3.bf16.msra.mxu0 %v20221_v28 }
 0x996   : > { %10026 = vmatprep.subr.bf16.mxu1 %v19942_v57  ;;  %14377 = vmatprep.subr.bf16.mxu0 %v20233_v29 }
 0x999   : > { %10027 = vmatpush1.bf16.msra.mxu1 %v19948_v42  ;;  %14378 = vmatpush3.bf16.msra.mxu0 %v20245_v18 }
 0x99a   : > { %10028 = vmatprep.subr.bf16.mxu1 %v19954_v2  ;;  %10111 = vmatprep.subr.bf16.mxu0 %v19859_v63 }
 0x99d   : > { %10029 = vmatpush1.bf16.msra.mxu1 %v19960_v55 }
 0x99e   : > { %10030 = vmatprep.subr.bf16.mxu1 %v19966_v34 }
 0x9a1   : > { %10031 = vmatpush1.bf16.msra.mxu1 %v19972_v25 }
 0x9a2   : > { %10032 = vmatprep.subr.bf16.mxu1 %v19978_v59 }
 0x9a5   : > { %10033 = vmatpush1.bf16.msra.mxu1 %v19984_v38 }
 0x9a6   : > { %10034 = vmatprep.subr.bf16.mxu1 %v19990_v11 }
 0x9a9   : > { %10035 = vmatpush1.bf16.msra.mxu1 %v19996_v19 }
 0x9aa   : > { %10036 = vmatprep.subr.bf16.mxu1 %v20158_v20 }
 0x9ad   : > { %10037 = vmatpush1.bf16.msra.mxu1 %v20168_v44 }
 0x9ae   : > { %10038 = vmatprep.subr.bf16.mxu1 %v20182_v27 }
 0x9b1   : > { %10039 = vmatpush1.bf16.msra.mxu1 %v20192_v32 }
 0x9b2   : > { %10040 = vmatprep.subr.bf16.mxu1 %v20202_v48 }
 0x9b5   : > { %10041 = vmatpush1.bf16.msra.mxu1 %v20216_v6 }
 0x9b6   : > { %10042 = vmatprep.subr.bf16.mxu1 %v20228_v14 }
 0x9b9   : > { %10043 = vmatpush1.bf16.msra.mxu1 %v20240_v61 }
 0x9ba   : > { %14385 = vmatprep.subr.bf16.mxu1 %v21799_v7 }
 0xa4f   : > { %v9947_v33 = vpop.f32.mrb[8].mxu0  ;;  %v14357_v56 = vpop.f32.mrb[60].mxu1 }
 0xa50   : > { %v10006_v51 = vadd.f32 %v21800_v40, %v9947_v33  ;;  %v9949_v16 = vpop.f32.mrb[9].mxu0  ;;  %v14358_v31 = vpop.f32.mrb[61].mxu1 }
 0xa51   : > { %v10007_v1 = vadd.f32 %v20260_v4, %v9949_v16  ;;  %v14359_v0 = vadd.f32 %v14358_v31, %v14357_v56  ;;  %v9951_v17 = vpop.f32.mrb[10].mxu0  ;;  %v14360_v60 = vpop.f32.mrb[62].mxu1 }
 0xa52   : > { %15877 = vtanh.f32 %v10006_v51  ;;  %v9952_v37 = vpop.f32.mrb[11].mxu0  ;;  %v14361_v54 = vpop.f32.mrb[63].mxu1  ;;  %v21805_v51 = vld [vmem:[#allocation25_spill] sm:$0xff] }
 0xa53   : > { %15879 = vtanh.f32 %v10007_v1  ;;  %v9994_v50 = vadd.f32 %v14359_v0, %v20316_v47 }
 0xa55   : > { %v20379_v61 = vadd.f32 %v9994_v50, %v8992_v49  ;;  %v21802_v50 = vld [vmem:[#allocation23_spill] sm:$0xff] }
 0xa57   : > { %21801 = vst [vmem:[#allocation27_spill] sm:$0xff] %v20379_v61  ;;  %9996 = vmax.xlane.f32.xlu0 %v20379_v61 }
 0xa5c   : > { %v15878_v7 = vpop.eup %15877 }
 0xa5d   : > { %v15880_v33 = vpop.eup %15879  ;;  %v10010_v14 = vpack.c.bf16 %v15878_v7, %v15878_v7  ;;  %v21804_v7 = vld [vmem:[#allocation22_spill] sm:$0xff] }
 0xa5e   : > { %v10011_v40 = vpack.c.bf16 %v15880_v33, %v15880_v33  ;;  %v8993_v33 = vld [vmem:[%s20320_s25 + $0x10] sm:$0xff] }
 0xa60   : > { %10044 = vmatprep.mubr.bf16.mxu1 %v10011_v40  ;;  %10085 = vmatprep.mubr.bf16.mxu0 %v10011_v40 }
 0xa61   : > { %10045 = vmatmul.mubr.bf16.vlgmr.msra.gmra.mrb[64].mxu1 %v10010_v14  ;;  %10086 = vmatmul.mubr.bf16.vlgmr.msra.gmra.mrb[12].mxu0 %v10010_v14  ;;  %v21803_v14 = vld [vmem:[#allocation24_spill] sm:$0xff] }
 0xa62   : > { %10112 = vmatpush1.bf16.msra.mxu0 %v19864_v43  ;;  %14386 = vmatpush3.bf16.msra.mxu1 %v20115_v24 }
 0xa63   : > { %10113 = vmatprep.subr.bf16.mxu0 %v19869_v13  ;;  %14387 = vmatprep.subr.bf16.mxu1 %v20121_v12 }
 0xa66   : > { %10114 = vmatpush1.bf16.msra.mxu0 %v19876_v53  ;;  %14388 = vmatpush3.bf16.msra.mxu1 %v20127_v58 }
 0xa67   : > { %10115 = vmatprep.subr.bf16.mxu0 %v19882_v21  ;;  %14389 = vmatprep.subr.bf16.mxu1 %v20133_v30 }
 0xa6a   : > { %10116 = vmatpush1.bf16.msra.mxu0 %v19888_v10  ;;  %14390 = vmatpush3.bf16.msra.mxu1 %v20139_v22 }
 0xa6b   : > { %10117 = vmatprep.subr.bf16.mxu0 %v19894_v62  ;;  %14391 = vmatprep.subr.bf16.mxu1 %v20145_v9 }
 0xa6e   : > { %10118 = vmatpush1.bf16.msra.mxu0 %v19900_v15  ;;  %14392 = vmatpush3.bf16.msra.mxu1 %v20151_v52 }
 0xa6f   : > { %10119 = vmatprep.subr.bf16.mxu0 %v19906_v5  ;;  %14393 = vmatprep.subr.bf16.mxu1 %v20163_v45 }
 0xa72   : > { %10120 = vmatpush1.bf16.msra.mxu0 %v19912_v8  ;;  %14394 = vmatpush3.bf16.msra.mxu1 %v20173_v3 }
 0xa73   : > { %10121 = vmatprep.subr.bf16.mxu0 %v19918_v26  ;;  %14395 = vmatprep.subr.bf16.mxu1 %v20187_v46 }
 0xa76   : > { %10122 = vmatpush1.bf16.msra.mxu0 %v19924_v23  ;;  %14396 = vmatpush3.bf16.msra.mxu1 %v20197_v41 }
 0xa77   : > { %10123 = vmatprep.subr.bf16.mxu0 %v19930_v35  ;;  %14397 = vmatprep.subr.bf16.mxu1 %v20207_v39 }
 0xa7a   : > { %10124 = vmatpush1.bf16.msra.mxu0 %v19936_v36  ;;  %14398 = vmatpush3.bf16.msra.mxu1 %v20221_v28 }
 0xa7b   : > { %10125 = vmatprep.subr.bf16.mxu0 %v19942_v57  ;;  %14399 = vmatprep.subr.bf16.mxu1 %v20233_v29 }
 0xa7e   : > { %10126 = vmatpush1.bf16.msra.mxu0 %v19948_v42  ;;  %14400 = vmatpush3.bf16.msra.mxu1 %v20245_v18 }
 0xa7f   : > { %10127 = vmatprep.subr.bf16.mxu0 %v19954_v2  ;;  %10210 = vmatprep.subr.bf16.mxu1 %v19859_v63 }
 0xa82   : > { %10128 = vmatpush1.bf16.msra.mxu0 %v19960_v55 }
 0xa83   : > { %10129 = vmatprep.subr.bf16.mxu0 %v19966_v34 }
 0xa86   : > { %10130 = vmatpush1.bf16.msra.mxu0 %v19972_v25 }
 0xa87   : > { %10131 = vmatprep.subr.bf16.mxu0 %v19978_v59 }
 0xa8a   : > { %10132 = vmatpush1.bf16.msra.mxu0 %v19984_v38 }
 0xa8b   : > { %10133 = vmatprep.subr.bf16.mxu0 %v19990_v11 }
 0xa8e   : > { %10134 = vmatpush1.bf16.msra.mxu0 %v19996_v19 }
 0xa8f   : > { %10135 = vmatprep.subr.bf16.mxu0 %v20158_v20 }
 0xa92   : > { %10136 = vmatpush1.bf16.msra.mxu0 %v20168_v44 }
 0xa93   : > { %10137 = vmatprep.subr.bf16.mxu0 %v20182_v27 }
 0xa96   : > { %10138 = vmatpush1.bf16.msra.mxu0 %v20192_v32 }
 0xa97   : > { %10139 = vmatprep.subr.bf16.mxu0 %v20202_v48 }
 0xa9a   : > { %10140 = vmatpush1.bf16.msra.mxu0 %v20216_v6 }
 0xa9b   : > { %10141 = vmatprep.subr.bf16.mxu0 %v21802_v50 }
 0xa9e   : > { %10142 = vmatpush1.bf16.msra.mxu0 %v21803_v14 }
 0xa9f   : > { %14407 = vmatprep.subr.bf16.mxu0 %v21804_v7 }
 0xb34   : > { %v10046_v56 = vpop.f32.mrb[64].mxu1  ;;  %v14379_v40 = vpop.f32.mrb[12].mxu0 }
 0xb35   : > { %v10105_v16 = vadd.f32 %v21805_v51, %v10046_v56  ;;  %v10048_v31 = vpop.f32.mrb[65].mxu1  ;;  %v14380_v1 = vpop.f32.mrb[13].mxu0 }
 0xb36   : > { %v10106_v0 = vadd.f32 %v20260_v4, %v10048_v31  ;;  %v14381_v17 = vadd.f32 %v14380_v1, %v14379_v40  ;;  %v10050_v60 = vpop.f32.mrb[66].mxu1  ;;  %v14382_v37 = vpop.f32.mrb[14].mxu0 }
 0xb37   : > { %15881 = vtanh.f32 %v10105_v16  ;;  %v10051_v54 = vpop.f32.mrb[67].mxu1  ;;  %v14383_v49 = vpop.f32.mrb[15].mxu0 }
 0xb38   : > { %15883 = vtanh.f32 %v10106_v0  ;;  %v10093_v61 = vadd.f32 %v14381_v17, %v20316_v47 }
 0xb3a   : > { %v20434_v14 = vadd.f32 %v10093_v61, %v8993_v33  ;;  %v21808_v61 = vld [vmem:[#allocation24_spill] sm:$0xff]  ;;  %v8994_v33 = vld [vmem:[%s20320_s25 + $0x18] sm:$0xff] }
 0xb3c   : > { %21806 = vst [vmem:[#allocation28_spill] sm:$0xff] %v20434_v14  ;;  %10095 = vmax.xlane.f32.xlu1 %v20434_v14 }
 0xb41   : > { %v15882_v7 = vpop.eup %15881 }
 0xb42   : > { %v15884_v56 = vpop.eup %15883  ;;  %v10109_v50 = vpack.c.bf16 %v15882_v7, %v15882_v7 }
 0xb43   : > { %v10110_v51 = vpack.c.bf16 %v15884_v56, %v15884_v56 }
 0xb45   : > { %10143 = vmatprep.mubr.bf16.mxu0 %v10110_v51  ;;  %10184 = vmatprep.mubr.bf16.mxu1 %v10110_v51  ;;  %v21810_v51 = vld [vmem:[#allocation25_spill] sm:$0xff] }
 0xb46   : > { %10144 = vmatmul.mubr.bf16.vlgmr.msra.gmra.mrb[16].mxu0 %v10109_v50  ;;  %10185 = vmatmul.mubr.bf16.vlgmr.msra.gmra.mrb[68].mxu1 %v10109_v50  ;;  %v21809_v50 = vld [vmem:[#allocation22_spill] sm:$0xff] }
 0xb47   : > { %10211 = vmatpush1.bf16.msra.mxu1 %v19864_v43  ;;  %14408 = vmatpush3.bf16.msra.mxu0 %v20115_v24 }
 0xb48   : > { %10212 = vmatprep.subr.bf16.mxu1 %v19869_v13  ;;  %14409 = vmatprep.subr.bf16.mxu0 %v20121_v12 }
 0xb4b   : > { %10213 = vmatpush1.bf16.msra.mxu1 %v19876_v53  ;;  %14410 = vmatpush3.bf16.msra.mxu0 %v20127_v58 }
 0xb4c   : > { %10214 = vmatprep.subr.bf16.mxu1 %v19882_v21  ;;  %14411 = vmatprep.subr.bf16.mxu0 %v20133_v30 }
 0xb4f   : > { %10215 = vmatpush1.bf16.msra.mxu1 %v19888_v10  ;;  %14412 = vmatpush3.bf16.msra.mxu0 %v20139_v22 }
 0xb50   : > { %10216 = vmatprep.subr.bf16.mxu1 %v19894_v62  ;;  %14413 = vmatprep.subr.bf16.mxu0 %v20145_v9 }
 0xb53   : > { %10217 = vmatpush1.bf16.msra.mxu1 %v19900_v15  ;;  %14414 = vmatpush3.bf16.msra.mxu0 %v20151_v52 }
 0xb54   : > { %10218 = vmatprep.subr.bf16.mxu1 %v19906_v5  ;;  %14415 = vmatprep.subr.bf16.mxu0 %v20163_v45 }
 0xb57   : > { %10219 = vmatpush1.bf16.msra.mxu1 %v19912_v8  ;;  %14416 = vmatpush3.bf16.msra.mxu0 %v20173_v3 }
 0xb58   : > { %10220 = vmatprep.subr.bf16.mxu1 %v19918_v26  ;;  %14417 = vmatprep.subr.bf16.mxu0 %v20187_v46 }
 0xb5b   : > { %10221 = vmatpush1.bf16.msra.mxu1 %v19924_v23  ;;  %14418 = vmatpush3.bf16.msra.mxu0 %v20197_v41 }
 0xb5c   : > { %10222 = vmatprep.subr.bf16.mxu1 %v19930_v35  ;;  %14419 = vmatprep.subr.bf16.mxu0 %v20207_v39 }
 0xb5f   : > { %10223 = vmatpush1.bf16.msra.mxu1 %v19936_v36  ;;  %14420 = vmatpush3.bf16.msra.mxu0 %v20221_v28 }
 0xb60   : > { %10224 = vmatprep.subr.bf16.mxu1 %v19942_v57  ;;  %14421 = vmatprep.subr.bf16.mxu0 %v20233_v29 }
 0xb63   : > { %10225 = vmatpush1.bf16.msra.mxu1 %v19948_v42  ;;  %14422 = vmatpush3.bf16.msra.mxu0 %v20245_v18 }
 0xb64   : > { %10226 = vmatprep.subr.bf16.mxu1 %v19954_v2  ;;  %10309 = vmatprep.subr.bf16.mxu0 %v19859_v63  ;;  %v21807_v63 = vld [vmem:[#allocation23_spill] sm:$0xff] }
 0xb67   : > { %10227 = vmatpush1.bf16.msra.mxu1 %v19960_v55 }
 0xb68   : > { %10228 = vmatprep.subr.bf16.mxu1 %v19966_v34 }
 0xb6b   : > { %10229 = vmatpush1.bf16.msra.mxu1 %v19972_v25 }
 0xb6c   : > { %10230 = vmatprep.subr.bf16.mxu1 %v19978_v59 }
 0xb6f   : > { %10231 = vmatpush1.bf16.msra.mxu1 %v19984_v38 }
 0xb70   : > { %10232 = vmatprep.subr.bf16.mxu1 %v19990_v11 }
 0xb73   : > { %10233 = vmatpush1.bf16.msra.mxu1 %v19996_v19 }
 0xb74   : > { %10234 = vmatprep.subr.bf16.mxu1 %v20158_v20 }
 0xb77   : > { %10235 = vmatpush1.bf16.msra.mxu1 %v20168_v44 }
 0xb78   : > { %10236 = vmatprep.subr.bf16.mxu1 %v20182_v27 }
 0xb7b   : > { %10237 = vmatpush1.bf16.msra.mxu1 %v20192_v32 }
 0xb7c   : > { %10238 = vmatprep.subr.bf16.mxu1 %v20202_v48 }
 0xb7f   : > { %10239 = vmatpush1.bf16.msra.mxu1 %v20216_v6 }
 0xb80   : > { %10240 = vmatprep.subr.bf16.mxu1 %v21807_v63 }
 0xb83   : > { %10241 = vmatpush1.bf16.msra.mxu1 %v21808_v61 }
 0xb84   : > { %14429 = vmatprep.subr.bf16.mxu1 %v21809_v50 }
 0xc19   : > { %v10145_v7 = vpop.f32.mrb[16].mxu0  ;;  %v14401_v40 = vpop.f32.mrb[68].mxu1 }
 0xc1a   : > { %v10204_v16 = vadd.f32 %v21810_v51, %v10145_v7  ;;  %v10147_v31 = vpop.f32.mrb[17].mxu0  ;;  %v14402_v1 = vpop.f32.mrb[69].mxu1 }
 0xc1b   : > { %v10205_v0 = vadd.f32 %v20260_v4, %v10147_v31  ;;  %v14403_v17 = vadd.f32 %v14402_v1, %v14401_v40  ;;  %v10149_v60 = vpop.f32.mrb[18].mxu0  ;;  %v14404_v37 = vpop.f32.mrb[70].mxu1  ;;  %v15970_v40 = vld [vmem:[%s21718_s9 + $0x34] ss:$12 sps:$4 sm:$0xff]   ;;  %v15974_v1 = vld [vmem:[%s21718_s9 + $0x64] ss:$12 sps:$4 sm:$0xff]  }
 0xc1c   : > { %15885 = vtanh.f32 %v10204_v16  ;;  %v10150_v54 = vpop.f32.mrb[19].mxu0  ;;  %v14405_v49 = vpop.f32.mrb[71].mxu1  ;;  %v15972_v16 = vld [vmem:[%s21718_s9 + $0x4c] ss:$12 sps:$4 sm:$0xff]   ;;  %v15973_v31 = vld [vmem:[%s21718_s9 + $0x48] ss:$12 sps:$4 sm:$0xff]  }
 0xc1d   : > { %15887 = vtanh.f32 %v10205_v0  ;;  %v10192_v56 = vadd.f32 %v14403_v17, %v20316_v47  ;;  %v15975_v0 = vld [vmem:[%s21718_s9 + $0x60] ss:$12 sps:$4 sm:$0xff]   ;;  %v15976_v17 = vld [vmem:[%s21718_s9 + $0x7c] ss:$12 sps:$4 sm:$0xff]   ;;  %v15977_v60 = vld [vmem:[%s21718_s9 + $0x78] ss:$12 sps:$4 sm:$0xff]  }
 0xc1e   : > { %v15978_v37 = vld [vmem:[%s21718_s9 + $0x94] ss:$12 sps:$4 sm:$0xff]   ;;  %v15979_v54 = vld [vmem:[%s21718_s9 + $0x90] ss:$12 sps:$4 sm:$0xff]   ;;  %v15980_v49 = vld [vmem:[%s21718_s9 + $0xac] ss:$12 sps:$4 sm:$0xff]  }
 0xc1f   : > { %v20489_v14 = vadd.f32 %v10192_v56, %v8994_v33  ;;  %v15981_v33 = vld [vmem:[%s21718_s9 + $0xa8] ss:$12 sps:$4 sm:$0xff]   ;;  %v15982_v56 = vld [vmem:[%s21718_s9 + $0xc4] ss:$12 sps:$4 sm:$0xff]  }
 0xc21   : > { %10194 = vmax.xlane.f32.xlu1 %v20489_v14 }
 0xc26   : > { %v15886_v50 = vpop.eup %15885 }
 0xc27   : > { %v15888_v7 = vpop.eup %15887  ;;  %v10208_v61 = vpack.c.bf16 %v15886_v50, %v15886_v50  ;;  %v15969_v50 = vld [vmem:[%s21718_s9 + $0x18] ss:$12 sps:$4 sm:$0xff]  }
 0xc28   : > { %v10209_v51 = vpack.c.bf16 %v15888_v7, %v15888_v7  ;;  %v15983_v7 = vld [vmem:[%s21718_s9 + $0xc0] ss:$12 sps:$4 sm:$0xff]  }
 0xc2a   : > { %10242 = vmatprep.mubr.bf16.mxu1 %v10209_v51  ;;  %10283 = vmatprep.mubr.bf16.mxu0 %v10209_v51  ;;  %v15971_v51 = vld [vmem:[%s21718_s9 + $0x30] ss:$12 sps:$4 sm:$0xff]  }
 0xc2b   : > { %10243 = vmatmul.mubr.bf16.vlgmr.msra.gmra.mrb[72].mxu1 %v10208_v61  ;;  %10284 = vmatmul.mubr.bf16.vlgmr.msra.gmra.mrb[20].mxu0 %v10208_v61  ;;  %v15968_v61 = vld [vmem:[%s21718_s9 + $0x1c] ss:$12 sps:$4 sm:$0xff]  }
 0xc2c   : > { %10310 = vmatpush1.bf16.msra.mxu0 %v19864_v43  ;;  %14430 = vmatpush3.bf16.msra.mxu1 %v20115_v24  ;;  %v15966_v43 = vld [vmem:[%s21718_s9 + $0x4] ss:$12 sps:$4 sm:$0xff]  }
 0xc2d   : > { %10311 = vmatprep.subr.bf16.mxu0 %v19869_v13  ;;  %14431 = vmatprep.subr.bf16.mxu1 %v20121_v12  ;;  %v21811_v13 = vld [vmem:[#allocation24_spill] sm:$0xff] }
 0xc30   : > { %10312 = vmatpush1.bf16.msra.mxu0 %v19876_v53  ;;  %14432 = vmatpush3.bf16.msra.mxu1 %v20127_v58  ;;  %v21812_v53 = vld [vmem:[#allocation22_spill] sm:$0xff] }
 0xc31   : > { %10313 = vmatprep.subr.bf16.mxu0 %v19882_v21  ;;  %14433 = vmatprep.subr.bf16.mxu1 %v20133_v30 }
 0xc34   : > { %10314 = vmatpush1.bf16.msra.mxu0 %v19888_v10  ;;  %14434 = vmatpush3.bf16.msra.mxu1 %v20139_v22 }
 0xc35   : > { %10315 = vmatprep.subr.bf16.mxu0 %v19894_v62  ;;  %14435 = vmatprep.subr.bf16.mxu1 %v20145_v9  ;;  %v21813_v62 = vld [vmem:[#allocation25_spill] sm:$0xff] }
 0xc38   : > { %10316 = vmatpush1.bf16.msra.mxu0 %v19900_v15  ;;  %14436 = vmatpush3.bf16.msra.mxu1 %v20151_v52 }
 0xc39   : > { %10317 = vmatprep.subr.bf16.mxu0 %v19906_v5  ;;  %14437 = vmatprep.subr.bf16.mxu1 %v20163_v45 }
 0xc3c   : > { %10318 = vmatpush1.bf16.msra.mxu0 %v19912_v8  ;;  %14438 = vmatpush3.bf16.msra.mxu1 %v20173_v3 }
 0xc3d   : > { %10319 = vmatprep.subr.bf16.mxu0 %v19918_v26  ;;  %14439 = vmatprep.subr.bf16.mxu1 %v20187_v46 }
 0xc40   : > { %10320 = vmatpush1.bf16.msra.mxu0 %v19924_v23  ;;  %14440 = vmatpush3.bf16.msra.mxu1 %v20197_v41 }
 0xc41   : > { %10321 = vmatprep.subr.bf16.mxu0 %v19930_v35  ;;  %14441 = vmatprep.subr.bf16.mxu1 %v20207_v39 }
 0xc44   : > { %10322 = vmatpush1.bf16.msra.mxu0 %v19936_v36  ;;  %14442 = vmatpush3.bf16.msra.mxu1 %v20221_v28 }
 0xc45   : > { %10323 = vmatprep.subr.bf16.mxu0 %v19942_v57  ;;  %14443 = vmatprep.subr.bf16.mxu1 %v20233_v29 }
 0xc48   : > { %10324 = vmatpush1.bf16.msra.mxu0 %v19948_v42  ;;  %14444 = vmatpush3.bf16.msra.mxu1 %v20245_v18 }
 0xc49   : > { %10325 = vmatprep.subr.bf16.mxu0 %v19954_v2  ;;  %10408 = vmatprep.subr.bf16.mxu1 %v15966_v43  ;;  %v8995_v2 = vld [vmem:[%s20320_s25 + $0x20] sm:$0xff]  ;;  %v15984_v43 = vld [vmem:[%s21718_s9 + $0xdc] ss:$12 sps:$4 sm:$0xff]  }
 0xc4c   : > { %10326 = vmatpush1.bf16.msra.mxu0 %v19960_v55 }
 0xc4d   : > { %10327 = vmatprep.subr.bf16.mxu0 %v19966_v34 }
 0xc50   : > { %10328 = vmatpush1.bf16.msra.mxu0 %v19972_v25 }
 0xc51   : > { %10329 = vmatprep.subr.bf16.mxu0 %v19978_v59 }
 0xc54   : > { %10330 = vmatpush1.bf16.msra.mxu0 %v19984_v38 }
 0xc55   : > { %10331 = vmatprep.subr.bf16.mxu0 %v19990_v11 }
 0xc58   : > { %10332 = vmatpush1.bf16.msra.mxu0 %v19996_v19  ;;  %v15967_v19 = vld [vmem:[%s21718_s9] ss:$12 sps:$4 sm:$0xff]  }
 0xc59   : > { %10333 = vmatprep.subr.bf16.mxu0 %v20158_v20 }
 0xc5c   : > { %10334 = vmatpush1.bf16.msra.mxu0 %v20168_v44 }
 0xc5d   : > { %10335 = vmatprep.subr.bf16.mxu0 %v20182_v27 }
 0xc60   : > { %10336 = vmatpush1.bf16.msra.mxu0 %v20192_v32 }
 0xc61   : > { %10337 = vmatprep.subr.bf16.mxu0 %v20202_v48 }
 0xc64   : > { %10338 = vmatpush1.bf16.msra.mxu0 %v20216_v6 }
 0xc65   : > { %10339 = vmatprep.subr.bf16.mxu0 %v21807_v63 }
 0xc68   : > { %10340 = vmatpush1.bf16.msra.mxu0 %v21811_v13 }
 0xc69   : > { %14451 = vmatprep.subr.bf16.mxu0 %v21812_v53 }
 0xcfe   : > { %v10244_v21 = vpop.f32.mrb[72].mxu1  ;;  %v14423_v10 = vpop.f32.mrb[20].mxu0 }
 0xcff   : > { %v10303_v15 = vadd.f32 %v21813_v62, %v10244_v21  ;;  %v10246_v5 = vpop.f32.mrb[73].mxu1  ;;  %v14424_v8 = vpop.f32.mrb[21].mxu0  ;;  %v15985_v21 = vld [vmem:[%s21718_s9 + $0xd8] ss:$12 sps:$4 sm:$0xff]  }
 0xd00   : > { %v10304_v26 = vadd.f32 %v20260_v4, %v10246_v5  ;;  %v14425_v23 = vadd.f32 %v14424_v8, %v14423_v10  ;;  %v10248_v35 = vpop.f32.mrb[74].mxu1  ;;  %v14426_v36 = vpop.f32.mrb[22].mxu0  ;;  %v15986_v10 = vld [vmem:[%s21718_s9 + $0xf4] ss:$12 sps:$4 sm:$0xff]  }
 0xd01   : > { %15889 = vtanh.f32 %v10303_v15  ;;  %v10249_v57 = vpop.f32.mrb[75].mxu1  ;;  %v14427_v42 = vpop.f32.mrb[23].mxu0  ;;  %v15988_v15 = vld [vmem:[%s21718_s9 + $0x10c] ss:$12 sps:$4 sm:$0xff]   ;;  %v15989_v5 = vld [vmem:[%s21718_s9 + $0x108] ss:$12 sps:$4 sm:$0xff]  }
 0xd02   : > { %15891 = vtanh.f32 %v10304_v26  ;;  %v10291_v55 = vadd.f32 %v14425_v23, %v20316_v47  ;;  %v8996_v42 = vld [vmem:[%s20320_s25 + $0x28] sm:$0xff] }
 0xd04   : > { %v20546_v34 = vadd.f32 %v10291_v55, %v8995_v2 }
 0xd06   : > { %10293 = vmax.xlane.f32.xlu0 %v20546_v34 }
 0xd0b   : > { %v15890_v25 = vpop.eup %15889 }
 0xd0c   : > { %v15892_v59 = vpop.eup %15891  ;;  %v10307_v11 = vpack.c.bf16 %v15890_v25, %v15890_v25 }
 0xd0d   : > { %v10308_v38 = vpack.c.bf16 %v15892_v59, %v15892_v59  ;;  %v21814_v59 = vmov 0  }
 0xd0f   : > { %10341 = vmatprep.mubr.bf16.mxu0 %v10308_v38  ;;  %10382 = vmatprep.mubr.bf16.mxu1 %v10308_v38  ;;  %v8997_v38 = vld [vmem:[%s20320_s25 + $0x30] sm:$0xff] }
 0xd10   : > { %10342 = vmatmul.mubr.bf16.vlgmr.msra.gmra.mrb[24].mxu0 %v10307_v11  ;;  %10383 = vmatmul.mubr.bf16.vlgmr.msra.gmra.mrb[76].mxu1 %v10307_v11 }
 0xd11   : > { %10409 = vmatpush1.bf16.msra.mxu1 %v15967_v19  ;;  %14452 = vmatpush3.bf16.msra.mxu0 %v20115_v24 }
 0xd12   : > { %10410 = vmatprep.subr.bf16.mxu1 %v15968_v61  ;;  %14453 = vmatprep.subr.bf16.mxu0 %v20121_v12  ;;  %v10096_v61 = vpop.xlane.xlu1 %10095 }
 0xd15   : > { %10411 = vmatpush1.bf16.msra.mxu1 %v15969_v50  ;;  %14454 = vmatpush3.bf16.msra.mxu0 %v20127_v58 }
 0xd16   : > { %10412 = vmatprep.subr.bf16.mxu1 %v15970_v40  ;;  %14455 = vmatprep.subr.bf16.mxu0 %v20133_v30  ;;  %v21817_v40 = vld [vmem:[#allocation28_spill] sm:$0xff] }
 0xd17   : > { %vm10097_vm9 = vcmp.ge.f32.partialorder %v21817_v40, %v10096_v61  ;;  %v10873_v40 = vld [vmem:[%s21723_s14 + $0x28] sm:$0xff] }
 0xd19   : > { %10413 = vmatpush1.bf16.msra.mxu1 %v15971_v51  ;;  %14456 = vmatpush3.bf16.msra.mxu0 %v20139_v22 }
 0xd1a   : > { %10414 = vmatprep.subr.bf16.mxu1 %v15972_v16  ;;  %14457 = vmatprep.subr.bf16.mxu0 %v20145_v9 }
 0xd1d   : > { %10415 = vmatpush1.bf16.msra.mxu1 %v15973_v31  ;;  %14458 = vmatpush3.bf16.msra.mxu0 %v20151_v52 }
 0xd1e   : > { %10416 = vmatprep.subr.bf16.mxu1 %v15974_v1  ;;  %14459 = vmatprep.subr.bf16.mxu0 %v20163_v45 }
 0xd21   : > { %10417 = vmatpush1.bf16.msra.mxu1 %v15975_v0  ;;  %14460 = vmatpush3.bf16.msra.mxu0 %v20173_v3 }
 0xd22   : > { %10418 = vmatprep.subr.bf16.mxu1 %v15976_v17  ;;  %14461 = vmatprep.subr.bf16.mxu0 %v20187_v46 }
 0xd25   : > { %10419 = vmatpush1.bf16.msra.mxu1 %v15977_v60  ;;  %14462 = vmatpush3.bf16.msra.mxu0 %v20197_v41 }
 0xd26   : > { %10420 = vmatprep.subr.bf16.mxu1 %v15978_v37  ;;  %14463 = vmatprep.subr.bf16.mxu0 %v20207_v39 }
 0xd29   : > { %10421 = vmatpush1.bf16.msra.mxu1 %v15979_v54  ;;  %14464 = vmatpush3.bf16.msra.mxu0 %v20221_v28 }
 0xd2a   : > { %10422 = vmatprep.subr.bf16.mxu1 %v15980_v49  ;;  %14465 = vmatprep.subr.bf16.mxu0 %v20233_v29 }
 0xd2d   : > { %10423 = vmatpush1.bf16.msra.mxu1 %v15981_v33  ;;  %14466 = vmatpush3.bf16.msra.mxu0 %v20245_v18 }
 0xd2e   : > { %10424 = vmatprep.subr.bf16.mxu1 %v15982_v56  ;;  %14473 = vmatprep.subr.bf16.mxu0 %v21812_v53  ;;  %v15987_v53 = vld [vmem:[%s21718_s9 + $0xf0] ss:$12 sps:$4 sm:$0xff]  }
 0xd31   : > { %10425 = vmatpush1.bf16.msra.mxu1 %v15983_v7 }
 0xd32   : > { %10426 = vmatprep.subr.bf16.mxu1 %v15984_v43  ;;  %v8998_v43 = vld [vmem:[%s20320_s25 + $0x38] sm:$0xff]  ;;  %s21626_s25 = scalar_lea.hbm %s21728_s19, %s14187_s2 }
 0xd35   : > { %10427 = vmatpush1.bf16.msra.mxu1 %v15985_v21 }
 0xd36   : > { %10428 = vmatprep.subr.bf16.mxu1 %v15986_v10 }
 0xd39   : > { %10429 = vmatpush1.bf16.msra.mxu1 %v15987_v53  ;;  %v21818_v53 = vld [vmem:[#allocation27_spill] sm:$0xff] }
 0xd3a   : > { %10430 = vmatprep.subr.bf16.mxu1 %v15988_v15  ;;  %v10195_v15 = vpop.xlane.xlu1 %10194 }
 0xd3b   : > { %vm10196_vm13 = vcmp.ge.f32.partialorder %v20489_v14, %v10195_v15  ;;  %v15824_v14 = vld [vmem:[%s21721_s12 + $0x8] ss:$16 sps:$4 sm:$0xff]  }
 0xd3d   : > { %10431 = vmatpush1.bf16.msra.mxu1 %v15989_v5 }
 0xd3e   : > { %10432 = vmatprep.subr.bf16.mxu1 %v20158_v20 }
 0xd41   : > { %10433 = vmatpush1.bf16.msra.mxu1 %v20168_v44 }
 0xd42   : > { %10434 = vmatprep.subr.bf16.mxu1 %v20182_v27 }
 0xd45   : > { %10435 = vmatpush1.bf16.msra.mxu1 %v20192_v32 }
 0xd46   : > { %10436 = vmatprep.subr.bf16.mxu1 %v20202_v48 }
 0xd49   : > { %10437 = vmatpush1.bf16.msra.mxu1 %v20216_v6 }
 0xd4a   : > { %10438 = vmatprep.subr.bf16.mxu1 %v21807_v63 }
 0xd4d   : > { %10439 = vmatpush1.bf16.msra.mxu1 %v21811_v13 }
 0xde3   : > { %v10343_v8 = vpop.f32.mrb[24].mxu0  ;;  %v14445_v26 = vpop.f32.mrb[76].mxu1 }
 0xde4   : > { %v10402_v23 = vadd.f32 %v21813_v62, %v10343_v8  ;;  %v10345_v20 = vpop.f32.mrb[25].mxu0  ;;  %v14446_v35 = vpop.f32.mrb[77].mxu1 }
 0xde5   : > { %v10403_v44 = vadd.f32 %v20260_v4, %v10345_v20  ;;  %v14447_v27 = vadd.f32 %v14446_v35, %v14445_v26  ;;  %v10347_v36 = vpop.f32.mrb[26].mxu0  ;;  %v14448_v32 = vpop.f32.mrb[78].mxu1  ;;  %v15823_v20 = vld [vmem:[%s21721_s12 + $0x4] ss:$16 sps:$4 sm:$0xff]   ;;  %v15826_v35 = vld [vmem:[%s21721_s12 + $0xc] ss:$16 sps:$4 sm:$0xff]  }
 0xde6   : > { %15893 = vtanh.f32 %v10402_v23  ;;  %v10348_v48 = vpop.f32.mrb[27].mxu0  ;;  %v14449_v57 = vpop.f32.mrb[79].mxu1  ;;  %v15821_v23 = vld [vmem:[%s21721_s12] ss:$16 sps:$4 sm:$0xff]   ;;  %10752 = vmatprep.subr.bf16.mxu1 %v15823_v20  ;;  %v15830_v32 = vld [vmem:[%s21721_s12 + $0x28] ss:$16 sps:$4 sm:$0xff]  }
 0xde7   : > { %15895 = vtanh.f32 %v10403_v44  ;;  %v10390_v6 = vadd.f32 %v14447_v27, %v20316_v47  ;;  %v15829_v44 = vld [vmem:[%s21721_s12 + $0x24] ss:$16 sps:$4 sm:$0xff]   ;;  %v15832_v27 = vld [vmem:[%s21721_s12 + $0x2c] ss:$16 sps:$4 sm:$0xff]   ;;  %v15827_v36 = vld [vmem:[%s21721_s12 + $0x20] ss:$16 sps:$4 sm:$0xff]  }
 0xde8   : > { %v15835_v48 = vld [vmem:[%s21721_s12 + $0x44] ss:$16 sps:$4 sm:$0xff]   ;;  %v15838_v57 = vld [vmem:[%s21721_s12 + $0x4c] ss:$16 sps:$4 sm:$0xff]  }
 0xde9   : > { %v20646_v63 = vadd.f32 %v10390_v6, %v8996_v42  ;;  %v15833_v42 = vld [vmem:[%s21721_s12 + $0x40] ss:$16 sps:$4 sm:$0xff]   ;;  %v15836_v6 = vld [vmem:[%s21721_s12 + $0x48] ss:$16 sps:$4 sm:$0xff]  }
 0xdea   : > { %v10876_v20 = vld [vmem:[%s21723_s14 + $0x40] sm:$0xff] }
 0xdeb   : > { %10392 = vmax.xlane.f32.xlu1 %v20646_v63 }
 0xdf0   : > { %v15894_v13 = vpop.eup %15893 }
 0xdf1   : > { %v15896_v2 = vpop.eup %15895  ;;  %v10406_v25 = vpack.c.bf16 %v15894_v13, %v15894_v13  ;;  %v15844_v13 = vld [vmem:[%s21721_s12 + $0x6c] ss:$16 sps:$4 sm:$0xff]  }
 0xdf2   : > { %v10407_v55 = vpack.c.bf16 %v15896_v2, %v15896_v2  ;;  %v15839_v2 = vld [vmem:[%s21721_s12 + $0x60] ss:$16 sps:$4 sm:$0xff]  }
 0xdf4   : > { %10440 = vmatprep.mubr.bf16.mxu1 %v10407_v55  ;;  %10481 = vmatprep.mubr.bf16.mxu0 %v10407_v55  ;;  %v15842_v55 = vld [vmem:[%s21721_s12 + $0x68] ss:$16 sps:$4 sm:$0xff]  }
 0xdf5   : > { %10441 = vmatmul.mubr.bf16.vlgmr.msra.gmra.mrb[80].mxu1 %v10406_v25  ;;  %10482 = vmatmul.mubr.bf16.vlgmr.msra.gmra.mrb[28].mxu0 %v10406_v25  ;;  %v15847_v25 = vld [vmem:[%s21721_s12 + $0x84] ss:$16 sps:$4 sm:$0xff]  }
 0xdf6   : > { %14474 = vmatpush3.bf16.msra.mxu0 %v20115_v24  ;;  %10784 = vmatprep.mubr.bf16.mxu1 %v21814_v59 }
 0xdf7   : > { %14475 = vmatprep.subr.bf16.mxu0 %v20121_v12  ;;  %10753 = vmatpush1.bf16.msra.mxu1 %v15821_v23 }
 0xdf8   : > { %10754 = vmatprep.subr.bf16.mxu1 %v15829_v44  ;;  %v10877_v44 = vld [vmem:[%s21723_s14 + $0x48] sm:$0xff] }
 0xdfa   : > { %14476 = vmatpush3.bf16.msra.mxu0 %v20127_v58 }
 0xdfb   : > { %14477 = vmatprep.subr.bf16.mxu0 %v20133_v30  ;;  %10755 = vmatpush1.bf16.msra.mxu1 %v15827_v36 }
 0xdfc   : > { %10756 = vmatprep.subr.bf16.mxu1 %v15835_v48 }
 0xdfe   : > { %14478 = vmatpush3.bf16.msra.mxu0 %v20139_v22 }
 0xdff   : > { %14479 = vmatprep.subr.bf16.mxu0 %v20145_v9  ;;  %10757 = vmatpush1.bf16.msra.mxu1 %v15833_v42  ;;  %v10888_v42 = vld [vmem:[%s21723_s14 + $0xa0] sm:$0xff] }
 0xe02   : > { %14480 = vmatpush3.bf16.msra.mxu0 %v20151_v52 }
 0xe03   : > { %14481 = vmatprep.subr.bf16.mxu0 %v20163_v45 }
 0xe06   : > { %14482 = vmatpush3.bf16.msra.mxu0 %v20173_v3 }
 0xe07   : > { %14483 = vmatprep.subr.bf16.mxu0 %v20187_v46  ;;  %v21815_v46 = vlaneseq }
 0xe0a   : > { %14484 = vmatpush3.bf16.msra.mxu0 %v20197_v41  ;;  %v8989_v41 = vand.u32 127, %v21815_v46  ;;  %v15860_v46 = vld [vmem:[%s21721_s12 + $0xc8] ss:$16 sps:$4 sm:$0xff]  }
 0xe0b   : > { %14485 = vmatprep.subr.bf16.mxu0 %v20207_v39 }
 0xe0c   : > { %v20670_v19 = vcvt.s32.f32 %v8989_v41 }
 0xe0e   : > { %14486 = vmatpush3.bf16.msra.mxu0 %v20221_v28  ;;  %v10098_v0 = vsel %vm10097_vm9, %v20670_v19, 128.0  ;;  %v10197_v26 = vsel %vm10196_vm13, %v20670_v19, 128.0 }
 0xe0f   : > { %14487 = vmatprep.subr.bf16.mxu0 %v20233_v29 }
 0xe12   : > { %14488 = vmatpush3.bf16.msra.mxu0 %v20245_v18  ;;  %v9898_v18 = vpop.xlane.xlu0 %9897 }
 0xe13   : > { %10793 = vmatprep.subr.bf16.mxu0 %v15826_v35  ;;  %v10880_v35 = vld [vmem:[%s21723_s14 + $0x60] sm:$0xff] }
 0xe78   : > { %v10393_v8 = vpop.xlane.xlu1 %10392 }
 0xe79   : > { %vm10394_vm14 = vcmp.ge.f32.partialorder %v20646_v63, %v10393_v8  ;;  %v15841_v63 = vld [vmem:[%s21721_s12 + $0x64] ss:$16 sps:$4 sm:$0xff]  }
 0xe7a   : > { %10758 = vmatprep.subr.bf16.mxu1 %v15841_v63  ;;  %v10889_v63 = vld [vmem:[%s21723_s14 + $0xa8] sm:$0xff] }
 0xe7b   : > { %10759 = vmatpush1.bf16.msra.mxu1 %v15839_v2 }
 0xe7c   : > { %10760 = vmatprep.subr.bf16.mxu1 %v15847_v25 }
 0xec8   : > { %v10442_v24 = vpop.f32.mrb[80].mxu1  ;;  %v14467_v12 = vpop.f32.mrb[28].mxu0 }
 0xec9   : > { %v10501_v58 = vadd.f32 %v21813_v62, %v10442_v24  ;;  %v10444_v30 = vpop.f32.mrb[81].mxu1  ;;  %v14468_v22 = vpop.f32.mrb[29].mxu0  ;;  %v21816_v62 = vld [vmem:[#allocation26_spill] sm:$0xff] }
 0xeca   : > { %v10502_v9 = vadd.f32 %v20260_v4, %v10444_v30  ;;  %v14469_v52 = vadd.f32 %v14468_v22, %v14467_v12  ;;  %v10446_v45 = vpop.f32.mrb[82].mxu1  ;;  %v14470_v3 = vpop.f32.mrb[30].mxu0  ;;  %vm9899_vm8 = vcmp.ge.f32.partialorder %v21816_v62, %v9898_v18  ;;  %v15845_v24 = vld [vmem:[%s21721_s12 + $0x80] ss:$16 sps:$4 sm:$0xff]   ;;  %v15848_v12 = vld [vmem:[%s21721_s12 + $0x88] ss:$16 sps:$4 sm:$0xff]  }
 0xecb   : > { %15897 = vtanh.f32 %v10501_v58  ;;  %v10447_v39 = vpop.f32.mrb[83].mxu1  ;;  %v14471_v28 = vpop.f32.mrb[31].mxu0  ;;  %v9900_v50 = vsel %vm9899_vm8, %v20670_v19, 128.0  ;;  %v15853_v58 = vld [vmem:[%s21721_s12 + $0xa4] ss:$16 sps:$4 sm:$0xff]   ;;  %10761 = vmatpush1.bf16.msra.mxu1 %v15845_v24 }
 0xecc   : > { %15899 = vtanh.f32 %v10502_v9  ;;  %v10489_v29 = vadd.f32 %v14469_v52, %v20316_v47  ;;  %v9997_v4 = vpop.xlane.xlu0 %9996  ;;  %v15856_v30 = vld [vmem:[%s21721_s12 + $0xac] ss:$16 sps:$4 sm:$0xff]   ;;  %v15851_v22 = vld [vmem:[%s21721_s12 + $0xa0] ss:$16 sps:$4 sm:$0xff]   ;;  %10762 = vmatprep.subr.bf16.mxu1 %v15853_v58  ;;  %v15854_v9 = vld [vmem:[%s21721_s12 + $0xa8] ss:$16 sps:$4 sm:$0xff]  }
 0xecd   : > { %vm9998_vm12 = vcmp.ge.f32.partialorder %v21818_v53, %v9997_v4  ;;  %v15859_v52 = vld [vmem:[%s21721_s12 + $0xc4] ss:$16 sps:$4 sm:$0xff]   ;;  %v15862_v45 = vld [vmem:[%s21721_s12 + $0xcc] ss:$16 sps:$4 sm:$0xff]   ;;  %v15857_v3 = vld [vmem:[%s21721_s12 + $0xc0] ss:$16 sps:$4 sm:$0xff]  }
 0xece   : > { %v10490_v11 = vadd.f32 %v10489_v29, %v8997_v38  ;;  %v9999_v5 = vsel %vm9998_vm12, %v20670_v19, 128.0  ;;  %v15865_v28 = vld [vmem:[%s21721_s12 + $0xe4] ss:$16 sps:$4 sm:$0xff]   ;;  %v15868_v38 = vld [vmem:[%s21721_s12 + $0xec] ss:$16 sps:$4 sm:$0xff]  }
 0xecf   : > { %10763 = vmatpush1.bf16.msra.mxu1 %v15851_v22  ;;  %v15863_v29 = vld [vmem:[%s21721_s12 + $0xe0] ss:$16 sps:$4 sm:$0xff]   ;;  %v15866_v18 = vld [vmem:[%s21721_s12 + $0xe8] ss:$16 sps:$4 sm:$0xff]  }
 0xed0   : > { %10491 = vmax.xlane.f32.xlu0 %v10490_v11  ;;  %v10294_v16 = vpop.xlane.xlu0 %10293  ;;  %10764 = vmatprep.subr.bf16.mxu1 %v15859_v52  ;;  %v10872_v62 = vld [vmem:[%s21723_s14 + $0x20] sm:$0xff]  ;;  %v10869_v4 = vld [vmem:[%s21723_s14 + $0x8] sm:$0xff] }
 0xed1   : > { %vm10295_vm10 = vcmp.ge.f32.partialorder %v20546_v34, %v10294_v16  ;;  %v13926_v16 = vcombine.high %v10869_v4, %v10873_v40  ;;  %v10896_v24 = vld [vmem:[%s21723_s14 + $0xe0] sm:$0xff]  ;;  %v10897_v58 = vld [vmem:[%s21723_s14 + $0xe8] sm:$0xff] }
 0xed2   : > { %v10296_v60 = vsel %vm10295_vm10, %v20670_v19, 128.0 }
 0xed3   : > { %10765 = vmatpush1.bf16.msra.mxu1 %v15857_v3  ;;  %v10904_v3 = vld [vmem:[%s21723_s14 + $0x120] sm:$0xff] }
 0xed4   : > { %9901 = vmin.xlane.f32.xlu0 %v9900_v50  ;;  %10766 = vmatprep.subr.bf16.mxu1 %v15865_v28 }
 0xed5   : > { %v15898_v51 = vpop.eup %15897 }
 0xed6   : > { %v15900_v31 = vpop.eup %15899  ;;  %v10505_v17 = vpack.c.bf16 %v15898_v51, %v15898_v51  ;;  %v13925_v51 = vcombine.low %v10869_v4, %v10873_v40  ;;  %v10913_v4 = vld [vmem:[%s21723_s14 + $0x168] sm:$0xff] }
 0xed7   : > { %v10506_v1 = vpack.c.bf16 %v15900_v31, %v15900_v31  ;;  %10767 = vmatpush1.bf16.msra.mxu1 %v15863_v29 }
 0xed8   : > { %10099 = vmin.xlane.f32.xlu0 %v10098_v0 }
 0xed9   : > { %10539 = vmatprep.mubr.bf16.mxu0 %v10506_v1 }
 0xeda   : > { %10540 = vmatmul.mubr.bf16.vlgmr.msra.gmra.mrb[32].mxu0 %v10505_v17  ;;  %v16087_v17 = vmov 0.0  }
 0xedb   : > { %10825 = vmatprep.mubr.bf16.mxu0 %v21814_v59  ;;  %10794 = vmatpush1.bf16.msra.mxu0 %v15824_v14  ;;  %v15850_v59 = vld [vmem:[%s21721_s12 + $0x8c] ss:$16 sps:$4 sm:$0xff]  }
 0xedc   : > { %10297 = vmin.xlane.f32.xlu0 %v10296_v60  ;;  %10795 = vmatprep.subr.bf16.mxu0 %v15832_v27  ;;  %v10881_v27 = vld [vmem:[%s21723_s14 + $0x68] sm:$0xff] }
 0xedd   : > { %v13934_v48 = vcombine.high %v10877_v44, %v10881_v27  ;;  %v13933_v2 = vcombine.low %v10877_v44, %v10881_v27  ;;  %v10941_v44 = vld [vmem:[%s21723_s14 + $0x248] sm:$0xff] }
 0xede   : > { %v10945_v27 = vld [vmem:[%s21723_s14 + $0x268] sm:$0xff] }
 0xedf   : > { %10796 = vmatpush1.bf16.msra.mxu0 %v15830_v32 }
 0xee0   : > { %10797 = vmatprep.subr.bf16.mxu0 %v15838_v57  ;;  %v10884_v57 = vld [vmem:[%s21723_s14 + $0x80] sm:$0xff] }
 0xee3   : > { %10798 = vmatpush1.bf16.msra.mxu0 %v15836_v6  ;;  %v10885_v6 = vld [vmem:[%s21723_s14 + $0x88] sm:$0xff] }
 0xee4   : > { %10799 = vmatprep.subr.bf16.mxu0 %v15844_v13  ;;  %v13931_v13 = vcombine.low %v10876_v20, %v10880_v35  ;;  %v13942_v25 = vcombine.high %v10885_v6, %v10889_v63  ;;  %v13941_v22 = vcombine.low %v10885_v6, %v10889_v63  ;;  %v10949_v6 = vld [vmem:[%s21723_s14 + $0x288] sm:$0xff] }
 0xee5   : > { %v10953_v63 = vld [vmem:[%s21723_s14 + $0x2a8] sm:$0xff] }
 0xee7   : > { %10800 = vmatpush1.bf16.msra.mxu0 %v15842_v55  ;;  %v13940_v55 = vcombine.high %v10884_v57, %v10888_v42 }
 0xee8   : > { %10801 = vmatprep.subr.bf16.mxu0 %v15850_v59  ;;  %v10892_v59 = vld [vmem:[%s21723_s14 + $0xc0] sm:$0xff] }
 0xeeb   : > { %10802 = vmatpush1.bf16.msra.mxu0 %v15848_v12  ;;  %v10893_v12 = vld [vmem:[%s21723_s14 + $0xc8] sm:$0xff] }
 0xeec   : > { %10803 = vmatprep.subr.bf16.mxu0 %v15856_v30  ;;  %v13939_v30 = vcombine.low %v10884_v57, %v10888_v42  ;;  %v13950_v52 = vcombine.high %v10893_v12, %v10897_v58  ;;  %v13949_v28 = vcombine.low %v10893_v12, %v10897_v58  ;;  %v10948_v57 = vld [vmem:[%s21723_s14 + $0x280] sm:$0xff]  ;;  %v10957_v12 = vld [vmem:[%s21723_s14 + $0x2c8] sm:$0xff] }
 0xeed   : > { %v10952_v42 = vld [vmem:[%s21723_s14 + $0x2a0] sm:$0xff]  ;;  %v10961_v58 = vld [vmem:[%s21723_s14 + $0x2e8] sm:$0xff] }
 0xeef   : > { %10804 = vmatpush1.bf16.msra.mxu0 %v15854_v9  ;;  %v13948_v9 = vcombine.high %v10892_v59, %v10896_v24 }
 0xef0   : > { %10805 = vmatprep.subr.bf16.mxu0 %v15862_v45  ;;  %v10900_v45 = vld [vmem:[%s21723_s14 + $0x100] sm:$0xff] }
 0xef3   : > { %10806 = vmatpush1.bf16.msra.mxu0 %v15860_v46  ;;  %v10901_v46 = vld [vmem:[%s21723_s14 + $0x108] sm:$0xff] }
 0xef4   : > { %10807 = vmatprep.subr.bf16.mxu0 %v15868_v38  ;;  %v13956_v38 = vcombine.high %v10900_v45, %v10904_v3 }
 0xef7   : > { %10808 = vmatpush1.bf16.msra.mxu0 %v15866_v18  ;;  %v10908_v18 = vld [vmem:[%s21723_s14 + $0x140] sm:$0xff] }
 0xef8   : > { %12528 = vmatprep.subr.bf16.mxu0 %v13926_v16  ;;  %v10916_v16 = vld [vmem:[%s21723_s14 + $0x180] sm:$0xff] }
 0xf5d   : > { %v10492_v37 = vpop.xlane.xlu0 %10491 }
 0xf5e   : > { %vm10493_vm11 = vcmp.ge.f32.partialorder %v10490_v11, %v10492_v37  ;;  %v10868_v11 = vld [vmem:[%s21723_s14] sm:$0xff] }
 0xf5f   : > { %v10494_v54 = vsel %vm10493_vm11, %v20670_v19, 128.0  ;;  %v13923_v61 = vcombine.low %v10868_v11, %v10872_v62  ;;  %v13924_v50 = vcombine.high %v10868_v11, %v10872_v62  ;;  %v10912_v11 = vld [vmem:[%s21723_s14 + $0x160] sm:$0xff]  ;;  %v10909_v62 = vld [vmem:[%s21723_s14 + $0x148] sm:$0xff] }
 0xf60   : > { %10495 = vmin.xlane.f32.xlu0 %v10494_v54  ;;  %v13964_v40 = vcombine.high %v10908_v18, %v10912_v11 }
 0xf61   : > { %12446 = vmatprep.subr.bf16.mxu1 %v13924_v50  ;;  %v9902_v31 = vpop.xlane.xlu0 %9901 }
 0xf62   : > { %vm9903_vm1 = vcmp.eq.f32.partialorder %v20670_v19, %v9902_v31  ;;  %v10920_v31 = vld [vmem:[%s21723_s14 + $0x1a0] sm:$0xff] }
 0xf63   : > { %v13883_v37 = vsel %vm9903_vm1, 1.0, %v16087_v17 }
 0xf65   : > { %v10100_v0 = vpop.xlane.xlu0 %10099 }
 0xf66   : > { %vm10101_vm2 = vcmp.eq.f32.partialorder %v20670_v19, %v10100_v0  ;;  %v10921_v0 = vld [vmem:[%s21723_s14 + $0x1a8] sm:$0xff] }
 0xfad   : > { %v14489_v49 = vpop.f32.mrb[32].mxu0 }
 0xfae   : > { %v14490_v33 = vpop.f32.mrb[33].mxu0 }
 0xfaf   : > { %v14491_v56 = vadd.f32 %v14490_v33, %v14489_v49  ;;  %v14492_v7 = vpop.f32.mrb[34].mxu0  ;;  %v13885_v33 = vsel %vm10101_vm2, 1.0, %v16087_v17 }
 0xfb0   : > { %v14493_v34 = vpop.f32.mrb[35].mxu0  ;;  %v10298_v7 = vpop.xlane.xlu0 %10297 }
 0xfb1   : > { %v10547_v21 = vadd.f32 %v14491_v56, %v20316_v47  ;;  %v10395_v47 = vsel %vm10394_vm14, %v20670_v19, 128.0  ;;  %vm10299_vm4 = vcmp.eq.f32.partialorder %v20670_v19, %v10298_v7  ;;  %v10929_v7 = vld [vmem:[%s21723_s14 + $0x1e8] sm:$0xff] }
 0xfb3   : > { %v20682_v10 = vadd.f32 %v10547_v21, %v8998_v43 }
 0xfb5   : > { %10549 = vmax.xlane.f32.xlu1 %v20682_v10 }
 0xfb9   : > { %10000 = vmin.xlane.f32.xlu1 %v9999_v5 }
 0xfbd   : > { %10198 = vmin.xlane.f32.xlu1 %v10197_v26 }
 0xfc1   : > { %10396 = vmin.xlane.f32.xlu1 %v10395_v47 }
 0xfed   : > { %v10496_v15 = vpop.xlane.xlu0 %10495 }
 0xfee   : > { %vm10497_vm6 = vcmp.eq.f32.partialorder %v20670_v19, %v10496_v15  ;;  %v10936_v15 = vld [vmem:[%s21723_s14 + $0x220] sm:$0xff] }
 0xfef   : > { %v13889_v26 = vsel %vm10497_vm6, 1.0, %v16087_v17 }
0x1042   : > { %v10550_v41 = vpop.xlane.xlu1 %10549 }
0x1043   : > { %vm10551_vm15 = vcmp.ge.f32.partialorder %v20682_v10, %v10550_v41  ;;  %v13887_v10 = vsel %vm10299_vm4, 1.0, %v16087_v17  ;;  %v10905_v41 = vld [vmem:[%s21723_s14 + $0x128] sm:$0xff] }
0x1044   : > { %v10552_v39 = vsel %vm10551_vm15, %v20670_v19, 128.0  ;;  %v13958_v29 = vcombine.high %v10901_v46, %v10905_v41  ;;  %v13957_v50 = vcombine.low %v10901_v46, %v10905_v41  ;;  %v10965_v46 = vld [vmem:[%s21723_s14 + $0x308] sm:$0xff] }
0x1045   : > { %10553 = vmin.xlane.f32.xlu1 %v10552_v39  ;;  %v13947_v39 = vcombine.low %v10892_v59, %v10896_v24  ;;  %v10956_v59 = vld [vmem:[%s21723_s14 + $0x2c0] sm:$0xff]  ;;  %v10969_v41 = vld [vmem:[%s21723_s14 + $0x328] sm:$0xff] }
0x1046   : > { %v10001_v1 = vpop.xlane.xlu1 %10000  ;;  %v10960_v24 = vld [vmem:[%s21723_s14 + $0x2e0] sm:$0xff] }
0x1047   : > { %vm10002_vm0 = vcmp.eq.f32.partialorder %v20670_v19, %v10001_v1  ;;  %v10917_v1 = vld [vmem:[%s21723_s14 + $0x188] sm:$0xff] }
0x1048   : > { %v13884_v60 = vsel %vm10002_vm0, 1.0, %v16087_v17 }
0x1049   : > { %v10005_v49 = vadd.f32 %v13884_v60, %v13883_v37  ;;  %v13965_v60 = vcombine.low %v10909_v62, %v10913_v4  ;;  %v13972_v37 = vcombine.high %v10916_v16, %v10920_v31 }
0x104a   : > { %v10199_v54 = vpop.xlane.xlu1 %10198 }
0x104b   : > { %vm10200_vm3 = vcmp.eq.f32.partialorder %v20670_v19, %v10199_v54  ;;  %v10104_v56 = vadd.f32 %v13885_v33, %v10005_v49  ;;  %v13974_v54 = vcombine.high %v10917_v1, %v10921_v0  ;;  %v10924_v49 = vld [vmem:[%s21723_s14 + $0x1c0] sm:$0xff] }
0x104c   : > { %v13886_v34 = vsel %vm10200_vm3, 1.0, %v16087_v17  ;;  %v10928_v33 = vld [vmem:[%s21723_s14 + $0x1e0] sm:$0xff] }
0x104d   : > { %v10203_v21 = vadd.f32 %v13886_v34, %v10104_v56  ;;  %v10925_v56 = vld [vmem:[%s21723_s14 + $0x1c8] sm:$0xff]  ;;  %v13971_v34 = vcombine.low %v10916_v16, %v10920_v31 }
0x104e   : > { %v10397_v43 = vpop.xlane.xlu1 %10396 }
0x104f   : > { %vm10398_vm5 = vcmp.eq.f32.partialorder %v20670_v19, %v10397_v43  ;;  %v10302_v53 = vadd.f32 %v13887_v10, %v10203_v21  ;;  %v13973_v43 = vcombine.low %v10917_v1, %v10921_v0  ;;  %v13980_v21 = vcombine.high %v10924_v49, %v10928_v33  ;;  %v10980_v1 = vld [vmem:[%s21723_s14 + $0x380] sm:$0xff] }
0x1050   : > { %v13888_v5 = vsel %vm10398_vm5, 1.0, %v16087_v17  ;;  %v13982_v10 = vcombine.high %v10925_v56, %v10929_v7  ;;  %v10984_v0 = vld [vmem:[%s21723_s14 + $0x3a0] sm:$0xff] }
0x1051   : > { %v10401_v8 = vadd.f32 %v13888_v5, %v10302_v53  ;;  %v10932_v53 = vld [vmem:[%s21723_s14 + $0x200] sm:$0xff]  ;;  %v10933_v5 = vld [vmem:[%s21723_s14 + $0x208] sm:$0xff] }
0x1053   : > { %v10500_v23 = vadd.f32 %v13889_v26, %v10401_v8  ;;  %v10937_v8 = vld [vmem:[%s21723_s14 + $0x228] sm:$0xff]  ;;  %v13979_v26 = vcombine.low %v10924_v49, %v10928_v33 }
0x10d2   : > { %v10554_v47 = vpop.xlane.xlu1 %10553 }
0x10d3   : > { %vm10555_vm7 = vcmp.eq.f32.partialorder %v20670_v19, %v10554_v47  ;;  %v13932_v19 = vcombine.high %v10876_v20, %v10880_v35  ;;  %v13981_v47 = vcombine.low %v10925_v56, %v10929_v7  ;;  %v13990_v20 = vcombine.high %v10933_v5, %v10937_v8  ;;  %v10944_v35 = vld [vmem:[%s21723_s14 + $0x260] sm:$0xff] }
0x10d4   : > { %v13890_v14 = vsel %vm10555_vm7, 1.0, %v16087_v17  ;;  %v13963_v17 = vcombine.low %v10908_v18, %v10912_v11  ;;  %v10972_v18 = vld [vmem:[%s21723_s14 + $0x340] sm:$0xff] }
0x10d5   : > { %v10558_v36 = vadd.f32 %v13890_v14, %v10500_v23  ;;  %v13988_v23 = vcombine.high %v10932_v53, %v10936_v15  ;;  %v10940_v14 = vld [vmem:[%s21723_s14 + $0x240] sm:$0xff] }
0x10d6   : > { %v10976_v11 = vld [vmem:[%s21723_s14 + $0x360] sm:$0xff] }
0x10d7   : > { %v10559_v32 = vpack.c.bf16 %v10558_v36, %v10558_v36  ;;  %v13987_v36 = vcombine.low %v10932_v53, %v10936_v15  ;;  %v14027_v16 = vcombine.low %v10972_v18, %v10976_v11  ;;  %v10988_v56 = vld [vmem:[%s21723_s14 + $0x3c0] sm:$0xff] }
0x10d8   : > { %v10992_v7 = vld [vmem:[%s21723_s14 + $0x3e0] sm:$0xff] }
0x10d9   : > { %10785 = vmatmul.mubr.bf16.vlgmr.msra.gmra.mrb[84].mxu1 %v10559_v32  ;;  %10826 = vmatmul.mubr.bf16.vlgmr.msra.gmra.mrb[36].mxu0 %v10559_v32  ;;  %v13989_v32 = vcombine.low %v10933_v5, %v10937_v8  ;;  %v10996_v5 = vld [vmem:[%s21723_s14 + $0x400] sm:$0xff] }
0x10da   : > { %12447 = vmatpush1.bf16.msra.mxu1 %v13923_v61  ;;  %12529 = vmatpush1.bf16.msra.mxu0 %v13925_v51  ;;  %v13955_v61 = vcombine.low %v10900_v45, %v10904_v3  ;;  %v13966_v51 = vcombine.high %v10909_v62, %v10913_v4  ;;  %v10964_v45 = vld [vmem:[%s21723_s14 + $0x300] sm:$0xff]  ;;  %v10973_v62 = vld [vmem:[%s21723_s14 + $0x348] sm:$0xff] }
0x10db   : > { %12448 = vmatprep.subr.bf16.mxu1 %v13932_v19  ;;  %12530 = vmatprep.subr.bf16.mxu0 %v13934_v48  ;;  %v13996_v19 = vcombine.high %v10940_v14, %v10944_v35  ;;  %v13998_v48 = vcombine.high %v10941_v44, %v10945_v27  ;;  %v10968_v3 = vld [vmem:[%s21723_s14 + $0x320] sm:$0xff]  ;;  %v10977_v4 = vld [vmem:[%s21723_s14 + $0x368] sm:$0xff] }
0x10dc   : > { %v14029_v31 = vcombine.low %v10973_v62, %v10977_v4  ;;  %v11000_v8 = vld [vmem:[%s21723_s14 + $0x420] sm:$0xff] }
0x10de   : > { %12449 = vmatpush1.bf16.msra.mxu1 %v13931_v13  ;;  %12531 = vmatpush1.bf16.msra.mxu0 %v13933_v2  ;;  %v13995_v13 = vcombine.low %v10940_v14, %v10944_v35  ;;  %v13997_v2 = vcombine.low %v10941_v44, %v10945_v27  ;;  %v10838_v44 = vld [vmem:[%s21722_s13] sm:$0xf] }
0x10df   : > { %12450 = vmatprep.subr.bf16.mxu1 %v13940_v55  ;;  %12532 = vmatprep.subr.bf16.mxu0 %v13942_v25  ;;  %v14004_v55 = vcombine.high %v10948_v57, %v10952_v42  ;;  %v14006_v25 = vcombine.high %v10949_v6, %v10953_v63  ;;  %v21819_v27 = vld [vmem:[#allocation14_spill] sm:$0xff] }
0x10e2   : > { %12451 = vmatpush1.bf16.msra.mxu1 %v13939_v30  ;;  %12533 = vmatpush1.bf16.msra.mxu0 %v13941_v22  ;;  %v14003_v30 = vcombine.low %v10948_v57, %v10952_v42  ;;  %v14005_v22 = vcombine.low %v10949_v6, %v10953_v63  ;;  %v21821_v42 = vld [vmem:[#allocation15_spill] sm:$0xff] }
0x10e3   : > { %12452 = vmatprep.subr.bf16.mxu1 %v13948_v9  ;;  %12534 = vmatprep.subr.bf16.mxu0 %v13950_v52  ;;  %v14012_v9 = vcombine.high %v10956_v59, %v10960_v24  ;;  %v14014_v52 = vcombine.high %v10957_v12, %v10961_v58  ;;  %v10847_v6 = vrot.slane %v10838_v44, %v21821_v42 }
0x10e6   : > { %12453 = vmatpush1.bf16.msra.mxu1 %v13947_v39  ;;  %12535 = vmatpush1.bf16.msra.mxu0 %v13949_v28  ;;  %v14011_v39 = vcombine.low %v10956_v59, %v10960_v24  ;;  %v14013_v28 = vcombine.low %v10957_v12, %v10961_v58 }
0x10e7   : > { %12454 = vmatprep.subr.bf16.mxu1 %v13956_v38  ;;  %12536 = vmatprep.subr.bf16.mxu0 %v13958_v29  ;;  %v14020_v38 = vcombine.high %v10964_v45, %v10968_v3  ;;  %v14022_v29 = vcombine.high %v10965_v46, %v10969_v41 }
0x10ea   : > { %12455 = vmatpush1.bf16.msra.mxu1 %v13955_v61  ;;  %12537 = vmatpush1.bf16.msra.mxu0 %v13957_v50  ;;  %v14019_v61 = vcombine.low %v10964_v45, %v10968_v3  ;;  %v14021_v50 = vcombine.low %v10965_v46, %v10969_v41  ;;  %v11004_v46 = vld [vmem:[%s21723_s14 + $0x440] sm:$0xff] }
0x10eb   : > { %12456 = vmatprep.subr.bf16.mxu1 %v13964_v40  ;;  %12538 = vmatprep.subr.bf16.mxu0 %v13966_v51  ;;  %v14028_v40 = vcombine.high %v10972_v18, %v10976_v11  ;;  %v14030_v51 = vcombine.high %v10973_v62, %v10977_v4  ;;  %v11012_v11 = vld [vmem:[%s21723_s14 + $0x480] sm:$0xff] }
0x10ee   : > { %12457 = vmatpush1.bf16.msra.mxu1 %v13963_v17  ;;  %12539 = vmatpush1.bf16.msra.mxu0 %v13965_v60  ;;  %v10981_v17 = vld [vmem:[%s21723_s14 + $0x388] sm:$0xff]  ;;  %v14036_v60 = vcombine.high %v10980_v1, %v10984_v0 }
0x10ef   : > { %12458 = vmatprep.subr.bf16.mxu1 %v13972_v37  ;;  %12540 = vmatprep.subr.bf16.mxu0 %v13974_v54  ;;  %v10985_v37 = vld [vmem:[%s21723_s14 + $0x3a8] sm:$0xff]  ;;  %v14035_v54 = vcombine.low %v10980_v1, %v10984_v0 }
0x10f0   : > { %v14037_v49 = vcombine.low %v10981_v17, %v10985_v37  ;;  %v14038_v33 = vcombine.high %v10981_v17, %v10985_v37  ;;  %v11020_v17 = vld [vmem:[%s21723_s14 + $0x4c0] sm:$0xff]  ;;  %v11021_v37 = vld [vmem:[%s21723_s14 + $0x4c8] sm:$0xff] }
0x10f2   : > { %12459 = vmatpush1.bf16.msra.mxu1 %v13971_v34  ;;  %12541 = vmatpush1.bf16.msra.mxu0 %v13973_v43  ;;  %v10989_v34 = vld [vmem:[%s21723_s14 + $0x3c8] sm:$0xff]  ;;  %v14044_v43 = vcombine.high %v10988_v56, %v10992_v7 }
0x10f3   : > { %12460 = vmatprep.subr.bf16.mxu1 %v13980_v21  ;;  %12542 = vmatprep.subr.bf16.mxu0 %v13982_v10  ;;  %v10993_v21 = vld [vmem:[%s21723_s14 + $0x3e8] sm:$0xff]  ;;  %v14043_v10 = vcombine.low %v10988_v56, %v10992_v7 }
0x10f4   : > { %v14045_v53 = vcombine.low %v10989_v34, %v10993_v21  ;;  %v14046_v15 = vcombine.high %v10989_v34, %v10993_v21  ;;  %v11028_v34 = vld [vmem:[%s21723_s14 + $0x500] sm:$0xff]  ;;  %v11029_v21 = vld [vmem:[%s21723_s14 + $0x508] sm:$0xff] }
0x10f6   : > { %12461 = vmatpush1.bf16.msra.mxu1 %v13979_v26  ;;  %12543 = vmatpush1.bf16.msra.mxu0 %v13981_v47  ;;  %v10997_v26 = vld [vmem:[%s21723_s14 + $0x408] sm:$0xff]  ;;  %v14052_v47 = vcombine.high %v10996_v5, %v11000_v8 }
0x10f7   : > { %12462 = vmatprep.subr.bf16.mxu1 %v13988_v23  ;;  %12544 = vmatprep.subr.bf16.mxu0 %v13990_v20  ;;  %v11001_v23 = vld [vmem:[%s21723_s14 + $0x428] sm:$0xff]  ;;  %v14051_v20 = vcombine.low %v10996_v5, %v11000_v8 }
0x10f8   : > { %v14053_v14 = vcombine.low %v10997_v26, %v11001_v23  ;;  %v14054_v35 = vcombine.high %v10997_v26, %v11001_v23  ;;  %v11036_v26 = vld [vmem:[%s21723_s14 + $0x540] sm:$0xff]  ;;  %v11037_v23 = vld [vmem:[%s21723_s14 + $0x548] sm:$0xff] }
0x10fa   : > { %12463 = vmatpush1.bf16.msra.mxu1 %v13987_v36  ;;  %12545 = vmatpush1.bf16.msra.mxu0 %v13989_v32  ;;  %v10843_v36 = vrot.slane %v10838_v44, %v21819_v27  ;;  %v21820_v32 = vld [vmem:[#allocation16_spill] sm:$0xff] }
0x10fb   : > { %12464 = vmatprep.subr.bf16.mxu1 %v13996_v19  ;;  %12546 = vmatprep.subr.bf16.mxu0 %v13998_v48  ;;  %v10851_v19 = vrot.slane %v10838_v44, %v21820_v32 }
0x10fe   : > { %12465 = vmatpush1.bf16.msra.mxu1 %v13995_v13  ;;  %12547 = vmatpush1.bf16.msra.mxu0 %v13997_v2 }
0x10ff   : > { %12466 = vmatprep.subr.bf16.mxu1 %v14004_v55  ;;  %12548 = vmatprep.subr.bf16.mxu0 %v14006_v25  ;;  %v21822_v25 = vld [vmem:[#allocation17_spill] sm:$0xff] }
0x1100   : > { %v10855_v59 = vrot.slane %v10838_v44, %v21822_v25 }
0x1102   : > { %12467 = vmatpush1.bf16.msra.mxu1 %v14003_v30  ;;  %12549 = vmatpush1.bf16.msra.mxu0 %v14005_v22 }
0x1103   : > { %12468 = vmatprep.subr.bf16.mxu1 %v14012_v9  ;;  %12550 = vmatprep.subr.bf16.mxu0 %v14014_v52 }
0x1106   : > { %12469 = vmatpush1.bf16.msra.mxu1 %v14011_v39  ;;  %12551 = vmatpush1.bf16.msra.mxu0 %v14013_v28  ;;  %v11008_v39 = vld [vmem:[%s21723_s14 + $0x460] sm:$0xff]  ;;  %v11005_v28 = vld [vmem:[%s21723_s14 + $0x448] sm:$0xff] }
0x1107   : > { %12470 = vmatprep.subr.bf16.mxu1 %v14020_v38  ;;  %12552 = vmatprep.subr.bf16.mxu0 %v14022_v29  ;;  %v11009_v38 = vld [vmem:[%s21723_s14 + $0x468] sm:$0xff]  ;;  %v14060_v62 = vcombine.high %v11004_v46, %v11008_v39 }
0x1108   : > { %v14062_v4 = vcombine.high %v11005_v28, %v11009_v38 }
0x110a   : > { %12471 = vmatpush1.bf16.msra.mxu1 %v14019_v61  ;;  %12553 = vmatpush1.bf16.msra.mxu0 %v14021_v50  ;;  %v11016_v61 = vld [vmem:[%s21723_s14 + $0x4a0] sm:$0xff]  ;;  %v11013_v50 = vld [vmem:[%s21723_s14 + $0x488] sm:$0xff] }
0x110b   : > { %12472 = vmatprep.subr.bf16.mxu1 %v14028_v40  ;;  %12554 = vmatprep.subr.bf16.mxu0 %v14030_v51  ;;  %v11017_v40 = vld [vmem:[%s21723_s14 + $0x4a8] sm:$0xff]  ;;  %v14068_v1 = vcombine.high %v11012_v11, %v11016_v61 }
0x110c   : > { %v14070_v0 = vcombine.high %v11013_v50, %v11017_v40 }
0x110e   : > { %12473 = vmatpush1.bf16.msra.mxu1 %v14027_v16  ;;  %12555 = vmatpush1.bf16.msra.mxu0 %v14029_v31  ;;  %v14059_v16 = vcombine.low %v11004_v46, %v11008_v39  ;;  %v14061_v31 = vcombine.low %v11005_v28, %v11009_v38  ;;  %v11064_v46 = vld [vmem:[%s21723_s14 + $0x620] sm:$0xff]  ;;  %v11065_v39 = vld [vmem:[%s21723_s14 + $0x628] sm:$0xff] }
0x110f   : > { %12474 = vmatprep.subr.bf16.mxu1 %v14036_v60  ;;  %12556 = vmatprep.subr.bf16.mxu0 %v14038_v33  ;;  %v11024_v60 = vld [vmem:[%s21723_s14 + $0x4e0] sm:$0xff]  ;;  %v14069_v33 = vcombine.low %v11013_v50, %v11017_v40  ;;  %v11069_v50 = vld [vmem:[%s21723_s14 + $0x648] sm:$0xff] }
0x1110   : > { %v14076_v56 = vcombine.high %v11020_v17, %v11024_v60  ;;  %v11073_v40 = vld [vmem:[%s21723_s14 + $0x668] sm:$0xff] }
0x1112   : > { %12475 = vmatpush1.bf16.msra.mxu1 %v14035_v54  ;;  %12557 = vmatpush1.bf16.msra.mxu0 %v14037_v49  ;;  %v11025_v54 = vld [vmem:[%s21723_s14 + $0x4e8] sm:$0xff]  ;;  %v14067_v49 = vcombine.low %v11012_v11, %v11016_v61  ;;  %v11072_v61 = vld [vmem:[%s21723_s14 + $0x660] sm:$0xff] }
0x1113   : > { %12476 = vmatprep.subr.bf16.mxu1 %v14044_v43  ;;  %12558 = vmatprep.subr.bf16.mxu0 %v14046_v15  ;;  %v14078_v7 = vcombine.high %v11021_v37, %v11025_v54  ;;  %v11032_v43 = vld [vmem:[%s21723_s14 + $0x520] sm:$0xff]  ;;  %v14077_v15 = vcombine.low %v11021_v37, %v11025_v54  ;;  %v11077_v37 = vld [vmem:[%s21723_s14 + $0x688] sm:$0xff] }
0x1114   : > { %v14084_v5 = vcombine.high %v11028_v34, %v11032_v43  ;;  %v11081_v54 = vld [vmem:[%s21723_s14 + $0x6a8] sm:$0xff] }
0x1116   : > { %12477 = vmatpush1.bf16.msra.mxu1 %v14043_v10  ;;  %12559 = vmatpush1.bf16.msra.mxu0 %v14045_v53  ;;  %v11033_v10 = vld [vmem:[%s21723_s14 + $0x528] sm:$0xff]  ;;  %v14075_v53 = vcombine.low %v11020_v17, %v11024_v60  ;;  %v11076_v17 = vld [vmem:[%s21723_s14 + $0x680] sm:$0xff] }
0x1117   : > { %12487 = vmatprep.subr.bf16.mxu1 %v14052_v47  ;;  %12569 = vmatprep.subr.bf16.mxu0 %v14054_v35  ;;  %v14086_v8 = vcombine.high %v11029_v21, %v11033_v10  ;;  %v11040_v47 = vld [vmem:[%s21723_s14 + $0x560] sm:$0xff]  ;;  %v14085_v35 = vcombine.low %v11029_v21, %v11033_v10  ;;  %v11085_v21 = vld [vmem:[%s21723_s14 + $0x6c8] sm:$0xff] }
0x1118   : > { %v14092_v44 = vcombine.high %v11036_v26, %v11040_v47  ;;  %v11080_v60 = vld [vmem:[%s21723_s14 + $0x6a0] sm:$0xff]  ;;  %v11089_v10 = vld [vmem:[%s21723_s14 + $0x6e8] sm:$0xff] }
0x11ac   : > { %v10786_v48 = vpop.f32.mrb[84].mxu1  ;;  %v10827_v57 = vpop.f32.mrb[36].mxu0 }
0x11ad   : > { %v10834_v63 = vmul.f32 0.125, %v10786_v48  ;;  %v10836_v13 = vmul.f32 0.125, %v10827_v57  ;;  %v10788_v2 = vpop.f32.mrb[85].mxu1  ;;  %v10829_v55 = vpop.f32.mrb[37].mxu0  ;;  %v11048_v48 = vld [vmem:[%s21723_s14 + $0x5a0] sm:$0xff]  ;;  %v11045_v57 = vld [vmem:[%s21723_s14 + $0x588] sm:$0xff] }
0x11ae   : > { %v10835_v24 = vmul.f32 0.125, %v10788_v2  ;;  %v10837_v12 = vmul.f32 0.125, %v10829_v55  ;;  %v10790_v58 = vpop.f32.mrb[86].mxu1  ;;  %v10831_v30 = vpop.f32.mrb[38].mxu0 }
0x11af   : > { %v10860_v22 = vadd.f32 %v10843_v36, %v10834_v63  ;;  %v21008_v9 = vadd.f32 %v10851_v19, %v10836_v13  ;;  %v10791_v52 = vpop.f32.mrb[87].mxu1  ;;  %v10832_v45 = vpop.f32.mrb[39].mxu0  ;;  %v11044_v19 = vld [vmem:[%s21723_s14 + $0x580] sm:$0xff]  ;;  %v14091_v63 = vcombine.low %v11036_v26, %v11040_v47  ;;  %v11057_v58 = vld [vmem:[%s21723_s14 + $0x5e8] sm:$0xff] }
0x11b0   : > { %v10861_v3 = vadd.f32 %v10847_v6, %v10835_v24  ;;  %v10863_v41 = vadd.f32 %v10855_v59, %v10837_v12  ;;  %v11049_v6 = vld [vmem:[%s21723_s14 + $0x5a8] sm:$0xff]  ;;  %v14100_v2 = vcombine.high %v11044_v19, %v11048_v48  ;;  %v11052_v59 = vld [vmem:[%s21723_s14 + $0x5c0] sm:$0xff]  ;;  %v14099_v30 = vcombine.low %v11044_v19, %v11048_v48 }
0x11b1   : > { %v21024_v18 = vpack.c.bf16 %v10860_v22, %v10860_v22  ;;  %v14102_v55 = vcombine.high %v11045_v57, %v11049_v6  ;;  %v11056_v24 = vld [vmem:[%s21723_s14 + $0x5e0] sm:$0xff]  ;;  %v11053_v12 = vld [vmem:[%s21723_s14 + $0x5c8] sm:$0xff]  ;;  %v14101_v22 = vcombine.low %v11045_v57, %v11049_v6 }
0x11b2   : > { %v21022_v29 = vpack.c.bf16 %v10861_v3, %v10861_v3  ;;  %v21040_v51 = vpack.c.bf16 %v10863_v41, %v10863_v41  ;;  %v14108_v52 = vcombine.high %v11052_v59, %v11056_v24  ;;  %v14110_v45 = vcombine.high %v11053_v12, %v11057_v58  ;;  %v11060_v3 = vld [vmem:[%s21723_s14 + $0x600] sm:$0xff]  ;;  %v11061_v41 = vld [vmem:[%s21723_s14 + $0x608] sm:$0xff] }
0x11b3   : > { %v14107_v28 = vcombine.low %v11052_v59, %v11056_v24  ;;  %v14109_v38 = vcombine.low %v11053_v12, %v11057_v58  ;;  %v14116_v11 = vcombine.high %v11060_v3, %v11064_v46  ;;  %v11092_v26 = vld [vmem:[%s21723_s14 + $0x700] sm:$0xff]  ;;  %v11101_v57 = vld [vmem:[%s21723_s14 + $0x748] sm:$0xff] }
0x11b4   : > { %12478 = vmatprep.mubr.bf16.mxu1 %v21022_v29  ;;  %12560 = vmatprep.mubr.bf16.mxu0 %v21022_v29  ;;  %v11096_v47 = vld [vmem:[%s21723_s14 + $0x720] sm:$0xff]  ;;  %v11105_v6 = vld [vmem:[%s21723_s14 + $0x768] sm:$0xff] }
0x11b5   : > { %12479 = vmatmul.mubr.bf16.vlgmr.msra.gmra.mrb[88].mxu1 %v21024_v18  ;;  %12561 = vmatmul.mubr.bf16.vlgmr.msra.gmra.mrb[40].mxu0 %v21024_v18  ;;  %v11100_v19 = vld [vmem:[%s21723_s14 + $0x740] sm:$0xff]  ;;  %v11109_v12 = vld [vmem:[%s21723_s14 + $0x788] sm:$0xff] }
0x11b6   : > { %12488 = vmatpush1.bf16.msra.mxu1 %v14051_v20  ;;  %12570 = vmatpush1.bf16.msra.mxu0 %v14053_v14  ;;  %v11041_v20 = vld [vmem:[%s21723_s14 + $0x568] sm:$0xff]  ;;  %v14083_v14 = vcombine.low %v11028_v34, %v11032_v43  ;;  %v11084_v34 = vld [vmem:[%s21723_s14 + $0x6c0] sm:$0xff] }
0x11b7   : > { %12519 = vmatprep.mubr.bf16.mxu1 %v21040_v51  ;;  %12601 = vmatprep.mubr.bf16.mxu0 %v21040_v51  ;;  %v14094_v36 = vcombine.high %v11037_v23, %v11041_v20  ;;  %v14093_v13 = vcombine.low %v11037_v23, %v11041_v20  ;;  %v11088_v43 = vld [vmem:[%s21723_s14 + $0x6e0] sm:$0xff]  ;;  %v11093_v23 = vld [vmem:[%s21723_s14 + $0x708] sm:$0xff] }
0x11b8   : > { %12489 = vmatprep.subr.bf16.mxu1 %v14060_v62  ;;  %12571 = vmatprep.subr.bf16.mxu0 %v14062_v4  ;;  %v14118_v62 = vcombine.high %v11061_v41, %v11065_v39  ;;  %v11068_v4 = vld [vmem:[%s21723_s14 + $0x640] sm:$0xff]  ;;  %v11097_v20 = vld [vmem:[%s21723_s14 + $0x728] sm:$0xff] }
0x11b9   : > { %v11104_v48 = vld [vmem:[%s21723_s14 + $0x760] sm:$0xff]  ;;  %v11113_v58 = vld [vmem:[%s21723_s14 + $0x7a8] sm:$0xff] }
0x11ba   : > { %12490 = vmatpush1.bf16.msra.mxu1 %v14059_v16  ;;  %12572 = vmatpush1.bf16.msra.mxu0 %v14061_v31  ;;  %v14115_v16 = vcombine.low %v11060_v3, %v11064_v46  ;;  %v14117_v31 = vcombine.low %v11061_v41, %v11065_v39  ;;  %v11108_v59 = vld [vmem:[%s21723_s14 + $0x780] sm:$0xff]  ;;  %v11117_v41 = vld [vmem:[%s21723_s14 + $0x7c8] sm:$0xff] }
0x11bb   : > { %12491 = vmatprep.subr.bf16.mxu1 %v14068_v1  ;;  %12573 = vmatprep.subr.bf16.mxu0 %v14070_v0  ;;  %v14124_v1 = vcombine.high %v11068_v4, %v11072_v61  ;;  %v14126_v0 = vcombine.high %v11069_v50, %v11073_v40  ;;  %v11112_v24 = vld [vmem:[%s21723_s14 + $0x7a0] sm:$0xff]  ;;  %v11121_v39 = vld [vmem:[%s21723_s14 + $0x7e8] sm:$0xff] }
0x11bc   : > { %v11116_v3 = vld [vmem:[%s21723_s14 + $0x7c0] sm:$0xff] }
0x11bd   : > { %v11120_v46 = vld [vmem:[%s21723_s14 + $0x7e0] sm:$0xff] }
0x11be   : > { %12492 = vmatpush1.bf16.msra.mxu1 %v14067_v49  ;;  %12574 = vmatpush1.bf16.msra.mxu0 %v14069_v33  ;;  %v14123_v49 = vcombine.low %v11068_v4, %v11072_v61  ;;  %v14125_v33 = vcombine.low %v11069_v50, %v11073_v40  ;;  %v10870_v4 = vld [vmem:[%s21723_s14 + $0x10] sm:$0xff]  ;;  %v10871_v50 = vld [vmem:[%s21723_s14 + $0x18] sm:$0xff] }
0x11bf   : > { %12493 = vmatprep.subr.bf16.mxu1 %v14076_v56  ;;  %12575 = vmatprep.subr.bf16.mxu0 %v14078_v7  ;;  %v14132_v56 = vcombine.high %v11076_v17, %v11080_v60  ;;  %v14134_v7 = vcombine.high %v11077_v37, %v11081_v54  ;;  %v10874_v61 = vld [vmem:[%s21723_s14 + $0x30] sm:$0xff]  ;;  %v10875_v40 = vld [vmem:[%s21723_s14 + $0x38] sm:$0xff] }
0x11c2   : > { %12494 = vmatpush1.bf16.msra.mxu1 %v14075_v53  ;;  %12576 = vmatpush1.bf16.msra.mxu0 %v14077_v15  ;;  %v14131_v53 = vcombine.low %v11076_v17, %v11080_v60  ;;  %v14133_v15 = vcombine.low %v11077_v37, %v11081_v54  ;;  %v10878_v17 = vld [vmem:[%s21723_s14 + $0x50] sm:$0xff]  ;;  %v10879_v37 = vld [vmem:[%s21723_s14 + $0x58] sm:$0xff] }
0x11c3   : > { %12495 = vmatprep.subr.bf16.mxu1 %v14084_v5  ;;  %12577 = vmatprep.subr.bf16.mxu0 %v14086_v8  ;;  %v14140_v5 = vcombine.high %v11084_v34, %v11088_v43  ;;  %v14142_v8 = vcombine.high %v11085_v21, %v11089_v10  ;;  %v10882_v60 = vld [vmem:[%s21723_s14 + $0x70] sm:$0xff]  ;;  %v10883_v54 = vld [vmem:[%s21723_s14 + $0x78] sm:$0xff] }
0x11c6   : > { %12496 = vmatpush1.bf16.msra.mxu1 %v14083_v14  ;;  %12578 = vmatpush1.bf16.msra.mxu0 %v14085_v35  ;;  %v14139_v14 = vcombine.low %v11084_v34, %v11088_v43  ;;  %v14141_v35 = vcombine.low %v11085_v21, %v11089_v10  ;;  %v13938_v34 = vcombine.high %v10879_v37, %v10883_v54  ;;  %v10886_v43 = vld [vmem:[%s21723_s14 + $0x90] sm:$0xff]  ;;  %v10891_v10 = vld [vmem:[%s21723_s14 + $0xb8] sm:$0xff] }
0x11c7   : > { %12497 = vmatprep.subr.bf16.mxu1 %v14092_v44  ;;  %12579 = vmatprep.subr.bf16.mxu0 %v14094_v36  ;;  %v14148_v44 = vcombine.high %v11092_v26, %v11096_v47  ;;  %v14150_v36 = vcombine.high %v11093_v23, %v11097_v20  ;;  %v10890_v21 = vld [vmem:[%s21723_s14 + $0xb0] sm:$0xff] }
0x11ca   : > { %12498 = vmatpush1.bf16.msra.mxu1 %v14091_v63  ;;  %12580 = vmatpush1.bf16.msra.mxu0 %v14093_v13  ;;  %v14147_v63 = vcombine.low %v11092_v26, %v11096_v47  ;;  %v14149_v13 = vcombine.low %v11093_v23, %v11097_v20  ;;  %v10894_v26 = vld [vmem:[%s21723_s14 + $0xd0] sm:$0xff]  ;;  %v10895_v23 = vld [vmem:[%s21723_s14 + $0xd8] sm:$0xff]  ;;  %v13943_v20 = vcombine.low %v10886_v43, %v10890_v21 }
0x11cb   : > { %12499 = vmatprep.subr.bf16.mxu1 %v14100_v2  ;;  %12581 = vmatprep.subr.bf16.mxu0 %v14102_v55  ;;  %v14156_v2 = vcombine.high %v11100_v19, %v11104_v48  ;;  %v14158_v55 = vcombine.high %v11101_v57, %v11105_v6  ;;  %v10898_v47 = vld [vmem:[%s21723_s14 + $0xf0] sm:$0xff] }
0x11ce   : > { %12500 = vmatpush1.bf16.msra.mxu1 %v14099_v30  ;;  %12582 = vmatpush1.bf16.msra.mxu0 %v14101_v22  ;;  %v14155_v30 = vcombine.low %v11100_v19, %v11104_v48  ;;  %v14157_v22 = vcombine.low %v11101_v57, %v11105_v6  ;;  %v10906_v19 = vld [vmem:[%s21723_s14 + $0x130] sm:$0xff]  ;;  %v10903_v48 = vld [vmem:[%s21723_s14 + $0x118] sm:$0xff]  ;;  %v13951_v6 = vcombine.low %v10894_v26, %v10898_v47 }
0x11cf   : > { %12501 = vmatprep.subr.bf16.mxu1 %v14108_v52  ;;  %12583 = vmatprep.subr.bf16.mxu0 %v14110_v45  ;;  %v14164_v52 = vcombine.high %v11108_v59, %v11112_v24  ;;  %v14166_v45 = vcombine.high %v11109_v12, %v11113_v58  ;;  %v10907_v57 = vld [vmem:[%s21723_s14 + $0x138] sm:$0xff] }
0x11d2   : > { %12502 = vmatpush1.bf16.msra.mxu1 %v14107_v28  ;;  %12584 = vmatpush1.bf16.msra.mxu0 %v14109_v38  ;;  %v14163_v28 = vcombine.low %v11108_v59, %v11112_v24  ;;  %v14165_v38 = vcombine.low %v11109_v12, %v11113_v58  ;;  %v10914_v59 = vld [vmem:[%s21723_s14 + $0x170] sm:$0xff]  ;;  %v10911_v24 = vld [vmem:[%s21723_s14 + $0x158] sm:$0xff] }
0x11d3   : > { %12503 = vmatprep.subr.bf16.mxu1 %v14116_v11  ;;  %12585 = vmatprep.subr.bf16.mxu0 %v14118_v62  ;;  %v14172_v11 = vcombine.high %v11116_v3, %v11120_v46  ;;  %v14174_v62 = vcombine.high %v11117_v41, %v11121_v39  ;;  %v10915_v12 = vld [vmem:[%s21723_s14 + $0x178] sm:$0xff] }
0x11d6   : > { %12504 = vmatpush1.bf16.msra.mxu1 %v14115_v16  ;;  %12586 = vmatpush1.bf16.msra.mxu0 %v14117_v31  ;;  %v14171_v16 = vcombine.low %v11116_v3, %v11120_v46  ;;  %v14173_v31 = vcombine.low %v11117_v41, %v11121_v39  ;;  %v10922_v3 = vld [vmem:[%s21723_s14 + $0x1b0] sm:$0xff]  ;;  %v10919_v46 = vld [vmem:[%s21723_s14 + $0x198] sm:$0xff] }
0x11d7   : > { %12505 = vmatprep.subr.bf16.mxu1 %v14124_v1  ;;  %12587 = vmatprep.subr.bf16.mxu0 %v14126_v0  ;;  %v13928_v1 = vcombine.high %v10870_v4, %v10874_v61  ;;  %v13930_v0 = vcombine.high %v10871_v50, %v10875_v40  ;;  %v10923_v41 = vld [vmem:[%s21723_s14 + $0x1b8] sm:$0xff] }
0x11da   : > { %12506 = vmatpush1.bf16.msra.mxu1 %v14123_v49  ;;  %12588 = vmatpush1.bf16.msra.mxu0 %v14125_v33  ;;  %v13927_v49 = vcombine.low %v10870_v4, %v10874_v61  ;;  %v21228_v33 = vpack.c.bf16 %v21008_v9, %v21008_v9  ;;  %v10887_v9 = vld [vmem:[%s21723_s14 + $0x98] sm:$0xff]  ;;  %v10930_v4 = vld [vmem:[%s21723_s14 + $0x1f0] sm:$0xff] }
0x11db   : > { %12507 = vmatprep.subr.bf16.mxu1 %v14132_v56  ;;  %12589 = vmatprep.subr.bf16.mxu0 %v14134_v7  ;;  %v13929_v56 = vcombine.low %v10871_v50, %v10875_v40  ;;  %v13936_v7 = vcombine.high %v10878_v17, %v10882_v60  ;;  %v10927_v61 = vld [vmem:[%s21723_s14 + $0x1d8] sm:$0xff] }
0x11dc   : > { %v10931_v50 = vld [vmem:[%s21723_s14 + $0x1f8] sm:$0xff] }
0x11de   : > { %12508 = vmatpush1.bf16.msra.mxu1 %v14131_v53  ;;  %12590 = vmatpush1.bf16.msra.mxu0 %v14133_v15  ;;  %v13935_v53 = vcombine.low %v10878_v17, %v10882_v60  ;;  %v13937_v15 = vcombine.low %v10879_v37, %v10883_v54  ;;  %v10938_v17 = vld [vmem:[%s21723_s14 + $0x230] sm:$0xff]  ;;  %v10935_v60 = vld [vmem:[%s21723_s14 + $0x218] sm:$0xff] }
0x11df   : > { %12509 = vmatprep.subr.bf16.mxu1 %v14140_v5  ;;  %12591 = vmatprep.subr.bf16.mxu0 %v14142_v8  ;;  %v13944_v5 = vcombine.high %v10886_v43, %v10890_v21  ;;  %v13946_v8 = vcombine.high %v10887_v9, %v10891_v10  ;;  %v10939_v37 = vld [vmem:[%s21723_s14 + $0x238] sm:$0xff]  ;;  %v10946_v43 = vld [vmem:[%s21723_s14 + $0x270] sm:$0xff] }
0x11e0   : > { %v10943_v21 = vld [vmem:[%s21723_s14 + $0x258] sm:$0xff] }
0x11e2   : > { %12510 = vmatpush1.bf16.msra.mxu1 %v14139_v14  ;;  %12592 = vmatpush1.bf16.msra.mxu0 %v14141_v35  ;;  %v13945_v14 = vcombine.low %v10887_v9, %v10891_v10  ;;  %v13952_v35 = vcombine.high %v10894_v26, %v10898_v47  ;;  %v10947_v9 = vld [vmem:[%s21723_s14 + $0x278] sm:$0xff]  ;;  %v10954_v26 = vld [vmem:[%s21723_s14 + $0x2b0] sm:$0xff] }
0x11e3   : > { %12511 = vmatprep.subr.bf16.mxu1 %v14148_v44  ;;  %12593 = vmatprep.subr.bf16.mxu0 %v14150_v36  ;;  %v10902_v36 = vld [vmem:[%s21723_s14 + $0x110] sm:$0xff]  ;;  %v10951_v47 = vld [vmem:[%s21723_s14 + $0x298] sm:$0xff] }
0x11e4   : > { %v13959_v58 = vcombine.low %v10902_v36, %v10906_v19 }
0x11e6   : > { %12512 = vmatpush1.bf16.msra.mxu1 %v14147_v63  ;;  %12594 = vmatpush1.bf16.msra.mxu0 %v14149_v13  ;;  %v13960_v13 = vcombine.high %v10902_v36, %v10906_v19  ;;  %v10962_v36 = vld [vmem:[%s21723_s14 + $0x2f0] sm:$0xff]  ;;  %v10959_v19 = vld [vmem:[%s21723_s14 + $0x2d8] sm:$0xff] }
0x11e7   : > { %12513 = vmatprep.subr.bf16.mxu1 %v14156_v2  ;;  %12595 = vmatprep.subr.bf16.mxu0 %v14158_v55  ;;  %v13962_v2 = vcombine.high %v10903_v48, %v10907_v57  ;;  %v10910_v55 = vld [vmem:[%s21723_s14 + $0x150] sm:$0xff] }
0x11e8   : > { %v13967_v39 = vcombine.low %v10910_v55, %v10914_v59 }
0x11ea   : > { %12514 = vmatpush1.bf16.msra.mxu1 %v14155_v30  ;;  %12596 = vmatpush1.bf16.msra.mxu0 %v14157_v22  ;;  %v13961_v30 = vcombine.low %v10903_v48, %v10907_v57  ;;  %v13968_v22 = vcombine.high %v10910_v55, %v10914_v59  ;;  %v10963_v48 = vld [vmem:[%s21723_s14 + $0x2f8] sm:$0xff]  ;;  %v10970_v55 = vld [vmem:[%s21723_s14 + $0x330] sm:$0xff] }
0x11eb   : > { %12515 = vmatprep.subr.bf16.mxu1 %v14164_v52  ;;  %12597 = vmatprep.subr.bf16.mxu0 %v14166_v45  ;;  %v13970_v52 = vcombine.high %v10911_v24, %v10915_v12  ;;  %v10918_v45 = vld [vmem:[%s21723_s14 + $0x190] sm:$0xff]  ;;  %v10967_v59 = vld [vmem:[%s21723_s14 + $0x318] sm:$0xff] }
0x11ec   : > { %v13975_v40 = vcombine.low %v10918_v45, %v10922_v3 }
0x11ee   : > { %12516 = vmatpush1.bf16.msra.mxu1 %v14163_v28  ;;  %12598 = vmatpush1.bf16.msra.mxu0 %v14165_v38  ;;  %v13969_v28 = vcombine.low %v10911_v24, %v10915_v12  ;;  %v13976_v38 = vcombine.high %v10918_v45, %v10922_v3  ;;  %v10971_v24 = vld [vmem:[%s21723_s14 + $0x338] sm:$0xff]  ;;  %v10978_v45 = vld [vmem:[%s21723_s14 + $0x370] sm:$0xff] }
0x11ef   : > { %12517 = vmatprep.subr.bf16.mxu1 %v14172_v11  ;;  %12599 = vmatprep.subr.bf16.mxu0 %v14174_v62  ;;  %v13978_v11 = vcombine.high %v10919_v46, %v10923_v41  ;;  %v10926_v62 = vld [vmem:[%s21723_s14 + $0x1d0] sm:$0xff]  ;;  %v10975_v3 = vld [vmem:[%s21723_s14 + $0x358] sm:$0xff] }
0x11f0   : > { %v13983_v54 = vcombine.low %v10926_v62, %v10930_v4 }
0x11f2   : > { %12518 = vmatpush1.bf16.msra.mxu1 %v14171_v16  ;;  %12600 = vmatpush1.bf16.msra.mxu0 %v14173_v31  ;;  %v13977_v16 = vcombine.low %v10919_v46, %v10923_v41  ;;  %v13984_v31 = vcombine.high %v10926_v62, %v10930_v4  ;;  %v10979_v46 = vld [vmem:[%s21723_s14 + $0x378] sm:$0xff]  ;;  %v10986_v62 = vld [vmem:[%s21723_s14 + $0x3b0] sm:$0xff] }
0x11f3   : > { %12610 = vmatprep.subr.bf16.mxu1 %v13928_v1  ;;  %12692 = vmatprep.subr.bf16.mxu0 %v13930_v0  ;;  %v13986_v1 = vcombine.high %v10927_v61, %v10931_v50  ;;  %v10934_v0 = vld [vmem:[%s21723_s14 + $0x210] sm:$0xff]  ;;  %v10983_v4 = vld [vmem:[%s21723_s14 + $0x398] sm:$0xff] }
0x11f4   : > { %v13991_v10 = vcombine.low %v10934_v0, %v10938_v17 }
0x11f5   : > { %12520 = vmatmul.mubr.bf16.vlgmr.msra.gmra.mrb[88].mxu1 %v21228_v33  ;;  %12602 = vmatmul.mubr.bf16.vlgmr.msra.gmra.mrb[40].mxu0 %v21228_v33 }
0x11f6   : > { %12611 = vmatpush1.bf16.msra.mxu1 %v13927_v49  ;;  %12642 = vmatprep.mubr.bf16.mxu1 %v21022_v29  ;;  %v13985_v49 = vcombine.low %v10927_v61, %v10931_v50  ;;  %v10987_v61 = vld [vmem:[%s21723_s14 + $0x3b8] sm:$0xff] }
0x11f7   : > { %12693 = vmatpush1.bf16.msra.mxu0 %v13929_v56  ;;  %12724 = vmatprep.mubr.bf16.mxu0 %v21022_v29  ;;  %v10899_v29 = vld [vmem:[%s21723_s14 + $0xf8] sm:$0xff]  ;;  %v13992_v56 = vcombine.high %v10934_v0, %v10938_v17  ;;  %v10994_v0 = vld [vmem:[%s21723_s14 + $0x3f0] sm:$0xff] }
0x11f8   : > { %12612 = vmatprep.subr.bf16.mxu1 %v13936_v7  ;;  %12694 = vmatprep.subr.bf16.mxu0 %v13938_v34  ;;  %v13954_v44 = vcombine.high %v10895_v23, %v10899_v29  ;;  %v13953_v63 = vcombine.low %v10895_v23, %v10899_v29  ;;  %v13994_v7 = vcombine.high %v10935_v60, %v10939_v37  ;;  %v10942_v34 = vld [vmem:[%s21723_s14 + $0x250] sm:$0xff]  ;;  %v10955_v23 = vld [vmem:[%s21723_s14 + $0x2b8] sm:$0xff] }
0x11f9   : > { %v13999_v29 = vcombine.low %v10942_v34, %v10946_v43  ;;  %v10991_v17 = vld [vmem:[%s21723_s14 + $0x3d8] sm:$0xff] }
0x11fa   : > { %12613 = vmatpush1.bf16.msra.mxu1 %v13935_v53  ;;  %v13993_v53 = vcombine.low %v10935_v60, %v10939_v37  ;;  %v10995_v60 = vld [vmem:[%s21723_s14 + $0x3f8] sm:$0xff] }
0x11fb   : > { %12695 = vmatpush1.bf16.msra.mxu0 %v13937_v15  ;;  %12614 = vmatprep.subr.bf16.mxu1 %v13944_v5  ;;  %v14000_v15 = vcombine.high %v10942_v34, %v10946_v43  ;;  %v14002_v5 = vcombine.high %v10943_v21, %v10947_v9  ;;  %v11002_v34 = vld [vmem:[%s21723_s14 + $0x430] sm:$0xff]  ;;  %v10999_v43 = vld [vmem:[%s21723_s14 + $0x418] sm:$0xff] }
0x11fc   : > { %12696 = vmatprep.subr.bf16.mxu0 %v13946_v8  ;;  %v10950_v8 = vld [vmem:[%s21723_s14 + $0x290] sm:$0xff] }
0x11fd   : > { %v14007_v57 = vcombine.low %v10950_v8, %v10954_v26 }
0x11fe   : > { %12615 = vmatpush1.bf16.msra.mxu1 %v13943_v20  ;;  %v14001_v20 = vcombine.low %v10943_v21, %v10947_v9  ;;  %v11003_v21 = vld [vmem:[%s21723_s14 + $0x438] sm:$0xff] }
0x11ff   : > { %12697 = vmatpush1.bf16.msra.mxu0 %v13945_v14  ;;  %12616 = vmatprep.subr.bf16.mxu1 %v13952_v35  ;;  %v14008_v14 = vcombine.high %v10950_v8, %v10954_v26  ;;  %v14010_v35 = vcombine.high %v10951_v47, %v10955_v23  ;;  %v11010_v8 = vld [vmem:[%s21723_s14 + $0x470] sm:$0xff] }
0x1200   : > { %12698 = vmatprep.subr.bf16.mxu0 %v13954_v44  ;;  %v10958_v44 = vld [vmem:[%s21723_s14 + $0x2d0] sm:$0xff] }
0x1201   : > { %v14015_v12 = vcombine.low %v10958_v44, %v10962_v36 }
0x1202   : > { %12617 = vmatpush1.bf16.msra.mxu1 %v13951_v6  ;;  %v14009_v6 = vcombine.low %v10951_v47, %v10955_v23  ;;  %v11007_v47 = vld [vmem:[%s21723_s14 + $0x458] sm:$0xff] }
0x1203   : > { %12699 = vmatpush1.bf16.msra.mxu0 %v13953_v63  ;;  %12618 = vmatprep.subr.bf16.mxu1 %v13960_v13  ;;  %v14016_v63 = vcombine.high %v10958_v44, %v10962_v36  ;;  %v14018_v13 = vcombine.high %v10959_v19, %v10963_v48  ;;  %v11011_v23 = vld [vmem:[%s21723_s14 + $0x478] sm:$0xff] }
0x1204   : > { %12700 = vmatprep.subr.bf16.mxu0 %v13962_v2  ;;  %v10966_v2 = vld [vmem:[%s21723_s14 + $0x310] sm:$0xff]  ;;  %v14066_v44 = vcombine.high %v11007_v47, %v11011_v23  ;;  %v11015_v36 = vld [vmem:[%s21723_s14 + $0x498] sm:$0xff] }
0x1205   : > { %v14023_v41 = vcombine.low %v10966_v2, %v10970_v55 }
0x1206   : > { %12619 = vmatpush1.bf16.msra.mxu1 %v13959_v58  ;;  %v14017_v58 = vcombine.low %v10959_v19, %v10963_v48  ;;  %v11019_v19 = vld [vmem:[%s21723_s14 + $0x4b8] sm:$0xff] }
0x1207   : > { %12701 = vmatpush1.bf16.msra.mxu0 %v13961_v30  ;;  %12620 = vmatprep.subr.bf16.mxu1 %v13968_v22  ;;  %v14024_v30 = vcombine.high %v10966_v2, %v10970_v55  ;;  %v14026_v22 = vcombine.high %v10967_v59, %v10971_v24  ;;  %v11026_v2 = vld [vmem:[%s21723_s14 + $0x4f0] sm:$0xff]  ;;  %v11027_v55 = vld [vmem:[%s21723_s14 + $0x4f8] sm:$0xff] }
0x1208   : > { %12702 = vmatprep.subr.bf16.mxu0 %v13970_v52  ;;  %v10974_v52 = vld [vmem:[%s21723_s14 + $0x350] sm:$0xff] }
0x1209   : > { %v14031_v50 = vcombine.low %v10974_v52, %v10978_v45 }
0x120a   : > { %12621 = vmatpush1.bf16.msra.mxu1 %v13967_v39  ;;  %v14025_v39 = vcombine.low %v10967_v59, %v10971_v24  ;;  %v14073_v59 = vcombine.low %v11015_v36, %v11019_v19 }
0x120b   : > { %12703 = vmatpush1.bf16.msra.mxu0 %v13969_v28  ;;  %12622 = vmatprep.subr.bf16.mxu1 %v13976_v38  ;;  %v14032_v28 = vcombine.high %v10974_v52, %v10978_v45  ;;  %v14034_v38 = vcombine.high %v10975_v3, %v10979_v46  ;;  %v11035_v52 = vld [vmem:[%s21723_s14 + $0x538] sm:$0xff] }
0x120c   : > { %12704 = vmatprep.subr.bf16.mxu0 %v13978_v11  ;;  %v10982_v11 = vld [vmem:[%s21723_s14 + $0x390] sm:$0xff] }
0x120d   : > { %v14039_v37 = vcombine.low %v10982_v11, %v10986_v62 }
0x120e   : > { %12623 = vmatpush1.bf16.msra.mxu1 %v13975_v40  ;;  %v14033_v40 = vcombine.low %v10975_v3, %v10979_v46 }
0x120f   : > { %12705 = vmatpush1.bf16.msra.mxu0 %v13977_v16  ;;  %12624 = vmatprep.subr.bf16.mxu1 %v13984_v31  ;;  %v14040_v16 = vcombine.high %v10982_v11, %v10986_v62  ;;  %v14042_v31 = vcombine.high %v10983_v4, %v10987_v61  ;;  %v11043_v11 = vld [vmem:[%s21723_s14 + $0x578] sm:$0xff] }
0x1210   : > { %12706 = vmatprep.subr.bf16.mxu0 %v13986_v1  ;;  %v10990_v1 = vld [vmem:[%s21723_s14 + $0x3d0] sm:$0xff] }
0x1211   : > { %v14047_v9 = vcombine.low %v10990_v1, %v10994_v0 }
0x1212   : > { %12625 = vmatpush1.bf16.msra.mxu1 %v13983_v54  ;;  %v14041_v54 = vcombine.low %v10983_v4, %v10987_v61 }
0x1213   : > { %12707 = vmatpush1.bf16.msra.mxu0 %v13985_v49  ;;  %12626 = vmatprep.subr.bf16.mxu1 %v13992_v56  ;;  %v14048_v49 = vcombine.high %v10990_v1, %v10994_v0  ;;  %v14050_v56 = vcombine.high %v10991_v17, %v10995_v60  ;;  %v11051_v1 = vld [vmem:[%s21723_s14 + $0x5b8] sm:$0xff] }
0x1214   : > { %12708 = vmatprep.subr.bf16.mxu0 %v13994_v7  ;;  %v10998_v7 = vld [vmem:[%s21723_s14 + $0x410] sm:$0xff] }
0x1215   : > { %v14055_v26 = vcombine.low %v10998_v7, %v11002_v34 }
0x1216   : > { %12627 = vmatpush1.bf16.msra.mxu1 %v13991_v10  ;;  %v14049_v10 = vcombine.low %v10991_v17, %v10995_v60 }
0x1217   : > { %12709 = vmatpush1.bf16.msra.mxu0 %v13993_v53  ;;  %12628 = vmatprep.subr.bf16.mxu1 %v14000_v15  ;;  %v14056_v53 = vcombine.high %v10998_v7, %v11002_v34  ;;  %v14058_v15 = vcombine.high %v10999_v43, %v11003_v21  ;;  %v11059_v7 = vld [vmem:[%s21723_s14 + $0x5f8] sm:$0xff] }
0x1218   : > { %12710 = vmatprep.subr.bf16.mxu0 %v14002_v5  ;;  %v11006_v5 = vld [vmem:[%s21723_s14 + $0x450] sm:$0xff] }
0x1219   : > { %v14063_v48 = vcombine.low %v11006_v5, %v11010_v8 }
0x121a   : > { %12629 = vmatpush1.bf16.msra.mxu1 %v13999_v29  ;;  %v14057_v29 = vcombine.low %v10999_v43, %v11003_v21 }
0x121b   : > { %12711 = vmatpush1.bf16.msra.mxu0 %v14001_v20  ;;  %12630 = vmatprep.subr.bf16.mxu1 %v14008_v14  ;;  %v14064_v20 = vcombine.high %v11006_v5, %v11010_v8  ;;  %v11014_v14 = vld [vmem:[%s21723_s14 + $0x490] sm:$0xff]  ;;  %v11067_v5 = vld [vmem:[%s21723_s14 + $0x638] sm:$0xff] }
0x121c   : > { %12712 = vmatprep.subr.bf16.mxu0 %v14010_v35  ;;  %v11018_v35 = vld [vmem:[%s21723_s14 + $0x4b0] sm:$0xff] }
0x121e   : > { %12631 = vmatpush1.bf16.msra.mxu1 %v14007_v57  ;;  %v14065_v57 = vcombine.low %v11007_v47, %v11011_v23 }
0x121f   : > { %12713 = vmatpush1.bf16.msra.mxu0 %v14009_v6  ;;  %12632 = vmatprep.subr.bf16.mxu1 %v14016_v63  ;;  %v14072_v6 = vcombine.high %v11014_v14, %v11018_v35  ;;  %v14074_v63 = vcombine.high %v11015_v36, %v11019_v19 }
0x1220   : > { %12714 = vmatprep.subr.bf16.mxu0 %v14018_v13  ;;  %v11022_v13 = vld [vmem:[%s21723_s14 + $0x4d0] sm:$0xff] }
0x1221   : > { %v14080_v24 = vcombine.high %v11022_v13, %v11026_v2  ;;  %v14079_v45 = vcombine.low %v11022_v13, %v11026_v2  ;;  %v11083_v13 = vld [vmem:[%s21723_s14 + $0x6b8] sm:$0xff] }
0x1222   : > { %12633 = vmatpush1.bf16.msra.mxu1 %v14015_v12 }
0x1223   : > { %12715 = vmatpush1.bf16.msra.mxu0 %v14017_v58  ;;  %12634 = vmatprep.subr.bf16.mxu1 %v14024_v30  ;;  %v11030_v58 = vld [vmem:[%s21723_s14 + $0x510] sm:$0xff] }
0x1224   : > { %12716 = vmatprep.subr.bf16.mxu0 %v14026_v22  ;;  %v11034_v30 = vld [vmem:[%s21723_s14 + $0x530] sm:$0xff]  ;;  %v11031_v22 = vld [vmem:[%s21723_s14 + $0x518] sm:$0xff] }
0x1225   : > { %v14088_v46 = vcombine.high %v11030_v58, %v11034_v30  ;;  %v14087_v62 = vcombine.low %v11030_v58, %v11034_v30  ;;  %v14089_v4 = vcombine.low %v11031_v22, %v11035_v52  ;;  %v11091_v58 = vld [vmem:[%s21723_s14 + $0x6f8] sm:$0xff] }
0x1226   : > { %12635 = vmatpush1.bf16.msra.mxu1 %v14023_v41  ;;  %v14090_v41 = vcombine.high %v11031_v22, %v11035_v52 }
0x1227   : > { %12717 = vmatpush1.bf16.msra.mxu0 %v14025_v39  ;;  %12636 = vmatprep.subr.bf16.mxu1 %v14032_v28  ;;  %v11038_v39 = vld [vmem:[%s21723_s14 + $0x550] sm:$0xff] }
0x1228   : > { %12718 = vmatprep.subr.bf16.mxu0 %v14034_v38  ;;  %v11042_v28 = vld [vmem:[%s21723_s14 + $0x570] sm:$0xff]  ;;  %v11039_v38 = vld [vmem:[%s21723_s14 + $0x558] sm:$0xff] }
0x1229   : > { %v14096_v61 = vcombine.high %v11038_v39, %v11042_v28  ;;  %v14095_v0 = vcombine.low %v11038_v39, %v11042_v28  ;;  %v14097_v17 = vcombine.low %v11039_v38, %v11043_v11  ;;  %v11099_v39 = vld [vmem:[%s21723_s14 + $0x738] sm:$0xff] }
0x122a   : > { %12637 = vmatpush1.bf16.msra.mxu1 %v14031_v50  ;;  %v14098_v50 = vcombine.high %v11039_v38, %v11043_v11 }
0x122b   : > { %12719 = vmatpush1.bf16.msra.mxu0 %v14033_v40  ;;  %12638 = vmatprep.subr.bf16.mxu1 %v14040_v16  ;;  %v11046_v40 = vld [vmem:[%s21723_s14 + $0x590] sm:$0xff] }
0x122c   : > { %12720 = vmatprep.subr.bf16.mxu0 %v14042_v31  ;;  %v11050_v16 = vld [vmem:[%s21723_s14 + $0x5b0] sm:$0xff]  ;;  %v11047_v31 = vld [vmem:[%s21723_s14 + $0x598] sm:$0xff] }
0x122d   : > { %v14104_v60 = vcombine.high %v11046_v40, %v11050_v16  ;;  %v14103_v34 = vcombine.low %v11046_v40, %v11050_v16  ;;  %v14105_v43 = vcombine.low %v11047_v31, %v11051_v1  ;;  %v11107_v40 = vld [vmem:[%s21723_s14 + $0x778] sm:$0xff] }
0x122e   : > { %12639 = vmatpush1.bf16.msra.mxu1 %v14039_v37  ;;  %v14106_v37 = vcombine.high %v11047_v31, %v11051_v1 }
0x122f   : > { %12721 = vmatpush1.bf16.msra.mxu0 %v14041_v54  ;;  %12640 = vmatprep.subr.bf16.mxu1 %v14048_v49  ;;  %v11054_v54 = vld [vmem:[%s21723_s14 + $0x5d0] sm:$0xff] }
0x1230   : > { %12722 = vmatprep.subr.bf16.mxu0 %v14050_v56  ;;  %v11058_v49 = vld [vmem:[%s21723_s14 + $0x5f0] sm:$0xff]  ;;  %v11055_v56 = vld [vmem:[%s21723_s14 + $0x5d8] sm:$0xff] }
0x1231   : > { %v14112_v21 = vcombine.high %v11054_v54, %v11058_v49  ;;  %v14111_v8 = vcombine.low %v11054_v54, %v11058_v49  ;;  %v11115_v54 = vld [vmem:[%s21723_s14 + $0x7b8] sm:$0xff] }
0x1232   : > { %12641 = vmatpush1.bf16.msra.mxu1 %v14047_v9  ;;  %v14114_v9 = vcombine.high %v11055_v56, %v11059_v7 }
0x1233   : > { %12723 = vmatpush1.bf16.msra.mxu0 %v14049_v10  ;;  %12651 = vmatprep.subr.bf16.mxu1 %v14056_v53  ;;  %v11062_v10 = vld [vmem:[%s21723_s14 + $0x610] sm:$0xff] }
0x1234   : > { %12733 = vmatprep.subr.bf16.mxu0 %v14058_v15  ;;  %v11066_v53 = vld [vmem:[%s21723_s14 + $0x630] sm:$0xff]  ;;  %v11063_v15 = vld [vmem:[%s21723_s14 + $0x618] sm:$0xff] }
0x1235   : > { %12643 = vmatmul.mubr.bf16.vlgmr.msra.gmra.mrb[92].mxu1 %v21024_v18  ;;  %v14120_v47 = vcombine.high %v11062_v10, %v11066_v53  ;;  %v14122_v23 = vcombine.high %v11063_v15, %v11067_v5  ;;  %v14121_v36 = vcombine.low %v11063_v15, %v11067_v5 }
0x1236   : > { %12725 = vmatmul.mubr.bf16.vlgmr.msra.gmra.mrb[44].mxu0 %v21024_v18  ;;  %12652 = vmatpush1.bf16.msra.mxu1 %v14055_v26  ;;  %v11023_v18 = vld [vmem:[%s21723_s14 + $0x4d8] sm:$0xff]  ;;  %v14113_v26 = vcombine.low %v11055_v56, %v11059_v7 }
0x1237   : > { %12683 = vmatprep.mubr.bf16.mxu1 %v21040_v51  ;;  %12734 = vmatpush1.bf16.msra.mxu0 %v14057_v29  ;;  %v14082_v12 = vcombine.high %v11023_v18, %v11027_v55  ;;  %v14081_v3 = vcombine.low %v11023_v18, %v11027_v55  ;;  %v11070_v29 = vld [vmem:[%s21723_s14 + $0x650] sm:$0xff] }
0x1238   : > { %12765 = vmatprep.mubr.bf16.mxu0 %v21040_v51  ;;  %12653 = vmatprep.subr.bf16.mxu1 %v14064_v20  ;;  %v14071_v51 = vcombine.low %v11014_v14, %v11018_v35  ;;  %v11074_v20 = vld [vmem:[%s21723_s14 + $0x670] sm:$0xff]  ;;  %v11071_v14 = vld [vmem:[%s21723_s14 + $0x658] sm:$0xff] }
0x1239   : > { %12735 = vmatprep.subr.bf16.mxu0 %v14066_v44  ;;  %v11075_v35 = vld [vmem:[%s21723_s14 + $0x678] sm:$0xff]  ;;  %v14119_v44 = vcombine.low %v11062_v10, %v11066_v53  ;;  %v14128_v19 = vcombine.high %v11070_v29, %v11074_v20  ;;  %v14127_v2 = vcombine.low %v11070_v29, %v11074_v20 }
0x123a   : > { %12654 = vmatpush1.bf16.msra.mxu1 %v14063_v48  ;;  %v14130_v48 = vcombine.high %v11071_v14, %v11075_v35  ;;  %v14129_v18 = vcombine.low %v11071_v14, %v11075_v35  ;;  %v11123_v10 = vld [vmem:[%s21723_s14 + $0x7f8] sm:$0xff] }
0x123b   : > { %12736 = vmatpush1.bf16.msra.mxu0 %v14065_v57  ;;  %12655 = vmatprep.subr.bf16.mxu1 %v14072_v6  ;;  %v11078_v57 = vld [vmem:[%s21723_s14 + $0x690] sm:$0xff] }
0x123c   : > { %12737 = vmatprep.subr.bf16.mxu0 %v14074_v63  ;;  %v11082_v6 = vld [vmem:[%s21723_s14 + $0x6b0] sm:$0xff]  ;;  %v11079_v63 = vld [vmem:[%s21723_s14 + $0x698] sm:$0xff] }
0x123d   : > { %v14136_v55 = vcombine.high %v11078_v57, %v11082_v6  ;;  %v14135_v30 = vcombine.low %v11078_v57, %v11082_v6  ;;  %v14137_v22 = vcombine.low %v11079_v63, %v11083_v13 }
0x123e   : > { %12656 = vmatpush1.bf16.msra.mxu1 %v14071_v51  ;;  %v14138_v51 = vcombine.high %v11079_v63, %v11083_v13 }
0x123f   : > { %12738 = vmatpush1.bf16.msra.mxu0 %v14073_v59  ;;  %12657 = vmatprep.subr.bf16.mxu1 %v14080_v24  ;;  %v11086_v59 = vld [vmem:[%s21723_s14 + $0x6d0] sm:$0xff] }
0x1240   : > { %12739 = vmatprep.subr.bf16.mxu0 %v14082_v12  ;;  %v11090_v24 = vld [vmem:[%s21723_s14 + $0x6f0] sm:$0xff]  ;;  %v11087_v12 = vld [vmem:[%s21723_s14 + $0x6d8] sm:$0xff] }
0x1241   : > { %v14144_v52 = vcombine.high %v11086_v59, %v11090_v24  ;;  %v14143_v28 = vcombine.low %v11086_v59, %v11090_v24  ;;  %v14145_v38 = vcombine.low %v11087_v12, %v11091_v58 }
0x1242   : > { %12658 = vmatpush1.bf16.msra.mxu1 %v14079_v45  ;;  %v14146_v45 = vcombine.high %v11087_v12, %v11091_v58 }
0x1243   : > { %12740 = vmatpush1.bf16.msra.mxu0 %v14081_v3  ;;  %12659 = vmatprep.subr.bf16.mxu1 %v14088_v46  ;;  %v11094_v3 = vld [vmem:[%s21723_s14 + $0x710] sm:$0xff] }
0x1244   : > { %12741 = vmatprep.subr.bf16.mxu0 %v14090_v41  ;;  %v11098_v46 = vld [vmem:[%s21723_s14 + $0x730] sm:$0xff]  ;;  %v11095_v41 = vld [vmem:[%s21723_s14 + $0x718] sm:$0xff] }
0x1245   : > { %v14152_v11 = vcombine.high %v11094_v3, %v11098_v46  ;;  %v14151_v16 = vcombine.low %v11094_v3, %v11098_v46  ;;  %v14153_v31 = vcombine.low %v11095_v41, %v11099_v39 }
0x1246   : > { %12660 = vmatpush1.bf16.msra.mxu1 %v14087_v62  ;;  %v14154_v62 = vcombine.high %v11095_v41, %v11099_v39 }
0x1247   : > { %12742 = vmatpush1.bf16.msra.mxu0 %v14089_v4  ;;  %12661 = vmatprep.subr.bf16.mxu1 %v14096_v61  ;;  %v11102_v4 = vld [vmem:[%s21723_s14 + $0x750] sm:$0xff] }
0x1248   : > { %12743 = vmatprep.subr.bf16.mxu0 %v14098_v50  ;;  %v11106_v61 = vld [vmem:[%s21723_s14 + $0x770] sm:$0xff]  ;;  %v11103_v50 = vld [vmem:[%s21723_s14 + $0x758] sm:$0xff] }
0x1249   : > { %v14160_v1 = vcombine.high %v11102_v4, %v11106_v61  ;;  %v14159_v49 = vcombine.low %v11102_v4, %v11106_v61  ;;  %v14161_v56 = vcombine.low %v11103_v50, %v11107_v40 }
0x124a   : > { %12662 = vmatpush1.bf16.msra.mxu1 %v14095_v0  ;;  %v14162_v0 = vcombine.high %v11103_v50, %v11107_v40 }
0x124b   : > { %12744 = vmatpush1.bf16.msra.mxu0 %v14097_v17  ;;  %12663 = vmatprep.subr.bf16.mxu1 %v14104_v60  ;;  %v11110_v17 = vld [vmem:[%s21723_s14 + $0x790] sm:$0xff] }
0x124c   : > { %12745 = vmatprep.subr.bf16.mxu0 %v14106_v37  ;;  %v11114_v60 = vld [vmem:[%s21723_s14 + $0x7b0] sm:$0xff]  ;;  %v11111_v37 = vld [vmem:[%s21723_s14 + $0x798] sm:$0xff] }
0x124d   : > { %v14168_v7 = vcombine.high %v11110_v17, %v11114_v60  ;;  %v14167_v53 = vcombine.low %v11110_v17, %v11114_v60  ;;  %v14169_v15 = vcombine.low %v11111_v37, %v11115_v54 }
0x124e   : > { %12664 = vmatpush1.bf16.msra.mxu1 %v14103_v34  ;;  %v14170_v34 = vcombine.high %v11111_v37, %v11115_v54 }
0x124f   : > { %12746 = vmatpush1.bf16.msra.mxu0 %v14105_v43  ;;  %12665 = vmatprep.subr.bf16.mxu1 %v14112_v21  ;;  %v11118_v43 = vld [vmem:[%s21723_s14 + $0x7d0] sm:$0xff] }
0x1250   : > { %12747 = vmatprep.subr.bf16.mxu0 %v14114_v9  ;;  %v11122_v21 = vld [vmem:[%s21723_s14 + $0x7f0] sm:$0xff]  ;;  %v11119_v9 = vld [vmem:[%s21723_s14 + $0x7d8] sm:$0xff] }
0x1251   : > { %v14176_v5 = vcombine.high %v11118_v43, %v11122_v21 }
0x1252   : > { %12666 = vmatpush1.bf16.msra.mxu1 %v14111_v8  ;;  %v14178_v8 = vcombine.high %v11119_v9, %v11123_v10 }
0x1253   : > { %12748 = vmatpush1.bf16.msra.mxu0 %v14113_v26  ;;  %12667 = vmatprep.subr.bf16.mxu1 %v14120_v47  ;;  %v14175_v26 = vcombine.low %v11118_v43, %v11122_v21  ;;  %v14177_v47 = vcombine.low %v11119_v9, %v11123_v10 }
0x1254   : > { %12749 = vmatprep.subr.bf16.mxu0 %v14122_v23  ;;  %v21603_v23 = vld [vmem:[%s21724_s15] sm:$0xff] }
0x1255   : > { %v11129_v29 = vrot.slane %v21603_v23, %v21819_v27  ;;  %v11137_v20 = vrot.slane %v21603_v23, %v21820_v32  ;;  %v11133_v14 = vrot.slane %v21603_v23, %v21821_v42  ;;  %v11141_v35 = vrot.slane %v21603_v23, %v21822_v25 }
0x1256   : > { %12668 = vmatpush1.bf16.msra.mxu1 %v14119_v44 }
0x1257   : > { %12750 = vmatpush1.bf16.msra.mxu0 %v14121_v36  ;;  %12669 = vmatprep.subr.bf16.mxu1 %v14128_v19 }
0x1258   : > { %12751 = vmatprep.subr.bf16.mxu0 %v14130_v48 }
0x125a   : > { %12670 = vmatpush1.bf16.msra.mxu1 %v14127_v2 }
0x125b   : > { %12752 = vmatpush1.bf16.msra.mxu0 %v14129_v18  ;;  %12671 = vmatprep.subr.bf16.mxu1 %v14136_v55 }
0x125c   : > { %12753 = vmatprep.subr.bf16.mxu0 %v14138_v51 }
0x125e   : > { %12672 = vmatpush1.bf16.msra.mxu1 %v14135_v30 }
0x125f   : > { %12754 = vmatpush1.bf16.msra.mxu0 %v14137_v22  ;;  %12673 = vmatprep.subr.bf16.mxu1 %v14144_v52 }
0x1260   : > { %12755 = vmatprep.subr.bf16.mxu0 %v14146_v45 }
0x1262   : > { %12674 = vmatpush1.bf16.msra.mxu1 %v14143_v28 }
0x1263   : > { %12756 = vmatpush1.bf16.msra.mxu0 %v14145_v38  ;;  %12675 = vmatprep.subr.bf16.mxu1 %v14152_v11 }
0x1264   : > { %12757 = vmatprep.subr.bf16.mxu0 %v14154_v62 }
0x1266   : > { %12676 = vmatpush1.bf16.msra.mxu1 %v14151_v16 }
0x1267   : > { %12758 = vmatpush1.bf16.msra.mxu0 %v14153_v31  ;;  %12677 = vmatprep.subr.bf16.mxu1 %v14160_v1 }
0x1268   : > { %12759 = vmatprep.subr.bf16.mxu0 %v14162_v0 }
0x126a   : > { %12678 = vmatpush1.bf16.msra.mxu1 %v14159_v49 }
0x126b   : > { %12760 = vmatpush1.bf16.msra.mxu0 %v14161_v56  ;;  %12679 = vmatprep.subr.bf16.mxu1 %v14168_v7 }
0x126c   : > { %12761 = vmatprep.subr.bf16.mxu0 %v14170_v34 }
0x126e   : > { %12680 = vmatpush1.bf16.msra.mxu1 %v14167_v53 }
0x126f   : > { %12762 = vmatpush1.bf16.msra.mxu0 %v14169_v15  ;;  %12681 = vmatprep.subr.bf16.mxu1 %v14176_v5 }
0x1270   : > { %12763 = vmatprep.subr.bf16.mxu0 %v14178_v8 }
0x1272   : > { %12682 = vmatpush1.bf16.msra.mxu1 %v14175_v26 }
0x1273   : > { %12764 = vmatpush1.bf16.msra.mxu0 %v14177_v47 }
0x1275   : > { %12684 = vmatmul.mubr.bf16.vlgmr.msra.gmra.mrb[92].mxu1 %v21228_v33 }
0x1276   : > { %12766 = vmatmul.mubr.bf16.vlgmr.msra.gmra.mrb[44].mxu0 %v21228_v33 }
0x12c8   : > { %v12521_v44 = vpop.f32.mrb[88].mxu1  ;;  %v12603_v33 = vpop.f32.mrb[40].mxu0 }
0x12c9   : > { %v14761_v36 = vadd.f32 %v12521_v44, %v11129_v29  ;;  %v14763_v19 = vadd.f32 %v12603_v33, %v11137_v20  ;;  %v12523_v48 = vpop.f32.mrb[89].mxu1  ;;  %v12605_v57 = vpop.f32.mrb[41].mxu0 }
0x12ca   : > { %v14762_v27 = vadd.f32 %v12523_v48, %v11133_v14  ;;  %v14764_v6 = vadd.f32 %v12605_v57, %v11141_v35  ;;  %v12525_v63 = vpop.f32.mrb[90].mxu1  ;;  %v12607_v32 = vpop.f32.mrb[42].mxu0 }
0x12cb   : > { %12774 = vst [vmem:[%s21614_s23] sm:$0xff] %v14761_v36  ;;  %12776 = vst [vmem:[%s21614_s23 + $0x10] sm:$0xff] %v14763_v19  ;;  %v12526_v42 = vpop.f32.mrb[91].mxu1  ;;  %v12608_v25 = vpop.f32.mrb[43].mxu0 }
0x12cc   : > { %12775 = vst [vmem:[%s21614_s23 + $0x8] sm:$0xff] %v14762_v27  ;;  %12777 = vst [vmem:[%s21614_s23 + $0x18] sm:$0xff] %v14764_v6 }
0x12cd   : > { %16003 = shalt.err (!%p16000_p7)
}
0x12ce   : > { %s16004_s24 = scalar_lea.hbm %s21626_s25, 1024  ;;  %s16008_s5 = scalar_lea.hbm %s21728_s19, 2048 }
0x12cf   : > { %p16005_p10 = scmp.ne.s32.totalorder %s21626_s25, %s16004_s24  ;;  %p16009_p13 = scmp.lt.u32.totalorder %s21626_s25, %s21728_s19 }
0x12d0   : > { %p16010_p0 = scmp.lt.u32.totalorder %s16008_s5, %s16004_s24  ;;  %p16012_p2 = scmp.lt.u32.totalorder %s16004_s24, %s21626_s25 }
0x12d1   : > { %p16006_p11 = pnand %p16005_p10, %p16229_p6 }
0x12d2   : > { %p16011_p1 = por %p16010_p0, %p16009_p13 }
0x12d3   : > { %p16007_p12 = pneg %p16006_p11 }
0x12d4   : > { %p16013_p3 = por %p16012_p2, %p16011_p1 }
0x12d6   : > { %p16014_p4 = pnand %p16013_p3, %p16007_p12 }
0x12d8   : > { %16017 = shalt.err (!%p16014_p4)
}
0x12d9   : > { %14846 = dma.vmem_to_hbm [thread:$0]  (%p16229_p6), %s12817_s26, 1024, %s21626_s25, %s12788_s27   ;;  %v21823_v13 = vld [vmem:[#allocation18_spill] sm:$0xff]  ;;  %v21824_v18 = vld [vmem:[#allocation20_spill] sm:$0xff]  ;;  %v21825_v51 = vld [vmem:[#allocation19_spill] sm:$0xff] }
0x12da   : > { %v11145_v2 = vrot.slane %v21603_v23, %v21823_v13  ;;  %v11153_v55 = vrot.slane %v21603_v23, %v21824_v18  ;;  %v11149_v59 = vrot.slane %v21603_v23, %v21825_v51  ;;  %v21826_v24 = vld [vmem:[#allocation21_spill] sm:$0xff]  ;;  %s12802_s21 = sshll.u32 %s21614_s23, 4  ;;  %s21662_s27 = scalar_lea.hbm %s21727_s18, %s14187_s2  ;;  %s21664_s21 = int_to_ptr.vmem [resolvable:$true] %s12802_s21 }
0x12db   : > { %v11157_v12 = vrot.slane %v21603_v23, %v21826_v24  ;;  %s12783_s16 = scalar_lea.sflag [#allocation4], %s17883_s20  ;;  %s16018_s24 = scalar_lea.vmem %s21664_s21, 1024 }
0x12dc   : > { %p16019_p5 = scmp.ne.s32.totalorder %s21664_s21, %s16018_s24  ;;  %s16089_s1 = smov [#allocation3]  }
0x12dd   : > { %s16022_s4 = sshll.u32 %s16089_s1, 4  ;;  %s16023_s4 = int_to_ptr.vmem [resolvable:$false] %s16022_s4 }
0x12de   : > { %p16020_p7 = pnand %p16019_p5, %p16229_p6  ;;  %s16024_s2 = scalar_lea.vmem %s16023_s4, 2048 }
0x12df   : > { %p16025_p11 = scmp.lt.s32.totalorder %s21664_s21, %s16023_s4  ;;  %p16026_p12 = scmp.lt.s32.totalorder %s16024_s2, %s16018_s24 }
0x12e0   : > { %p16021_p10 = pneg %p16020_p7 }
0x12e1   : > { %p16027_p13 = por %p16026_p12, %p16025_p11 }
0x12e3   : > { %p16028_p0 = pnand %p16027_p13, %p16021_p10 }
0x1348   : > { %v12685_v58 = vpop.f32.mrb[92].mxu1 }
0x1349   : > { %v14765_v30 = vadd.f32 %v12685_v58, %v11145_v2  ;;  %v12767_v22 = vpop.f32.mrb[44].mxu0  ;;  %v12687_v52 = vpop.f32.mrb[93].mxu1 }
0x134a   : > { %v14767_v45 = vadd.f32 %v12767_v22, %v11153_v55  ;;  %v14766_v3 = vadd.f32 %v12687_v52, %v11149_v59  ;;  %v12769_v46 = vpop.f32.mrb[45].mxu0  ;;  %v12689_v41 = vpop.f32.mrb[94].mxu1 }
0x134b   : > { %12778 = vst [vmem:[%s21614_s23 + $0x20] sm:$0xff] %v14765_v30  ;;  %v14768_v39 = vadd.f32 %v12769_v46, %v11157_v12  ;;  %v12771_v28 = vpop.f32.mrb[46].mxu0  ;;  %v12690_v38 = vpop.f32.mrb[95].mxu1 }
0x134c   : > { %12780 = vst [vmem:[%s21614_s23 + $0x30] sm:$0xff] %v14767_v45  ;;  %12779 = vst [vmem:[%s21614_s23 + $0x28] sm:$0xff] %v14766_v3  ;;  %v12772_v11 = vpop.f32.mrb[47].mxu0 }
0x134d   : > { %12781 = vst [vmem:[%s21614_s23 + $0x38] sm:$0xff] %v14768_v39 }
0x134e   : > { %16031 = shalt.err (!%p16028_p0)
}
0x134f   : > { %s16032_s20 = scalar_lea.hbm %s21662_s27, 1024  ;;  %s16036_s5 = scalar_lea.hbm %s21727_s18, 2048 }
0x1350   : > { %p16033_p1 = scmp.ne.s32.totalorder %s21662_s27, %s16032_s20  ;;  %p16037_p4 = scmp.lt.u32.totalorder %s21662_s27, %s21727_s18 }
0x1351   : > { %p16038_p5 = scmp.lt.u32.totalorder %s16036_s5, %s16032_s20  ;;  %p16040_p10 = scmp.lt.u32.totalorder %s16032_s20, %s21662_s27 }
0x1352   : > { %p16034_p2 = pnand %p16033_p1, %p16229_p6 }
0x1353   : > { %p16039_p7 = por %p16038_p5, %p16037_p4 }
0x1354   : > { %p16035_p3 = pneg %p16034_p2 }
0x1355   : > { %p16041_p11 = por %p16040_p10, %p16039_p7 }
0x1357   : > { %p16042_p12 = pnand %p16041_p11, %p16035_p3 }
0x1359   : > { %16045 = shalt.err (!%p16042_p12)
}
0x135a   : > { %14845 = dma.vmem_to_hbm [thread:$0]  (%p16229_p6), %s21664_s21, 1024, %s21662_s27, %s12783_s16  }
0x135b PF: > { %s12828_s24 = sand.u32 1, %s16072_s0   ;;  %p14850_p13 = pnand %p12927_p9, %p16233_p8 }
0x135c   : > { %s12829_s1 = scalar_lea.sflag [#allocation4], %s12828_s24 }
0x135d   : > { %16063 = dma.done.wait (!%p14850_p13), %s12829_s1, 1024  }
0x135e   : > { %16065 = vsyncadd (!%p14850_p13), %s12829_s1, 4294966272  ;;  %s12838_s4 = scalar_lea.sflag [#allocation6], %s12828_s24 }
0x135f   : > { %16067 = dma.done.wait (!%p14850_p13), %s12838_s4, 1024  }
0x1360   : > { %16069 = vsyncadd (!%p14850_p13), %s12838_s4, 4294966272  ;;  %s21829_s21 = sld [smem:[#allocation11_spill]]  ;;  %s21830_s3 = sld [smem:[#allocation9_spill]] }
0x1361   : > { %s21831_s20 = sld [smem:[#allocation12_spill]]  ;;  %s21832_s0 = smov %s16076_s30 }
0x1366   : > { %p33_p6 = scmp.ge.s32.totalorder %s21829_s21, 4   ;;  %s21833_s30 = smov %s21830_s3 }
0x1368   :  { %35 = sbr.rel (!%p33_p6) target bundleno = 14 (0xe), region = 190 }
0x136f   :  { %12843 = vsyncpa [#allocation4], 1 }
0x1370   :  { %12845 = vsyncpa [#allocation4 + $0x1], 1 }
0x1371   :  { %12846 = vsyncpa [#allocation6], 1 }
0x1372   :  { %12848 = vsyncpa [#allocation6 + $0x1], 1 }

</bundles_post_ra>
